<compile_context>
chip_gen: v5e
topology: v5e:2x2
jax: 0.10.0
libtpu: 0.0.40
codegen_flags: <defaults>
</compile_context>

<pallas_src>
import functools

import jax
import jax.numpy as jnp
from jax.experimental import pallas as pl
from jax.experimental.pallas import tpu as pltpu

NUM_CLASSES = 21  # len(selected_classes)
VMEM_LIMIT = 32 * 1024 * 1024  # safe on v5e/v6e (128 MiB) and v7x (64 MiB)

# Per-layer config: (fold into lanes, row-tile of the *folded* patch matrix).
#   conv1: Cout=32  -> fold 4 => lane width 128, unfolded tile 4096 rows
#   conv2: Cout=64  -> fold 2 => lane width 128, unfolded tile 1024 rows
#   conv3..5: Cout>=128 already lane-dense
_CONV_CFG = {
    1: (4, 1024),
    2: (2, 512),
    3: (1, 512),
    4: (1, 256),
    5: (1, 128),
}


def _round_up(x, m):
    return ((x + m - 1) // m) * m


# ---------------------------------------------------------------------------
# Pallas kernel: out = relu?(x @ w + b), tiled over rows of x (bf16 in, f32 acc).
# ---------------------------------------------------------------------------
def _mm_bias_kernel(x_ref, w_ref, b_ref, o_ref, *, relu):
    acc = jnp.dot(x_ref[...], w_ref[...], preferred_element_type=jnp.float32)
    acc = acc + b_ref[...]
    if relu:
        acc = jnp.maximum(acc, 0.0)
    o_ref[...] = acc.astype(o_ref.dtype)


def matmul_bias(x, w, b, *, relu, tile_m, out_dtype=jnp.bfloat16):
    """x: (M, K), w: (K, N) bf16, b: (N,) f32 -> (M, N) out_dtype."""
    M, K = x.shape
    Kw, N = w.shape
    assert K == Kw and b.shape[0] == N
    tm = min(tile_m, _round_up(M, 8))
    m_pad = _round_up(M, tm)
    if m_pad != M:
        x = jnp.pad(x, ((0, m_pad - M), (0, 0)))
    b2 = b.reshape(1, N).astype(jnp.float32)

    out = pl.pallas_call(
        functools.partial(_mm_bias_kernel, relu=relu),
        out_shape=jax.ShapeDtypeStruct((m_pad, N), out_dtype),
        grid=(m_pad // tm,),
        in_specs=[
            pl.BlockSpec((tm, K), lambda i: (i, 0)),   # row tile of patches
            pl.BlockSpec((K, N), lambda i: (0, 0)),    # full (small) weight
            pl.BlockSpec((1, N), lambda i: (0, 0)),    # bias
        ],
        out_specs=pl.BlockSpec((tm, N), lambda i: (i, 0)),
        compiler_params=pltpu.CompilerParams(
            dimension_semantics=("parallel",),
            vmem_limit_bytes=VMEM_LIMIT,
        ),
    )(x.astype(jnp.bfloat16), w.astype(jnp.bfloat16), b2)
    return out[:M]


# ---------------------------------------------------------------------------
# Pallas kernel for the FC layer: K-tiled contraction with f32 accumulator.
# ---------------------------------------------------------------------------
def _fc_kernel(x_ref, w_ref, b_ref, o_ref, acc_ref):
    k = pl.program_id(0)

    @pl.when(k == 0)
    def _():
        acc_ref[...] = jnp.zeros_like(acc_ref)

    acc_ref[...] += jnp.dot(x_ref[...], w_ref[...],
                            preferred_element_type=jnp.float32)

    @pl.when(k == pl.num_programs(0) - 1)
    def _():
        o_ref[...] = (acc_ref[...] + b_ref[...]).astype(o_ref.dtype)


def fc_matmul_bias(x, w, b, *, tile_k=2048):
    """x: (M, K), w: (K, N) bf16, b: (N,) f32 -> (M, N) f32 logits."""
    M, K = x.shape
    Kw, N = w.shape
    assert K == Kw
    m_pad = _round_up(M, 8)
    if m_pad != M:
        x = jnp.pad(x, ((0, m_pad - M), (0, 0)))
    tk = min(tile_k, K)
    assert K % tk == 0
    b2 = b.reshape(1, N).astype(jnp.float32)

    out = pl.pallas_call(
        _fc_kernel,
        out_shape=jax.ShapeDtypeStruct((m_pad, N), jnp.float32),
        grid=(K // tk,),
        in_specs=[
            pl.BlockSpec((m_pad, tk), lambda k: (0, k)),
            pl.BlockSpec((tk, N), lambda k: (k, 0)),
            pl.BlockSpec((1, N), lambda k: (0, 0)),
        ],
        out_specs=pl.BlockSpec((m_pad, N), lambda k: (0, 0)),
        scratch_shapes=[pltpu.VMEM((m_pad, N), jnp.float32)],
        compiler_params=pltpu.CompilerParams(
            dimension_semantics=("arbitrary",),   # K is a reduction axis
            vmem_limit_bytes=VMEM_LIMIT,
        ),
    )(x.astype(jnp.bfloat16), w.astype(jnp.bfloat16), b2)
    return out[:M]


# ---------------------------------------------------------------------------
# Conv2d(kernel=2, stride=2, padding=1) as space-to-depth + Pallas matmul.
# w2 is the pre-folded (fold*4*Cin, fold*Cout) block-diag weight (bf16),
# b the fold-tiled bias (f32); folding makes the output lane-dense.
# ---------------------------------------------------------------------------
def conv2x2_s2_p1(x_nhwc, w2, b, *, relu, fold, tile_m):
    N, H, W, C = x_nhwc.shape
    Cout = w2.shape[1] // fold
    Ho = H // 2 + 1          # floor((H + 2*1 - 2)/2) + 1
    Wo = W // 2 + 1
    # pad 1 on each side; with kernel=2/stride=2 only the first 2*Ho rows /
    # 2*Wo cols are touched, so the windows tile the (sliced) padded input.
    xp = jnp.pad(x_nhwc, ((0, 0), (1, 1), (1, 1), (0, 0)))
    xp = xp[:, : 2 * Ho, : 2 * Wo, :]
    patches = (
        xp.reshape(N, Ho, 2, Wo, 2, C)
        .transpose(0, 1, 3, 2, 4, 5)          # (N, Ho, Wo, kh, kw, C)
        .reshape(N * Ho * Wo, 4 * C)
        .astype(jnp.bfloat16)
    )
    M = N * Ho * Wo
    m_pad = _round_up(M, fold)
    if m_pad != M:
        patches = jnp.pad(patches, ((0, m_pad - M), (0, 0)))
    # Fold `fold` consecutive patch rows into the lane dim (pure reshape).
    xf = patches.reshape(m_pad // fold, fold * 4 * C)
    out = matmul_bias(xf, w2, b, relu=relu, tile_m=tile_m)  # (m_pad/fold, fold*Cout)
    out = out.reshape(m_pad, Cout)[:M]
    return out.reshape(N, Ho, Wo, Cout)


# ---------------------------------------------------------------------------
# Parameter init (deterministic, PyTorch-default-like uniform(-1/sqrt(fan_in)))
# in the original torch layout, plus a one-time reformat for the kernels.
# ---------------------------------------------------------------------------
def init_params(key):
    conv_shapes = [
        (32, 3, 2, 2),
        (64, 32, 2, 2),
        (128, 64, 2, 2),
        (256, 128, 2, 2),
        (256, 256, 2, 2),
    ]
    params = {}
    keys = jax.random.split(key, 2 * len(conv_shapes) + 2)
    for i, shp in enumerate(conv_shapes):
        fan_in = shp[1] * shp[2] * shp[3]
        bound = 1.0 / jnp.sqrt(fan_in)
        params[f"conv{i+1}_w"] = jax.random.uniform(
            keys[2 * i], shp, jnp.float32, -bound, bound)
        params[f"conv{i+1}_b"] = jax.random.uniform(
            keys[2 * i + 1], (shp[0],), jnp.float32, -bound, bound)
    fan_in = 16384
    bound = 1.0 / jnp.sqrt(fan_in)
    params["fc1_w"] = jax.random.uniform(
        keys[-2], (NUM_CLASSES, 16384), jnp.float32, -bound, bound)
    params["fc1_b"] = jax.random.uniform(
        keys[-1], (NUM_CLASSES,), jnp.float32, -bound, bound)
    return params


def prepare_params(params):
    """One-time reformat: conv OIHW -> (kh,kw,Cin,Cout) matmul layout,
    block-diagonal lane-fold for conv1/conv2, bf16 weights, fc weight.T."""
    prep = {}
    for i in range(1, 6):
        w = params[f"conv{i}_w"]                     # (Cout, Cin, 2, 2)
        b = params[f"conv{i}_b"]
        Cout, Cin = w.shape[0], w.shape[1]
        w2 = w.transpose(2, 3, 1, 0).reshape(4 * Cin, Cout)
        fold, _ = _CONV_CFG[i]
        if fold > 1:
            w2 = jnp.kron(jnp.eye(fold, dtype=w2.dtype), w2)  # block-diagonal
            b = jnp.tile(b, fold)
        prep[f"conv{i}_w"] = w2.astype(jnp.bfloat16)           # (fold*4Cin, fold*Cout)
        prep[f"conv{i}_b"] = b.astype(jnp.float32)
    prep["fc1_w"] = params["fc1_w"].T.astype(jnp.bfloat16)     # (16384, 21)
    prep["fc1_b"] = params["fc1_b"].astype(jnp.float32)
    return prep


# ---------------------------------------------------------------------------
# Full forward pass (matches SimpleNN.forward semantics).
# ---------------------------------------------------------------------------
def simple_nn_forward(x_nchw, prep):
    x = jnp.transpose(x_nchw, (0, 2, 3, 1))  # NCHW -> NHWC for the conv stack
    for i in range(1, 6):
        fold, tile_m = _CONV_CFG[i]
        x = conv2x2_s2_p1(
            x, prep[f"conv{i}_w"], prep[f"conv{i}_b"],
            relu=(i < 5), fold=fold, tile_m=tile_m)
    # torch.nn.Flatten works on NCHW: transpose back before flattening.
    n = x.shape[0]
    x = jnp.transpose(x, (0, 3, 1, 2)).reshape(n, -1)  # (N, 16384)
    out = fc_matmul_bias(x, prep["fc1_w"], prep["fc1_b"], tile_k=2048)
    return out  # (N, 21) f32


if __name__ == "__main__":
    key = jax.random.PRNGKey(0)
    k_params, k_x = jax.random.split(key)
    params = init_params(k_params)
    prep = prepare_params(params)
    # fc1 expects 16384 = 256*8*8 features -> input spatial must be 224x224.
    x = jax.random.normal(k_x, (2, 3, 224, 224), dtype=jnp.float32)
    fwd = jax.jit(simple_nn_forward)
    logits = fwd(x, prep)
    logits = jax.block_until_ready(logits)
    assert logits.shape == (2, NUM_CLASSES)
    assert bool(jnp.all(jnp.isfinite(logits)))
    print("KERNEL_OK")
</pallas_src>

<mosaic_0001>
module attributes {stable_mosaic.version = 11 : i64} {
  func.func @_mm_bias_kernel(%arg0: i32, %arg1: memref<1024x48xbf16, #tpu.memory_space<vmem>>, %arg2: memref<48x128xbf16, #tpu.memory_space<vmem>>, %arg3: memref<1x128xf32, #tpu.memory_space<vmem>>, %arg4: memref<1024x128xbf16, #tpu.memory_space<vmem>>) attributes {dimension_semantics = [#tpu.dimension_semantics<parallel>], iteration_bounds = array<i64: 7>, scalar_prefetch = 0 : i64, scratch_operands = 0 : i64, tpu.core_type = #tpu.core_type<tc>, window_params = [{transform_indices = @transform_0, window_bounds = array<i64: 1024, 48>}, {pipeline_mode = #tpu.pipeline_mode<synchronous>, transform_indices = @transform_1, window_bounds = array<i64: 48, 128>}, {pipeline_mode = #tpu.pipeline_mode<synchronous>, transform_indices = @transform_2, window_bounds = array<i64: 1, 128>}, {transform_indices = @transform_3, window_bounds = array<i64: 1024, 128>}]} {
    %c0 = arith.constant 0 : index
    %c0_0 = arith.constant 0 : index
    %0 = vector.load %arg1[%c0, %c0_0] : memref<1024x48xbf16, #tpu.memory_space<vmem>>, vector<1024x48xbf16>
    %c0_1 = arith.constant 0 : index
    %c0_2 = arith.constant 0 : index
    %1 = vector.load %arg2[%c0_1, %c0_2] : memref<48x128xbf16, #tpu.memory_space<vmem>>, vector<48x128xbf16>
    %cst = arith.constant dense<0.000000e+00> : vector<1024x128xf32>
    %2 = tpu.matmul %0, %1, %cst {dimension_numbers = #tpu.dot_dimension_numbers<[1], [0], [0], [1], [0, 0, 1, 1], [], []>} : vector<1024x48xbf16>, vector<48x128xbf16>, vector<1024x128xf32> -> vector<1024x128xf32>
    %c0_3 = arith.constant 0 : index
    %c0_4 = arith.constant 0 : index
    %3 = vector.load %arg3[%c0_3, %c0_4] : memref<1x128xf32, #tpu.memory_space<vmem>>, vector<1x128xf32>
    %4 = vector.broadcast %3 : vector<1x128xf32> to vector<1024x128xf32>
    %5 = arith.addf %2, %4 : vector<1024x128xf32>
    %cst_5 = arith.constant 0.000000e+00 : f32
    %6 = vector.broadcast %cst_5 : f32 to vector<1024x128xf32>
    %7 = arith.maximumf %5, %6 : vector<1024x128xf32>
    %8 = arith.truncf %7 : vector<1024x128xf32> to vector<1024x128xbf16>
    %c0_6 = arith.constant 0 : index
    %c0_7 = arith.constant 0 : index
    %9 = vector.load %arg4[%c0_6, %c0_7] : memref<1024x128xbf16, #tpu.memory_space<vmem>>, vector<1024x128xbf16>
    tpu.vector_store %arg4[%c0_6, %c0_7], %8 {strides = array<i32>} : memref<1024x128xbf16, #tpu.memory_space<vmem>>, vector<1024x128xbf16>,
    return
  }
  func.func @transform_0(%arg0: i32) -> (i32, i32) {
    %c0_i32 = arith.constant 0 : i32
    %c0_i32_0 = arith.constant 0 : i32
    return %arg0, %c0_i32 : i32, i32
  }
  func.func @transform_1(%arg0: i32) -> (i32, i32) {
    %c0_i32 = arith.constant 0 : i32
    %c0_i32_0 = arith.constant 0 : i32
    %c0_i32_1 = arith.constant 0 : i32
    return %c0_i32, %c0_i32_0 : i32, i32
  }
  func.func @transform_2(%arg0: i32) -> (i32, i32) {
    %c0_i32 = arith.constant 0 : i32
    %c0_i32_0 = arith.constant 0 : i32
    %c0_i32_1 = arith.constant 0 : i32
    return %c0_i32, %c0_i32_0 : i32, i32
  }
  func.func @transform_3(%arg0: i32) -> (i32, i32) {
    %c0_i32 = arith.constant 0 : i32
    %c0_i32_0 = arith.constant 0 : i32
    return %arg0, %c0_i32 : i32, i32
  }
}

module attributes {stable_mosaic.version = 11 : i64} {
  func.func @_mm_bias_kernel(%arg0: i32, %arg1: memref<512x256xbf16, #tpu.memory_space<vmem>>, %arg2: memref<256x128xbf16, #tpu.memory_space<vmem>>, %arg3: memref<1x128xf32, #tpu.memory_space<vmem>>, %arg4: memref<512x128xbf16, #tpu.memory_space<vmem>>) attributes {dimension_semantics = [#tpu.dimension_semantics<parallel>], iteration_bounds = array<i64: 7>, scalar_prefetch = 0 : i64, scratch_operands = 0 : i64, tpu.core_type = #tpu.core_type<tc>, window_params = [{transform_indices = @transform_0, window_bounds = array<i64: 512, 256>}, {pipeline_mode = #tpu.pipeline_mode<synchronous>, transform_indices = @transform_1, window_bounds = array<i64: 256, 128>}, {pipeline_mode = #tpu.pipeline_mode<synchronous>, transform_indices = @transform_2, window_bounds = array<i64: 1, 128>}, {transform_indices = @transform_3, window_bounds = array<i64: 512, 128>}]} {
    %c0 = arith.constant 0 : index
    %c0_0 = arith.constant 0 : index
    %0 = vector.load %arg1[%c0, %c0_0] : memref<512x256xbf16, #tpu.memory_space<vmem>>, vector<512x256xbf16>
    %c0_1 = arith.constant 0 : index
    %c0_2 = arith.constant 0 : index
    %1 = vector.load %arg2[%c0_1, %c0_2] : memref<256x128xbf16, #tpu.memory_space<vmem>>, vector<256x128xbf16>
    %cst = arith.constant dense<0.000000e+00> : vector<512x128xf32>
    %2 = tpu.matmul %0, %1, %cst {dimension_numbers = #tpu.dot_dimension_numbers<[1], [0], [0], [1], [0, 0, 1, 1], [], []>} : vector<512x256xbf16>, vector<256x128xbf16>, vector<512x128xf32> -> vector<512x128xf32>
    %c0_3 = arith.constant 0 : index
    %c0_4 = arith.constant 0 : index
    %3 = vector.load %arg3[%c0_3, %c0_4] : memref<1x128xf32, #tpu.memory_space<vmem>>, vector<1x128xf32>
    %4 = vector.broadcast %3 : vector<1x128xf32> to vector<512x128xf32>
    %5 = arith.addf %2, %4 : vector<512x128xf32>
    %cst_5 = arith.constant 0.000000e+00 : f32
    %6 = vector.broadcast %cst_5 : f32 to vector<512x128xf32>
    %7 = arith.maximumf %5, %6 : vector<512x128xf32>
    %8 = arith.truncf %7 : vector<512x128xf32> to vector<512x128xbf16>
    %c0_6 = arith.constant 0 : index
    %c0_7 = arith.constant 0 : index
    %9 = vector.load %arg4[%c0_6, %c0_7] : memref<512x128xbf16, #tpu.memory_space<vmem>>, vector<512x128xbf16>
    tpu.vector_store %arg4[%c0_6, %c0_7], %8 {strides = array<i32>} : memref<512x128xbf16, #tpu.memory_space<vmem>>, vector<512x128xbf16>,
    return
  }
  func.func @transform_0(%arg0: i32) -> (i32, i32) {
    %c0_i32 = arith.constant 0 : i32
    %c0_i32_0 = arith.constant 0 : i32
    return %arg0, %c0_i32 : i32, i32
  }
  func.func @transform_1(%arg0: i32) -> (i32, i32) {
    %c0_i32 = arith.constant 0 : i32
    %c0_i32_0 = arith.constant 0 : i32
    %c0_i32_1 = arith.constant 0 : i32
    return %c0_i32, %c0_i32_0 : i32, i32
  }
  func.func @transform_2(%arg0: i32) -> (i32, i32) {
    %c0_i32 = arith.constant 0 : i32
    %c0_i32_0 = arith.constant 0 : i32
    %c0_i32_1 = arith.constant 0 : i32
    return %c0_i32, %c0_i32_0 : i32, i32
  }
  func.func @transform_3(%arg0: i32) -> (i32, i32) {
    %c0_i32 = arith.constant 0 : i32
    %c0_i32_0 = arith.constant 0 : i32
    return %arg0, %c0_i32 : i32, i32
  }
}

module attributes {stable_mosaic.version = 11 : i64} {
  func.func @_mm_bias_kernel(%arg0: i32, %arg1: memref<512x256xbf16, #tpu.memory_space<vmem>>, %arg2: memref<256x128xbf16, #tpu.memory_space<vmem>>, %arg3: memref<1x128xf32, #tpu.memory_space<vmem>>, %arg4: memref<512x128xbf16, #tpu.memory_space<vmem>>) attributes {dimension_semantics = [#tpu.dimension_semantics<parallel>], iteration_bounds = array<i64: 4>, scalar_prefetch = 0 : i64, scratch_operands = 0 : i64, tpu.core_type = #tpu.core_type<tc>, window_params = [{transform_indices = @transform_0, window_bounds = array<i64: 512, 256>}, {pipeline_mode = #tpu.pipeline_mode<synchronous>, transform_indices = @transform_1, window_bounds = array<i64: 256, 128>}, {pipeline_mode = #tpu.pipeline_mode<synchronous>, transform_indices = @transform_2, window_bounds = array<i64: 1, 128>}, {transform_indices = @transform_3, window_bounds = array<i64: 512, 128>}]} {
    %c0 = arith.constant 0 : index
    %c0_0 = arith.constant 0 : index
    %0 = vector.load %arg1[%c0, %c0_0] : memref<512x256xbf16, #tpu.memory_space<vmem>>, vector<512x256xbf16>
    %c0_1 = arith.constant 0 : index
    %c0_2 = arith.constant 0 : index
    %1 = vector.load %arg2[%c0_1, %c0_2] : memref<256x128xbf16, #tpu.memory_space<vmem>>, vector<256x128xbf16>
    %cst = arith.constant dense<0.000000e+00> : vector<512x128xf32>
    %2 = tpu.matmul %0, %1, %cst {dimension_numbers = #tpu.dot_dimension_numbers<[1], [0], [0], [1], [0, 0, 1, 1], [], []>} : vector<512x256xbf16>, vector<256x128xbf16>, vector<512x128xf32> -> vector<512x128xf32>
    %c0_3 = arith.constant 0 : index
    %c0_4 = arith.constant 0 : index
    %3 = vector.load %arg3[%c0_3, %c0_4] : memref<1x128xf32, #tpu.memory_space<vmem>>, vector<1x128xf32>
    %4 = vector.broadcast %3 : vector<1x128xf32> to vector<512x128xf32>
    %5 = arith.addf %2, %4 : vector<512x128xf32>
    %cst_5 = arith.constant 0.000000e+00 : f32
    %6 = vector.broadcast %cst_5 : f32 to vector<512x128xf32>
    %7 = arith.maximumf %5, %6 : vector<512x128xf32>
    %8 = arith.truncf %7 : vector<512x128xf32> to vector<512x128xbf16>
    %c0_6 = arith.constant 0 : index
    %c0_7 = arith.constant 0 : index
    %9 = vector.load %arg4[%c0_6, %c0_7] : memref<512x128xbf16, #tpu.memory_space<vmem>>, vector<512x128xbf16>
    tpu.vector_store %arg4[%c0_6, %c0_7], %8 {strides = array<i32>} : memref<512x128xbf16, #tpu.memory_space<vmem>>, vector<512x128xbf16>,
    return
  }
  func.func @transform_0(%arg0: i32) -> (i32, i32) {
    %c0_i32 = arith.constant 0 : i32
    %c0_i32_0 = arith.constant 0 : i32
    return %arg0, %c0_i32 : i32, i32
  }
  func.func @transform_1(%arg0: i32) -> (i32, i32) {
    %c0_i32 = arith.constant 0 : i32
    %c0_i32_0 = arith.constant 0 : i32
    %c0_i32_1 = arith.constant 0 : i32
    return %c0_i32, %c0_i32_0 : i32, i32
  }
  func.func @transform_2(%arg0: i32) -> (i32, i32) {
    %c0_i32 = arith.constant 0 : i32
    %c0_i32_0 = arith.constant 0 : i32
    %c0_i32_1 = arith.constant 0 : i32
    return %c0_i32, %c0_i32_0 : i32, i32
  }
  func.func @transform_3(%arg0: i32) -> (i32, i32) {
    %c0_i32 = arith.constant 0 : i32
    %c0_i32_0 = arith.constant 0 : i32
    return %arg0, %c0_i32 : i32, i32
  }
}

module attributes {stable_mosaic.version = 11 : i64} {
  func.func @_mm_bias_kernel(%arg0: i32, %arg1: memref<256x512xbf16, #tpu.memory_space<vmem>>, %arg2: memref<512x256xbf16, #tpu.memory_space<vmem>>, %arg3: memref<1x256xf32, #tpu.memory_space<vmem>>, %arg4: memref<256x256xbf16, #tpu.memory_space<vmem>>) attributes {dimension_semantics = [#tpu.dimension_semantics<parallel>], iteration_bounds = array<i64: 2>, scalar_prefetch = 0 : i64, scratch_operands = 0 : i64, tpu.core_type = #tpu.core_type<tc>, window_params = [{transform_indices = @transform_0, window_bounds = array<i64: 256, 512>}, {pipeline_mode = #tpu.pipeline_mode<synchronous>, transform_indices = @transform_1, window_bounds = array<i64: 512, 256>}, {pipeline_mode = #tpu.pipeline_mode<synchronous>, transform_indices = @transform_2, window_bounds = array<i64: 1, 256>}, {transform_indices = @transform_3, window_bounds = array<i64: 256, 256>}]} {
    %c0 = arith.constant 0 : index
    %c0_0 = arith.constant 0 : index
    %0 = vector.load %arg1[%c0, %c0_0] : memref<256x512xbf16, #tpu.memory_space<vmem>>, vector<256x512xbf16>
    %c0_1 = arith.constant 0 : index
    %c0_2 = arith.constant 0 : index
    %1 = vector.load %arg2[%c0_1, %c0_2] : memref<512x256xbf16, #tpu.memory_space<vmem>>, vector<512x256xbf16>
    %cst = arith.constant dense<0.000000e+00> : vector<256x256xf32>
    %2 = tpu.matmul %0, %1, %cst {dimension_numbers = #tpu.dot_dimension_numbers<[1], [0], [0], [1], [0, 0, 1, 1], [], []>} : vector<256x512xbf16>, vector<512x256xbf16>, vector<256x256xf32> -> vector<256x256xf32>
    %c0_3 = arith.constant 0 : index
    %c0_4 = arith.constant 0 : index
    %3 = vector.load %arg3[%c0_3, %c0_4] : memref<1x256xf32, #tpu.memory_space<vmem>>, vector<1x256xf32>
    %4 = vector.broadcast %3 : vector<1x256xf32> to vector<256x256xf32>
    %5 = arith.addf %2, %4 : vector<256x256xf32>
    %cst_5 = arith.constant 0.000000e+00 : f32
    %6 = vector.broadcast %cst_5 : f32 to vector<256x256xf32>
    %7 = arith.maximumf %5, %6 : vector<256x256xf32>
    %8 = arith.truncf %7 : vector<256x256xf32> to vector<256x256xbf16>
    %c0_6 = arith.constant 0 : index
    %c0_7 = arith.constant 0 : index
    %9 = vector.load %arg4[%c0_6, %c0_7] : memref<256x256xbf16, #tpu.memory_space<vmem>>, vector<256x256xbf16>
    tpu.vector_store %arg4[%c0_6, %c0_7], %8 {strides = array<i32>} : memref<256x256xbf16, #tpu.memory_space<vmem>>, vector<256x256xbf16>,
    return
  }
  func.func @transform_0(%arg0: i32) -> (i32, i32) {
    %c0_i32 = arith.constant 0 : i32
    %c0_i32_0 = arith.constant 0 : i32
    return %arg0, %c0_i32 : i32, i32
  }
  func.func @transform_1(%arg0: i32) -> (i32, i32) {
    %c0_i32 = arith.constant 0 : i32
    %c0_i32_0 = arith.constant 0 : i32
    %c0_i32_1 = arith.constant 0 : i32
    return %c0_i32, %c0_i32_0 : i32, i32
  }
  func.func @transform_2(%arg0: i32) -> (i32, i32) {
    %c0_i32 = arith.constant 0 : i32
    %c0_i32_0 = arith.constant 0 : i32
    %c0_i32_1 = arith.constant 0 : i32
    return %c0_i32, %c0_i32_0 : i32, i32
  }
  func.func @transform_3(%arg0: i32) -> (i32, i32) {
    %c0_i32 = arith.constant 0 : i32
    %c0_i32_0 = arith.constant 0 : i32
    return %arg0, %c0_i32 : i32, i32
  }
}

module attributes {stable_mosaic.version = 11 : i64} {
  func.func @_mm_bias_kernel(%arg0: i32, %arg1: memref<128x1024xbf16, #tpu.memory_space<vmem>>, %arg2: memref<1024x256xbf16, #tpu.memory_space<vmem>>, %arg3: memref<1x256xf32, #tpu.memory_space<vmem>>, %arg4: memref<128x256xbf16, #tpu.memory_space<vmem>>) attributes {dimension_semantics = [#tpu.dimension_semantics<parallel>], iteration_bounds = array<i64: 1>, scalar_prefetch = 0 : i64, scratch_operands = 0 : i64, tpu.core_type = #tpu.core_type<tc>, window_params = [{transform_indices = @transform_0, window_bounds = array<i64: 128, 1024>}, {pipeline_mode = #tpu.pipeline_mode<synchronous>, transform_indices = @transform_1, window_bounds = array<i64: 1024, 256>}, {pipeline_mode = #tpu.pipeline_mode<synchronous>, transform_indices = @transform_2, window_bounds = array<i64: 1, 256>}, {transform_indices = @transform_3, window_bounds = array<i64: 128, 256>}]} {
    %c0 = arith.constant 0 : index
    %c0_0 = arith.constant 0 : index
    %0 = vector.load %arg1[%c0, %c0_0] : memref<128x1024xbf16, #tpu.memory_space<vmem>>, vector<128x1024xbf16>
    %c0_1 = arith.constant 0 : index
    %c0_2 = arith.constant 0 : index
    %1 = vector.load %arg2[%c0_1, %c0_2] : memref<1024x256xbf16, #tpu.memory_space<vmem>>, vector<1024x256xbf16>
    %cst = arith.constant dense<0.000000e+00> : vector<128x256xf32>
    %2 = tpu.matmul %0, %1, %cst {dimension_numbers = #tpu.dot_dimension_numbers<[1], [0], [0], [1], [0, 0, 1, 1], [], []>} : vector<128x1024xbf16>, vector<1024x256xbf16>, vector<128x256xf32> -> vector<128x256xf32>
    %c0_3 = arith.constant 0 : index
    %c0_4 = arith.constant 0 : index
    %3 = vector.load %arg3[%c0_3, %c0_4] : memref<1x256xf32, #tpu.memory_space<vmem>>, vector<1x256xf32>
    %4 = vector.broadcast %3 : vector<1x256xf32> to vector<128x256xf32>
    %5 = arith.addf %2, %4 : vector<128x256xf32>
    %6 = arith.truncf %5 : vector<128x256xf32> to vector<128x256xbf16>
    %c0_5 = arith.constant 0 : index
    %c0_6 = arith.constant 0 : index
    %7 = vector.load %arg4[%c0_5, %c0_6] : memref<128x256xbf16, #tpu.memory_space<vmem>>, vector<128x256xbf16>
    tpu.vector_store %arg4[%c0_5, %c0_6], %6 {strides = array<i32>} : memref<128x256xbf16, #tpu.memory_space<vmem>>, vector<128x256xbf16>,
    return
  }
  func.func @transform_0(%arg0: i32) -> (i32, i32) {
    %c0_i32 = arith.constant 0 : i32
    %c0_i32_0 = arith.constant 0 : i32
    return %arg0, %c0_i32 : i32, i32
  }
  func.func @transform_1(%arg0: i32) -> (i32, i32) {
    %c0_i32 = arith.constant 0 : i32
    %c0_i32_0 = arith.constant 0 : i32
    %c0_i32_1 = arith.constant 0 : i32
    return %c0_i32, %c0_i32_0 : i32, i32
  }
  func.func @transform_2(%arg0: i32) -> (i32, i32) {
    %c0_i32 = arith.constant 0 : i32
    %c0_i32_0 = arith.constant 0 : i32
    %c0_i32_1 = arith.constant 0 : i32
    return %c0_i32, %c0_i32_0 : i32, i32
  }
  func.func @transform_3(%arg0: i32) -> (i32, i32) {
    %c0_i32 = arith.constant 0 : i32
    %c0_i32_0 = arith.constant 0 : i32
    return %arg0, %c0_i32 : i32, i32
  }
}

module attributes {stable_mosaic.version = 11 : i64} {
  func.func @_fc_kernel(%arg0: i32, %arg1: memref<8x2048xbf16, #tpu.memory_space<vmem>>, %arg2: memref<2048x21xbf16, #tpu.memory_space<vmem>>, %arg3: memref<1x21xf32, #tpu.memory_space<vmem>>, %arg4: memref<8x21xf32, #tpu.memory_space<vmem>>, %arg5: memref<8x21xf32, #tpu.memory_space<vmem>>) attributes {dimension_semantics = [#tpu.dimension_semantics<arbitrary>], iteration_bounds = array<i64: 8>, scalar_prefetch = 0 : i64, scratch_operands = 1 : i64, tpu.core_type = #tpu.core_type<tc>, window_params = [{transform_indices = @transform_0, window_bounds = array<i64: 8, 2048>}, {transform_indices = @transform_1, window_bounds = array<i64: 2048, 21>}, {pipeline_mode = #tpu.pipeline_mode<synchronous>, transform_indices = @transform_2, window_bounds = array<i64: 1, 21>}, {pipeline_mode = #tpu.pipeline_mode<synchronous>, transform_indices = @transform_3, window_bounds = array<i64: 8, 21>}]} {
    %c0_i32 = arith.constant 0 : i32
    %0 = arith.cmpi eq, %arg0, %c0_i32 : i32
    %1 = arith.extui %0 : i1 to i32
    %c0_i32_0 = arith.constant 0 : i32
    %2 = arith.cmpi ne, %1, %c0_i32_0 : i32
    scf.if %2 {
      %cst_9 = arith.constant 0.000000e+00 : f32
      %12 = vector.broadcast %cst_9 : f32 to vector<8x21xf32>
      %c0_10 = arith.constant 0 : index
      %c0_11 = arith.constant 0 : index
      %13 = vector.load %arg5[%c0_10, %c0_11] : memref<8x21xf32, #tpu.memory_space<vmem>>, vector<8x21xf32>
      tpu.vector_store %arg5[%c0_10, %c0_11], %12 {strides = array<i32>} : memref<8x21xf32, #tpu.memory_space<vmem>>, vector<8x21xf32>,
    } else {
    }
    %c0 = arith.constant 0 : index
    %c0_1 = arith.constant 0 : index
    %3 = vector.load %arg5[%c0, %c0_1] : memref<8x21xf32, #tpu.memory_space<vmem>>, vector<8x21xf32>
    %c0_2 = arith.constant 0 : index
    %c0_3 = arith.constant 0 : index
    %4 = vector.load %arg1[%c0_2, %c0_3] : memref<8x2048xbf16, #tpu.memory_space<vmem>>, vector<8x2048xbf16>
    %c0_4 = arith.constant 0 : index
    %c0_5 = arith.constant 0 : index
    %5 = vector.load %arg2[%c0_4, %c0_5] : memref<2048x21xbf16, #tpu.memory_space<vmem>>, vector<2048x21xbf16>
    %cst = arith.constant dense<0.000000e+00> : vector<8x21xf32>
    %6 = tpu.matmul %4, %5, %cst {dimension_numbers = #tpu.dot_dimension_numbers<[1], [0], [0], [1], [0, 0, 1, 1], [], []>} : vector<8x2048xbf16>, vector<2048x21xbf16>, vector<8x21xf32> -> vector<8x21xf32>
    %7 = arith.addf %3, %6 : vector<8x21xf32>
    %c0_6 = arith.constant 0 : index
    %c0_7 = arith.constant 0 : index
    %8 = vector.load %arg5[%c0_6, %c0_7] : memref<8x21xf32, #tpu.memory_space<vmem>>, vector<8x21xf32>
    tpu.vector_store %arg5[%c0_6, %c0_7], %7 {strides = array<i32>} : memref<8x21xf32, #tpu.memory_space<vmem>>, vector<8x21xf32>,
    %c7_i32 = arith.constant 7 : i32
    %9 = arith.cmpi eq, %arg0, %c7_i32 : i32
    %10 = arith.extui %9 : i1 to i32
    %c0_i32_8 = arith.constant 0 : i32
    %11 = arith.cmpi ne, %10, %c0_i32_8 : i32
    scf.if %11 {
      %c0_9 = arith.constant 0 : index
      %c0_10 = arith.constant 0 : index
      %12 = vector.load %arg5[%c0_9, %c0_10] : memref<8x21xf32, #tpu.memory_space<vmem>>, vector<8x21xf32>
      %c0_11 = arith.constant 0 : index
      %c0_12 = arith.constant 0 : index
      %13 = vector.load %arg3[%c0_11, %c0_12] : memref<1x21xf32, #tpu.memory_space<vmem>>, vector<1x21xf32>
      %14 = vector.broadcast %13 : vector<1x21xf32> to vector<8x21xf32>
      %15 = arith.addf %12, %14 : vector<8x21xf32>
      %c0_13 = arith.constant 0 : index
      %c0_14 = arith.constant 0 : index
      %16 = vector.load %arg4[%c0_13, %c0_14] : memref<8x21xf32, #tpu.memory_space<vmem>>, vector<8x21xf32>
      tpu.vector_store %arg4[%c0_13, %c0_14], %15 {strides = array<i32>} : memref<8x21xf32, #tpu.memory_space<vmem>>, vector<8x21xf32>,
    } else {
    }
    return
  }
  func.func @transform_0(%arg0: i32) -> (i32, i32) {
    %c0_i32 = arith.constant 0 : i32
    %c0_i32_0 = arith.constant 0 : i32
    return %c0_i32, %arg0 : i32, i32
  }
  func.func @transform_1(%arg0: i32) -> (i32, i32) {
    %c0_i32 = arith.constant 0 : i32
    %c0_i32_0 = arith.constant 0 : i32
    return %arg0, %c0_i32 : i32, i32
  }
  func.func @transform_2(%arg0: i32) -> (i32, i32) {
    %c0_i32 = arith.constant 0 : i32
    %c0_i32_0 = arith.constant 0 : i32
    %c0_i32_1 = arith.constant 0 : i32
    return %c0_i32, %c0_i32_0 : i32, i32
  }
  func.func @transform_3(%arg0: i32) -> (i32, i32) {
    %c0_i32 = arith.constant 0 : i32
    %c0_i32_0 = arith.constant 0 : i32
    %c0_i32_1 = arith.constant 0 : i32
    return %c0_i32, %c0_i32_0 : i32, i32
  }
}

</mosaic_0001>

<bundles_post_ra>
// kernel: simple_nn_forward.6
= control target key start
LH: loop header
LB: loop body
LE: loop exit
PB: predicated region body
PF: predicated region fallthrough
CT: control target
= control target key end

     0   :  { %s2453_s12 = smov 0   ;;  %s2804_s0 = inlined_call_operand.vmem [shape: bf16[7168,48], index: 0, kind: input, shape index: {}]   ;;  %s2805_s1 = inlined_call_operand.vmem [shape: bf16[48,128], index: 1, kind: input, shape index: {}]   ;;  %s2806_s2 = inlined_call_operand.vmem [shape: f32[1,128], index: 2, kind: input, shape index: {}]   ;;  %s2807_s3 = inlined_call_operand.vmem [shape: bf16[7168,128], index: 3, kind: output, shape index: {}]  }
   0x1 LB: > { %s1613_s13 = sadd.s32 4294967295, %s2431_s12   ;;  %p1617_p0 = scmp.ge.s32.totalorder %s2431_s12, 1  ;;  %s2431_s12 = sphi %s2453_s12, %s13_s12  }
   0x2   : > { %p138_p1 = scmp.lt.s32.totalorder %s2431_s12, 8 }
   0x4   : > { %p139_p2 = pnand %p1617_p0, %p138_p1 }
   0x5   : > { %s1618_s16 = sshll.u32 (!%p139_p2), %s1613_s13, 7 }
   0x6   : > { %142 = sbr.rel (%p139_p2) target bundleno = 412 (0x19c), region = 32  ;;  %p163_p3 = scmp.lt.s32.totalorder (!%p139_p2), %s1618_s16, 895 }
   0xb   : > { %v2022_v0 = vld [vmem:[%s2805_s1 + $0x10] sm:$0xff]  ;;  %v2021_v1 = vld [vmem:[%s2805_s1 + $0x8] sm:$0xff]  ;;  %s2809_s16 = smov (!%p163_p3, %s1618_s16), 895  ;;  %v2020_v2 = vld [vmem:[%s2805_s1] sm:$0xff]  ;;  %vm651_vm0 = vcmask 392192  }
   0xc   : > { %849 = vmatpush.bf16.msra.mxu0 %v2022_v0  ;;  %2406 = vmatpush.bf16.msra.mxu1 %v2022_v0  ;;  %s1619_s19 = sshll.u32 %s2809_s16, 2  ;;  %v2551_v41 = vld [vmem:[%s2806_s2] ss:$0 sm:$0xff] }
   0xd   : > { %2407 = vmatpush.bf16.msra.mxu2 %v2022_v0  ;;  %2408 = vmatpush.bf16.msra.mxu3 %v2022_v0  ;;  %s2478_s24 = scalar_lea.vmem %s2804_s0, %s1619_s19  ;;  %s2566_s29 = scalar_lea.vmem %s2807_s3, %s1619_s19 }
   0xe   : > { %v1956_v3 = vld [vmem:[%s2478_s24] sm:$0xff]  ;;  %v1957_v7 = vld [vmem:[%s2478_s24 + $0x8] sm:$0xff]  ;;  %v1958_v11 = vld [vmem:[%s2478_s24 + $0x10] sm:$0xff] }
   0xf   : > { %v1972_v4 = vld [vmem:[%s2478_s24 + $0x80] sm:$0xff]  ;;  %v1973_v8 = vld [vmem:[%s2478_s24 + $0x88] sm:$0xff]  ;;  %v1974_v12 = vld [vmem:[%s2478_s24 + $0x90] sm:$0xff] }
  0x10   : > { %850 = vmatpush.bf16.msra.mxu0 %v2021_v1  ;;  %2409 = vmatpush.bf16.msra.mxu1 %v2021_v1  ;;  %v1988_v5 = vld [vmem:[%s2478_s24 + $0x100] sm:$0xff]  ;;  %v1989_v9 = vld [vmem:[%s2478_s24 + $0x108] sm:$0xff]  ;;  %v1990_v13 = vld [vmem:[%s2478_s24 + $0x110] sm:$0xff] }
  0x11   : > { %2410 = vmatpush.bf16.msra.mxu2 %v2021_v1  ;;  %2411 = vmatpush.bf16.msra.mxu3 %v2021_v1  ;;  %v2004_v6 = vld [vmem:[%s2478_s24 + $0x180] sm:$0xff]  ;;  %v2005_v10 = vld [vmem:[%s2478_s24 + $0x188] sm:$0xff]  ;;  %v2006_v14 = vld [vmem:[%s2478_s24 + $0x190] sm:$0xff] }
  0x12   : > { %v1959_v15 = vld [vmem:[%s2478_s24 + $0x18] sm:$0xff]  ;;  %v1960_v19 = vld [vmem:[%s2478_s24 + $0x20] sm:$0xff]  ;;  %v1961_v23 = vld [vmem:[%s2478_s24 + $0x28] sm:$0xff] }
  0x13   : > { %v1975_v16 = vld [vmem:[%s2478_s24 + $0x98] sm:$0xff]  ;;  %v1976_v20 = vld [vmem:[%s2478_s24 + $0xa0] sm:$0xff]  ;;  %v1977_v24 = vld [vmem:[%s2478_s24 + $0xa8] sm:$0xff] }
  0x14   : > { %851 = vmatpush.bf16.msra.mxu0 %v2020_v2  ;;  %2412 = vmatpush.bf16.msra.mxu1 %v2020_v2  ;;  %v1991_v17 = vld [vmem:[%s2478_s24 + $0x118] sm:$0xff]  ;;  %v1992_v21 = vld [vmem:[%s2478_s24 + $0x120] sm:$0xff]  ;;  %v1993_v25 = vld [vmem:[%s2478_s24 + $0x128] sm:$0xff] }
  0x15   : > { %2413 = vmatpush.bf16.msra.mxu2 %v2020_v2  ;;  %2414 = vmatpush.bf16.msra.mxu3 %v2020_v2  ;;  %v2007_v18 = vld [vmem:[%s2478_s24 + $0x198] sm:$0xff]  ;;  %v2008_v22 = vld [vmem:[%s2478_s24 + $0x1a0] sm:$0xff]  ;;  %v2009_v26 = vld [vmem:[%s2478_s24 + $0x1a8] sm:$0xff] }
  0x16   : > { %v1962_v27 = vld [vmem:[%s2478_s24 + $0x30] sm:$0xff]  ;;  %v1963_v31 = vld [vmem:[%s2478_s24 + $0x38] sm:$0xff]  ;;  %v1964_v35 = vld [vmem:[%s2478_s24 + $0x40] sm:$0xff] }
  0x17   : > { %1890 = vmatmul.msk.bf16.vlgmr.msra.gmra.mxu0 %vm651_vm0, %v1956_v3  ;;  %1906 = vmatmul.msk.bf16.vlgmr.msra.gmra.mxu1 %vm651_vm0, %v1972_v4  ;;  %v1978_v28 = vld [vmem:[%s2478_s24 + $0xb0] sm:$0xff]  ;;  %v1979_v32 = vld [vmem:[%s2478_s24 + $0xb8] sm:$0xff]  ;;  %v1980_v36 = vld [vmem:[%s2478_s24 + $0xc0] sm:$0xff] }
  0x18   : > { %1922 = vmatmul.msk.bf16.vlgmr.msra.gmra.mxu2 %vm651_vm0, %v1988_v5  ;;  %1938 = vmatmul.msk.bf16.vlgmr.msra.gmra.mxu3 %vm651_vm0, %v2004_v6  ;;  %v1994_v29 = vld [vmem:[%s2478_s24 + $0x130] sm:$0xff]  ;;  %v1995_v33 = vld [vmem:[%s2478_s24 + $0x138] sm:$0xff]  ;;  %v1996_v39 = vld [vmem:[%s2478_s24 + $0x140] sm:$0xff] }
  0x19   : > { %v2010_v30 = vld [vmem:[%s2478_s24 + $0x1b0] sm:$0xff]  ;;  %v2011_v34 = vld [vmem:[%s2478_s24 + $0x1b8] sm:$0xff]  ;;  %v2012_v40 = vld [vmem:[%s2478_s24 + $0x1c0] sm:$0xff] }
  0x1a   : > { %v1965_v60 = vld [vmem:[%s2478_s24 + $0x48] sm:$0xff] }
  0x1b   : > { %v1981_v61 = vld [vmem:[%s2478_s24 + $0xc8] sm:$0xff] }
  0x1c   : > { %v1997_v2 = vld [vmem:[%s2478_s24 + $0x148] sm:$0xff] }
  0x1d   : > { %v2013_v3 = vld [vmem:[%s2478_s24 + $0x1c8] sm:$0xff] }
  0x27   : > { %1891 = vmatmul.msk.bf16.gmra.mxu0 %vm651_vm0, %v1957_v7  ;;  %1907 = vmatmul.msk.bf16.gmra.mxu1 %vm651_vm0, %v1973_v8 }
  0x28   : > { %1923 = vmatmul.msk.bf16.gmra.mxu2 %vm651_vm0, %v1989_v9  ;;  %1939 = vmatmul.msk.bf16.gmra.mxu3 %vm651_vm0, %v2005_v10 }
  0x37   : > { %1892 = vmatmul.msk.bf16.gmra.mxu0 %vm651_vm0, %v1958_v11  ;;  %1908 = vmatmul.msk.bf16.gmra.mxu1 %vm651_vm0, %v1974_v12 }
  0x38   : > { %1924 = vmatmul.msk.bf16.gmra.mxu2 %vm651_vm0, %v1990_v13  ;;  %1940 = vmatmul.msk.bf16.gmra.mxu3 %vm651_vm0, %v2006_v14 }
  0x47   : > { %1893 = vmatmul.msk.bf16.gmra.mxu0 %vm651_vm0, %v1959_v15  ;;  %1909 = vmatmul.msk.bf16.gmra.mxu1 %vm651_vm0, %v1975_v16 }
  0x48   : > { %1925 = vmatmul.msk.bf16.gmra.mxu2 %vm651_vm0, %v1991_v17  ;;  %1941 = vmatmul.msk.bf16.gmra.mxu3 %vm651_vm0, %v2007_v18 }
  0x57   : > { %1894 = vmatmul.msk.bf16.gmra.mxu0 %vm651_vm0, %v1960_v19  ;;  %1910 = vmatmul.msk.bf16.gmra.mxu1 %vm651_vm0, %v1976_v20 }
  0x58   : > { %1926 = vmatmul.msk.bf16.gmra.mxu2 %vm651_vm0, %v1992_v21  ;;  %1942 = vmatmul.msk.bf16.gmra.mxu3 %vm651_vm0, %v2008_v22 }
  0x67   : > { %1895 = vmatmul.msk.bf16.gmra.mxu0 %vm651_vm0, %v1961_v23  ;;  %1911 = vmatmul.msk.bf16.gmra.mxu1 %vm651_vm0, %v1977_v24 }
  0x68   : > { %1927 = vmatmul.msk.bf16.gmra.mxu2 %vm651_vm0, %v1993_v25  ;;  %1943 = vmatmul.msk.bf16.gmra.mxu3 %vm651_vm0, %v2009_v26 }
  0x77   : > { %1896 = vmatmul.msk.bf16.gmra.mxu0 %vm651_vm0, %v1962_v27  ;;  %1912 = vmatmul.msk.bf16.gmra.mxu1 %vm651_vm0, %v1978_v28  ;;  %v1966_v28 = vld [vmem:[%s2478_s24 + $0x50] sm:$0xff] }
  0x78   : > { %1928 = vmatmul.msk.bf16.gmra.mxu2 %vm651_vm0, %v1994_v29  ;;  %1944 = vmatmul.msk.bf16.gmra.mxu3 %vm651_vm0, %v2010_v30  ;;  %v1982_v29 = vld [vmem:[%s2478_s24 + $0xd0] sm:$0xff] }
  0x87   : > { %1897 = vmatmul.msk.bf16.gmra.mxu0 %vm651_vm0, %v1963_v31  ;;  %1913 = vmatmul.msk.bf16.gmra.mxu1 %vm651_vm0, %v1979_v32 }
  0x88   : > { %1929 = vmatmul.msk.bf16.gmra.mxu2 %vm651_vm0, %v1995_v33  ;;  %1945 = vmatmul.msk.bf16.gmra.mxu3 %vm651_vm0, %v2011_v34  ;;  %v1998_v34 = vld [vmem:[%s2478_s24 + $0x150] sm:$0xff] }
  0x94   : > { %v853_v37 = vpop.f32.mrf.mxu0  ;;  %v933_v38 = vpop.f32.mrf.mxu1 }
  0x95   : > { %v854_v42 = vadd.f32 %v2551_v41, %v853_v37  ;;  %v934_v43 = vadd.f32 %v2551_v41, %v933_v38 }
  0x97   : > { %1898 = vmatmul.msk.bf16.gmra.mxu0 %vm651_vm0, %v1964_v35  ;;  %1914 = vmatmul.msk.bf16.gmra.mxu1 %vm651_vm0, %v1980_v36  ;;  %v1173_v50 = vmax.f32 %v854_v42, 0.0  ;;  %v1205_v51 = vmax.f32 %v934_v43, 0.0  ;;  %v2014_v35 = vld [vmem:[%s2478_s24 + $0x1d0] sm:$0xff] }
  0x98   : > { %1930 = vmatmul.msk.bf16.gmra.mxu2 %vm651_vm0, %v1996_v39  ;;  %1946 = vmatmul.msk.bf16.gmra.mxu3 %vm651_vm0, %v2012_v40 }
  0x9b   : > { %v1013_v44 = vpop.f32.mrf.mxu2  ;;  %v1093_v45 = vpop.f32.mrf.mxu3 }
  0x9c   : > { %v855_v46 = vpop.f32.mrf.mxu0  ;;  %v935_v47 = vpop.f32.mrf.mxu1  ;;  %v1014_v56 = vadd.f32 %v2551_v41, %v1013_v44  ;;  %v1094_v57 = vadd.f32 %v2551_v41, %v1093_v45 }
  0x9d   : > { %v856_v48 = vadd.f32 %v2551_v41, %v855_v46  ;;  %v936_v49 = vadd.f32 %v2551_v41, %v935_v47 }
  0x9e   : > { %v1237_v4 = vmax.f32 %v1014_v56, 0.0  ;;  %v1269_v5 = vmax.f32 %v1094_v57, 0.0 }
  0x9f   : > { %v1174_v52 = vmax.f32 %v856_v48, 0.0  ;;  %v1206_v53 = vmax.f32 %v936_v49, 0.0 }
  0xa1   : > { %v2026_v54 = vpack.c.bf16 %v1174_v52, %v1173_v50  ;;  %v2106_v55 = vpack.c.bf16 %v1206_v53, %v1205_v51 }
  0xa3   : > { %2027 = vst [vmem:[%s2566_s29] sm:$0xff] %v2026_v54   ;;  %v1015_v58 = vpop.f32.mrf.mxu2  ;;  %v1095_v59 = vpop.f32.mrf.mxu3 }
  0xa4   : > { %2358 = vst [vmem:[%s2566_s29 + $0x80] sm:$0xff] %v2106_v55   ;;  %v1016_v62 = vadd.f32 %v2551_v41, %v1015_v58  ;;  %v1096_v63 = vadd.f32 %v2551_v41, %v1095_v59  ;;  %v858_v0 = vpop.f32.mrf.mxu0  ;;  %v938_v1 = vpop.f32.mrf.mxu1 }
  0xa5   : > { %v859_v10 = vadd.f32 %v2551_v41, %v858_v0  ;;  %v939_v11 = vadd.f32 %v2551_v41, %v938_v1 }
  0xa6   : > { %v1238_v6 = vmax.f32 %v1016_v62, 0.0  ;;  %v1270_v7 = vmax.f32 %v1096_v63, 0.0  ;;  %v1983_v62 = vld [vmem:[%s2478_s24 + $0xd8] sm:$0xff] }
  0xa7   : > { %1899 = vmatmul.msk.bf16.gmra.mxu0 %vm651_vm0, %v1965_v60  ;;  %1915 = vmatmul.msk.bf16.gmra.mxu1 %vm651_vm0, %v1981_v61  ;;  %v1175_v18 = vmax.f32 %v859_v10, 0.0  ;;  %v1207_v19 = vmax.f32 %v939_v11, 0.0  ;;  %v1967_v61 = vld [vmem:[%s2478_s24 + $0x58] sm:$0xff] }
  0xa8   : > { %v2186_v8 = vpack.c.bf16 %v1238_v6, %v1237_v4  ;;  %v2266_v9 = vpack.c.bf16 %v1270_v7, %v1269_v5  ;;  %1931 = vmatmul.msk.bf16.gmra.mxu2 %vm651_vm0, %v1997_v2  ;;  %1947 = vmatmul.msk.bf16.gmra.mxu3 %vm651_vm0, %v2013_v3  ;;  %v1999_v3 = vld [vmem:[%s2478_s24 + $0x158] sm:$0xff] }
  0xa9   : > { %v2015_v4 = vld [vmem:[%s2478_s24 + $0x1d8] sm:$0xff] }
  0xaa   : > { %2374 = vst [vmem:[%s2566_s29 + $0x100] sm:$0xff] %v2186_v8  }
  0xab   : > { %2390 = vst [vmem:[%s2566_s29 + $0x180] sm:$0xff] %v2266_v9   ;;  %v1018_v12 = vpop.f32.mrf.mxu2  ;;  %v1098_v13 = vpop.f32.mrf.mxu3 }
  0xac   : > { %v860_v14 = vpop.f32.mrf.mxu0  ;;  %v940_v15 = vpop.f32.mrf.mxu1  ;;  %v1019_v24 = vadd.f32 %v2551_v41, %v1018_v12  ;;  %v1099_v25 = vadd.f32 %v2551_v41, %v1098_v13 }
  0xad   : > { %v861_v16 = vadd.f32 %v2551_v41, %v860_v14  ;;  %v941_v17 = vadd.f32 %v2551_v41, %v940_v15 }
  0xae   : > { %v1239_v36 = vmax.f32 %v1019_v24, 0.0  ;;  %v1271_v37 = vmax.f32 %v1099_v25, 0.0 }
  0xaf   : > { %v1176_v20 = vmax.f32 %v861_v16, 0.0  ;;  %v1208_v21 = vmax.f32 %v941_v17, 0.0 }
  0xb1   : > { %v2031_v22 = vpack.c.bf16 %v1176_v20, %v1175_v18  ;;  %v2111_v23 = vpack.c.bf16 %v1208_v21, %v1207_v19 }
  0xb3   : > { %2343 = vst [vmem:[%s2566_s29 + $0x8] sm:$0xff] %v2031_v22   ;;  %v1020_v26 = vpop.f32.mrf.mxu2  ;;  %v1100_v27 = vpop.f32.mrf.mxu3 }
  0xb4   : > { %2359 = vst [vmem:[%s2566_s29 + $0x88] sm:$0xff] %v2111_v23   ;;  %v1021_v30 = vadd.f32 %v2551_v41, %v1020_v26  ;;  %v1101_v31 = vadd.f32 %v2551_v41, %v1100_v27  ;;  %v863_v32 = vpop.f32.mrf.mxu0  ;;  %v943_v33 = vpop.f32.mrf.mxu1 }
  0xb5   : > { %v864_v43 = vadd.f32 %v2551_v41, %v863_v32  ;;  %v944_v44 = vadd.f32 %v2551_v41, %v943_v33 }
  0xb6   : > { %v1240_v38 = vmax.f32 %v1021_v30, 0.0  ;;  %v1272_v39 = vmax.f32 %v1101_v31, 0.0  ;;  %v1984_v30 = vld [vmem:[%s2478_s24 + $0xe0] sm:$0xff] }
  0xb7   : > { %1900 = vmatmul.msk.bf16.gmra.mxu0 %vm651_vm0, %v1966_v28  ;;  %1916 = vmatmul.msk.bf16.gmra.mxu1 %vm651_vm0, %v1982_v29  ;;  %v1177_v51 = vmax.f32 %v864_v43, 0.0  ;;  %v1209_v52 = vmax.f32 %v944_v44, 0.0  ;;  %v1968_v29 = vld [vmem:[%s2478_s24 + $0x60] sm:$0xff] }
  0xb8   : > { %v2191_v40 = vpack.c.bf16 %v1240_v38, %v1239_v36  ;;  %v2271_v42 = vpack.c.bf16 %v1272_v39, %v1271_v37  ;;  %1932 = vmatmul.msk.bf16.gmra.mxu2 %vm651_vm0, %v1998_v34  ;;  %1948 = vmatmul.msk.bf16.gmra.mxu3 %vm651_vm0, %v2014_v35  ;;  %v2000_v35 = vld [vmem:[%s2478_s24 + $0x160] sm:$0xff] }
  0xb9   : > { %v2016_v36 = vld [vmem:[%s2478_s24 + $0x1e0] sm:$0xff] }
  0xba   : > { %2375 = vst [vmem:[%s2566_s29 + $0x108] sm:$0xff] %v2191_v40  }
  0xbb   : > { %2391 = vst [vmem:[%s2566_s29 + $0x188] sm:$0xff] %v2271_v42   ;;  %v1023_v45 = vpop.f32.mrf.mxu2  ;;  %v1103_v46 = vpop.f32.mrf.mxu3 }
  0xbc   : > { %v865_v47 = vpop.f32.mrf.mxu0  ;;  %v945_v48 = vpop.f32.mrf.mxu1  ;;  %v1024_v57 = vadd.f32 %v2551_v41, %v1023_v45  ;;  %v1104_v58 = vadd.f32 %v2551_v41, %v1103_v46 }
  0xbd   : > { %v866_v49 = vadd.f32 %v2551_v41, %v865_v47  ;;  %v946_v50 = vadd.f32 %v2551_v41, %v945_v48 }
  0xbe   : > { %v1241_v5 = vmax.f32 %v1024_v57, 0.0  ;;  %v1273_v6 = vmax.f32 %v1104_v58, 0.0 }
  0xbf   : > { %v1178_v53 = vmax.f32 %v866_v49, 0.0  ;;  %v1210_v54 = vmax.f32 %v946_v50, 0.0 }
  0xc1   : > { %v2036_v55 = vpack.c.bf16 %v1178_v53, %v1177_v51  ;;  %v2116_v56 = vpack.c.bf16 %v1210_v54, %v1209_v52 }
  0xc3   : > { %2344 = vst [vmem:[%s2566_s29 + $0x10] sm:$0xff] %v2036_v55   ;;  %v1025_v59 = vpop.f32.mrf.mxu2  ;;  %v1105_v60 = vpop.f32.mrf.mxu3 }
  0xc4   : > { %2360 = vst [vmem:[%s2566_s29 + $0x90] sm:$0xff] %v2116_v56   ;;  %v1026_v63 = vadd.f32 %v2551_v41, %v1025_v59  ;;  %v1106_v0 = vadd.f32 %v2551_v41, %v1105_v60  ;;  %v868_v1 = vpop.f32.mrf.mxu0  ;;  %v948_v2 = vpop.f32.mrf.mxu1 }
  0xc5   : > { %v869_v11 = vadd.f32 %v2551_v41, %v868_v1  ;;  %v949_v12 = vadd.f32 %v2551_v41, %v948_v2 }
  0xc6   : > { %v1242_v7 = vmax.f32 %v1026_v63, 0.0  ;;  %v1274_v8 = vmax.f32 %v1106_v0, 0.0  ;;  %v1985_v63 = vld [vmem:[%s2478_s24 + $0xe8] sm:$0xff] }
  0xc7   : > { %1901 = vmatmul.msk.bf16.gmra.mxu0 %vm651_vm0, %v1967_v61  ;;  %1917 = vmatmul.msk.bf16.gmra.mxu1 %vm651_vm0, %v1983_v62  ;;  %v1179_v19 = vmax.f32 %v869_v11, 0.0  ;;  %v1211_v20 = vmax.f32 %v949_v12, 0.0  ;;  %v1969_v62 = vld [vmem:[%s2478_s24 + $0x68] sm:$0xff] }
  0xc8   : > { %v2196_v9 = vpack.c.bf16 %v1242_v7, %v1241_v5  ;;  %v2276_v10 = vpack.c.bf16 %v1274_v8, %v1273_v6  ;;  %1933 = vmatmul.msk.bf16.gmra.mxu2 %vm651_vm0, %v1999_v3  ;;  %1949 = vmatmul.msk.bf16.gmra.mxu3 %vm651_vm0, %v2015_v4  ;;  %v2001_v4 = vld [vmem:[%s2478_s24 + $0x168] sm:$0xff] }
  0xc9   : > { %v2017_v5 = vld [vmem:[%s2478_s24 + $0x1e8] sm:$0xff] }
  0xca   : > { %2376 = vst [vmem:[%s2566_s29 + $0x110] sm:$0xff] %v2196_v9  }
  0xcb   : > { %2392 = vst [vmem:[%s2566_s29 + $0x190] sm:$0xff] %v2276_v10   ;;  %v1028_v13 = vpop.f32.mrf.mxu2  ;;  %v1108_v14 = vpop.f32.mrf.mxu3 }
  0xcc   : > { %v870_v15 = vpop.f32.mrf.mxu0  ;;  %v950_v16 = vpop.f32.mrf.mxu1  ;;  %v1029_v25 = vadd.f32 %v2551_v41, %v1028_v13  ;;  %v1109_v26 = vadd.f32 %v2551_v41, %v1108_v14 }
  0xcd   : > { %v871_v17 = vadd.f32 %v2551_v41, %v870_v15  ;;  %v951_v18 = vadd.f32 %v2551_v41, %v950_v16 }
  0xce   : > { %v1243_v37 = vmax.f32 %v1029_v25, 0.0  ;;  %v1275_v38 = vmax.f32 %v1109_v26, 0.0 }
  0xcf   : > { %v1180_v21 = vmax.f32 %v871_v17, 0.0  ;;  %v1212_v22 = vmax.f32 %v951_v18, 0.0 }
  0xd1   : > { %v2041_v23 = vpack.c.bf16 %v1180_v21, %v1179_v19  ;;  %v2121_v24 = vpack.c.bf16 %v1212_v22, %v1211_v20 }
  0xd3   : > { %2345 = vst [vmem:[%s2566_s29 + $0x18] sm:$0xff] %v2041_v23   ;;  %v1030_v27 = vpop.f32.mrf.mxu2  ;;  %v1110_v28 = vpop.f32.mrf.mxu3 }
  0xd4   : > { %2361 = vst [vmem:[%s2566_s29 + $0x98] sm:$0xff] %v2121_v24   ;;  %v1031_v31 = vadd.f32 %v2551_v41, %v1030_v27  ;;  %v1111_v32 = vadd.f32 %v2551_v41, %v1110_v28  ;;  %v873_v33 = vpop.f32.mrf.mxu0  ;;  %v953_v34 = vpop.f32.mrf.mxu1 }
  0xd5   : > { %v874_v44 = vadd.f32 %v2551_v41, %v873_v33  ;;  %v954_v45 = vadd.f32 %v2551_v41, %v953_v34 }
  0xd6   : > { %v1244_v39 = vmax.f32 %v1031_v31, 0.0  ;;  %v1276_v40 = vmax.f32 %v1111_v32, 0.0  ;;  %v1986_v31 = vld [vmem:[%s2478_s24 + $0xf0] sm:$0xff] }
  0xd7   : > { %1902 = vmatmul.msk.bf16.gmra.mxu0 %vm651_vm0, %v1968_v29  ;;  %1918 = vmatmul.msk.bf16.gmra.mxu1 %vm651_vm0, %v1984_v30  ;;  %v1181_v52 = vmax.f32 %v874_v44, 0.0  ;;  %v1213_v53 = vmax.f32 %v954_v45, 0.0  ;;  %v1970_v30 = vld [vmem:[%s2478_s24 + $0x70] sm:$0xff] }
  0xd8   : > { %v2201_v42 = vpack.c.bf16 %v1244_v39, %v1243_v37  ;;  %v2281_v43 = vpack.c.bf16 %v1276_v40, %v1275_v38  ;;  %1934 = vmatmul.msk.bf16.gmra.mxu2 %vm651_vm0, %v2000_v35  ;;  %1950 = vmatmul.msk.bf16.gmra.mxu3 %vm651_vm0, %v2016_v36  ;;  %v2002_v36 = vld [vmem:[%s2478_s24 + $0x170] sm:$0xff] }
  0xd9   : > { %v2018_v37 = vld [vmem:[%s2478_s24 + $0x1f0] sm:$0xff] }
  0xda   : > { %2377 = vst [vmem:[%s2566_s29 + $0x118] sm:$0xff] %v2201_v42  }
  0xdb   : > { %2393 = vst [vmem:[%s2566_s29 + $0x198] sm:$0xff] %v2281_v43   ;;  %v1033_v46 = vpop.f32.mrf.mxu2  ;;  %v1113_v47 = vpop.f32.mrf.mxu3 }
  0xdc   : > { %v875_v48 = vpop.f32.mrf.mxu0  ;;  %v955_v49 = vpop.f32.mrf.mxu1  ;;  %v1034_v58 = vadd.f32 %v2551_v41, %v1033_v46  ;;  %v1114_v59 = vadd.f32 %v2551_v41, %v1113_v47 }
  0xdd   : > { %v876_v50 = vadd.f32 %v2551_v41, %v875_v48  ;;  %v956_v51 = vadd.f32 %v2551_v41, %v955_v49 }
  0xde   : > { %v1245_v6 = vmax.f32 %v1034_v58, 0.0  ;;  %v1277_v7 = vmax.f32 %v1114_v59, 0.0 }
  0xdf   : > { %v1182_v54 = vmax.f32 %v876_v50, 0.0  ;;  %v1214_v55 = vmax.f32 %v956_v51, 0.0 }
  0xe1   : > { %v2046_v56 = vpack.c.bf16 %v1182_v54, %v1181_v52  ;;  %v2126_v57 = vpack.c.bf16 %v1214_v55, %v1213_v53 }
  0xe3   : > { %2346 = vst [vmem:[%s2566_s29 + $0x20] sm:$0xff] %v2046_v56   ;;  %v1035_v60 = vpop.f32.mrf.mxu2  ;;  %v1115_v61 = vpop.f32.mrf.mxu3 }
  0xe4   : > { %2362 = vst [vmem:[%s2566_s29 + $0xa0] sm:$0xff] %v2126_v57   ;;  %v1036_v0 = vadd.f32 %v2551_v41, %v1035_v60  ;;  %v1116_v1 = vadd.f32 %v2551_v41, %v1115_v61  ;;  %v878_v2 = vpop.f32.mrf.mxu0  ;;  %v958_v3 = vpop.f32.mrf.mxu1 }
  0xe5   : > { %v879_v12 = vadd.f32 %v2551_v41, %v878_v2  ;;  %v959_v13 = vadd.f32 %v2551_v41, %v958_v3 }
  0xe6   : > { %v1246_v8 = vmax.f32 %v1036_v0, 0.0  ;;  %v1278_v9 = vmax.f32 %v1116_v1, 0.0  ;;  %v1987_v0 = vld [vmem:[%s2478_s24 + $0xf8] sm:$0xff] }
  0xe7   : > { %1903 = vmatmul.msk.bf16.gmra.mxu0 %vm651_vm0, %v1969_v62  ;;  %1919 = vmatmul.msk.bf16.gmra.mxu1 %vm651_vm0, %v1985_v63  ;;  %v1183_v20 = vmax.f32 %v879_v12, 0.0  ;;  %v1215_v21 = vmax.f32 %v959_v13, 0.0  ;;  %v1971_v63 = vld [vmem:[%s2478_s24 + $0x78] sm:$0xff] }
  0xe8   : > { %v2206_v10 = vpack.c.bf16 %v1246_v8, %v1245_v6  ;;  %v2286_v11 = vpack.c.bf16 %v1278_v9, %v1277_v7  ;;  %1935 = vmatmul.msk.bf16.gmra.mxu2 %vm651_vm0, %v2001_v4  ;;  %1951 = vmatmul.msk.bf16.gmra.mxu3 %vm651_vm0, %v2017_v5  ;;  %v2003_v5 = vld [vmem:[%s2478_s24 + $0x178] sm:$0xff] }
  0xe9   : > { %v2019_v6 = vld [vmem:[%s2478_s24 + $0x1f8] sm:$0xff] }
  0xea   : > { %2378 = vst [vmem:[%s2566_s29 + $0x120] sm:$0xff] %v2206_v10  }
  0xeb   : > { %2394 = vst [vmem:[%s2566_s29 + $0x1a0] sm:$0xff] %v2286_v11   ;;  %v1038_v14 = vpop.f32.mrf.mxu2  ;;  %v1118_v15 = vpop.f32.mrf.mxu3 }
  0xec   : > { %v880_v16 = vpop.f32.mrf.mxu0  ;;  %v960_v17 = vpop.f32.mrf.mxu1  ;;  %v1039_v26 = vadd.f32 %v2551_v41, %v1038_v14  ;;  %v1119_v27 = vadd.f32 %v2551_v41, %v1118_v15 }
  0xed   : > { %v881_v18 = vadd.f32 %v2551_v41, %v880_v16  ;;  %v961_v19 = vadd.f32 %v2551_v41, %v960_v17 }
  0xee   : > { %v1247_v38 = vmax.f32 %v1039_v26, 0.0  ;;  %v1279_v39 = vmax.f32 %v1119_v27, 0.0 }
  0xef   : > { %v1184_v22 = vmax.f32 %v881_v18, 0.0  ;;  %v1216_v23 = vmax.f32 %v961_v19, 0.0 }
  0xf1   : > { %v2051_v24 = vpack.c.bf16 %v1184_v22, %v1183_v20  ;;  %v2131_v25 = vpack.c.bf16 %v1216_v23, %v1215_v21 }
  0xf3   : > { %2347 = vst [vmem:[%s2566_s29 + $0x28] sm:$0xff] %v2051_v24   ;;  %v1040_v28 = vpop.f32.mrf.mxu2  ;;  %v1120_v29 = vpop.f32.mrf.mxu3 }
  0xf4   : > { %2363 = vst [vmem:[%s2566_s29 + $0xa8] sm:$0xff] %v2131_v25   ;;  %v1041_v32 = vadd.f32 %v2551_v41, %v1040_v28  ;;  %v1121_v33 = vadd.f32 %v2551_v41, %v1120_v29  ;;  %v883_v34 = vpop.f32.mrf.mxu0  ;;  %v963_v35 = vpop.f32.mrf.mxu1 }
  0xf5   : > { %v884_v45 = vadd.f32 %v2551_v41, %v883_v34  ;;  %v964_v46 = vadd.f32 %v2551_v41, %v963_v35 }
  0xf6   : > { %v1248_v40 = vmax.f32 %v1041_v32, 0.0  ;;  %v1280_v42 = vmax.f32 %v1121_v33, 0.0 }
  0xf7   : > { %1904 = vmatmul.msk.bf16.gmra.mxu0 %vm651_vm0, %v1970_v30  ;;  %1920 = vmatmul.msk.bf16.gmra.mxu1 %vm651_vm0, %v1986_v31  ;;  %v1185_v53 = vmax.f32 %v884_v45, 0.0  ;;  %v1217_v54 = vmax.f32 %v964_v46, 0.0 }
  0xf8   : > { %v2211_v43 = vpack.c.bf16 %v1248_v40, %v1247_v38  ;;  %v2291_v44 = vpack.c.bf16 %v1280_v42, %v1279_v39  ;;  %1936 = vmatmul.msk.bf16.gmra.mxu2 %vm651_vm0, %v2002_v36  ;;  %1952 = vmatmul.msk.bf16.gmra.mxu3 %vm651_vm0, %v2018_v37 }
  0xfa   : > { %2379 = vst [vmem:[%s2566_s29 + $0x128] sm:$0xff] %v2211_v43  }
  0xfb   : > { %2395 = vst [vmem:[%s2566_s29 + $0x1a8] sm:$0xff] %v2291_v44   ;;  %v1043_v47 = vpop.f32.mrf.mxu2  ;;  %v1123_v48 = vpop.f32.mrf.mxu3 }
  0xfc   : > { %v885_v49 = vpop.f32.mrf.mxu0  ;;  %v965_v50 = vpop.f32.mrf.mxu1  ;;  %v1044_v59 = vadd.f32 %v2551_v41, %v1043_v47  ;;  %v1124_v60 = vadd.f32 %v2551_v41, %v1123_v48 }
  0xfd   : > { %v886_v51 = vadd.f32 %v2551_v41, %v885_v49  ;;  %v966_v52 = vadd.f32 %v2551_v41, %v965_v50 }
  0xfe   : > { %v1249_v7 = vmax.f32 %v1044_v59, 0.0  ;;  %v1281_v8 = vmax.f32 %v1124_v60, 0.0 }
  0xff   : > { %v1186_v55 = vmax.f32 %v886_v51, 0.0  ;;  %v1218_v56 = vmax.f32 %v966_v52, 0.0 }
 0x101   : > { %v2056_v57 = vpack.c.bf16 %v1186_v55, %v1185_v53  ;;  %v2136_v58 = vpack.c.bf16 %v1218_v56, %v1217_v54 }
 0x103   : > { %2348 = vst [vmem:[%s2566_s29 + $0x30] sm:$0xff] %v2056_v57   ;;  %v1045_v61 = vpop.f32.mrf.mxu2  ;;  %v1125_v62 = vpop.f32.mrf.mxu3 }
 0x104   : > { %2364 = vst [vmem:[%s2566_s29 + $0xb0] sm:$0xff] %v2136_v58   ;;  %v1046_v1 = vadd.f32 %v2551_v41, %v1045_v61  ;;  %v1126_v2 = vadd.f32 %v2551_v41, %v1125_v62  ;;  %v888_v3 = vpop.f32.mrf.mxu0  ;;  %v968_v4 = vpop.f32.mrf.mxu1 }
 0x105   : > { %v889_v13 = vadd.f32 %v2551_v41, %v888_v3  ;;  %v969_v14 = vadd.f32 %v2551_v41, %v968_v4 }
 0x106   : > { %v1250_v9 = vmax.f32 %v1046_v1, 0.0  ;;  %v1282_v10 = vmax.f32 %v1126_v2, 0.0 }
 0x107   : > { %1905 = vmatmul.msk.bf16.gmra.mxu0 %vm651_vm0, %v1971_v63  ;;  %1921 = vmatmul.msk.bf16.gmra.mxu1 %vm651_vm0, %v1987_v0  ;;  %v1187_v21 = vmax.f32 %v889_v13, 0.0  ;;  %v1219_v22 = vmax.f32 %v969_v14, 0.0 }
 0x108   : > { %v2216_v11 = vpack.c.bf16 %v1250_v9, %v1249_v7  ;;  %v2296_v12 = vpack.c.bf16 %v1282_v10, %v1281_v8  ;;  %1937 = vmatmul.msk.bf16.gmra.mxu2 %vm651_vm0, %v2003_v5  ;;  %1953 = vmatmul.msk.bf16.gmra.mxu3 %vm651_vm0, %v2019_v6 }
 0x10a   : > { %2380 = vst [vmem:[%s2566_s29 + $0x130] sm:$0xff] %v2216_v11  }
 0x10b   : > { %2396 = vst [vmem:[%s2566_s29 + $0x1b0] sm:$0xff] %v2296_v12   ;;  %v1048_v15 = vpop.f32.mrf.mxu2  ;;  %v1128_v16 = vpop.f32.mrf.mxu3 }
 0x10c   : > { %v890_v17 = vpop.f32.mrf.mxu0  ;;  %v970_v18 = vpop.f32.mrf.mxu1  ;;  %v1049_v27 = vadd.f32 %v2551_v41, %v1048_v15  ;;  %v1129_v28 = vadd.f32 %v2551_v41, %v1128_v16 }
 0x10d   : > { %v891_v19 = vadd.f32 %v2551_v41, %v890_v17  ;;  %v971_v20 = vadd.f32 %v2551_v41, %v970_v18 }
 0x10e   : > { %v1251_v35 = vmax.f32 %v1049_v27, 0.0  ;;  %v1283_v36 = vmax.f32 %v1129_v28, 0.0 }
 0x10f   : > { %v1188_v23 = vmax.f32 %v891_v19, 0.0  ;;  %v1220_v24 = vmax.f32 %v971_v20, 0.0 }
 0x111   : > { %v2061_v25 = vpack.c.bf16 %v1188_v23, %v1187_v21  ;;  %v2141_v26 = vpack.c.bf16 %v1220_v24, %v1219_v22 }
 0x113   : > { %2349 = vst [vmem:[%s2566_s29 + $0x38] sm:$0xff] %v2061_v25   ;;  %v1050_v29 = vpop.f32.mrf.mxu2  ;;  %v1130_v30 = vpop.f32.mrf.mxu3 }
 0x114   : > { %2365 = vst [vmem:[%s2566_s29 + $0xb8] sm:$0xff] %v2141_v26   ;;  %v1051_v31 = vadd.f32 %v2551_v41, %v1050_v29  ;;  %v1131_v32 = vadd.f32 %v2551_v41, %v1130_v30  ;;  %v893_v33 = vpop.f32.mrf.mxu0  ;;  %v973_v34 = vpop.f32.mrf.mxu1 }
 0x115   : > { %v894_v42 = vadd.f32 %v2551_v41, %v893_v33  ;;  %v974_v43 = vadd.f32 %v2551_v41, %v973_v34 }
 0x116   : > { %v1252_v37 = vmax.f32 %v1051_v31, 0.0  ;;  %v1284_v38 = vmax.f32 %v1131_v32, 0.0 }
 0x117   : > { %v1189_v50 = vmax.f32 %v894_v42, 0.0  ;;  %v1221_v51 = vmax.f32 %v974_v43, 0.0 }
 0x118   : > { %v2221_v39 = vpack.c.bf16 %v1252_v37, %v1251_v35  ;;  %v2301_v40 = vpack.c.bf16 %v1284_v38, %v1283_v36 }
 0x11a   : > { %2381 = vst [vmem:[%s2566_s29 + $0x138] sm:$0xff] %v2221_v39  }
 0x11b   : > { %2397 = vst [vmem:[%s2566_s29 + $0x1b8] sm:$0xff] %v2301_v40   ;;  %v1053_v44 = vpop.f32.mrf.mxu2  ;;  %v1133_v45 = vpop.f32.mrf.mxu3 }
 0x11c   : > { %v895_v46 = vpop.f32.mrf.mxu0  ;;  %v975_v47 = vpop.f32.mrf.mxu1  ;;  %v1054_v56 = vadd.f32 %v2551_v41, %v1053_v44  ;;  %v1134_v57 = vadd.f32 %v2551_v41, %v1133_v45 }
 0x11d   : > { %v896_v48 = vadd.f32 %v2551_v41, %v895_v46  ;;  %v976_v49 = vadd.f32 %v2551_v41, %v975_v47 }
 0x11e   : > { %v1253_v0 = vmax.f32 %v1054_v56, 0.0  ;;  %v1285_v1 = vmax.f32 %v1134_v57, 0.0 }
 0x11f   : > { %v1190_v52 = vmax.f32 %v896_v48, 0.0  ;;  %v1222_v53 = vmax.f32 %v976_v49, 0.0 }
 0x121   : > { %v2066_v54 = vpack.c.bf16 %v1190_v52, %v1189_v50  ;;  %v2146_v55 = vpack.c.bf16 %v1222_v53, %v1221_v51 }
 0x123   : > { %2350 = vst [vmem:[%s2566_s29 + $0x40] sm:$0xff] %v2066_v54   ;;  %v1055_v58 = vpop.f32.mrf.mxu2  ;;  %v1135_v59 = vpop.f32.mrf.mxu3 }
 0x124   : > { %2366 = vst [vmem:[%s2566_s29 + $0xc0] sm:$0xff] %v2146_v55   ;;  %v1056_v60 = vadd.f32 %v2551_v41, %v1055_v58  ;;  %v1136_v61 = vadd.f32 %v2551_v41, %v1135_v59  ;;  %v898_v62 = vpop.f32.mrf.mxu0  ;;  %v978_v63 = vpop.f32.mrf.mxu1 }
 0x125   : > { %v899_v6 = vadd.f32 %v2551_v41, %v898_v62  ;;  %v979_v7 = vadd.f32 %v2551_v41, %v978_v63 }
 0x126   : > { %v1254_v2 = vmax.f32 %v1056_v60, 0.0  ;;  %v1286_v3 = vmax.f32 %v1136_v61, 0.0 }
 0x127   : > { %v1191_v14 = vmax.f32 %v899_v6, 0.0  ;;  %v1223_v15 = vmax.f32 %v979_v7, 0.0 }
 0x128   : > { %v2226_v4 = vpack.c.bf16 %v1254_v2, %v1253_v0  ;;  %v2306_v5 = vpack.c.bf16 %v1286_v3, %v1285_v1 }
 0x12a   : > { %2382 = vst [vmem:[%s2566_s29 + $0x140] sm:$0xff] %v2226_v4  }
 0x12b   : > { %2398 = vst [vmem:[%s2566_s29 + $0x1c0] sm:$0xff] %v2306_v5   ;;  %v1058_v8 = vpop.f32.mrf.mxu2  ;;  %v1138_v9 = vpop.f32.mrf.mxu3 }
 0x12c   : > { %v900_v10 = vpop.f32.mrf.mxu0  ;;  %v980_v11 = vpop.f32.mrf.mxu1  ;;  %v1059_v20 = vadd.f32 %v2551_v41, %v1058_v8  ;;  %v1139_v21 = vadd.f32 %v2551_v41, %v1138_v9 }
 0x12d   : > { %v901_v12 = vadd.f32 %v2551_v41, %v900_v10  ;;  %v981_v13 = vadd.f32 %v2551_v41, %v980_v11 }
 0x12e   : > { %v1255_v28 = vmax.f32 %v1059_v20, 0.0  ;;  %v1287_v29 = vmax.f32 %v1139_v21, 0.0 }
 0x12f   : > { %v1192_v16 = vmax.f32 %v901_v12, 0.0  ;;  %v1224_v17 = vmax.f32 %v981_v13, 0.0 }
 0x131   : > { %v2071_v18 = vpack.c.bf16 %v1192_v16, %v1191_v14  ;;  %v2151_v19 = vpack.c.bf16 %v1224_v17, %v1223_v15 }
 0x133   : > { %2351 = vst [vmem:[%s2566_s29 + $0x48] sm:$0xff] %v2071_v18   ;;  %v1060_v22 = vpop.f32.mrf.mxu2  ;;  %v1140_v23 = vpop.f32.mrf.mxu3 }
 0x134   : > { %2367 = vst [vmem:[%s2566_s29 + $0xc8] sm:$0xff] %v2151_v19   ;;  %v1061_v24 = vadd.f32 %v2551_v41, %v1060_v22  ;;  %v1141_v25 = vadd.f32 %v2551_v41, %v1140_v23  ;;  %v903_v26 = vpop.f32.mrf.mxu0  ;;  %v983_v27 = vpop.f32.mrf.mxu1 }
 0x135   : > { %v904_v34 = vadd.f32 %v2551_v41, %v903_v26  ;;  %v984_v35 = vadd.f32 %v2551_v41, %v983_v27 }
 0x136   : > { %v1256_v30 = vmax.f32 %v1061_v24, 0.0  ;;  %v1288_v31 = vmax.f32 %v1141_v25, 0.0 }
 0x137   : > { %v1193_v43 = vmax.f32 %v904_v34, 0.0  ;;  %v1225_v44 = vmax.f32 %v984_v35, 0.0 }
 0x138   : > { %v2231_v32 = vpack.c.bf16 %v1256_v30, %v1255_v28  ;;  %v2311_v33 = vpack.c.bf16 %v1288_v31, %v1287_v29 }
 0x13a   : > { %2383 = vst [vmem:[%s2566_s29 + $0x148] sm:$0xff] %v2231_v32  }
 0x13b   : > { %2399 = vst [vmem:[%s2566_s29 + $0x1c8] sm:$0xff] %v2311_v33   ;;  %v1063_v36 = vpop.f32.mrf.mxu2  ;;  %v1143_v37 = vpop.f32.mrf.mxu3 }
 0x13c   : > { %v905_v38 = vpop.f32.mrf.mxu0  ;;  %v985_v39 = vpop.f32.mrf.mxu1  ;;  %v1064_v49 = vadd.f32 %v2551_v41, %v1063_v36  ;;  %v1144_v50 = vadd.f32 %v2551_v41, %v1143_v37 }
 0x13d   : > { %v906_v40 = vadd.f32 %v2551_v41, %v905_v38  ;;  %v986_v42 = vadd.f32 %v2551_v41, %v985_v39 }
 0x13e   : > { %v1257_v57 = vmax.f32 %v1064_v49, 0.0  ;;  %v1289_v58 = vmax.f32 %v1144_v50, 0.0 }
 0x13f   : > { %v1194_v45 = vmax.f32 %v906_v40, 0.0  ;;  %v1226_v46 = vmax.f32 %v986_v42, 0.0 }
 0x141   : > { %v2076_v47 = vpack.c.bf16 %v1194_v45, %v1193_v43  ;;  %v2156_v48 = vpack.c.bf16 %v1226_v46, %v1225_v44 }
 0x143   : > { %2352 = vst [vmem:[%s2566_s29 + $0x50] sm:$0xff] %v2076_v47   ;;  %v1065_v51 = vpop.f32.mrf.mxu2  ;;  %v1145_v52 = vpop.f32.mrf.mxu3 }
 0x144   : > { %2368 = vst [vmem:[%s2566_s29 + $0xd0] sm:$0xff] %v2156_v48   ;;  %v1066_v53 = vadd.f32 %v2551_v41, %v1065_v51  ;;  %v1146_v54 = vadd.f32 %v2551_v41, %v1145_v52  ;;  %v908_v55 = vpop.f32.mrf.mxu0  ;;  %v988_v56 = vpop.f32.mrf.mxu1 }
 0x145   : > { %v909_v63 = vadd.f32 %v2551_v41, %v908_v55  ;;  %v989_v0 = vadd.f32 %v2551_v41, %v988_v56 }
 0x146   : > { %v1258_v59 = vmax.f32 %v1066_v53, 0.0  ;;  %v1290_v60 = vmax.f32 %v1146_v54, 0.0 }
 0x147   : > { %v1195_v7 = vmax.f32 %v909_v63, 0.0  ;;  %v1227_v8 = vmax.f32 %v989_v0, 0.0 }
 0x148   : > { %v2236_v61 = vpack.c.bf16 %v1258_v59, %v1257_v57  ;;  %v2316_v62 = vpack.c.bf16 %v1290_v60, %v1289_v58 }
 0x14a   : > { %2384 = vst [vmem:[%s2566_s29 + $0x150] sm:$0xff] %v2236_v61  }
 0x14b   : > { %2400 = vst [vmem:[%s2566_s29 + $0x1d0] sm:$0xff] %v2316_v62   ;;  %v1068_v1 = vpop.f32.mrf.mxu2  ;;  %v1148_v2 = vpop.f32.mrf.mxu3 }
 0x14c   : > { %v910_v3 = vpop.f32.mrf.mxu0  ;;  %v990_v4 = vpop.f32.mrf.mxu1  ;;  %v1069_v13 = vadd.f32 %v2551_v41, %v1068_v1  ;;  %v1149_v14 = vadd.f32 %v2551_v41, %v1148_v2 }
 0x14d   : > { %v911_v5 = vadd.f32 %v2551_v41, %v910_v3  ;;  %v991_v6 = vadd.f32 %v2551_v41, %v990_v4 }
 0x14e   : > { %v1259_v21 = vmax.f32 %v1069_v13, 0.0  ;;  %v1291_v22 = vmax.f32 %v1149_v14, 0.0 }
 0x14f   : > { %v1196_v9 = vmax.f32 %v911_v5, 0.0  ;;  %v1228_v10 = vmax.f32 %v991_v6, 0.0 }
 0x151   : > { %v2081_v11 = vpack.c.bf16 %v1196_v9, %v1195_v7  ;;  %v2161_v12 = vpack.c.bf16 %v1228_v10, %v1227_v8 }
 0x153   : > { %2353 = vst [vmem:[%s2566_s29 + $0x58] sm:$0xff] %v2081_v11   ;;  %v1070_v15 = vpop.f32.mrf.mxu2  ;;  %v1150_v16 = vpop.f32.mrf.mxu3 }
 0x154   : > { %2369 = vst [vmem:[%s2566_s29 + $0xd8] sm:$0xff] %v2161_v12   ;;  %v1071_v17 = vadd.f32 %v2551_v41, %v1070_v15  ;;  %v1151_v18 = vadd.f32 %v2551_v41, %v1150_v16  ;;  %v913_v19 = vpop.f32.mrf.mxu0  ;;  %v993_v20 = vpop.f32.mrf.mxu1 }
 0x155   : > { %v914_v27 = vadd.f32 %v2551_v41, %v913_v19  ;;  %v994_v28 = vadd.f32 %v2551_v41, %v993_v20 }
 0x156   : > { %v1260_v23 = vmax.f32 %v1071_v17, 0.0  ;;  %v1292_v24 = vmax.f32 %v1151_v18, 0.0 }
 0x157   : > { %v1197_v35 = vmax.f32 %v914_v27, 0.0  ;;  %v1229_v36 = vmax.f32 %v994_v28, 0.0 }
 0x158   : > { %v2241_v25 = vpack.c.bf16 %v1260_v23, %v1259_v21  ;;  %v2321_v26 = vpack.c.bf16 %v1292_v24, %v1291_v22 }
 0x15a   : > { %2385 = vst [vmem:[%s2566_s29 + $0x158] sm:$0xff] %v2241_v25  }
 0x15b   : > { %2401 = vst [vmem:[%s2566_s29 + $0x1d8] sm:$0xff] %v2321_v26   ;;  %v1073_v29 = vpop.f32.mrf.mxu2  ;;  %v1153_v30 = vpop.f32.mrf.mxu3  ;;  %v2424_v26 = vld [vmem:[%s2806_s2] ss:$0 sm:$0xff] }
 0x15c   : > { %v915_v31 = vpop.f32.mrf.mxu0  ;;  %v995_v32 = vpop.f32.mrf.mxu1  ;;  %v1074_v42 = vadd.f32 %v2551_v41, %v1073_v29  ;;  %v1154_v43 = vadd.f32 %v2551_v41, %v1153_v30 }
 0x15d   : > { %v916_v33 = vadd.f32 %v2551_v41, %v915_v31  ;;  %v996_v34 = vadd.f32 %v2551_v41, %v995_v32 }
 0x15e   : > { %v1261_v50 = vmax.f32 %v1074_v42, 0.0  ;;  %v1293_v51 = vmax.f32 %v1154_v43, 0.0 }
 0x15f   : > { %v1198_v37 = vmax.f32 %v916_v33, 0.0  ;;  %v1230_v38 = vmax.f32 %v996_v34, 0.0 }
 0x161   : > { %v2086_v39 = vpack.c.bf16 %v1198_v37, %v1197_v35  ;;  %v2166_v40 = vpack.c.bf16 %v1230_v38, %v1229_v36 }
 0x163   : > { %2354 = vst [vmem:[%s2566_s29 + $0x60] sm:$0xff] %v2086_v39   ;;  %v1075_v44 = vpop.f32.mrf.mxu2  ;;  %v1155_v45 = vpop.f32.mrf.mxu3 }
 0x164   : > { %2370 = vst [vmem:[%s2566_s29 + $0xe0] sm:$0xff] %v2166_v40   ;;  %v1076_v46 = vadd.f32 %v2551_v41, %v1075_v44  ;;  %v1156_v47 = vadd.f32 %v2551_v41, %v1155_v45  ;;  %v918_v48 = vpop.f32.mrf.mxu0  ;;  %v998_v49 = vpop.f32.mrf.mxu1 }
 0x165   : > { %v919_v56 = vadd.f32 %v2551_v41, %v918_v48  ;;  %v999_v57 = vadd.f32 %v2551_v41, %v998_v49 }
 0x166   : > { %v1262_v52 = vmax.f32 %v1076_v46, 0.0  ;;  %v1294_v53 = vmax.f32 %v1156_v47, 0.0 }
 0x167   : > { %v1199_v0 = vmax.f32 %v919_v56, 0.0  ;;  %v1231_v1 = vmax.f32 %v999_v57, 0.0 }
 0x168   : > { %v2246_v54 = vpack.c.bf16 %v1262_v52, %v1261_v50  ;;  %v2326_v55 = vpack.c.bf16 %v1294_v53, %v1293_v51 }
 0x16a   : > { %2386 = vst [vmem:[%s2566_s29 + $0x160] sm:$0xff] %v2246_v54  }
 0x16b   : > { %2402 = vst [vmem:[%s2566_s29 + $0x1e0] sm:$0xff] %v2326_v55   ;;  %v1078_v58 = vpop.f32.mrf.mxu2  ;;  %v1158_v59 = vpop.f32.mrf.mxu3 }
 0x16c   : > { %v920_v60 = vpop.f32.mrf.mxu0  ;;  %v1000_v61 = vpop.f32.mrf.mxu1  ;;  %v1079_v6 = vadd.f32 %v2551_v41, %v1078_v58  ;;  %v1159_v7 = vadd.f32 %v2551_v41, %v1158_v59 }
 0x16d   : > { %v921_v62 = vadd.f32 %v2551_v41, %v920_v60  ;;  %v1001_v63 = vadd.f32 %v2551_v41, %v1000_v61 }
 0x16e   : > { %v1263_v14 = vmax.f32 %v1079_v6, 0.0  ;;  %v1295_v15 = vmax.f32 %v1159_v7, 0.0 }
 0x16f   : > { %v1200_v2 = vmax.f32 %v921_v62, 0.0  ;;  %v1232_v3 = vmax.f32 %v1001_v63, 0.0 }
 0x171   : > { %v2091_v4 = vpack.c.bf16 %v1200_v2, %v1199_v0  ;;  %v2171_v5 = vpack.c.bf16 %v1232_v3, %v1231_v1 }
 0x173   : > { %2355 = vst [vmem:[%s2566_s29 + $0x68] sm:$0xff] %v2091_v4   ;;  %v1080_v8 = vpop.f32.mrf.mxu2  ;;  %v1160_v9 = vpop.f32.mrf.mxu3 }
 0x174   : > { %2371 = vst [vmem:[%s2566_s29 + $0xe8] sm:$0xff] %v2171_v5   ;;  %v1081_v10 = vadd.f32 %v2551_v41, %v1080_v8  ;;  %v1161_v11 = vadd.f32 %v2551_v41, %v1160_v9  ;;  %v923_v12 = vpop.f32.mrf.mxu0  ;;  %v1003_v13 = vpop.f32.mrf.mxu1 }
 0x175   : > { %v924_v20 = vadd.f32 %v2551_v41, %v923_v12  ;;  %v1004_v21 = vadd.f32 %v2551_v41, %v1003_v13 }
 0x176   : > { %v1264_v16 = vmax.f32 %v1081_v10, 0.0  ;;  %v1296_v17 = vmax.f32 %v1161_v11, 0.0 }
 0x177   : > { %v1201_v29 = vmax.f32 %v924_v20, 0.0  ;;  %v1233_v30 = vmax.f32 %v1004_v21, 0.0 }
 0x178   : > { %v2251_v18 = vpack.c.bf16 %v1264_v16, %v1263_v14  ;;  %v2331_v19 = vpack.c.bf16 %v1296_v17, %v1295_v15 }
 0x17a   : > { %2387 = vst [vmem:[%s2566_s29 + $0x168] sm:$0xff] %v2251_v18  }
 0x17b   : > { %2403 = vst [vmem:[%s2566_s29 + $0x1e8] sm:$0xff] %v2331_v19   ;;  %v1083_v22 = vpop.f32.mrf.mxu2  ;;  %v1163_v23 = vpop.f32.mrf.mxu3 }
 0x17c   : > { %v925_v24 = vpop.f32.mrf.mxu0  ;;  %v1005_v25 = vpop.f32.mrf.mxu1  ;;  %v1084_v35 = vadd.f32 %v2424_v26, %v1083_v22  ;;  %v1164_v41 = vadd.f32 %v2424_v26, %v1163_v23 }
 0x17d   : > { %v926_v27 = vadd.f32 %v2424_v26, %v925_v24  ;;  %v1006_v28 = vadd.f32 %v2424_v26, %v1005_v25 }
 0x17e   : > { %v1265_v43 = vmax.f32 %v1084_v35, 0.0  ;;  %v1297_v44 = vmax.f32 %v1164_v41, 0.0 }
 0x17f   : > { %v1202_v31 = vmax.f32 %v926_v27, 0.0  ;;  %v1234_v32 = vmax.f32 %v1006_v28, 0.0 }
 0x181   : > { %v2096_v33 = vpack.c.bf16 %v1202_v31, %v1201_v29  ;;  %v2176_v34 = vpack.c.bf16 %v1234_v32, %v1233_v30 }
 0x183   : > { %2356 = vst [vmem:[%s2566_s29 + $0x70] sm:$0xff] %v2096_v33   ;;  %v1085_v36 = vpop.f32.mrf.mxu2  ;;  %v1165_v37 = vpop.f32.mrf.mxu3 }
 0x184   : > { %2372 = vst [vmem:[%s2566_s29 + $0xf0] sm:$0xff] %v2176_v34   ;;  %v1086_v38 = vadd.f32 %v2424_v26, %v1085_v36  ;;  %v1166_v39 = vadd.f32 %v2424_v26, %v1165_v37  ;;  %v928_v40 = vpop.f32.mrf.mxu0  ;;  %v1008_v42 = vpop.f32.mrf.mxu1 }
 0x185   : > { %v929_v49 = vadd.f32 %v2424_v26, %v928_v40  ;;  %v1009_v50 = vadd.f32 %v2424_v26, %v1008_v42 }
 0x186   : > { %v1266_v45 = vmax.f32 %v1086_v38, 0.0  ;;  %v1298_v46 = vmax.f32 %v1166_v39, 0.0 }
 0x187   : > { %v1203_v57 = vmax.f32 %v929_v49, 0.0  ;;  %v1235_v58 = vmax.f32 %v1009_v50, 0.0 }
 0x188   : > { %v2256_v47 = vpack.c.bf16 %v1266_v45, %v1265_v43  ;;  %v2336_v48 = vpack.c.bf16 %v1298_v46, %v1297_v44 }
 0x18a   : > { %2388 = vst [vmem:[%s2566_s29 + $0x170] sm:$0xff] %v2256_v47  }
 0x18b   : > { %2404 = vst [vmem:[%s2566_s29 + $0x1f0] sm:$0xff] %v2336_v48   ;;  %v1088_v51 = vpop.f32.mrf.mxu2  ;;  %v1168_v52 = vpop.f32.mrf.mxu3 }
 0x18c   : > { %v930_v53 = vpop.f32.mrf.mxu0  ;;  %v1010_v54 = vpop.f32.mrf.mxu1  ;;  %v1089_v63 = vadd.f32 %v2424_v26, %v1088_v51  ;;  %v1169_v0 = vadd.f32 %v2424_v26, %v1168_v52 }
 0x18d   : > { %v931_v55 = vadd.f32 %v2424_v26, %v930_v53  ;;  %v1011_v56 = vadd.f32 %v2424_v26, %v1010_v54 }
 0x18e   : > { %v1267_v5 = vmax.f32 %v1089_v63, 0.0  ;;  %v1299_v6 = vmax.f32 %v1169_v0, 0.0 }
 0x18f   : > { %v1204_v59 = vmax.f32 %v931_v55, 0.0  ;;  %v1236_v60 = vmax.f32 %v1011_v56, 0.0 }
 0x191   : > { %v2101_v61 = vpack.c.bf16 %v1204_v59, %v1203_v57  ;;  %v2181_v62 = vpack.c.bf16 %v1236_v60, %v1235_v58 }
 0x193   : > { %2357 = vst [vmem:[%s2566_s29 + $0x78] sm:$0xff] %v2101_v61   ;;  %v1090_v1 = vpop.f32.mrf.mxu2  ;;  %v1170_v2 = vpop.f32.mrf.mxu3 }
 0x194   : > { %2373 = vst [vmem:[%s2566_s29 + $0xf8] sm:$0xff] %v2181_v62   ;;  %v1091_v3 = vadd.f32 %v2424_v26, %v1090_v1  ;;  %v1171_v4 = vadd.f32 %v2424_v26, %v1170_v2 }
 0x196   : > { %v1268_v7 = vmax.f32 %v1091_v3, 0.0  ;;  %v1300_v8 = vmax.f32 %v1171_v4, 0.0 }
 0x198   : > { %v2261_v9 = vpack.c.bf16 %v1268_v7, %v1267_v5  ;;  %v2341_v10 = vpack.c.bf16 %v1300_v8, %v1299_v6 }
 0x19a   : > { %2389 = vst [vmem:[%s2566_s29 + $0x178] sm:$0xff] %v2261_v9  }
 0x19b   : > { %2405 = vst [vmem:[%s2566_s29 + $0x1f8] sm:$0xff] %v2341_v10  }
 0x19c PF: > { %s13_s12 = sadd.s32 1, %s2431_s12  }
 0x19d   : > { %p10_p4 = scmp.ge.s32.totalorder %s13_s12, 9  }
 0x19f   :  { %12 = sbr.rel (!%p10_p4) target bundleno = 1 (0x1), region = 62 }

// kernel: simple_nn_forward.7
= control target key start
LH: loop header
LB: loop body
LE: loop exit
PB: predicated region body
PF: predicated region fallthrough
CT: control target
= control target key end

     0   :  { %s1936_s12 = smov 0   ;;  %s2238_s0 = inlined_call_operand.vmem [shape: bf16[3584,256], index: 0, kind: input, shape index: {}]   ;;  %s2239_s1 = inlined_call_operand.vmem [shape: bf16[256,128], index: 1, kind: input, shape index: {}]   ;;  %s2240_s2 = inlined_call_operand.vmem [shape: f32[1,128], index: 2, kind: input, shape index: {}]   ;;  %s2241_s3 = inlined_call_operand.vmem [shape: bf16[3584,128], index: 3, kind: output, shape index: {}]  }
   0x1 LB: > { %s1279_s13 = sadd.s32 4294967295, %s1914_s12   ;;  %p1283_p0 = scmp.ge.s32.totalorder %s1914_s12, 1  ;;  %s1914_s12 = sphi %s1936_s12, %s13_s12  }
   0x2   : > { %p139_p1 = scmp.lt.s32.totalorder %s1914_s12, 8 }
   0x4   : > { %p140_p2 = pnand %p1283_p0, %p139_p1 }
   0x5   : > { %s1284_s26 = sshll.u32 (!%p140_p2), %s1279_s13, 6 }
   0x6   : > { %143 = sbr.rel (%p140_p2) target bundleno = 432 (0x1b0), region = 32  ;;  %p165_p3 = scmp.lt.s32.totalorder (!%p140_p2), %s1284_s26, 447 }
   0xb   : > { %v1683_v0 = vld [vmem:[%s2239_s1 + $0x38] sm:$0xff]  ;;  %v1682_v2 = vld [vmem:[%s2239_s1 + $0x30] sm:$0xff]  ;;  %v1681_v4 = vld [vmem:[%s2239_s1 + $0x28] sm:$0xff]  ;;  %s2243_s26 = smov (!%p165_p3, %s1284_s26), 447 }
   0xc   : > { %v1691_v1 = vld [vmem:[%s2239_s1 + $0x78] sm:$0xff]  ;;  %693 = vmatpush.bf16.msra.mxu0 %v1683_v0  ;;  %1883 = vmatpush.bf16.msra.mxu2 %v1683_v0  ;;  %v1690_v3 = vld [vmem:[%s2239_s1 + $0x70] sm:$0xff]  ;;  %v1689_v5 = vld [vmem:[%s2239_s1 + $0x68] sm:$0xff]  ;;  %s1611_s13 = sshll.u32 %s2243_s26, 3  ;;  %s1288_s28 = sshll.u32 %s2243_s26, 2 }
   0xd   : > { %862 = vmatpush.bf16.msra.mxu1 %v1691_v1  ;;  %1891 = vmatpush.bf16.msra.mxu3 %v1691_v1  ;;  %v1680_v6 = vld [vmem:[%s2239_s1 + $0x20] sm:$0xff]  ;;  %v1679_v8 = vld [vmem:[%s2239_s1 + $0x18] sm:$0xff]  ;;  %v1678_v10 = vld [vmem:[%s2239_s1 + $0x10] sm:$0xff]  ;;  %s1989_s18 = scalar_lea.vmem %s2238_s0, %s1611_s13  ;;  %s2092_s4 = scalar_lea.vmem %s2241_s3, %s1288_s28 }
   0xe   : > { %v1688_v7 = vld [vmem:[%s2239_s1 + $0x60] sm:$0xff]  ;;  %v1687_v9 = vld [vmem:[%s2239_s1 + $0x58] sm:$0xff]  ;;  %v1686_v11 = vld [vmem:[%s2239_s1 + $0x50] sm:$0xff] }
   0xf   : > { %v1677_v12 = vld [vmem:[%s2239_s1 + $0x8] sm:$0xff]  ;;  %v1676_v14 = vld [vmem:[%s2239_s1] sm:$0xff]  ;;  %v1299_v28 = vld [vmem:[%s1989_s18 + $0x10] sm:$0xf] }
  0x10   : > { %694 = vmatpush.bf16.msra.mxu0 %v1682_v2  ;;  %1884 = vmatpush.bf16.msra.mxu2 %v1682_v2  ;;  %v1685_v13 = vld [vmem:[%s2239_s1 + $0x48] sm:$0xff]  ;;  %v1684_v15 = vld [vmem:[%s2239_s1 + $0x40] sm:$0xff]  ;;  %v1615_v29 = vld [vmem:[%s1989_s18 + $0x14] sm:$0xf0] }
  0x11   : > { %863 = vmatpush.bf16.msra.mxu1 %v1690_v3  ;;  %1892 = vmatpush.bf16.msra.mxu3 %v1690_v3  ;;  %v1291_v16 = vld [vmem:[%s1989_s18] sm:$0xf]  ;;  %v1613_v17 = vld [vmem:[%s1989_s18 + $0x4] sm:$0xf0]  ;;  %v1612_v20 = vld [vmem:[%s1989_s18 + $0x4] sm:$0xf]  ;;  %v1300_v36 = vor.u32 %v1615_v29, %v1299_v28 }
  0x12   : > { %v1419_v18 = vld [vmem:[%s1989_s18 + $0x100] sm:$0xf]  ;;  %v1645_v19 = vld [vmem:[%s1989_s18 + $0x104] sm:$0xf0]  ;;  %v1293_v21 = vld [vmem:[%s1989_s18 + $0x8] sm:$0xf0]  ;;  %v1292_v24 = vor.u32 %v1613_v17, %v1291_v16 }
  0x13   : > { %v1644_v22 = vld [vmem:[%s1989_s18 + $0x104] sm:$0xf]  ;;  %v1421_v23 = vld [vmem:[%s1989_s18 + $0x108] sm:$0xf0]  ;;  %v1420_v25 = vor.u32 %v1645_v19, %v1419_v18  ;;  %v1296_v26 = vor.u32 %v1612_v20, %v1293_v21  ;;  %v1427_v30 = vld [vmem:[%s1989_s18 + $0x110] sm:$0xf] }
  0x14   : > { %695 = vmatpush.bf16.msra.mxu0 %v1681_v4  ;;  %1885 = vmatpush.bf16.msra.mxu2 %v1681_v4  ;;  %v1424_v27 = vor.u32 %v1644_v22, %v1421_v23  ;;  %v1647_v31 = vld [vmem:[%s1989_s18 + $0x114] sm:$0xf0]  ;;  %v1614_v32 = vld [vmem:[%s1989_s18 + $0x14] sm:$0xf]  ;;  %v1301_v33 = vld [vmem:[%s1989_s18 + $0x18] sm:$0xf0] }
  0x15   : > { %864 = vmatpush.bf16.msra.mxu1 %v1689_v5  ;;  %1893 = vmatpush.bf16.msra.mxu3 %v1689_v5  ;;  %v1646_v34 = vld [vmem:[%s1989_s18 + $0x114] sm:$0xf]  ;;  %v1429_v35 = vld [vmem:[%s1989_s18 + $0x118] sm:$0xf0]  ;;  %v1428_v37 = vor.u32 %v1647_v31, %v1427_v30  ;;  %v1304_v38 = vor.u32 %v1614_v32, %v1301_v33  ;;  %v1307_v40 = vld [vmem:[%s1989_s18 + $0x20] sm:$0xf] }
  0x16   : > { %v1432_v39 = vor.u32 %v1646_v34, %v1429_v35  ;;  %v1617_v41 = vld [vmem:[%s1989_s18 + $0x24] sm:$0xf0]  ;;  %v1435_v42 = vld [vmem:[%s1989_s18 + $0x120] sm:$0xf]  ;;  %v1616_v44 = vld [vmem:[%s1989_s18 + $0x24] sm:$0xf] }
  0x17   : > { %v1649_v43 = vld [vmem:[%s1989_s18 + $0x124] sm:$0xf0]  ;;  %v1309_v45 = vld [vmem:[%s1989_s18 + $0x28] sm:$0xf0]  ;;  %v1648_v46 = vld [vmem:[%s1989_s18 + $0x124] sm:$0xf]  ;;  %v1308_v48 = vor.u32 %v1617_v41, %v1307_v40 }
  0x18   : > { %696 = vmatpush.bf16.msra.mxu0 %v1680_v6  ;;  %1886 = vmatpush.bf16.msra.mxu2 %v1680_v6  ;;  %v1437_v47 = vld [vmem:[%s1989_s18 + $0x128] sm:$0xf0]  ;;  %v1436_v49 = vor.u32 %v1649_v43, %v1435_v42  ;;  %v1312_v50 = vor.u32 %v1616_v44, %v1309_v45  ;;  %v1315_v52 = vld [vmem:[%s1989_s18 + $0x30] sm:$0xf]  ;;  %v1619_v53 = vld [vmem:[%s1989_s18 + $0x34] sm:$0xf0] }
  0x19   : > { %865 = vmatpush.bf16.msra.mxu1 %v1688_v7  ;;  %1894 = vmatpush.bf16.msra.mxu3 %v1688_v7  ;;  %v1440_v51 = vor.u32 %v1648_v46, %v1437_v47  ;;  %v1443_v54 = vld [vmem:[%s1989_s18 + $0x130] sm:$0xf]  ;;  %v1651_v55 = vld [vmem:[%s1989_s18 + $0x134] sm:$0xf0]  ;;  %v1618_v56 = vld [vmem:[%s1989_s18 + $0x34] sm:$0xf]  ;;  %v1316_v60 = vor.u32 %v1619_v53, %v1315_v52 }
  0x1a   : > { %v1317_v57 = vld [vmem:[%s1989_s18 + $0x38] sm:$0xf0]  ;;  %v1650_v58 = vld [vmem:[%s1989_s18 + $0x134] sm:$0xf]  ;;  %v1444_v61 = vor.u32 %v1651_v55, %v1443_v54  ;;  %v1323_v0 = vld [vmem:[%s1989_s18 + $0x40] sm:$0xf] }
  0x1b   : > { %v1445_v59 = vld [vmem:[%s1989_s18 + $0x138] sm:$0xf0]  ;;  %v1320_v62 = vor.u32 %v1618_v56, %v1317_v57  ;;  %v1621_v1 = vld [vmem:[%s1989_s18 + $0x44] sm:$0xf0]  ;;  %v1451_v2 = vld [vmem:[%s1989_s18 + $0x140] sm:$0xf] }
  0x1c   : > { %697 = vmatpush.bf16.msra.mxu0 %v1679_v8  ;;  %1887 = vmatpush.bf16.msra.mxu2 %v1679_v8  ;;  %v1448_v63 = vor.u32 %v1650_v58, %v1445_v59  ;;  %v1653_v3 = vld [vmem:[%s1989_s18 + $0x144] sm:$0xf0]  ;;  %v1620_v4 = vld [vmem:[%s1989_s18 + $0x44] sm:$0xf]  ;;  %v1325_v5 = vld [vmem:[%s1989_s18 + $0x48] sm:$0xf0]  ;;  %v1324_v8 = vor.u32 %v1621_v1, %v1323_v0 }
  0x1d   : > { %866 = vmatpush.bf16.msra.mxu1 %v1687_v9  ;;  %1895 = vmatpush.bf16.msra.mxu3 %v1687_v9  ;;  %v1652_v6 = vld [vmem:[%s1989_s18 + $0x144] sm:$0xf]  ;;  %v1453_v7 = vld [vmem:[%s1989_s18 + $0x148] sm:$0xf0]  ;;  %v1452_v9 = vor.u32 %v1653_v3, %v1451_v2  ;;  %v1622_v16 = vld [vmem:[%s1989_s18 + $0x54] sm:$0xf] }
  0x1e   : > { %v1333_v17 = vld [vmem:[%s1989_s18 + $0x58] sm:$0xf0]  ;;  %v1654_v18 = vld [vmem:[%s1989_s18 + $0x154] sm:$0xf]  ;;  %v1624_v28 = vld [vmem:[%s1989_s18 + $0x64] sm:$0xf] }
  0x1f   : > { %v1461_v19 = vld [vmem:[%s1989_s18 + $0x158] sm:$0xf0]  ;;  %v1336_v22 = vor.u32 %v1622_v16, %v1333_v17  ;;  %v1341_v29 = vld [vmem:[%s1989_s18 + $0x68] sm:$0xf0]  ;;  %v1656_v30 = vld [vmem:[%s1989_s18 + $0x164] sm:$0xf] }
  0x20   : > { %698 = vmatpush.bf16.msra.mxu0 %v1678_v10  ;;  %1888 = vmatpush.bf16.msra.mxu2 %v1678_v10  ;;  %v1328_v10 = vor.u32 %v1620_v4, %v1325_v5  ;;  %v1464_v23 = vor.u32 %v1654_v18, %v1461_v19  ;;  %v1469_v31 = vld [vmem:[%s1989_s18 + $0x168] sm:$0xf0]  ;;  %v1344_v34 = vor.u32 %v1624_v28, %v1341_v29  ;;  %v1626_v40 = vld [vmem:[%s1989_s18 + $0x74] sm:$0xf]  ;;  %v1349_v41 = vld [vmem:[%s1989_s18 + $0x78] sm:$0xf0] }
  0x21   : > { %867 = vmatpush.bf16.msra.mxu1 %v1686_v11  ;;  %1896 = vmatpush.bf16.msra.mxu3 %v1686_v11  ;;  %v1456_v11 = vor.u32 %v1652_v6, %v1453_v7  ;;  %v1472_v35 = vor.u32 %v1656_v30, %v1469_v31  ;;  %v1658_v42 = vld [vmem:[%s1989_s18 + $0x174] sm:$0xf]  ;;  %v1477_v43 = vld [vmem:[%s1989_s18 + $0x178] sm:$0xf0]  ;;  %v1352_v46 = vor.u32 %v1626_v40, %v1349_v41  ;;  %v1628_v52 = vld [vmem:[%s1989_s18 + $0x84] sm:$0xf] }
  0x22   : > { %v1480_v47 = vor.u32 %v1658_v42, %v1477_v43  ;;  %v1357_v53 = vld [vmem:[%s1989_s18 + $0x88] sm:$0xf0]  ;;  %v1660_v54 = vld [vmem:[%s1989_s18 + $0x184] sm:$0xf]  ;;  %v1662_v16 = vld [vmem:[%s1989_s18 + $0x194] sm:$0xf] }
  0x23   : > { %v1485_v55 = vld [vmem:[%s1989_s18 + $0x188] sm:$0xf0]  ;;  %v1360_v59 = vor.u32 %v1628_v52, %v1357_v53  ;;  %v1493_v17 = vld [vmem:[%s1989_s18 + $0x198] sm:$0xf0]  ;;  %v1371_v42 = vld [vmem:[%s1989_s18 + $0xa0] sm:$0xf] }
  0x24   : > { %699 = vmatpush.bf16.msra.mxu0 %v1677_v12  ;;  %1889 = vmatpush.bf16.msra.mxu2 %v1677_v12  ;;  %v1331_v12 = vld [vmem:[%s1989_s18 + $0x50] sm:$0xf]  ;;  %v1633_v43 = vld [vmem:[%s1989_s18 + $0xa4] sm:$0xf0] }
  0x25   : > { %868 = vmatpush.bf16.msra.mxu1 %v1685_v13  ;;  %1897 = vmatpush.bf16.msra.mxu3 %v1685_v13  ;;  %v1623_v13 = vld [vmem:[%s1989_s18 + $0x54] sm:$0xf0]  ;;  %v1372_v53 = vor.u32 %v1633_v43, %v1371_v42 }
  0x26   : > { %v1332_v20 = vor.u32 %v1623_v13, %v1331_v12  ;;  %v1630_v12 = vld [vmem:[%s1989_s18 + $0x94] sm:$0xf]  ;;  %v1365_v13 = vld [vmem:[%s1989_s18 + $0x98] sm:$0xf0] }
  0x28   : > { %700 = vmatpush.bf16.msra.mxu0 %v1676_v14  ;;  %1890 = vmatpush.bf16.msra.mxu2 %v1676_v14  ;;  %v1459_v14 = vld [vmem:[%s1989_s18 + $0x150] sm:$0xf] }
  0x29   : > { %869 = vmatpush.bf16.msra.mxu1 %v1684_v15  ;;  %1898 = vmatpush.bf16.msra.mxu3 %v1684_v15  ;;  %v1655_v15 = vld [vmem:[%s1989_s18 + $0x154] sm:$0xf0] }
  0x2a   : > { %v1460_v21 = vor.u32 %v1655_v15, %v1459_v14 }
  0x2b   : > { %701 = vmatmul.bf16.vlgmr.msra.gmra.mxu0 %v1292_v24  ;;  %781 = vmatmul.bf16.vlgmr.msra.gmra.mxu2 %v1420_v25  ;;  %v1339_v24 = vld [vmem:[%s1989_s18 + $0x60] sm:$0xf]  ;;  %v1625_v25 = vld [vmem:[%s1989_s18 + $0x64] sm:$0xf0] }
  0x2c   : > { %870 = vmatmul.bf16.vlgmr.msra.gmra.mxu1 %v1296_v26  ;;  %950 = vmatmul.bf16.vlgmr.msra.gmra.mxu3 %v1424_v27  ;;  %v1467_v26 = vld [vmem:[%s1989_s18 + $0x160] sm:$0xf]  ;;  %v1657_v27 = vld [vmem:[%s1989_s18 + $0x164] sm:$0xf0]  ;;  %v1340_v32 = vor.u32 %v1625_v25, %v1339_v24 }
  0x2d   : > { %v1468_v33 = vor.u32 %v1657_v27, %v1467_v26  ;;  %v1368_v26 = vor.u32 %v1630_v12, %v1365_v13  ;;  %v1496_v27 = vor.u32 %v1662_v16, %v1493_v17  ;;  %v1379_v13 = vld [vmem:[%s1989_s18 + $0xb0] sm:$0xf]  ;;  %v1667_v16 = vld [vmem:[%s1989_s18 + $0x1b4] sm:$0xf0]  ;;  %v1634_v17 = vld [vmem:[%s1989_s18 + $0xb4] sm:$0xf] }
  0x3b   : > { %706 = vmatmul.bf16.gmra.mxu0 %v1300_v36  ;;  %786 = vmatmul.bf16.gmra.mxu2 %v1428_v37  ;;  %v1347_v36 = vld [vmem:[%s1989_s18 + $0x70] sm:$0xf]  ;;  %v1627_v37 = vld [vmem:[%s1989_s18 + $0x74] sm:$0xf0] }
  0x3c   : > { %875 = vmatmul.bf16.gmra.mxu1 %v1304_v38  ;;  %955 = vmatmul.bf16.gmra.mxu3 %v1432_v39  ;;  %v1475_v38 = vld [vmem:[%s1989_s18 + $0x170] sm:$0xf]  ;;  %v1659_v39 = vld [vmem:[%s1989_s18 + $0x174] sm:$0xf0]  ;;  %v1348_v44 = vor.u32 %v1627_v37, %v1347_v36 }
  0x3d   : > { %v1476_v45 = vor.u32 %v1659_v39, %v1475_v38 }
  0x4b   : > { %711 = vmatmul.bf16.gmra.mxu0 %v1308_v48  ;;  %791 = vmatmul.bf16.gmra.mxu2 %v1436_v49  ;;  %v1355_v48 = vld [vmem:[%s1989_s18 + $0x80] sm:$0xf]  ;;  %v1629_v49 = vld [vmem:[%s1989_s18 + $0x84] sm:$0xf0] }
  0x4c   : > { %880 = vmatmul.bf16.gmra.mxu1 %v1312_v50  ;;  %960 = vmatmul.bf16.gmra.mxu3 %v1440_v51  ;;  %v1483_v50 = vld [vmem:[%s1989_s18 + $0x180] sm:$0xf]  ;;  %v1661_v51 = vld [vmem:[%s1989_s18 + $0x184] sm:$0xf0]  ;;  %v1356_v56 = vor.u32 %v1629_v49, %v1355_v48 }
  0x4d   : > { %v1484_v57 = vor.u32 %v1661_v51, %v1483_v50  ;;  %v1664_v50 = vld [vmem:[%s1989_s18 + $0x1a4] sm:$0xf]  ;;  %v1501_v51 = vld [vmem:[%s1989_s18 + $0x1a8] sm:$0xf0] }
  0x5b   : > { %716 = vmatmul.bf16.gmra.mxu0 %v1316_v60  ;;  %796 = vmatmul.bf16.gmra.mxu2 %v1444_v61  ;;  %v1488_v60 = vor.u32 %v1660_v54, %v1485_v55  ;;  %v2075_v61 = vld [vmem:[%s2240_s2] ss:$0 sm:$0xff] }
  0x5c   : > { %885 = vmatmul.bf16.gmra.mxu1 %v1320_v62  ;;  %965 = vmatmul.bf16.gmra.mxu3 %v1448_v63 }
  0x6b   : > { %721 = vmatmul.bf16.gmra.mxu0 %v1324_v8  ;;  %801 = vmatmul.bf16.gmra.mxu2 %v1452_v9  ;;  %v1363_v8 = vld [vmem:[%s1989_s18 + $0x90] sm:$0xf]  ;;  %v1631_v9 = vld [vmem:[%s1989_s18 + $0x94] sm:$0xf0] }
  0x6c   : > { %890 = vmatmul.bf16.gmra.mxu1 %v1328_v10  ;;  %970 = vmatmul.bf16.gmra.mxu3 %v1456_v11  ;;  %v1491_v10 = vld [vmem:[%s1989_s18 + $0x190] sm:$0xf]  ;;  %v1663_v11 = vld [vmem:[%s1989_s18 + $0x194] sm:$0xf0]  ;;  %v1364_v19 = vor.u32 %v1631_v9, %v1363_v8 }
  0x6d   : > { %v1492_v24 = vor.u32 %v1663_v11, %v1491_v10 }
  0x7b   : > { %726 = vmatmul.bf16.gmra.mxu0 %v1332_v20  ;;  %806 = vmatmul.bf16.gmra.mxu2 %v1460_v21 }
  0x7c   : > { %895 = vmatmul.bf16.gmra.mxu1 %v1336_v22  ;;  %975 = vmatmul.bf16.gmra.mxu3 %v1464_v23 }
  0x8b   : > { %731 = vmatmul.bf16.gmra.mxu0 %v1340_v32  ;;  %811 = vmatmul.bf16.gmra.mxu2 %v1468_v33 }
  0x8c   : > { %900 = vmatmul.bf16.gmra.mxu1 %v1344_v34  ;;  %980 = vmatmul.bf16.gmra.mxu3 %v1472_v35 }
  0x9b   : > { %736 = vmatmul.bf16.gmra.mxu0 %v1348_v44  ;;  %816 = vmatmul.bf16.gmra.mxu2 %v1476_v45  ;;  %v1499_v44 = vld [vmem:[%s1989_s18 + $0x1a0] sm:$0xf]  ;;  %v1665_v45 = vld [vmem:[%s1989_s18 + $0x1a4] sm:$0xf0] }
  0x9c   : > { %905 = vmatmul.bf16.gmra.mxu1 %v1352_v46  ;;  %985 = vmatmul.bf16.gmra.mxu3 %v1480_v47  ;;  %v1632_v46 = vld [vmem:[%s1989_s18 + $0xa4] sm:$0xf]  ;;  %v1373_v47 = vld [vmem:[%s1989_s18 + $0xa8] sm:$0xf0] }
  0xa8   : > { %v702_v58 = vpop.f32.mrf.mxu0 }
  0xa9   : > { %v871_v62 = vpop.f32.mrf.mxu1  ;;  %v703_v63 = vadd.f32 %v2075_v61, %v702_v58  ;;  %v1500_v58 = vor.u32 %v1665_v45, %v1499_v44 }
  0xab   : > { %741 = vmatmul.bf16.gmra.mxu0 %v1356_v56  ;;  %821 = vmatmul.bf16.gmra.mxu2 %v1484_v57  ;;  %v872_v3 = vadd.f32 %v871_v62, %v703_v63  ;;  %v1504_v62 = vor.u32 %v1664_v50, %v1501_v51  ;;  %v1669_v50 = vld [vmem:[%s1989_s18 + $0x1c4] sm:$0xf0]  ;;  %v1636_v51 = vld [vmem:[%s1989_s18 + $0xc4] sm:$0xf] }
  0xac   : > { %910 = vmatmul.bf16.gmra.mxu1 %v1360_v59  ;;  %990 = vmatmul.bf16.gmra.mxu3 %v1488_v60  ;;  %v1376_v60 = vor.u32 %v1632_v46, %v1373_v47  ;;  %v1387_v47 = vld [vmem:[%s1989_s18 + $0xc0] sm:$0xf] }
  0xad   : > { %v1031_v14 = vmax.f32 %v872_v3, 0.0 }
  0xae   : > { %v782_v0 = vpop.f32.mrf.mxu2 }
  0xaf   : > { %v951_v1 = vpop.f32.mrf.mxu3  ;;  %v783_v6 = vadd.f32 %v2075_v61, %v782_v0 }
  0xb0   : > { %v704_v2 = vpop.f32.mrf.mxu0 }
  0xb1   : > { %v705_v4 = vadd.f32 %v2075_v61, %v704_v2  ;;  %v873_v5 = vpop.f32.mrf.mxu1  ;;  %v952_v20 = vadd.f32 %v951_v1, %v783_v6 }
  0xb3   : > { %v874_v7 = vadd.f32 %v873_v5, %v705_v4  ;;  %v1063_v30 = vmax.f32 %v952_v20, 0.0 }
  0xb5   : > { %v1032_v15 = vmax.f32 %v874_v7, 0.0 }
  0xb6   : > { %v784_v18 = vpop.f32.mrf.mxu2 }
  0xb7   : > { %v1695_v21 = vpack.c.bf16 %v1032_v15, %v1031_v14  ;;  %v785_v22 = vadd.f32 %v2075_v61, %v784_v18  ;;  %v953_v23 = vpop.f32.mrf.mxu3  ;;  %v1635_v14 = vld [vmem:[%s1989_s18 + $0xb4] sm:$0xf0]  ;;  %v1507_v15 = vld [vmem:[%s1989_s18 + $0x1b0] sm:$0xf]  ;;  %v1381_v18 = vld [vmem:[%s1989_s18 + $0xb8] sm:$0xf0] }
  0xb8   : > { %v707_v25 = vpop.f32.mrf.mxu0 }
  0xb9   : > { %1696 = vst [vmem:[%s2092_s4] sm:$0xff] %v1695_v21   ;;  %v954_v28 = vadd.f32 %v953_v23, %v785_v22  ;;  %v876_v29 = vpop.f32.mrf.mxu1  ;;  %v708_v33 = vadd.f32 %v2075_v61, %v707_v25  ;;  %v1666_v21 = vld [vmem:[%s1989_s18 + $0x1b4] sm:$0xf]  ;;  %v1509_v22 = vld [vmem:[%s1989_s18 + $0x1b8] sm:$0xf0] }
  0xbb   : > { %v1064_v31 = vmax.f32 %v954_v28, 0.0  ;;  %746 = vmatmul.bf16.gmra.mxu0 %v1364_v19  ;;  %826 = vmatmul.bf16.gmra.mxu2 %v1492_v24  ;;  %v877_v37 = vadd.f32 %v876_v29, %v708_v33  ;;  %v1380_v24 = vor.u32 %v1635_v14, %v1379_v13  ;;  %v1508_v29 = vor.u32 %v1667_v16, %v1507_v15 }
  0xbc   : > { %915 = vmatmul.bf16.gmra.mxu1 %v1368_v26  ;;  %995 = vmatmul.bf16.gmra.mxu3 %v1496_v27 }
  0xbd   : > { %v1775_v32 = vpack.c.bf16 %v1064_v31, %v1063_v30  ;;  %v1033_v48 = vmax.f32 %v877_v37, 0.0  ;;  %v1384_v31 = vor.u32 %v1634_v17, %v1381_v18  ;;  %v1395_v18 = vld [vmem:[%s1989_s18 + $0xd0] sm:$0xf] }
  0xbe   : > { %v787_v34 = vpop.f32.mrf.mxu2 }
  0xbf   : > { %1867 = vst [vmem:[%s2092_s4 + $0x80] sm:$0xff] %v1775_v32   ;;  %v956_v35 = vpop.f32.mrf.mxu3  ;;  %v788_v40 = vadd.f32 %v2075_v61, %v787_v34  ;;  %v1512_v32 = vor.u32 %v1666_v21, %v1509_v22  ;;  %v1671_v21 = vld [vmem:[%s1989_s18 + $0x1d4] sm:$0xf0]  ;;  %v1638_v22 = vld [vmem:[%s1989_s18 + $0xd4] sm:$0xf] }
  0xc0   : > { %v709_v36 = vpop.f32.mrf.mxu0 }
  0xc1   : > { %v710_v38 = vadd.f32 %v2075_v61, %v709_v36  ;;  %v878_v39 = vpop.f32.mrf.mxu1  ;;  %v957_v54 = vadd.f32 %v956_v35, %v788_v40 }
  0xc3   : > { %v879_v41 = vadd.f32 %v878_v39, %v710_v38  ;;  %v1065_v1 = vmax.f32 %v957_v54, 0.0 }
  0xc5   : > { %v1034_v49 = vmax.f32 %v879_v41, 0.0 }
  0xc6   : > { %v789_v52 = vpop.f32.mrf.mxu2 }
  0xc7   : > { %v1700_v55 = vpack.c.bf16 %v1034_v49, %v1033_v48  ;;  %v790_v56 = vadd.f32 %v2075_v61, %v789_v52  ;;  %v958_v57 = vpop.f32.mrf.mxu3  ;;  %v1637_v48 = vld [vmem:[%s1989_s18 + $0xc4] sm:$0xf0]  ;;  %v1515_v49 = vld [vmem:[%s1989_s18 + $0x1c0] sm:$0xf]  ;;  %v1389_v52 = vld [vmem:[%s1989_s18 + $0xc8] sm:$0xf0] }
  0xc8   : > { %v712_v59 = vpop.f32.mrf.mxu0 }
  0xc9   : > { %1852 = vst [vmem:[%s2092_s4 + $0x8] sm:$0xff] %v1700_v55   ;;  %v959_v63 = vadd.f32 %v958_v57, %v790_v56  ;;  %v881_v0 = vpop.f32.mrf.mxu1  ;;  %v713_v4 = vadd.f32 %v2075_v61, %v712_v59  ;;  %v1668_v55 = vld [vmem:[%s1989_s18 + $0x1c4] sm:$0xf]  ;;  %v1517_v56 = vld [vmem:[%s1989_s18 + $0x1c8] sm:$0xf0] }
  0xcb   : > { %v1066_v2 = vmax.f32 %v959_v63, 0.0  ;;  %751 = vmatmul.bf16.gmra.mxu0 %v1372_v53  ;;  %831 = vmatmul.bf16.gmra.mxu2 %v1500_v58  ;;  %v882_v8 = vadd.f32 %v881_v0, %v713_v4  ;;  %v1388_v58 = vor.u32 %v1637_v48, %v1387_v47  ;;  %v1516_v0 = vor.u32 %v1669_v50, %v1515_v49 }
  0xcc   : > { %920 = vmatmul.bf16.gmra.mxu1 %v1376_v60  ;;  %1000 = vmatmul.bf16.gmra.mxu3 %v1504_v62 }
  0xcd   : > { %v1780_v3 = vpack.c.bf16 %v1066_v2, %v1065_v1  ;;  %v1035_v19 = vmax.f32 %v882_v8, 0.0  ;;  %v1392_v2 = vor.u32 %v1636_v51, %v1389_v52  ;;  %v1403_v52 = vld [vmem:[%s1989_s18 + $0xe0] sm:$0xf] }
  0xce   : > { %v792_v5 = vpop.f32.mrf.mxu2 }
  0xcf   : > { %1868 = vst [vmem:[%s2092_s4 + $0x88] sm:$0xff] %v1780_v3   ;;  %v961_v6 = vpop.f32.mrf.mxu3  ;;  %v793_v11 = vadd.f32 %v2075_v61, %v792_v5  ;;  %v1520_v3 = vor.u32 %v1668_v55, %v1517_v56  ;;  %v1673_v55 = vld [vmem:[%s1989_s18 + $0x1e4] sm:$0xf0]  ;;  %v1640_v56 = vld [vmem:[%s1989_s18 + $0xe4] sm:$0xf] }
  0xd0   : > { %v714_v7 = vpop.f32.mrf.mxu0 }
  0xd1   : > { %v715_v9 = vadd.f32 %v2075_v61, %v714_v7  ;;  %v883_v10 = vpop.f32.mrf.mxu1  ;;  %v962_v25 = vadd.f32 %v961_v6, %v793_v11 }
  0xd3   : > { %v884_v12 = vadd.f32 %v883_v10, %v715_v9  ;;  %v1067_v35 = vmax.f32 %v962_v25, 0.0 }
  0xd5   : > { %v1036_v20 = vmax.f32 %v884_v12, 0.0 }
  0xd6   : > { %v794_v23 = vpop.f32.mrf.mxu2 }
  0xd7   : > { %v1705_v26 = vpack.c.bf16 %v1036_v20, %v1035_v19  ;;  %v795_v27 = vadd.f32 %v2075_v61, %v794_v23  ;;  %v963_v28 = vpop.f32.mrf.mxu3  ;;  %v1639_v19 = vld [vmem:[%s1989_s18 + $0xd4] sm:$0xf0]  ;;  %v1523_v20 = vld [vmem:[%s1989_s18 + $0x1d0] sm:$0xf]  ;;  %v1397_v23 = vld [vmem:[%s1989_s18 + $0xd8] sm:$0xf0] }
  0xd8   : > { %v717_v30 = vpop.f32.mrf.mxu0 }
  0xd9   : > { %1853 = vst [vmem:[%s2092_s4 + $0x10] sm:$0xff] %v1705_v26   ;;  %v964_v33 = vadd.f32 %v963_v28, %v795_v27  ;;  %v886_v34 = vpop.f32.mrf.mxu1  ;;  %v718_v38 = vadd.f32 %v2075_v61, %v717_v30  ;;  %v1670_v26 = vld [vmem:[%s1989_s18 + $0x1d4] sm:$0xf]  ;;  %v1525_v27 = vld [vmem:[%s1989_s18 + $0x1d8] sm:$0xf0] }
  0xdb   : > { %v1068_v36 = vmax.f32 %v964_v33, 0.0  ;;  %756 = vmatmul.bf16.gmra.mxu0 %v1380_v24  ;;  %836 = vmatmul.bf16.gmra.mxu2 %v1508_v29  ;;  %v887_v42 = vadd.f32 %v886_v34, %v718_v38  ;;  %v1396_v29 = vor.u32 %v1639_v19, %v1395_v18  ;;  %v1524_v34 = vor.u32 %v1671_v21, %v1523_v20 }
  0xdc   : > { %925 = vmatmul.bf16.gmra.mxu1 %v1384_v31  ;;  %1005 = vmatmul.bf16.gmra.mxu3 %v1512_v32 }
  0xdd   : > { %v1785_v37 = vpack.c.bf16 %v1068_v36, %v1067_v35  ;;  %v1037_v53 = vmax.f32 %v887_v42, 0.0  ;;  %v1400_v36 = vor.u32 %v1638_v22, %v1397_v23  ;;  %v1411_v23 = vld [vmem:[%s1989_s18 + $0xf0] sm:$0xf] }
  0xde   : > { %v797_v39 = vpop.f32.mrf.mxu2 }
  0xdf   : > { %1869 = vst [vmem:[%s2092_s4 + $0x90] sm:$0xff] %v1785_v37   ;;  %v966_v40 = vpop.f32.mrf.mxu3  ;;  %v798_v45 = vadd.f32 %v2075_v61, %v797_v39  ;;  %v1528_v37 = vor.u32 %v1670_v26, %v1525_v27  ;;  %v1675_v26 = vld [vmem:[%s1989_s18 + $0x1f4] sm:$0xf0]  ;;  %v1642_v27 = vld [vmem:[%s1989_s18 + $0xf4] sm:$0xf] }
  0xe0   : > { %v719_v41 = vpop.f32.mrf.mxu0 }
  0xe1   : > { %v720_v43 = vadd.f32 %v2075_v61, %v719_v41  ;;  %v888_v44 = vpop.f32.mrf.mxu1  ;;  %v967_v59 = vadd.f32 %v966_v40, %v798_v45 }
  0xe3   : > { %v889_v46 = vadd.f32 %v888_v44, %v720_v43  ;;  %v1069_v6 = vmax.f32 %v967_v59, 0.0 }
  0xe5   : > { %v1038_v54 = vmax.f32 %v889_v46, 0.0 }
  0xe6   : > { %v799_v57 = vpop.f32.mrf.mxu2 }
  0xe7   : > { %v1710_v60 = vpack.c.bf16 %v1038_v54, %v1037_v53  ;;  %v800_v62 = vadd.f32 %v2075_v61, %v799_v57  ;;  %v968_v63 = vpop.f32.mrf.mxu3  ;;  %v1641_v53 = vld [vmem:[%s1989_s18 + $0xe4] sm:$0xf0]  ;;  %v1531_v54 = vld [vmem:[%s1989_s18 + $0x1e0] sm:$0xf]  ;;  %v1405_v57 = vld [vmem:[%s1989_s18 + $0xe8] sm:$0xf0] }
  0xe8   : > { %v722_v1 = vpop.f32.mrf.mxu0 }
  0xe9   : > { %1854 = vst [vmem:[%s2092_s4 + $0x18] sm:$0xff] %v1710_v60   ;;  %v969_v4 = vadd.f32 %v968_v63, %v800_v62  ;;  %v891_v5 = vpop.f32.mrf.mxu1  ;;  %v723_v9 = vadd.f32 %v2075_v61, %v722_v1  ;;  %v1672_v60 = vld [vmem:[%s1989_s18 + $0x1e4] sm:$0xf]  ;;  %v1533_v62 = vld [vmem:[%s1989_s18 + $0x1e8] sm:$0xf0] }
  0xeb   : > { %v1070_v7 = vmax.f32 %v969_v4, 0.0  ;;  %761 = vmatmul.bf16.gmra.mxu0 %v1388_v58  ;;  %841 = vmatmul.bf16.gmra.mxu2 %v1516_v0  ;;  %v892_v13 = vadd.f32 %v891_v5, %v723_v9  ;;  %v1404_v0 = vor.u32 %v1641_v53, %v1403_v52  ;;  %v1532_v5 = vor.u32 %v1673_v55, %v1531_v54 }
  0xec   : > { %930 = vmatmul.bf16.gmra.mxu1 %v1392_v2  ;;  %1010 = vmatmul.bf16.gmra.mxu3 %v1520_v3 }
  0xed   : > { %v1790_v8 = vpack.c.bf16 %v1070_v7, %v1069_v6  ;;  %v1039_v24 = vmax.f32 %v892_v13, 0.0  ;;  %v1408_v7 = vor.u32 %v1640_v56, %v1405_v57 }
  0xee   : > { %v802_v10 = vpop.f32.mrf.mxu2 }
  0xef   : > { %1870 = vst [vmem:[%s2092_s4 + $0x98] sm:$0xff] %v1790_v8   ;;  %v971_v11 = vpop.f32.mrf.mxu3  ;;  %v803_v16 = vadd.f32 %v2075_v61, %v802_v10  ;;  %v1536_v8 = vor.u32 %v1672_v60, %v1533_v62 }
  0xf0   : > { %v724_v12 = vpop.f32.mrf.mxu0 }
  0xf1   : > { %v725_v14 = vadd.f32 %v2075_v61, %v724_v12  ;;  %v893_v15 = vpop.f32.mrf.mxu1  ;;  %v972_v30 = vadd.f32 %v971_v11, %v803_v16 }
  0xf3   : > { %v894_v17 = vadd.f32 %v893_v15, %v725_v14  ;;  %v1071_v40 = vmax.f32 %v972_v30, 0.0 }
  0xf5   : > { %v1040_v25 = vmax.f32 %v894_v17, 0.0 }
  0xf6   : > { %v804_v28 = vpop.f32.mrf.mxu2 }
  0xf7   : > { %v1715_v31 = vpack.c.bf16 %v1040_v25, %v1039_v24  ;;  %v805_v32 = vadd.f32 %v2075_v61, %v804_v28  ;;  %v973_v33 = vpop.f32.mrf.mxu3  ;;  %v1643_v24 = vld [vmem:[%s1989_s18 + $0xf4] sm:$0xf0]  ;;  %v1539_v25 = vld [vmem:[%s1989_s18 + $0x1f0] sm:$0xf]  ;;  %v1413_v28 = vld [vmem:[%s1989_s18 + $0xf8] sm:$0xf0] }
  0xf8   : > { %v727_v35 = vpop.f32.mrf.mxu0 }
  0xf9   : > { %1855 = vst [vmem:[%s2092_s4 + $0x20] sm:$0xff] %v1715_v31   ;;  %v974_v38 = vadd.f32 %v973_v33, %v805_v32  ;;  %v896_v39 = vpop.f32.mrf.mxu1  ;;  %v728_v43 = vadd.f32 %v2075_v61, %v727_v35  ;;  %v1674_v31 = vld [vmem:[%s1989_s18 + $0x1f4] sm:$0xf]  ;;  %v1541_v32 = vld [vmem:[%s1989_s18 + $0x1f8] sm:$0xf0] }
  0xfb   : > { %v1072_v41 = vmax.f32 %v974_v38, 0.0  ;;  %766 = vmatmul.bf16.gmra.mxu0 %v1396_v29  ;;  %846 = vmatmul.bf16.gmra.mxu2 %v1524_v34  ;;  %v897_v47 = vadd.f32 %v896_v39, %v728_v43  ;;  %v1412_v34 = vor.u32 %v1643_v24, %v1411_v23  ;;  %v1540_v39 = vor.u32 %v1675_v26, %v1539_v25 }
  0xfc   : > { %935 = vmatmul.bf16.gmra.mxu1 %v1400_v36  ;;  %1015 = vmatmul.bf16.gmra.mxu3 %v1528_v37 }
  0xfd   : > { %v1795_v42 = vpack.c.bf16 %v1072_v41, %v1071_v40  ;;  %v1041_v58 = vmax.f32 %v897_v47, 0.0  ;;  %v1416_v41 = vor.u32 %v1642_v27, %v1413_v28 }
  0xfe   : > { %v807_v44 = vpop.f32.mrf.mxu2 }
  0xff   : > { %1871 = vst [vmem:[%s2092_s4 + $0xa0] sm:$0xff] %v1795_v42   ;;  %v976_v45 = vpop.f32.mrf.mxu3  ;;  %v808_v50 = vadd.f32 %v2075_v61, %v807_v44  ;;  %v1544_v42 = vor.u32 %v1674_v31, %v1541_v32 }
 0x100   : > { %v729_v46 = vpop.f32.mrf.mxu0 }
 0x101   : > { %v730_v48 = vadd.f32 %v2075_v61, %v729_v46  ;;  %v898_v49 = vpop.f32.mrf.mxu1  ;;  %v977_v1 = vadd.f32 %v976_v45, %v808_v50 }
 0x103   : > { %v899_v51 = vadd.f32 %v898_v49, %v730_v48  ;;  %v1073_v11 = vmax.f32 %v977_v1, 0.0 }
 0x105   : > { %v1042_v59 = vmax.f32 %v899_v51, 0.0 }
 0x106   : > { %v809_v63 = vpop.f32.mrf.mxu2 }
 0x107   : > { %v1720_v2 = vpack.c.bf16 %v1042_v59, %v1041_v58  ;;  %v810_v3 = vadd.f32 %v2075_v61, %v809_v63  ;;  %v978_v4 = vpop.f32.mrf.mxu3 }
 0x108   : > { %v732_v6 = vpop.f32.mrf.mxu0 }
 0x109   : > { %1856 = vst [vmem:[%s2092_s4 + $0x28] sm:$0xff] %v1720_v2   ;;  %v979_v9 = vadd.f32 %v978_v4, %v810_v3  ;;  %v901_v10 = vpop.f32.mrf.mxu1  ;;  %v733_v14 = vadd.f32 %v2075_v61, %v732_v6 }
 0x10b   : > { %v1074_v12 = vmax.f32 %v979_v9, 0.0  ;;  %771 = vmatmul.bf16.gmra.mxu0 %v1404_v0  ;;  %851 = vmatmul.bf16.gmra.mxu2 %v1532_v5  ;;  %v902_v18 = vadd.f32 %v901_v10, %v733_v14 }
 0x10c   : > { %940 = vmatmul.bf16.gmra.mxu1 %v1408_v7  ;;  %1020 = vmatmul.bf16.gmra.mxu3 %v1536_v8 }
 0x10d   : > { %v1800_v13 = vpack.c.bf16 %v1074_v12, %v1073_v11  ;;  %v1043_v29 = vmax.f32 %v902_v18, 0.0 }
 0x10e   : > { %v812_v15 = vpop.f32.mrf.mxu2 }
 0x10f   : > { %1872 = vst [vmem:[%s2092_s4 + $0xa8] sm:$0xff] %v1800_v13   ;;  %v981_v16 = vpop.f32.mrf.mxu3  ;;  %v813_v21 = vadd.f32 %v2075_v61, %v812_v15 }
 0x110   : > { %v734_v17 = vpop.f32.mrf.mxu0 }
 0x111   : > { %v735_v19 = vadd.f32 %v2075_v61, %v734_v17  ;;  %v903_v20 = vpop.f32.mrf.mxu1  ;;  %v982_v35 = vadd.f32 %v981_v16, %v813_v21 }
 0x113   : > { %v904_v22 = vadd.f32 %v903_v20, %v735_v19  ;;  %v1075_v45 = vmax.f32 %v982_v35, 0.0 }
 0x115   : > { %v1044_v30 = vmax.f32 %v904_v22, 0.0 }
 0x116   : > { %v814_v33 = vpop.f32.mrf.mxu2 }
 0x117   : > { %v1725_v36 = vpack.c.bf16 %v1044_v30, %v1043_v29  ;;  %v815_v37 = vadd.f32 %v2075_v61, %v814_v33  ;;  %v983_v38 = vpop.f32.mrf.mxu3 }
 0x118   : > { %v737_v40 = vpop.f32.mrf.mxu0 }
 0x119   : > { %1857 = vst [vmem:[%s2092_s4 + $0x30] sm:$0xff] %v1725_v36   ;;  %v984_v43 = vadd.f32 %v983_v38, %v815_v37  ;;  %v906_v44 = vpop.f32.mrf.mxu1  ;;  %v738_v48 = vadd.f32 %v2075_v61, %v737_v40 }
 0x11b   : > { %v1076_v46 = vmax.f32 %v984_v43, 0.0  ;;  %776 = vmatmul.bf16.gmra.mxu0 %v1412_v34  ;;  %856 = vmatmul.bf16.gmra.mxu2 %v1540_v39  ;;  %v907_v52 = vadd.f32 %v906_v44, %v738_v48 }
 0x11c   : > { %945 = vmatmul.bf16.gmra.mxu1 %v1416_v41  ;;  %1025 = vmatmul.bf16.gmra.mxu3 %v1544_v42 }
 0x11d   : > { %v1805_v47 = vpack.c.bf16 %v1076_v46, %v1075_v45  ;;  %v1045_v57 = vmax.f32 %v907_v52, 0.0 }
 0x11e   : > { %v817_v49 = vpop.f32.mrf.mxu2 }
 0x11f   : > { %1873 = vst [vmem:[%s2092_s4 + $0xb0] sm:$0xff] %v1805_v47   ;;  %v986_v50 = vpop.f32.mrf.mxu3  ;;  %v818_v55 = vadd.f32 %v2075_v61, %v817_v49 }
 0x120   : > { %v739_v51 = vpop.f32.mrf.mxu0 }
 0x121   : > { %v740_v53 = vadd.f32 %v2075_v61, %v739_v51  ;;  %v908_v54 = vpop.f32.mrf.mxu1  ;;  %v987_v60 = vadd.f32 %v986_v50, %v818_v55 }
 0x123   : > { %v909_v56 = vadd.f32 %v908_v54, %v740_v53  ;;  %v1077_v4 = vmax.f32 %v987_v60, 0.0 }
 0x125   : > { %v1046_v58 = vmax.f32 %v909_v56, 0.0 }
 0x126   : > { %v819_v59 = vpop.f32.mrf.mxu2 }
 0x127   : > { %v1730_v62 = vpack.c.bf16 %v1046_v58, %v1045_v57  ;;  %v820_v63 = vadd.f32 %v2075_v61, %v819_v59  ;;  %v988_v0 = vpop.f32.mrf.mxu3 }
 0x128   : > { %v742_v1 = vpop.f32.mrf.mxu0 }
 0x129   : > { %1858 = vst [vmem:[%s2092_s4 + $0x38] sm:$0xff] %v1730_v62   ;;  %v989_v2 = vadd.f32 %v988_v0, %v820_v63  ;;  %v911_v3 = vpop.f32.mrf.mxu1  ;;  %v743_v7 = vadd.f32 %v2075_v61, %v742_v1 }
 0x12b   : > { %v1078_v5 = vmax.f32 %v989_v2, 0.0  ;;  %v912_v11 = vadd.f32 %v911_v3, %v743_v7 }
 0x12d   : > { %v1810_v6 = vpack.c.bf16 %v1078_v5, %v1077_v4  ;;  %v1047_v16 = vmax.f32 %v912_v11, 0.0 }
 0x12e   : > { %v822_v8 = vpop.f32.mrf.mxu2 }
 0x12f   : > { %1874 = vst [vmem:[%s2092_s4 + $0xb8] sm:$0xff] %v1810_v6   ;;  %v991_v9 = vpop.f32.mrf.mxu3  ;;  %v823_v14 = vadd.f32 %v2075_v61, %v822_v8 }
 0x130   : > { %v744_v10 = vpop.f32.mrf.mxu0 }
 0x131   : > { %v745_v12 = vadd.f32 %v2075_v61, %v744_v10  ;;  %v913_v13 = vpop.f32.mrf.mxu1  ;;  %v992_v19 = vadd.f32 %v991_v9, %v823_v14 }
 0x133   : > { %v914_v15 = vadd.f32 %v913_v13, %v745_v12  ;;  %v1079_v26 = vmax.f32 %v992_v19, 0.0 }
 0x135   : > { %v1048_v17 = vmax.f32 %v914_v15, 0.0 }
 0x136   : > { %v824_v18 = vpop.f32.mrf.mxu2 }
 0x137   : > { %v1735_v20 = vpack.c.bf16 %v1048_v17, %v1047_v16  ;;  %v825_v21 = vadd.f32 %v2075_v61, %v824_v18  ;;  %v993_v22 = vpop.f32.mrf.mxu3 }
 0x138   : > { %v747_v23 = vpop.f32.mrf.mxu0 }
 0x139   : > { %1859 = vst [vmem:[%s2092_s4 + $0x40] sm:$0xff] %v1735_v20   ;;  %v994_v24 = vadd.f32 %v993_v22, %v825_v21  ;;  %v916_v25 = vpop.f32.mrf.mxu1  ;;  %v748_v29 = vadd.f32 %v2075_v61, %v747_v23 }
 0x13b   : > { %v1080_v27 = vmax.f32 %v994_v24, 0.0  ;;  %v917_v33 = vadd.f32 %v916_v25, %v748_v29 }
 0x13d   : > { %v1815_v28 = vpack.c.bf16 %v1080_v27, %v1079_v26  ;;  %v1049_v38 = vmax.f32 %v917_v33, 0.0 }
 0x13e   : > { %v827_v30 = vpop.f32.mrf.mxu2 }
 0x13f   : > { %1875 = vst [vmem:[%s2092_s4 + $0xc0] sm:$0xff] %v1815_v28   ;;  %v996_v31 = vpop.f32.mrf.mxu3  ;;  %v828_v36 = vadd.f32 %v2075_v61, %v827_v30 }
 0x140   : > { %v749_v32 = vpop.f32.mrf.mxu0 }
 0x141   : > { %v750_v34 = vadd.f32 %v2075_v61, %v749_v32  ;;  %v918_v35 = vpop.f32.mrf.mxu1  ;;  %v997_v41 = vadd.f32 %v996_v31, %v828_v36 }
 0x143   : > { %v919_v37 = vadd.f32 %v918_v35, %v750_v34  ;;  %v1081_v48 = vmax.f32 %v997_v41, 0.0 }
 0x145   : > { %v1050_v39 = vmax.f32 %v919_v37, 0.0 }
 0x146   : > { %v829_v40 = vpop.f32.mrf.mxu2 }
 0x147   : > { %v1740_v42 = vpack.c.bf16 %v1050_v39, %v1049_v38  ;;  %v830_v43 = vadd.f32 %v2075_v61, %v829_v40  ;;  %v998_v44 = vpop.f32.mrf.mxu3 }
 0x148   : > { %v752_v45 = vpop.f32.mrf.mxu0 }
 0x149   : > { %1860 = vst [vmem:[%s2092_s4 + $0x48] sm:$0xff] %v1740_v42   ;;  %v999_v46 = vadd.f32 %v998_v44, %v830_v43  ;;  %v921_v47 = vpop.f32.mrf.mxu1  ;;  %v753_v51 = vadd.f32 %v2075_v61, %v752_v45 }
 0x14b   : > { %v1082_v49 = vmax.f32 %v999_v46, 0.0  ;;  %v922_v55 = vadd.f32 %v921_v47, %v753_v51 }
 0x14d   : > { %v1820_v50 = vpack.c.bf16 %v1082_v49, %v1081_v48  ;;  %v1051_v60 = vmax.f32 %v922_v55, 0.0 }
 0x14e   : > { %v832_v52 = vpop.f32.mrf.mxu2 }
 0x14f   : > { %1876 = vst [vmem:[%s2092_s4 + $0xc8] sm:$0xff] %v1820_v50   ;;  %v1001_v53 = vpop.f32.mrf.mxu3  ;;  %v833_v58 = vadd.f32 %v2075_v61, %v832_v52 }
 0x150   : > { %v754_v54 = vpop.f32.mrf.mxu0 }
 0x151   : > { %v755_v56 = vadd.f32 %v2075_v61, %v754_v54  ;;  %v923_v57 = vpop.f32.mrf.mxu1  ;;  %v1002_v0 = vadd.f32 %v1001_v53, %v833_v58 }
 0x153   : > { %v924_v59 = vadd.f32 %v923_v57, %v755_v56  ;;  %v1083_v7 = vmax.f32 %v1002_v0, 0.0 }
 0x155   : > { %v1052_v62 = vmax.f32 %v924_v59, 0.0 }
 0x156   : > { %v834_v63 = vpop.f32.mrf.mxu2 }
 0x157   : > { %v1745_v1 = vpack.c.bf16 %v1052_v62, %v1051_v60  ;;  %v835_v2 = vadd.f32 %v2075_v61, %v834_v63  ;;  %v1003_v3 = vpop.f32.mrf.mxu3 }
 0x158   : > { %v757_v4 = vpop.f32.mrf.mxu0 }
 0x159   : > { %1861 = vst [vmem:[%s2092_s4 + $0x50] sm:$0xff] %v1745_v1   ;;  %v1004_v5 = vadd.f32 %v1003_v3, %v835_v2  ;;  %v926_v6 = vpop.f32.mrf.mxu1  ;;  %v758_v10 = vadd.f32 %v2075_v61, %v757_v4 }
 0x15b   : > { %v1084_v8 = vmax.f32 %v1004_v5, 0.0  ;;  %v927_v14 = vadd.f32 %v926_v6, %v758_v10 }
 0x15d   : > { %v1825_v9 = vpack.c.bf16 %v1084_v8, %v1083_v7  ;;  %v1053_v19 = vmax.f32 %v927_v14, 0.0 }
 0x15e   : > { %v837_v11 = vpop.f32.mrf.mxu2 }
 0x15f   : > { %1877 = vst [vmem:[%s2092_s4 + $0xd0] sm:$0xff] %v1825_v9   ;;  %v1006_v12 = vpop.f32.mrf.mxu3  ;;  %v838_v17 = vadd.f32 %v2075_v61, %v837_v11 }
 0x160   : > { %v759_v13 = vpop.f32.mrf.mxu0 }
 0x161   : > { %v760_v15 = vadd.f32 %v2075_v61, %v759_v13  ;;  %v928_v16 = vpop.f32.mrf.mxu1  ;;  %v1007_v22 = vadd.f32 %v1006_v12, %v838_v17 }
 0x163   : > { %v929_v18 = vadd.f32 %v928_v16, %v760_v15  ;;  %v1085_v29 = vmax.f32 %v1007_v22, 0.0 }
 0x165   : > { %v1054_v20 = vmax.f32 %v929_v18, 0.0 }
 0x166   : > { %v839_v21 = vpop.f32.mrf.mxu2 }
 0x167   : > { %v1750_v23 = vpack.c.bf16 %v1054_v20, %v1053_v19  ;;  %v840_v24 = vadd.f32 %v2075_v61, %v839_v21  ;;  %v1008_v25 = vpop.f32.mrf.mxu3 }
 0x168   : > { %v762_v26 = vpop.f32.mrf.mxu0 }
 0x169   : > { %1862 = vst [vmem:[%s2092_s4 + $0x58] sm:$0xff] %v1750_v23   ;;  %v1009_v27 = vadd.f32 %v1008_v25, %v840_v24  ;;  %v931_v28 = vpop.f32.mrf.mxu1  ;;  %v763_v32 = vadd.f32 %v2075_v61, %v762_v26 }
 0x16b   : > { %v1086_v30 = vmax.f32 %v1009_v27, 0.0  ;;  %v932_v36 = vadd.f32 %v931_v28, %v763_v32 }
 0x16d   : > { %v1830_v31 = vpack.c.bf16 %v1086_v30, %v1085_v29  ;;  %v1055_v41 = vmax.f32 %v932_v36, 0.0 }
 0x16e   : > { %v842_v33 = vpop.f32.mrf.mxu2 }
 0x16f   : > { %1878 = vst [vmem:[%s2092_s4 + $0xd8] sm:$0xff] %v1830_v31   ;;  %v1011_v34 = vpop.f32.mrf.mxu3  ;;  %v843_v39 = vadd.f32 %v2075_v61, %v842_v33 }
 0x170   : > { %v764_v35 = vpop.f32.mrf.mxu0 }
 0x171   : > { %v765_v37 = vadd.f32 %v2075_v61, %v764_v35  ;;  %v933_v38 = vpop.f32.mrf.mxu1  ;;  %v1012_v44 = vadd.f32 %v1011_v34, %v843_v39 }
 0x173   : > { %v934_v40 = vadd.f32 %v933_v38, %v765_v37  ;;  %v1087_v51 = vmax.f32 %v1012_v44, 0.0 }
 0x175   : > { %v1056_v42 = vmax.f32 %v934_v40, 0.0 }
 0x176   : > { %v844_v43 = vpop.f32.mrf.mxu2 }
 0x177   : > { %v1755_v45 = vpack.c.bf16 %v1056_v42, %v1055_v41  ;;  %v845_v46 = vadd.f32 %v2075_v61, %v844_v43  ;;  %v1013_v47 = vpop.f32.mrf.mxu3 }
 0x178   : > { %v767_v48 = vpop.f32.mrf.mxu0 }
 0x179   : > { %1863 = vst [vmem:[%s2092_s4 + $0x60] sm:$0xff] %v1755_v45   ;;  %v1014_v49 = vadd.f32 %v1013_v47, %v845_v46  ;;  %v936_v50 = vpop.f32.mrf.mxu1  ;;  %v768_v54 = vadd.f32 %v2075_v61, %v767_v48 }
 0x17b   : > { %v1088_v52 = vmax.f32 %v1014_v49, 0.0  ;;  %v937_v58 = vadd.f32 %v936_v50, %v768_v54 }
 0x17d   : > { %v1835_v53 = vpack.c.bf16 %v1088_v52, %v1087_v51  ;;  %v1057_v0 = vmax.f32 %v937_v58, 0.0 }
 0x17e   : > { %v847_v55 = vpop.f32.mrf.mxu2 }
 0x17f   : > { %1879 = vst [vmem:[%s2092_s4 + $0xe0] sm:$0xff] %v1835_v53   ;;  %v1016_v56 = vpop.f32.mrf.mxu3  ;;  %v848_v62 = vadd.f32 %v2075_v61, %v847_v55 }
 0x180   : > { %v769_v57 = vpop.f32.mrf.mxu0 }
 0x181   : > { %v770_v59 = vadd.f32 %v2075_v61, %v769_v57  ;;  %v938_v60 = vpop.f32.mrf.mxu1  ;;  %v1017_v3 = vadd.f32 %v1016_v56, %v848_v62 }
 0x183   : > { %v939_v63 = vadd.f32 %v938_v60, %v770_v59  ;;  %v1089_v10 = vmax.f32 %v1017_v3, 0.0 }
 0x185   : > { %v1058_v1 = vmax.f32 %v939_v63, 0.0 }
 0x186   : > { %v849_v2 = vpop.f32.mrf.mxu2 }
 0x187   : > { %v1760_v4 = vpack.c.bf16 %v1058_v1, %v1057_v0  ;;  %v850_v5 = vadd.f32 %v2075_v61, %v849_v2  ;;  %v1018_v6 = vpop.f32.mrf.mxu3 }
 0x188   : > { %v772_v7 = vpop.f32.mrf.mxu0 }
 0x189   : > { %1864 = vst [vmem:[%s2092_s4 + $0x68] sm:$0xff] %v1760_v4   ;;  %v1019_v8 = vadd.f32 %v1018_v6, %v850_v5  ;;  %v941_v9 = vpop.f32.mrf.mxu1  ;;  %v773_v13 = vadd.f32 %v2075_v61, %v772_v7 }
 0x18b   : > { %v1090_v11 = vmax.f32 %v1019_v8, 0.0  ;;  %v942_v17 = vadd.f32 %v941_v9, %v773_v13 }
 0x18d   : > { %v1840_v12 = vpack.c.bf16 %v1090_v11, %v1089_v10  ;;  %v1059_v22 = vmax.f32 %v942_v17, 0.0 }
 0x18e   : > { %v852_v14 = vpop.f32.mrf.mxu2 }
 0x18f   : > { %1880 = vst [vmem:[%s2092_s4 + $0xe8] sm:$0xff] %v1840_v12   ;;  %v1021_v15 = vpop.f32.mrf.mxu3  ;;  %v853_v20 = vadd.f32 %v2075_v61, %v852_v14 }
 0x190   : > { %v774_v16 = vpop.f32.mrf.mxu0 }
 0x191   : > { %v775_v18 = vadd.f32 %v2075_v61, %v774_v16  ;;  %v943_v19 = vpop.f32.mrf.mxu1  ;;  %v1022_v25 = vadd.f32 %v1021_v15, %v853_v20 }
 0x193   : > { %v944_v21 = vadd.f32 %v943_v19, %v775_v18  ;;  %v1091_v32 = vmax.f32 %v1022_v25, 0.0 }
 0x195   : > { %v1060_v23 = vmax.f32 %v944_v21, 0.0 }
 0x196   : > { %v854_v24 = vpop.f32.mrf.mxu2 }
 0x197   : > { %v1765_v26 = vpack.c.bf16 %v1060_v23, %v1059_v22  ;;  %v855_v27 = vadd.f32 %v2075_v61, %v854_v24  ;;  %v1023_v28 = vpop.f32.mrf.mxu3 }
 0x198   : > { %v777_v29 = vpop.f32.mrf.mxu0 }
 0x199   : > { %1865 = vst [vmem:[%s2092_s4 + $0x70] sm:$0xff] %v1765_v26   ;;  %v1024_v30 = vadd.f32 %v1023_v28, %v855_v27  ;;  %v946_v31 = vpop.f32.mrf.mxu1  ;;  %v778_v35 = vadd.f32 %v2075_v61, %v777_v29 }
 0x19b   : > { %v1092_v33 = vmax.f32 %v1024_v30, 0.0  ;;  %v947_v39 = vadd.f32 %v946_v31, %v778_v35 }
 0x19d   : > { %v1845_v34 = vpack.c.bf16 %v1092_v33, %v1091_v32  ;;  %v1061_v44 = vmax.f32 %v947_v39, 0.0 }
 0x19e   : > { %v857_v36 = vpop.f32.mrf.mxu2 }
 0x19f   : > { %1881 = vst [vmem:[%s2092_s4 + $0xf0] sm:$0xff] %v1845_v34   ;;  %v1026_v37 = vpop.f32.mrf.mxu3  ;;  %v858_v42 = vadd.f32 %v2075_v61, %v857_v36 }
 0x1a0   : > { %v779_v38 = vpop.f32.mrf.mxu0 }
 0x1a1   : > { %v780_v40 = vadd.f32 %v2075_v61, %v779_v38  ;;  %v948_v41 = vpop.f32.mrf.mxu1  ;;  %v1027_v47 = vadd.f32 %v1026_v37, %v858_v42 }
 0x1a3   : > { %v949_v43 = vadd.f32 %v948_v41, %v780_v40  ;;  %v1093_v52 = vmax.f32 %v1027_v47, 0.0 }
 0x1a5   : > { %v1062_v45 = vmax.f32 %v949_v43, 0.0 }
 0x1a6   : > { %v859_v46 = vpop.f32.mrf.mxu2 }
 0x1a7   : > { %v1770_v48 = vpack.c.bf16 %v1062_v45, %v1061_v44  ;;  %v860_v49 = vadd.f32 %v2075_v61, %v859_v46  ;;  %v1028_v50 = vpop.f32.mrf.mxu3 }
 0x1a9   : > { %1866 = vst [vmem:[%s2092_s4 + $0x78] sm:$0xff] %v1770_v48   ;;  %v1029_v51 = vadd.f32 %v1028_v50, %v860_v49 }
 0x1ab   : > { %v1094_v53 = vmax.f32 %v1029_v51, 0.0 }
 0x1ad   : > { %v1850_v54 = vpack.c.bf16 %v1094_v53, %v1093_v52 }
 0x1af   : > { %1882 = vst [vmem:[%s2092_s4 + $0xf8] sm:$0xff] %v1850_v54  }
 0x1b0 PF: > { %s13_s12 = sadd.s32 1, %s1914_s12  }
 0x1b1   : > { %p10_p4 = scmp.ge.s32.totalorder %s13_s12, 9  }
 0x1b3   :  { %12 = sbr.rel (!%p10_p4) target bundleno = 1 (0x1), region = 62 }

// kernel: simple_nn_forward.8
= control target key start
LH: loop header
LB: loop body
LE: loop exit
PB: predicated region body
PF: predicated region fallthrough
CT: control target
= control target key end

     0   :  { %s1936_s12 = smov 0   ;;  %s2238_s0 = inlined_call_operand.vmem [shape: bf16[2048,256], index: 0, kind: input, shape index: {}]   ;;  %s2239_s1 = inlined_call_operand.vmem [shape: bf16[256,128], index: 1, kind: input, shape index: {}]   ;;  %s2240_s2 = inlined_call_operand.vmem [shape: f32[1,128], index: 2, kind: input, shape index: {}]   ;;  %s2241_s3 = inlined_call_operand.vmem [shape: bf16[2048,128], index: 3, kind: output, shape index: {}]  }
   0x1 LB: > { %s1279_s13 = sadd.s32 4294967295, %s1914_s12   ;;  %p1283_p0 = scmp.ge.s32.totalorder %s1914_s12, 1  ;;  %s1914_s12 = sphi %s1936_s12, %s13_s12  }
   0x2   : > { %p139_p1 = scmp.lt.s32.totalorder %s1914_s12, 5 }
   0x4   : > { %p140_p2 = pnand %p1283_p0, %p139_p1 }
   0x5   : > { %s1284_s26 = sshll.u32 (!%p140_p2), %s1279_s13, 6 }
   0x6   : > { %143 = sbr.rel (%p140_p2) target bundleno = 432 (0x1b0), region = 32  ;;  %p165_p3 = scmp.lt.s32.totalorder (!%p140_p2), %s1284_s26, 255 }
   0xb   : > { %v1683_v0 = vld [vmem:[%s2239_s1 + $0x38] sm:$0xff]  ;;  %v1682_v2 = vld [vmem:[%s2239_s1 + $0x30] sm:$0xff]  ;;  %v1681_v4 = vld [vmem:[%s2239_s1 + $0x28] sm:$0xff]  ;;  %s2243_s26 = smov (!%p165_p3, %s1284_s26), 255 }
   0xc   : > { %v1691_v1 = vld [vmem:[%s2239_s1 + $0x78] sm:$0xff]  ;;  %693 = vmatpush.bf16.msra.mxu0 %v1683_v0  ;;  %1883 = vmatpush.bf16.msra.mxu2 %v1683_v0  ;;  %v1690_v3 = vld [vmem:[%s2239_s1 + $0x70] sm:$0xff]  ;;  %v1689_v5 = vld [vmem:[%s2239_s1 + $0x68] sm:$0xff]  ;;  %s1611_s13 = sshll.u32 %s2243_s26, 3  ;;  %s1288_s28 = sshll.u32 %s2243_s26, 2 }
   0xd   : > { %862 = vmatpush.bf16.msra.mxu1 %v1691_v1  ;;  %1891 = vmatpush.bf16.msra.mxu3 %v1691_v1  ;;  %v1680_v6 = vld [vmem:[%s2239_s1 + $0x20] sm:$0xff]  ;;  %v1679_v8 = vld [vmem:[%s2239_s1 + $0x18] sm:$0xff]  ;;  %v1678_v10 = vld [vmem:[%s2239_s1 + $0x10] sm:$0xff]  ;;  %s1989_s18 = scalar_lea.vmem %s2238_s0, %s1611_s13  ;;  %s2092_s4 = scalar_lea.vmem %s2241_s3, %s1288_s28 }
   0xe   : > { %v1688_v7 = vld [vmem:[%s2239_s1 + $0x60] sm:$0xff]  ;;  %v1687_v9 = vld [vmem:[%s2239_s1 + $0x58] sm:$0xff]  ;;  %v1686_v11 = vld [vmem:[%s2239_s1 + $0x50] sm:$0xff] }
   0xf   : > { %v1677_v12 = vld [vmem:[%s2239_s1 + $0x8] sm:$0xff]  ;;  %v1676_v14 = vld [vmem:[%s2239_s1] sm:$0xff]  ;;  %v1299_v28 = vld [vmem:[%s1989_s18 + $0x10] sm:$0xf] }
  0x10   : > { %694 = vmatpush.bf16.msra.mxu0 %v1682_v2  ;;  %1884 = vmatpush.bf16.msra.mxu2 %v1682_v2  ;;  %v1685_v13 = vld [vmem:[%s2239_s1 + $0x48] sm:$0xff]  ;;  %v1684_v15 = vld [vmem:[%s2239_s1 + $0x40] sm:$0xff]  ;;  %v1615_v29 = vld [vmem:[%s1989_s18 + $0x14] sm:$0xf0] }
  0x11   : > { %863 = vmatpush.bf16.msra.mxu1 %v1690_v3  ;;  %1892 = vmatpush.bf16.msra.mxu3 %v1690_v3  ;;  %v1291_v16 = vld [vmem:[%s1989_s18] sm:$0xf]  ;;  %v1613_v17 = vld [vmem:[%s1989_s18 + $0x4] sm:$0xf0]  ;;  %v1612_v20 = vld [vmem:[%s1989_s18 + $0x4] sm:$0xf]  ;;  %v1300_v36 = vor.u32 %v1615_v29, %v1299_v28 }
  0x12   : > { %v1419_v18 = vld [vmem:[%s1989_s18 + $0x100] sm:$0xf]  ;;  %v1645_v19 = vld [vmem:[%s1989_s18 + $0x104] sm:$0xf0]  ;;  %v1293_v21 = vld [vmem:[%s1989_s18 + $0x8] sm:$0xf0]  ;;  %v1292_v24 = vor.u32 %v1613_v17, %v1291_v16 }
  0x13   : > { %v1644_v22 = vld [vmem:[%s1989_s18 + $0x104] sm:$0xf]  ;;  %v1421_v23 = vld [vmem:[%s1989_s18 + $0x108] sm:$0xf0]  ;;  %v1420_v25 = vor.u32 %v1645_v19, %v1419_v18  ;;  %v1296_v26 = vor.u32 %v1612_v20, %v1293_v21  ;;  %v1427_v30 = vld [vmem:[%s1989_s18 + $0x110] sm:$0xf] }
  0x14   : > { %695 = vmatpush.bf16.msra.mxu0 %v1681_v4  ;;  %1885 = vmatpush.bf16.msra.mxu2 %v1681_v4  ;;  %v1424_v27 = vor.u32 %v1644_v22, %v1421_v23  ;;  %v1647_v31 = vld [vmem:[%s1989_s18 + $0x114] sm:$0xf0]  ;;  %v1614_v32 = vld [vmem:[%s1989_s18 + $0x14] sm:$0xf]  ;;  %v1301_v33 = vld [vmem:[%s1989_s18 + $0x18] sm:$0xf0] }
  0x15   : > { %864 = vmatpush.bf16.msra.mxu1 %v1689_v5  ;;  %1893 = vmatpush.bf16.msra.mxu3 %v1689_v5  ;;  %v1646_v34 = vld [vmem:[%s1989_s18 + $0x114] sm:$0xf]  ;;  %v1429_v35 = vld [vmem:[%s1989_s18 + $0x118] sm:$0xf0]  ;;  %v1428_v37 = vor.u32 %v1647_v31, %v1427_v30  ;;  %v1304_v38 = vor.u32 %v1614_v32, %v1301_v33  ;;  %v1307_v40 = vld [vmem:[%s1989_s18 + $0x20] sm:$0xf] }
  0x16   : > { %v1432_v39 = vor.u32 %v1646_v34, %v1429_v35  ;;  %v1617_v41 = vld [vmem:[%s1989_s18 + $0x24] sm:$0xf0]  ;;  %v1435_v42 = vld [vmem:[%s1989_s18 + $0x120] sm:$0xf]  ;;  %v1616_v44 = vld [vmem:[%s1989_s18 + $0x24] sm:$0xf] }
  0x17   : > { %v1649_v43 = vld [vmem:[%s1989_s18 + $0x124] sm:$0xf0]  ;;  %v1309_v45 = vld [vmem:[%s1989_s18 + $0x28] sm:$0xf0]  ;;  %v1648_v46 = vld [vmem:[%s1989_s18 + $0x124] sm:$0xf]  ;;  %v1308_v48 = vor.u32 %v1617_v41, %v1307_v40 }
  0x18   : > { %696 = vmatpush.bf16.msra.mxu0 %v1680_v6  ;;  %1886 = vmatpush.bf16.msra.mxu2 %v1680_v6  ;;  %v1437_v47 = vld [vmem:[%s1989_s18 + $0x128] sm:$0xf0]  ;;  %v1436_v49 = vor.u32 %v1649_v43, %v1435_v42  ;;  %v1312_v50 = vor.u32 %v1616_v44, %v1309_v45  ;;  %v1315_v52 = vld [vmem:[%s1989_s18 + $0x30] sm:$0xf]  ;;  %v1619_v53 = vld [vmem:[%s1989_s18 + $0x34] sm:$0xf0] }
  0x19   : > { %865 = vmatpush.bf16.msra.mxu1 %v1688_v7  ;;  %1894 = vmatpush.bf16.msra.mxu3 %v1688_v7  ;;  %v1440_v51 = vor.u32 %v1648_v46, %v1437_v47  ;;  %v1443_v54 = vld [vmem:[%s1989_s18 + $0x130] sm:$0xf]  ;;  %v1651_v55 = vld [vmem:[%s1989_s18 + $0x134] sm:$0xf0]  ;;  %v1618_v56 = vld [vmem:[%s1989_s18 + $0x34] sm:$0xf]  ;;  %v1316_v60 = vor.u32 %v1619_v53, %v1315_v52 }
  0x1a   : > { %v1317_v57 = vld [vmem:[%s1989_s18 + $0x38] sm:$0xf0]  ;;  %v1650_v58 = vld [vmem:[%s1989_s18 + $0x134] sm:$0xf]  ;;  %v1444_v61 = vor.u32 %v1651_v55, %v1443_v54  ;;  %v1323_v0 = vld [vmem:[%s1989_s18 + $0x40] sm:$0xf] }
  0x1b   : > { %v1445_v59 = vld [vmem:[%s1989_s18 + $0x138] sm:$0xf0]  ;;  %v1320_v62 = vor.u32 %v1618_v56, %v1317_v57  ;;  %v1621_v1 = vld [vmem:[%s1989_s18 + $0x44] sm:$0xf0]  ;;  %v1451_v2 = vld [vmem:[%s1989_s18 + $0x140] sm:$0xf] }
  0x1c   : > { %697 = vmatpush.bf16.msra.mxu0 %v1679_v8  ;;  %1887 = vmatpush.bf16.msra.mxu2 %v1679_v8  ;;  %v1448_v63 = vor.u32 %v1650_v58, %v1445_v59  ;;  %v1653_v3 = vld [vmem:[%s1989_s18 + $0x144] sm:$0xf0]  ;;  %v1620_v4 = vld [vmem:[%s1989_s18 + $0x44] sm:$0xf]  ;;  %v1325_v5 = vld [vmem:[%s1989_s18 + $0x48] sm:$0xf0]  ;;  %v1324_v8 = vor.u32 %v1621_v1, %v1323_v0 }
  0x1d   : > { %866 = vmatpush.bf16.msra.mxu1 %v1687_v9  ;;  %1895 = vmatpush.bf16.msra.mxu3 %v1687_v9  ;;  %v1652_v6 = vld [vmem:[%s1989_s18 + $0x144] sm:$0xf]  ;;  %v1453_v7 = vld [vmem:[%s1989_s18 + $0x148] sm:$0xf0]  ;;  %v1452_v9 = vor.u32 %v1653_v3, %v1451_v2  ;;  %v1622_v16 = vld [vmem:[%s1989_s18 + $0x54] sm:$0xf] }
  0x1e   : > { %v1333_v17 = vld [vmem:[%s1989_s18 + $0x58] sm:$0xf0]  ;;  %v1654_v18 = vld [vmem:[%s1989_s18 + $0x154] sm:$0xf]  ;;  %v1624_v28 = vld [vmem:[%s1989_s18 + $0x64] sm:$0xf] }
  0x1f   : > { %v1461_v19 = vld [vmem:[%s1989_s18 + $0x158] sm:$0xf0]  ;;  %v1336_v22 = vor.u32 %v1622_v16, %v1333_v17  ;;  %v1341_v29 = vld [vmem:[%s1989_s18 + $0x68] sm:$0xf0]  ;;  %v1656_v30 = vld [vmem:[%s1989_s18 + $0x164] sm:$0xf] }
  0x20   : > { %698 = vmatpush.bf16.msra.mxu0 %v1678_v10  ;;  %1888 = vmatpush.bf16.msra.mxu2 %v1678_v10  ;;  %v1328_v10 = vor.u32 %v1620_v4, %v1325_v5  ;;  %v1464_v23 = vor.u32 %v1654_v18, %v1461_v19  ;;  %v1469_v31 = vld [vmem:[%s1989_s18 + $0x168] sm:$0xf0]  ;;  %v1344_v34 = vor.u32 %v1624_v28, %v1341_v29  ;;  %v1626_v40 = vld [vmem:[%s1989_s18 + $0x74] sm:$0xf]  ;;  %v1349_v41 = vld [vmem:[%s1989_s18 + $0x78] sm:$0xf0] }
  0x21   : > { %867 = vmatpush.bf16.msra.mxu1 %v1686_v11  ;;  %1896 = vmatpush.bf16.msra.mxu3 %v1686_v11  ;;  %v1456_v11 = vor.u32 %v1652_v6, %v1453_v7  ;;  %v1472_v35 = vor.u32 %v1656_v30, %v1469_v31  ;;  %v1658_v42 = vld [vmem:[%s1989_s18 + $0x174] sm:$0xf]  ;;  %v1477_v43 = vld [vmem:[%s1989_s18 + $0x178] sm:$0xf0]  ;;  %v1352_v46 = vor.u32 %v1626_v40, %v1349_v41  ;;  %v1628_v52 = vld [vmem:[%s1989_s18 + $0x84] sm:$0xf] }
  0x22   : > { %v1480_v47 = vor.u32 %v1658_v42, %v1477_v43  ;;  %v1357_v53 = vld [vmem:[%s1989_s18 + $0x88] sm:$0xf0]  ;;  %v1660_v54 = vld [vmem:[%s1989_s18 + $0x184] sm:$0xf]  ;;  %v1662_v16 = vld [vmem:[%s1989_s18 + $0x194] sm:$0xf] }
  0x23   : > { %v1485_v55 = vld [vmem:[%s1989_s18 + $0x188] sm:$0xf0]  ;;  %v1360_v59 = vor.u32 %v1628_v52, %v1357_v53  ;;  %v1493_v17 = vld [vmem:[%s1989_s18 + $0x198] sm:$0xf0]  ;;  %v1371_v42 = vld [vmem:[%s1989_s18 + $0xa0] sm:$0xf] }
  0x24   : > { %699 = vmatpush.bf16.msra.mxu0 %v1677_v12  ;;  %1889 = vmatpush.bf16.msra.mxu2 %v1677_v12  ;;  %v1331_v12 = vld [vmem:[%s1989_s18 + $0x50] sm:$0xf]  ;;  %v1633_v43 = vld [vmem:[%s1989_s18 + $0xa4] sm:$0xf0] }
  0x25   : > { %868 = vmatpush.bf16.msra.mxu1 %v1685_v13  ;;  %1897 = vmatpush.bf16.msra.mxu3 %v1685_v13  ;;  %v1623_v13 = vld [vmem:[%s1989_s18 + $0x54] sm:$0xf0]  ;;  %v1372_v53 = vor.u32 %v1633_v43, %v1371_v42 }
  0x26   : > { %v1332_v20 = vor.u32 %v1623_v13, %v1331_v12  ;;  %v1630_v12 = vld [vmem:[%s1989_s18 + $0x94] sm:$0xf]  ;;  %v1365_v13 = vld [vmem:[%s1989_s18 + $0x98] sm:$0xf0] }
  0x28   : > { %700 = vmatpush.bf16.msra.mxu0 %v1676_v14  ;;  %1890 = vmatpush.bf16.msra.mxu2 %v1676_v14  ;;  %v1459_v14 = vld [vmem:[%s1989_s18 + $0x150] sm:$0xf] }
  0x29   : > { %869 = vmatpush.bf16.msra.mxu1 %v1684_v15  ;;  %1898 = vmatpush.bf16.msra.mxu3 %v1684_v15  ;;  %v1655_v15 = vld [vmem:[%s1989_s18 + $0x154] sm:$0xf0] }
  0x2a   : > { %v1460_v21 = vor.u32 %v1655_v15, %v1459_v14 }
  0x2b   : > { %701 = vmatmul.bf16.vlgmr.msra.gmra.mxu0 %v1292_v24  ;;  %781 = vmatmul.bf16.vlgmr.msra.gmra.mxu2 %v1420_v25  ;;  %v1339_v24 = vld [vmem:[%s1989_s18 + $0x60] sm:$0xf]  ;;  %v1625_v25 = vld [vmem:[%s1989_s18 + $0x64] sm:$0xf0] }
  0x2c   : > { %870 = vmatmul.bf16.vlgmr.msra.gmra.mxu1 %v1296_v26  ;;  %950 = vmatmul.bf16.vlgmr.msra.gmra.mxu3 %v1424_v27  ;;  %v1467_v26 = vld [vmem:[%s1989_s18 + $0x160] sm:$0xf]  ;;  %v1657_v27 = vld [vmem:[%s1989_s18 + $0x164] sm:$0xf0]  ;;  %v1340_v32 = vor.u32 %v1625_v25, %v1339_v24 }
  0x2d   : > { %v1468_v33 = vor.u32 %v1657_v27, %v1467_v26  ;;  %v1368_v26 = vor.u32 %v1630_v12, %v1365_v13  ;;  %v1496_v27 = vor.u32 %v1662_v16, %v1493_v17  ;;  %v1379_v13 = vld [vmem:[%s1989_s18 + $0xb0] sm:$0xf]  ;;  %v1667_v16 = vld [vmem:[%s1989_s18 + $0x1b4] sm:$0xf0]  ;;  %v1634_v17 = vld [vmem:[%s1989_s18 + $0xb4] sm:$0xf] }
  0x3b   : > { %706 = vmatmul.bf16.gmra.mxu0 %v1300_v36  ;;  %786 = vmatmul.bf16.gmra.mxu2 %v1428_v37  ;;  %v1347_v36 = vld [vmem:[%s1989_s18 + $0x70] sm:$0xf]  ;;  %v1627_v37 = vld [vmem:[%s1989_s18 + $0x74] sm:$0xf0] }
  0x3c   : > { %875 = vmatmul.bf16.gmra.mxu1 %v1304_v38  ;;  %955 = vmatmul.bf16.gmra.mxu3 %v1432_v39  ;;  %v1475_v38 = vld [vmem:[%s1989_s18 + $0x170] sm:$0xf]  ;;  %v1659_v39 = vld [vmem:[%s1989_s18 + $0x174] sm:$0xf0]  ;;  %v1348_v44 = vor.u32 %v1627_v37, %v1347_v36 }
  0x3d   : > { %v1476_v45 = vor.u32 %v1659_v39, %v1475_v38 }
  0x4b   : > { %711 = vmatmul.bf16.gmra.mxu0 %v1308_v48  ;;  %791 = vmatmul.bf16.gmra.mxu2 %v1436_v49  ;;  %v1355_v48 = vld [vmem:[%s1989_s18 + $0x80] sm:$0xf]  ;;  %v1629_v49 = vld [vmem:[%s1989_s18 + $0x84] sm:$0xf0] }
  0x4c   : > { %880 = vmatmul.bf16.gmra.mxu1 %v1312_v50  ;;  %960 = vmatmul.bf16.gmra.mxu3 %v1440_v51  ;;  %v1483_v50 = vld [vmem:[%s1989_s18 + $0x180] sm:$0xf]  ;;  %v1661_v51 = vld [vmem:[%s1989_s18 + $0x184] sm:$0xf0]  ;;  %v1356_v56 = vor.u32 %v1629_v49, %v1355_v48 }
  0x4d   : > { %v1484_v57 = vor.u32 %v1661_v51, %v1483_v50  ;;  %v1664_v50 = vld [vmem:[%s1989_s18 + $0x1a4] sm:$0xf]  ;;  %v1501_v51 = vld [vmem:[%s1989_s18 + $0x1a8] sm:$0xf0] }
  0x5b   : > { %716 = vmatmul.bf16.gmra.mxu0 %v1316_v60  ;;  %796 = vmatmul.bf16.gmra.mxu2 %v1444_v61  ;;  %v1488_v60 = vor.u32 %v1660_v54, %v1485_v55  ;;  %v2075_v61 = vld [vmem:[%s2240_s2] ss:$0 sm:$0xff] }
  0x5c   : > { %885 = vmatmul.bf16.gmra.mxu1 %v1320_v62  ;;  %965 = vmatmul.bf16.gmra.mxu3 %v1448_v63 }
  0x6b   : > { %721 = vmatmul.bf16.gmra.mxu0 %v1324_v8  ;;  %801 = vmatmul.bf16.gmra.mxu2 %v1452_v9  ;;  %v1363_v8 = vld [vmem:[%s1989_s18 + $0x90] sm:$0xf]  ;;  %v1631_v9 = vld [vmem:[%s1989_s18 + $0x94] sm:$0xf0] }
  0x6c   : > { %890 = vmatmul.bf16.gmra.mxu1 %v1328_v10  ;;  %970 = vmatmul.bf16.gmra.mxu3 %v1456_v11  ;;  %v1491_v10 = vld [vmem:[%s1989_s18 + $0x190] sm:$0xf]  ;;  %v1663_v11 = vld [vmem:[%s1989_s18 + $0x194] sm:$0xf0]  ;;  %v1364_v19 = vor.u32 %v1631_v9, %v1363_v8 }
  0x6d   : > { %v1492_v24 = vor.u32 %v1663_v11, %v1491_v10 }
  0x7b   : > { %726 = vmatmul.bf16.gmra.mxu0 %v1332_v20  ;;  %806 = vmatmul.bf16.gmra.mxu2 %v1460_v21 }
  0x7c   : > { %895 = vmatmul.bf16.gmra.mxu1 %v1336_v22  ;;  %975 = vmatmul.bf16.gmra.mxu3 %v1464_v23 }
  0x8b   : > { %731 = vmatmul.bf16.gmra.mxu0 %v1340_v32  ;;  %811 = vmatmul.bf16.gmra.mxu2 %v1468_v33 }
  0x8c   : > { %900 = vmatmul.bf16.gmra.mxu1 %v1344_v34  ;;  %980 = vmatmul.bf16.gmra.mxu3 %v1472_v35 }
  0x9b   : > { %736 = vmatmul.bf16.gmra.mxu0 %v1348_v44  ;;  %816 = vmatmul.bf16.gmra.mxu2 %v1476_v45  ;;  %v1499_v44 = vld [vmem:[%s1989_s18 + $0x1a0] sm:$0xf]  ;;  %v1665_v45 = vld [vmem:[%s1989_s18 + $0x1a4] sm:$0xf0] }
  0x9c   : > { %905 = vmatmul.bf16.gmra.mxu1 %v1352_v46  ;;  %985 = vmatmul.bf16.gmra.mxu3 %v1480_v47  ;;  %v1632_v46 = vld [vmem:[%s1989_s18 + $0xa4] sm:$0xf]  ;;  %v1373_v47 = vld [vmem:[%s1989_s18 + $0xa8] sm:$0xf0] }
  0xa8   : > { %v702_v58 = vpop.f32.mrf.mxu0 }
  0xa9   : > { %v871_v62 = vpop.f32.mrf.mxu1  ;;  %v703_v63 = vadd.f32 %v2075_v61, %v702_v58  ;;  %v1500_v58 = vor.u32 %v1665_v45, %v1499_v44 }
  0xab   : > { %741 = vmatmul.bf16.gmra.mxu0 %v1356_v56  ;;  %821 = vmatmul.bf16.gmra.mxu2 %v1484_v57  ;;  %v872_v3 = vadd.f32 %v871_v62, %v703_v63  ;;  %v1504_v62 = vor.u32 %v1664_v50, %v1501_v51  ;;  %v1669_v50 = vld [vmem:[%s1989_s18 + $0x1c4] sm:$0xf0]  ;;  %v1636_v51 = vld [vmem:[%s1989_s18 + $0xc4] sm:$0xf] }
  0xac   : > { %910 = vmatmul.bf16.gmra.mxu1 %v1360_v59  ;;  %990 = vmatmul.bf16.gmra.mxu3 %v1488_v60  ;;  %v1376_v60 = vor.u32 %v1632_v46, %v1373_v47  ;;  %v1387_v47 = vld [vmem:[%s1989_s18 + $0xc0] sm:$0xf] }
  0xad   : > { %v1031_v14 = vmax.f32 %v872_v3, 0.0 }
  0xae   : > { %v782_v0 = vpop.f32.mrf.mxu2 }
  0xaf   : > { %v951_v1 = vpop.f32.mrf.mxu3  ;;  %v783_v6 = vadd.f32 %v2075_v61, %v782_v0 }
  0xb0   : > { %v704_v2 = vpop.f32.mrf.mxu0 }
  0xb1   : > { %v705_v4 = vadd.f32 %v2075_v61, %v704_v2  ;;  %v873_v5 = vpop.f32.mrf.mxu1  ;;  %v952_v20 = vadd.f32 %v951_v1, %v783_v6 }
  0xb3   : > { %v874_v7 = vadd.f32 %v873_v5, %v705_v4  ;;  %v1063_v30 = vmax.f32 %v952_v20, 0.0 }
  0xb5   : > { %v1032_v15 = vmax.f32 %v874_v7, 0.0 }
  0xb6   : > { %v784_v18 = vpop.f32.mrf.mxu2 }
  0xb7   : > { %v1695_v21 = vpack.c.bf16 %v1032_v15, %v1031_v14  ;;  %v785_v22 = vadd.f32 %v2075_v61, %v784_v18  ;;  %v953_v23 = vpop.f32.mrf.mxu3  ;;  %v1635_v14 = vld [vmem:[%s1989_s18 + $0xb4] sm:$0xf0]  ;;  %v1507_v15 = vld [vmem:[%s1989_s18 + $0x1b0] sm:$0xf]  ;;  %v1381_v18 = vld [vmem:[%s1989_s18 + $0xb8] sm:$0xf0] }
  0xb8   : > { %v707_v25 = vpop.f32.mrf.mxu0 }
  0xb9   : > { %1696 = vst [vmem:[%s2092_s4] sm:$0xff] %v1695_v21   ;;  %v954_v28 = vadd.f32 %v953_v23, %v785_v22  ;;  %v876_v29 = vpop.f32.mrf.mxu1  ;;  %v708_v33 = vadd.f32 %v2075_v61, %v707_v25  ;;  %v1666_v21 = vld [vmem:[%s1989_s18 + $0x1b4] sm:$0xf]  ;;  %v1509_v22 = vld [vmem:[%s1989_s18 + $0x1b8] sm:$0xf0] }
  0xbb   : > { %v1064_v31 = vmax.f32 %v954_v28, 0.0  ;;  %746 = vmatmul.bf16.gmra.mxu0 %v1364_v19  ;;  %826 = vmatmul.bf16.gmra.mxu2 %v1492_v24  ;;  %v877_v37 = vadd.f32 %v876_v29, %v708_v33  ;;  %v1380_v24 = vor.u32 %v1635_v14, %v1379_v13  ;;  %v1508_v29 = vor.u32 %v1667_v16, %v1507_v15 }
  0xbc   : > { %915 = vmatmul.bf16.gmra.mxu1 %v1368_v26  ;;  %995 = vmatmul.bf16.gmra.mxu3 %v1496_v27 }
  0xbd   : > { %v1775_v32 = vpack.c.bf16 %v1064_v31, %v1063_v30  ;;  %v1033_v48 = vmax.f32 %v877_v37, 0.0  ;;  %v1384_v31 = vor.u32 %v1634_v17, %v1381_v18  ;;  %v1395_v18 = vld [vmem:[%s1989_s18 + $0xd0] sm:$0xf] }
  0xbe   : > { %v787_v34 = vpop.f32.mrf.mxu2 }
  0xbf   : > { %1867 = vst [vmem:[%s2092_s4 + $0x80] sm:$0xff] %v1775_v32   ;;  %v956_v35 = vpop.f32.mrf.mxu3  ;;  %v788_v40 = vadd.f32 %v2075_v61, %v787_v34  ;;  %v1512_v32 = vor.u32 %v1666_v21, %v1509_v22  ;;  %v1671_v21 = vld [vmem:[%s1989_s18 + $0x1d4] sm:$0xf0]  ;;  %v1638_v22 = vld [vmem:[%s1989_s18 + $0xd4] sm:$0xf] }
  0xc0   : > { %v709_v36 = vpop.f32.mrf.mxu0 }
  0xc1   : > { %v710_v38 = vadd.f32 %v2075_v61, %v709_v36  ;;  %v878_v39 = vpop.f32.mrf.mxu1  ;;  %v957_v54 = vadd.f32 %v956_v35, %v788_v40 }
  0xc3   : > { %v879_v41 = vadd.f32 %v878_v39, %v710_v38  ;;  %v1065_v1 = vmax.f32 %v957_v54, 0.0 }
  0xc5   : > { %v1034_v49 = vmax.f32 %v879_v41, 0.0 }
  0xc6   : > { %v789_v52 = vpop.f32.mrf.mxu2 }
  0xc7   : > { %v1700_v55 = vpack.c.bf16 %v1034_v49, %v1033_v48  ;;  %v790_v56 = vadd.f32 %v2075_v61, %v789_v52  ;;  %v958_v57 = vpop.f32.mrf.mxu3  ;;  %v1637_v48 = vld [vmem:[%s1989_s18 + $0xc4] sm:$0xf0]  ;;  %v1515_v49 = vld [vmem:[%s1989_s18 + $0x1c0] sm:$0xf]  ;;  %v1389_v52 = vld [vmem:[%s1989_s18 + $0xc8] sm:$0xf0] }
  0xc8   : > { %v712_v59 = vpop.f32.mrf.mxu0 }
  0xc9   : > { %1852 = vst [vmem:[%s2092_s4 + $0x8] sm:$0xff] %v1700_v55   ;;  %v959_v63 = vadd.f32 %v958_v57, %v790_v56  ;;  %v881_v0 = vpop.f32.mrf.mxu1  ;;  %v713_v4 = vadd.f32 %v2075_v61, %v712_v59  ;;  %v1668_v55 = vld [vmem:[%s1989_s18 + $0x1c4] sm:$0xf]  ;;  %v1517_v56 = vld [vmem:[%s1989_s18 + $0x1c8] sm:$0xf0] }
  0xcb   : > { %v1066_v2 = vmax.f32 %v959_v63, 0.0  ;;  %751 = vmatmul.bf16.gmra.mxu0 %v1372_v53  ;;  %831 = vmatmul.bf16.gmra.mxu2 %v1500_v58  ;;  %v882_v8 = vadd.f32 %v881_v0, %v713_v4  ;;  %v1388_v58 = vor.u32 %v1637_v48, %v1387_v47  ;;  %v1516_v0 = vor.u32 %v1669_v50, %v1515_v49 }
  0xcc   : > { %920 = vmatmul.bf16.gmra.mxu1 %v1376_v60  ;;  %1000 = vmatmul.bf16.gmra.mxu3 %v1504_v62 }
  0xcd   : > { %v1780_v3 = vpack.c.bf16 %v1066_v2, %v1065_v1  ;;  %v1035_v19 = vmax.f32 %v882_v8, 0.0  ;;  %v1392_v2 = vor.u32 %v1636_v51, %v1389_v52  ;;  %v1403_v52 = vld [vmem:[%s1989_s18 + $0xe0] sm:$0xf] }
  0xce   : > { %v792_v5 = vpop.f32.mrf.mxu2 }
  0xcf   : > { %1868 = vst [vmem:[%s2092_s4 + $0x88] sm:$0xff] %v1780_v3   ;;  %v961_v6 = vpop.f32.mrf.mxu3  ;;  %v793_v11 = vadd.f32 %v2075_v61, %v792_v5  ;;  %v1520_v3 = vor.u32 %v1668_v55, %v1517_v56  ;;  %v1673_v55 = vld [vmem:[%s1989_s18 + $0x1e4] sm:$0xf0]  ;;  %v1640_v56 = vld [vmem:[%s1989_s18 + $0xe4] sm:$0xf] }
  0xd0   : > { %v714_v7 = vpop.f32.mrf.mxu0 }
  0xd1   : > { %v715_v9 = vadd.f32 %v2075_v61, %v714_v7  ;;  %v883_v10 = vpop.f32.mrf.mxu1  ;;  %v962_v25 = vadd.f32 %v961_v6, %v793_v11 }
  0xd3   : > { %v884_v12 = vadd.f32 %v883_v10, %v715_v9  ;;  %v1067_v35 = vmax.f32 %v962_v25, 0.0 }
  0xd5   : > { %v1036_v20 = vmax.f32 %v884_v12, 0.0 }
  0xd6   : > { %v794_v23 = vpop.f32.mrf.mxu2 }
  0xd7   : > { %v1705_v26 = vpack.c.bf16 %v1036_v20, %v1035_v19  ;;  %v795_v27 = vadd.f32 %v2075_v61, %v794_v23  ;;  %v963_v28 = vpop.f32.mrf.mxu3  ;;  %v1639_v19 = vld [vmem:[%s1989_s18 + $0xd4] sm:$0xf0]  ;;  %v1523_v20 = vld [vmem:[%s1989_s18 + $0x1d0] sm:$0xf]  ;;  %v1397_v23 = vld [vmem:[%s1989_s18 + $0xd8] sm:$0xf0] }
  0xd8   : > { %v717_v30 = vpop.f32.mrf.mxu0 }
  0xd9   : > { %1853 = vst [vmem:[%s2092_s4 + $0x10] sm:$0xff] %v1705_v26   ;;  %v964_v33 = vadd.f32 %v963_v28, %v795_v27  ;;  %v886_v34 = vpop.f32.mrf.mxu1  ;;  %v718_v38 = vadd.f32 %v2075_v61, %v717_v30  ;;  %v1670_v26 = vld [vmem:[%s1989_s18 + $0x1d4] sm:$0xf]  ;;  %v1525_v27 = vld [vmem:[%s1989_s18 + $0x1d8] sm:$0xf0] }
  0xdb   : > { %v1068_v36 = vmax.f32 %v964_v33, 0.0  ;;  %756 = vmatmul.bf16.gmra.mxu0 %v1380_v24  ;;  %836 = vmatmul.bf16.gmra.mxu2 %v1508_v29  ;;  %v887_v42 = vadd.f32 %v886_v34, %v718_v38  ;;  %v1396_v29 = vor.u32 %v1639_v19, %v1395_v18  ;;  %v1524_v34 = vor.u32 %v1671_v21, %v1523_v20 }
  0xdc   : > { %925 = vmatmul.bf16.gmra.mxu1 %v1384_v31  ;;  %1005 = vmatmul.bf16.gmra.mxu3 %v1512_v32 }
  0xdd   : > { %v1785_v37 = vpack.c.bf16 %v1068_v36, %v1067_v35  ;;  %v1037_v53 = vmax.f32 %v887_v42, 0.0  ;;  %v1400_v36 = vor.u32 %v1638_v22, %v1397_v23  ;;  %v1411_v23 = vld [vmem:[%s1989_s18 + $0xf0] sm:$0xf] }
  0xde   : > { %v797_v39 = vpop.f32.mrf.mxu2 }
  0xdf   : > { %1869 = vst [vmem:[%s2092_s4 + $0x90] sm:$0xff] %v1785_v37   ;;  %v966_v40 = vpop.f32.mrf.mxu3  ;;  %v798_v45 = vadd.f32 %v2075_v61, %v797_v39  ;;  %v1528_v37 = vor.u32 %v1670_v26, %v1525_v27  ;;  %v1675_v26 = vld [vmem:[%s1989_s18 + $0x1f4] sm:$0xf0]  ;;  %v1642_v27 = vld [vmem:[%s1989_s18 + $0xf4] sm:$0xf] }
  0xe0   : > { %v719_v41 = vpop.f32.mrf.mxu0 }
  0xe1   : > { %v720_v43 = vadd.f32 %v2075_v61, %v719_v41  ;;  %v888_v44 = vpop.f32.mrf.mxu1  ;;  %v967_v59 = vadd.f32 %v966_v40, %v798_v45 }
  0xe3   : > { %v889_v46 = vadd.f32 %v888_v44, %v720_v43  ;;  %v1069_v6 = vmax.f32 %v967_v59, 0.0 }
  0xe5   : > { %v1038_v54 = vmax.f32 %v889_v46, 0.0 }
  0xe6   : > { %v799_v57 = vpop.f32.mrf.mxu2 }
  0xe7   : > { %v1710_v60 = vpack.c.bf16 %v1038_v54, %v1037_v53  ;;  %v800_v62 = vadd.f32 %v2075_v61, %v799_v57  ;;  %v968_v63 = vpop.f32.mrf.mxu3  ;;  %v1641_v53 = vld [vmem:[%s1989_s18 + $0xe4] sm:$0xf0]  ;;  %v1531_v54 = vld [vmem:[%s1989_s18 + $0x1e0] sm:$0xf]  ;;  %v1405_v57 = vld [vmem:[%s1989_s18 + $0xe8] sm:$0xf0] }
  0xe8   : > { %v722_v1 = vpop.f32.mrf.mxu0 }
  0xe9   : > { %1854 = vst [vmem:[%s2092_s4 + $0x18] sm:$0xff] %v1710_v60   ;;  %v969_v4 = vadd.f32 %v968_v63, %v800_v62  ;;  %v891_v5 = vpop.f32.mrf.mxu1  ;;  %v723_v9 = vadd.f32 %v2075_v61, %v722_v1  ;;  %v1672_v60 = vld [vmem:[%s1989_s18 + $0x1e4] sm:$0xf]  ;;  %v1533_v62 = vld [vmem:[%s1989_s18 + $0x1e8] sm:$0xf0] }
  0xeb   : > { %v1070_v7 = vmax.f32 %v969_v4, 0.0  ;;  %761 = vmatmul.bf16.gmra.mxu0 %v1388_v58  ;;  %841 = vmatmul.bf16.gmra.mxu2 %v1516_v0  ;;  %v892_v13 = vadd.f32 %v891_v5, %v723_v9  ;;  %v1404_v0 = vor.u32 %v1641_v53, %v1403_v52  ;;  %v1532_v5 = vor.u32 %v1673_v55, %v1531_v54 }
  0xec   : > { %930 = vmatmul.bf16.gmra.mxu1 %v1392_v2  ;;  %1010 = vmatmul.bf16.gmra.mxu3 %v1520_v3 }
  0xed   : > { %v1790_v8 = vpack.c.bf16 %v1070_v7, %v1069_v6  ;;  %v1039_v24 = vmax.f32 %v892_v13, 0.0  ;;  %v1408_v7 = vor.u32 %v1640_v56, %v1405_v57 }
  0xee   : > { %v802_v10 = vpop.f32.mrf.mxu2 }
  0xef   : > { %1870 = vst [vmem:[%s2092_s4 + $0x98] sm:$0xff] %v1790_v8   ;;  %v971_v11 = vpop.f32.mrf.mxu3  ;;  %v803_v16 = vadd.f32 %v2075_v61, %v802_v10  ;;  %v1536_v8 = vor.u32 %v1672_v60, %v1533_v62 }
  0xf0   : > { %v724_v12 = vpop.f32.mrf.mxu0 }
  0xf1   : > { %v725_v14 = vadd.f32 %v2075_v61, %v724_v12  ;;  %v893_v15 = vpop.f32.mrf.mxu1  ;;  %v972_v30 = vadd.f32 %v971_v11, %v803_v16 }
  0xf3   : > { %v894_v17 = vadd.f32 %v893_v15, %v725_v14  ;;  %v1071_v40 = vmax.f32 %v972_v30, 0.0 }
  0xf5   : > { %v1040_v25 = vmax.f32 %v894_v17, 0.0 }
  0xf6   : > { %v804_v28 = vpop.f32.mrf.mxu2 }
  0xf7   : > { %v1715_v31 = vpack.c.bf16 %v1040_v25, %v1039_v24  ;;  %v805_v32 = vadd.f32 %v2075_v61, %v804_v28  ;;  %v973_v33 = vpop.f32.mrf.mxu3  ;;  %v1643_v24 = vld [vmem:[%s1989_s18 + $0xf4] sm:$0xf0]  ;;  %v1539_v25 = vld [vmem:[%s1989_s18 + $0x1f0] sm:$0xf]  ;;  %v1413_v28 = vld [vmem:[%s1989_s18 + $0xf8] sm:$0xf0] }
  0xf8   : > { %v727_v35 = vpop.f32.mrf.mxu0 }
  0xf9   : > { %1855 = vst [vmem:[%s2092_s4 + $0x20] sm:$0xff] %v1715_v31   ;;  %v974_v38 = vadd.f32 %v973_v33, %v805_v32  ;;  %v896_v39 = vpop.f32.mrf.mxu1  ;;  %v728_v43 = vadd.f32 %v2075_v61, %v727_v35  ;;  %v1674_v31 = vld [vmem:[%s1989_s18 + $0x1f4] sm:$0xf]  ;;  %v1541_v32 = vld [vmem:[%s1989_s18 + $0x1f8] sm:$0xf0] }
  0xfb   : > { %v1072_v41 = vmax.f32 %v974_v38, 0.0  ;;  %766 = vmatmul.bf16.gmra.mxu0 %v1396_v29  ;;  %846 = vmatmul.bf16.gmra.mxu2 %v1524_v34  ;;  %v897_v47 = vadd.f32 %v896_v39, %v728_v43  ;;  %v1412_v34 = vor.u32 %v1643_v24, %v1411_v23  ;;  %v1540_v39 = vor.u32 %v1675_v26, %v1539_v25 }
  0xfc   : > { %935 = vmatmul.bf16.gmra.mxu1 %v1400_v36  ;;  %1015 = vmatmul.bf16.gmra.mxu3 %v1528_v37 }
  0xfd   : > { %v1795_v42 = vpack.c.bf16 %v1072_v41, %v1071_v40  ;;  %v1041_v58 = vmax.f32 %v897_v47, 0.0  ;;  %v1416_v41 = vor.u32 %v1642_v27, %v1413_v28 }
  0xfe   : > { %v807_v44 = vpop.f32.mrf.mxu2 }
  0xff   : > { %1871 = vst [vmem:[%s2092_s4 + $0xa0] sm:$0xff] %v1795_v42   ;;  %v976_v45 = vpop.f32.mrf.mxu3  ;;  %v808_v50 = vadd.f32 %v2075_v61, %v807_v44  ;;  %v1544_v42 = vor.u32 %v1674_v31, %v1541_v32 }
 0x100   : > { %v729_v46 = vpop.f32.mrf.mxu0 }
 0x101   : > { %v730_v48 = vadd.f32 %v2075_v61, %v729_v46  ;;  %v898_v49 = vpop.f32.mrf.mxu1  ;;  %v977_v1 = vadd.f32 %v976_v45, %v808_v50 }
 0x103   : > { %v899_v51 = vadd.f32 %v898_v49, %v730_v48  ;;  %v1073_v11 = vmax.f32 %v977_v1, 0.0 }
 0x105   : > { %v1042_v59 = vmax.f32 %v899_v51, 0.0 }
 0x106   : > { %v809_v63 = vpop.f32.mrf.mxu2 }
 0x107   : > { %v1720_v2 = vpack.c.bf16 %v1042_v59, %v1041_v58  ;;  %v810_v3 = vadd.f32 %v2075_v61, %v809_v63  ;;  %v978_v4 = vpop.f32.mrf.mxu3 }
 0x108   : > { %v732_v6 = vpop.f32.mrf.mxu0 }
 0x109   : > { %1856 = vst [vmem:[%s2092_s4 + $0x28] sm:$0xff] %v1720_v2   ;;  %v979_v9 = vadd.f32 %v978_v4, %v810_v3  ;;  %v901_v10 = vpop.f32.mrf.mxu1  ;;  %v733_v14 = vadd.f32 %v2075_v61, %v732_v6 }
 0x10b   : > { %v1074_v12 = vmax.f32 %v979_v9, 0.0  ;;  %771 = vmatmul.bf16.gmra.mxu0 %v1404_v0  ;;  %851 = vmatmul.bf16.gmra.mxu2 %v1532_v5  ;;  %v902_v18 = vadd.f32 %v901_v10, %v733_v14 }
 0x10c   : > { %940 = vmatmul.bf16.gmra.mxu1 %v1408_v7  ;;  %1020 = vmatmul.bf16.gmra.mxu3 %v1536_v8 }
 0x10d   : > { %v1800_v13 = vpack.c.bf16 %v1074_v12, %v1073_v11  ;;  %v1043_v29 = vmax.f32 %v902_v18, 0.0 }
 0x10e   : > { %v812_v15 = vpop.f32.mrf.mxu2 }
 0x10f   : > { %1872 = vst [vmem:[%s2092_s4 + $0xa8] sm:$0xff] %v1800_v13   ;;  %v981_v16 = vpop.f32.mrf.mxu3  ;;  %v813_v21 = vadd.f32 %v2075_v61, %v812_v15 }
 0x110   : > { %v734_v17 = vpop.f32.mrf.mxu0 }
 0x111   : > { %v735_v19 = vadd.f32 %v2075_v61, %v734_v17  ;;  %v903_v20 = vpop.f32.mrf.mxu1  ;;  %v982_v35 = vadd.f32 %v981_v16, %v813_v21 }
 0x113   : > { %v904_v22 = vadd.f32 %v903_v20, %v735_v19  ;;  %v1075_v45 = vmax.f32 %v982_v35, 0.0 }
 0x115   : > { %v1044_v30 = vmax.f32 %v904_v22, 0.0 }
 0x116   : > { %v814_v33 = vpop.f32.mrf.mxu2 }
 0x117   : > { %v1725_v36 = vpack.c.bf16 %v1044_v30, %v1043_v29  ;;  %v815_v37 = vadd.f32 %v2075_v61, %v814_v33  ;;  %v983_v38 = vpop.f32.mrf.mxu3 }
 0x118   : > { %v737_v40 = vpop.f32.mrf.mxu0 }
 0x119   : > { %1857 = vst [vmem:[%s2092_s4 + $0x30] sm:$0xff] %v1725_v36   ;;  %v984_v43 = vadd.f32 %v983_v38, %v815_v37  ;;  %v906_v44 = vpop.f32.mrf.mxu1  ;;  %v738_v48 = vadd.f32 %v2075_v61, %v737_v40 }
 0x11b   : > { %v1076_v46 = vmax.f32 %v984_v43, 0.0  ;;  %776 = vmatmul.bf16.gmra.mxu0 %v1412_v34  ;;  %856 = vmatmul.bf16.gmra.mxu2 %v1540_v39  ;;  %v907_v52 = vadd.f32 %v906_v44, %v738_v48 }
 0x11c   : > { %945 = vmatmul.bf16.gmra.mxu1 %v1416_v41  ;;  %1025 = vmatmul.bf16.gmra.mxu3 %v1544_v42 }
 0x11d   : > { %v1805_v47 = vpack.c.bf16 %v1076_v46, %v1075_v45  ;;  %v1045_v57 = vmax.f32 %v907_v52, 0.0 }
 0x11e   : > { %v817_v49 = vpop.f32.mrf.mxu2 }
 0x11f   : > { %1873 = vst [vmem:[%s2092_s4 + $0xb0] sm:$0xff] %v1805_v47   ;;  %v986_v50 = vpop.f32.mrf.mxu3  ;;  %v818_v55 = vadd.f32 %v2075_v61, %v817_v49 }
 0x120   : > { %v739_v51 = vpop.f32.mrf.mxu0 }
 0x121   : > { %v740_v53 = vadd.f32 %v2075_v61, %v739_v51  ;;  %v908_v54 = vpop.f32.mrf.mxu1  ;;  %v987_v60 = vadd.f32 %v986_v50, %v818_v55 }
 0x123   : > { %v909_v56 = vadd.f32 %v908_v54, %v740_v53  ;;  %v1077_v4 = vmax.f32 %v987_v60, 0.0 }
 0x125   : > { %v1046_v58 = vmax.f32 %v909_v56, 0.0 }
 0x126   : > { %v819_v59 = vpop.f32.mrf.mxu2 }
 0x127   : > { %v1730_v62 = vpack.c.bf16 %v1046_v58, %v1045_v57  ;;  %v820_v63 = vadd.f32 %v2075_v61, %v819_v59  ;;  %v988_v0 = vpop.f32.mrf.mxu3 }
 0x128   : > { %v742_v1 = vpop.f32.mrf.mxu0 }
 0x129   : > { %1858 = vst [vmem:[%s2092_s4 + $0x38] sm:$0xff] %v1730_v62   ;;  %v989_v2 = vadd.f32 %v988_v0, %v820_v63  ;;  %v911_v3 = vpop.f32.mrf.mxu1  ;;  %v743_v7 = vadd.f32 %v2075_v61, %v742_v1 }
 0x12b   : > { %v1078_v5 = vmax.f32 %v989_v2, 0.0  ;;  %v912_v11 = vadd.f32 %v911_v3, %v743_v7 }
 0x12d   : > { %v1810_v6 = vpack.c.bf16 %v1078_v5, %v1077_v4  ;;  %v1047_v16 = vmax.f32 %v912_v11, 0.0 }
 0x12e   : > { %v822_v8 = vpop.f32.mrf.mxu2 }
 0x12f   : > { %1874 = vst [vmem:[%s2092_s4 + $0xb8] sm:$0xff] %v1810_v6   ;;  %v991_v9 = vpop.f32.mrf.mxu3  ;;  %v823_v14 = vadd.f32 %v2075_v61, %v822_v8 }
 0x130   : > { %v744_v10 = vpop.f32.mrf.mxu0 }
 0x131   : > { %v745_v12 = vadd.f32 %v2075_v61, %v744_v10  ;;  %v913_v13 = vpop.f32.mrf.mxu1  ;;  %v992_v19 = vadd.f32 %v991_v9, %v823_v14 }
 0x133   : > { %v914_v15 = vadd.f32 %v913_v13, %v745_v12  ;;  %v1079_v26 = vmax.f32 %v992_v19, 0.0 }
 0x135   : > { %v1048_v17 = vmax.f32 %v914_v15, 0.0 }
 0x136   : > { %v824_v18 = vpop.f32.mrf.mxu2 }
 0x137   : > { %v1735_v20 = vpack.c.bf16 %v1048_v17, %v1047_v16  ;;  %v825_v21 = vadd.f32 %v2075_v61, %v824_v18  ;;  %v993_v22 = vpop.f32.mrf.mxu3 }
 0x138   : > { %v747_v23 = vpop.f32.mrf.mxu0 }
 0x139   : > { %1859 = vst [vmem:[%s2092_s4 + $0x40] sm:$0xff] %v1735_v20   ;;  %v994_v24 = vadd.f32 %v993_v22, %v825_v21  ;;  %v916_v25 = vpop.f32.mrf.mxu1  ;;  %v748_v29 = vadd.f32 %v2075_v61, %v747_v23 }
 0x13b   : > { %v1080_v27 = vmax.f32 %v994_v24, 0.0  ;;  %v917_v33 = vadd.f32 %v916_v25, %v748_v29 }
 0x13d   : > { %v1815_v28 = vpack.c.bf16 %v1080_v27, %v1079_v26  ;;  %v1049_v38 = vmax.f32 %v917_v33, 0.0 }
 0x13e   : > { %v827_v30 = vpop.f32.mrf.mxu2 }
 0x13f   : > { %1875 = vst [vmem:[%s2092_s4 + $0xc0] sm:$0xff] %v1815_v28   ;;  %v996_v31 = vpop.f32.mrf.mxu3  ;;  %v828_v36 = vadd.f32 %v2075_v61, %v827_v30 }
 0x140   : > { %v749_v32 = vpop.f32.mrf.mxu0 }
 0x141   : > { %v750_v34 = vadd.f32 %v2075_v61, %v749_v32  ;;  %v918_v35 = vpop.f32.mrf.mxu1  ;;  %v997_v41 = vadd.f32 %v996_v31, %v828_v36 }
 0x143   : > { %v919_v37 = vadd.f32 %v918_v35, %v750_v34  ;;  %v1081_v48 = vmax.f32 %v997_v41, 0.0 }
 0x145   : > { %v1050_v39 = vmax.f32 %v919_v37, 0.0 }
 0x146   : > { %v829_v40 = vpop.f32.mrf.mxu2 }
 0x147   : > { %v1740_v42 = vpack.c.bf16 %v1050_v39, %v1049_v38  ;;  %v830_v43 = vadd.f32 %v2075_v61, %v829_v40  ;;  %v998_v44 = vpop.f32.mrf.mxu3 }
 0x148   : > { %v752_v45 = vpop.f32.mrf.mxu0 }
 0x149   : > { %1860 = vst [vmem:[%s2092_s4 + $0x48] sm:$0xff] %v1740_v42   ;;  %v999_v46 = vadd.f32 %v998_v44, %v830_v43  ;;  %v921_v47 = vpop.f32.mrf.mxu1  ;;  %v753_v51 = vadd.f32 %v2075_v61, %v752_v45 }
 0x14b   : > { %v1082_v49 = vmax.f32 %v999_v46, 0.0  ;;  %v922_v55 = vadd.f32 %v921_v47, %v753_v51 }
 0x14d   : > { %v1820_v50 = vpack.c.bf16 %v1082_v49, %v1081_v48  ;;  %v1051_v60 = vmax.f32 %v922_v55, 0.0 }
 0x14e   : > { %v832_v52 = vpop.f32.mrf.mxu2 }
 0x14f   : > { %1876 = vst [vmem:[%s2092_s4 + $0xc8] sm:$0xff] %v1820_v50   ;;  %v1001_v53 = vpop.f32.mrf.mxu3  ;;  %v833_v58 = vadd.f32 %v2075_v61, %v832_v52 }
 0x150   : > { %v754_v54 = vpop.f32.mrf.mxu0 }
 0x151   : > { %v755_v56 = vadd.f32 %v2075_v61, %v754_v54  ;;  %v923_v57 = vpop.f32.mrf.mxu1  ;;  %v1002_v0 = vadd.f32 %v1001_v53, %v833_v58 }
 0x153   : > { %v924_v59 = vadd.f32 %v923_v57, %v755_v56  ;;  %v1083_v7 = vmax.f32 %v1002_v0, 0.0 }
 0x155   : > { %v1052_v62 = vmax.f32 %v924_v59, 0.0 }
 0x156   : > { %v834_v63 = vpop.f32.mrf.mxu2 }
 0x157   : > { %v1745_v1 = vpack.c.bf16 %v1052_v62, %v1051_v60  ;;  %v835_v2 = vadd.f32 %v2075_v61, %v834_v63  ;;  %v1003_v3 = vpop.f32.mrf.mxu3 }
 0x158   : > { %v757_v4 = vpop.f32.mrf.mxu0 }
 0x159   : > { %1861 = vst [vmem:[%s2092_s4 + $0x50] sm:$0xff] %v1745_v1   ;;  %v1004_v5 = vadd.f32 %v1003_v3, %v835_v2  ;;  %v926_v6 = vpop.f32.mrf.mxu1  ;;  %v758_v10 = vadd.f32 %v2075_v61, %v757_v4 }
 0x15b   : > { %v1084_v8 = vmax.f32 %v1004_v5, 0.0  ;;  %v927_v14 = vadd.f32 %v926_v6, %v758_v10 }
 0x15d   : > { %v1825_v9 = vpack.c.bf16 %v1084_v8, %v1083_v7  ;;  %v1053_v19 = vmax.f32 %v927_v14, 0.0 }
 0x15e   : > { %v837_v11 = vpop.f32.mrf.mxu2 }
 0x15f   : > { %1877 = vst [vmem:[%s2092_s4 + $0xd0] sm:$0xff] %v1825_v9   ;;  %v1006_v12 = vpop.f32.mrf.mxu3  ;;  %v838_v17 = vadd.f32 %v2075_v61, %v837_v11 }
 0x160   : > { %v759_v13 = vpop.f32.mrf.mxu0 }
 0x161   : > { %v760_v15 = vadd.f32 %v2075_v61, %v759_v13  ;;  %v928_v16 = vpop.f32.mrf.mxu1  ;;  %v1007_v22 = vadd.f32 %v1006_v12, %v838_v17 }
 0x163   : > { %v929_v18 = vadd.f32 %v928_v16, %v760_v15  ;;  %v1085_v29 = vmax.f32 %v1007_v22, 0.0 }
 0x165   : > { %v1054_v20 = vmax.f32 %v929_v18, 0.0 }
 0x166   : > { %v839_v21 = vpop.f32.mrf.mxu2 }
 0x167   : > { %v1750_v23 = vpack.c.bf16 %v1054_v20, %v1053_v19  ;;  %v840_v24 = vadd.f32 %v2075_v61, %v839_v21  ;;  %v1008_v25 = vpop.f32.mrf.mxu3 }
 0x168   : > { %v762_v26 = vpop.f32.mrf.mxu0 }
 0x169   : > { %1862 = vst [vmem:[%s2092_s4 + $0x58] sm:$0xff] %v1750_v23   ;;  %v1009_v27 = vadd.f32 %v1008_v25, %v840_v24  ;;  %v931_v28 = vpop.f32.mrf.mxu1  ;;  %v763_v32 = vadd.f32 %v2075_v61, %v762_v26 }
 0x16b   : > { %v1086_v30 = vmax.f32 %v1009_v27, 0.0  ;;  %v932_v36 = vadd.f32 %v931_v28, %v763_v32 }
 0x16d   : > { %v1830_v31 = vpack.c.bf16 %v1086_v30, %v1085_v29  ;;  %v1055_v41 = vmax.f32 %v932_v36, 0.0 }
 0x16e   : > { %v842_v33 = vpop.f32.mrf.mxu2 }
 0x16f   : > { %1878 = vst [vmem:[%s2092_s4 + $0xd8] sm:$0xff] %v1830_v31   ;;  %v1011_v34 = vpop.f32.mrf.mxu3  ;;  %v843_v39 = vadd.f32 %v2075_v61, %v842_v33 }
 0x170   : > { %v764_v35 = vpop.f32.mrf.mxu0 }
 0x171   : > { %v765_v37 = vadd.f32 %v2075_v61, %v764_v35  ;;  %v933_v38 = vpop.f32.mrf.mxu1  ;;  %v1012_v44 = vadd.f32 %v1011_v34, %v843_v39 }
 0x173   : > { %v934_v40 = vadd.f32 %v933_v38, %v765_v37  ;;  %v1087_v51 = vmax.f32 %v1012_v44, 0.0 }
 0x175   : > { %v1056_v42 = vmax.f32 %v934_v40, 0.0 }
 0x176   : > { %v844_v43 = vpop.f32.mrf.mxu2 }
 0x177   : > { %v1755_v45 = vpack.c.bf16 %v1056_v42, %v1055_v41  ;;  %v845_v46 = vadd.f32 %v2075_v61, %v844_v43  ;;  %v1013_v47 = vpop.f32.mrf.mxu3 }
 0x178   : > { %v767_v48 = vpop.f32.mrf.mxu0 }
 0x179   : > { %1863 = vst [vmem:[%s2092_s4 + $0x60] sm:$0xff] %v1755_v45   ;;  %v1014_v49 = vadd.f32 %v1013_v47, %v845_v46  ;;  %v936_v50 = vpop.f32.mrf.mxu1  ;;  %v768_v54 = vadd.f32 %v2075_v61, %v767_v48 }
 0x17b   : > { %v1088_v52 = vmax.f32 %v1014_v49, 0.0  ;;  %v937_v58 = vadd.f32 %v936_v50, %v768_v54 }
 0x17d   : > { %v1835_v53 = vpack.c.bf16 %v1088_v52, %v1087_v51  ;;  %v1057_v0 = vmax.f32 %v937_v58, 0.0 }
 0x17e   : > { %v847_v55 = vpop.f32.mrf.mxu2 }
 0x17f   : > { %1879 = vst [vmem:[%s2092_s4 + $0xe0] sm:$0xff] %v1835_v53   ;;  %v1016_v56 = vpop.f32.mrf.mxu3  ;;  %v848_v62 = vadd.f32 %v2075_v61, %v847_v55 }
 0x180   : > { %v769_v57 = vpop.f32.mrf.mxu0 }
 0x181   : > { %v770_v59 = vadd.f32 %v2075_v61, %v769_v57  ;;  %v938_v60 = vpop.f32.mrf.mxu1  ;;  %v1017_v3 = vadd.f32 %v1016_v56, %v848_v62 }
 0x183   : > { %v939_v63 = vadd.f32 %v938_v60, %v770_v59  ;;  %v1089_v10 = vmax.f32 %v1017_v3, 0.0 }
 0x185   : > { %v1058_v1 = vmax.f32 %v939_v63, 0.0 }
 0x186   : > { %v849_v2 = vpop.f32.mrf.mxu2 }
 0x187   : > { %v1760_v4 = vpack.c.bf16 %v1058_v1, %v1057_v0  ;;  %v850_v5 = vadd.f32 %v2075_v61, %v849_v2  ;;  %v1018_v6 = vpop.f32.mrf.mxu3 }
 0x188   : > { %v772_v7 = vpop.f32.mrf.mxu0 }
 0x189   : > { %1864 = vst [vmem:[%s2092_s4 + $0x68] sm:$0xff] %v1760_v4   ;;  %v1019_v8 = vadd.f32 %v1018_v6, %v850_v5  ;;  %v941_v9 = vpop.f32.mrf.mxu1  ;;  %v773_v13 = vadd.f32 %v2075_v61, %v772_v7 }
 0x18b   : > { %v1090_v11 = vmax.f32 %v1019_v8, 0.0  ;;  %v942_v17 = vadd.f32 %v941_v9, %v773_v13 }
 0x18d   : > { %v1840_v12 = vpack.c.bf16 %v1090_v11, %v1089_v10  ;;  %v1059_v22 = vmax.f32 %v942_v17, 0.0 }
 0x18e   : > { %v852_v14 = vpop.f32.mrf.mxu2 }
 0x18f   : > { %1880 = vst [vmem:[%s2092_s4 + $0xe8] sm:$0xff] %v1840_v12   ;;  %v1021_v15 = vpop.f32.mrf.mxu3  ;;  %v853_v20 = vadd.f32 %v2075_v61, %v852_v14 }
 0x190   : > { %v774_v16 = vpop.f32.mrf.mxu0 }
 0x191   : > { %v775_v18 = vadd.f32 %v2075_v61, %v774_v16  ;;  %v943_v19 = vpop.f32.mrf.mxu1  ;;  %v1022_v25 = vadd.f32 %v1021_v15, %v853_v20 }
 0x193   : > { %v944_v21 = vadd.f32 %v943_v19, %v775_v18  ;;  %v1091_v32 = vmax.f32 %v1022_v25, 0.0 }
 0x195   : > { %v1060_v23 = vmax.f32 %v944_v21, 0.0 }
 0x196   : > { %v854_v24 = vpop.f32.mrf.mxu2 }
 0x197   : > { %v1765_v26 = vpack.c.bf16 %v1060_v23, %v1059_v22  ;;  %v855_v27 = vadd.f32 %v2075_v61, %v854_v24  ;;  %v1023_v28 = vpop.f32.mrf.mxu3 }
 0x198   : > { %v777_v29 = vpop.f32.mrf.mxu0 }
 0x199   : > { %1865 = vst [vmem:[%s2092_s4 + $0x70] sm:$0xff] %v1765_v26   ;;  %v1024_v30 = vadd.f32 %v1023_v28, %v855_v27  ;;  %v946_v31 = vpop.f32.mrf.mxu1  ;;  %v778_v35 = vadd.f32 %v2075_v61, %v777_v29 }
 0x19b   : > { %v1092_v33 = vmax.f32 %v1024_v30, 0.0  ;;  %v947_v39 = vadd.f32 %v946_v31, %v778_v35 }
 0x19d   : > { %v1845_v34 = vpack.c.bf16 %v1092_v33, %v1091_v32  ;;  %v1061_v44 = vmax.f32 %v947_v39, 0.0 }
 0x19e   : > { %v857_v36 = vpop.f32.mrf.mxu2 }
 0x19f   : > { %1881 = vst [vmem:[%s2092_s4 + $0xf0] sm:$0xff] %v1845_v34   ;;  %v1026_v37 = vpop.f32.mrf.mxu3  ;;  %v858_v42 = vadd.f32 %v2075_v61, %v857_v36 }
 0x1a0   : > { %v779_v38 = vpop.f32.mrf.mxu0 }
 0x1a1   : > { %v780_v40 = vadd.f32 %v2075_v61, %v779_v38  ;;  %v948_v41 = vpop.f32.mrf.mxu1  ;;  %v1027_v47 = vadd.f32 %v1026_v37, %v858_v42 }
 0x1a3   : > { %v949_v43 = vadd.f32 %v948_v41, %v780_v40  ;;  %v1093_v52 = vmax.f32 %v1027_v47, 0.0 }
 0x1a5   : > { %v1062_v45 = vmax.f32 %v949_v43, 0.0 }
 0x1a6   : > { %v859_v46 = vpop.f32.mrf.mxu2 }
 0x1a7   : > { %v1770_v48 = vpack.c.bf16 %v1062_v45, %v1061_v44  ;;  %v860_v49 = vadd.f32 %v2075_v61, %v859_v46  ;;  %v1028_v50 = vpop.f32.mrf.mxu3 }
 0x1a9   : > { %1866 = vst [vmem:[%s2092_s4 + $0x78] sm:$0xff] %v1770_v48   ;;  %v1029_v51 = vadd.f32 %v1028_v50, %v860_v49 }
 0x1ab   : > { %v1094_v53 = vmax.f32 %v1029_v51, 0.0 }
 0x1ad   : > { %v1850_v54 = vpack.c.bf16 %v1094_v53, %v1093_v52 }
 0x1af   : > { %1882 = vst [vmem:[%s2092_s4 + $0xf8] sm:$0xff] %v1850_v54  }
 0x1b0 PF: > { %s13_s12 = sadd.s32 1, %s1914_s12  }
 0x1b1   : > { %p10_p4 = scmp.ge.s32.totalorder %s13_s12, 6  }
 0x1b3   :  { %12 = sbr.rel (!%p10_p4) target bundleno = 1 (0x1), region = 62 }

// kernel: simple_nn_forward.9
= control target key start
LH: loop header
LB: loop body
LE: loop exit
PB: predicated region body
PF: predicated region fallthrough
CT: control target
= control target key end

     0   :  { %s2542_s12 = smov 0   ;;  %s3540_s0 = inlined_call_operand.vmem [shape: bf16[512,512], index: 0, kind: input, shape index: {}]   ;;  %s3541_s1 = inlined_call_operand.vmem [shape: bf16[512,256], index: 1, kind: input, shape index: {}]   ;;  %s3542_s2 = inlined_call_operand.vmem [shape: f32[1,256], index: 2, kind: input, shape index: {}]   ;;  %s3543_s3 = inlined_call_operand.vmem [shape: bf16[512,256], index: 3, kind: output, shape index: {}]  }
   0x1 LB: > { %s1851_s13 = sadd.s32 4294967295, %s2520_s12   ;;  %p1855_p0 = scmp.ge.s32.totalorder %s2520_s12, 1  ;;  %s2520_s12 = sphi %s2542_s12, %s13_s12  }
   0x2   : > { %p139_p1 = scmp.lt.s32.totalorder %s2520_s12, 3 }
   0x4   : > { %p140_p2 = pnand %p1855_p0, %p139_p1 }
   0x6   : > { %143 = sbr.rel (%p140_p2) target bundleno = 692 (0x2b4), region = 32 }
   0xb   : > { %v2176_v0 = vld [vmem:[%s3541_s1 + $0x70] sm:$0xf]  ;;  %v2457_v1 = vld [vmem:[%s3541_s1 + $0x74] sm:$0xf0]  ;;  %v2168_v11 = vld [vmem:[%s3541_s1 + $0x60] sm:$0xf] }
   0xc   : > { %v2240_v2 = vld [vmem:[%s3541_s1 + $0xf0] sm:$0xf]  ;;  %v2177_v3 = vor.u32 %v2457_v1, %v2176_v0  ;;  %v2473_v4 = vld [vmem:[%s3541_s1 + $0xf4] sm:$0xf0]  ;;  %v2455_v13 = vld [vmem:[%s3541_s1 + $0x64] sm:$0xf0] }
   0xd   : > { %v2304_v5 = vld [vmem:[%s3541_s1 + $0x170] sm:$0xf]  ;;  %v2489_v6 = vld [vmem:[%s3541_s1 + $0x174] sm:$0xf0]  ;;  %v2241_v7 = vor.u32 %v2473_v4, %v2240_v2  ;;  %v2232_v14 = vld [vmem:[%s3541_s1 + $0xe0] sm:$0xf]  ;;  %v2169_v16 = vor.u32 %v2455_v13, %v2168_v11 }
   0xe   : > { %v2305_v8 = vor.u32 %v2489_v6, %v2304_v5  ;;  %v2368_v9 = vld [vmem:[%s3541_s1 + $0x1f0] sm:$0xf]  ;;  %v2505_v10 = vld [vmem:[%s3541_s1 + $0x1f4] sm:$0xf0]  ;;  %953 = vmatpush.bf16.msra.mxu0 %v2177_v3  ;;  %v2471_v15 = vld [vmem:[%s3541_s1 + $0xe4] sm:$0xf0] }
   0xf   : > { %v2369_v12 = vor.u32 %v2505_v10, %v2368_v9  ;;  %1042 = vmatpush.bf16.msra.mxu1 %v2241_v7  ;;  %v2233_v17 = vor.u32 %v2471_v15, %v2232_v14  ;;  %v2296_v18 = vld [vmem:[%s3541_s1 + $0x160] sm:$0xf]  ;;  %v2487_v19 = vld [vmem:[%s3541_s1 + $0x164] sm:$0xf0]  ;;  %v2160_v23 = vld [vmem:[%s3541_s1 + $0x50] sm:$0xf] }
  0x10   : > { %1131 = vmatpush.bf16.msra.mxu2 %v2305_v8  ;;  %v2360_v20 = vld [vmem:[%s3541_s1 + $0x1e0] sm:$0xf]  ;;  %v2297_v21 = vor.u32 %v2487_v19, %v2296_v18  ;;  %v2503_v22 = vld [vmem:[%s3541_s1 + $0x1e4] sm:$0xf0]  ;;  %v2453_v24 = vld [vmem:[%s3541_s1 + $0x54] sm:$0xf0] }
  0x11   : > { %1220 = vmatpush.bf16.msra.mxu3 %v2369_v12  ;;  %v2361_v25 = vor.u32 %v2503_v22, %v2360_v20  ;;  %v2224_v26 = vld [vmem:[%s3541_s1 + $0xd0] sm:$0xf]  ;;  %v2469_v27 = vld [vmem:[%s3541_s1 + $0xd4] sm:$0xf0]  ;;  %v2161_v29 = vor.u32 %v2453_v24, %v2160_v23  ;;  %v2152_v35 = vld [vmem:[%s3541_s1 + $0x40] sm:$0xf] }
  0x12   : > { %v2288_v28 = vld [vmem:[%s3541_s1 + $0x150] sm:$0xf]  ;;  %954 = vmatpush.bf16.msra.mxu0 %v2169_v16  ;;  %v2485_v30 = vld [vmem:[%s3541_s1 + $0x154] sm:$0xf0]  ;;  %v2225_v33 = vor.u32 %v2469_v27, %v2224_v26  ;;  %v2451_v36 = vld [vmem:[%s3541_s1 + $0x44] sm:$0xf0] }
  0x13   : > { %v2352_v31 = vld [vmem:[%s3541_s1 + $0x1d0] sm:$0xf]  ;;  %v2501_v32 = vld [vmem:[%s3541_s1 + $0x1d4] sm:$0xf0]  ;;  %1043 = vmatpush.bf16.msra.mxu1 %v2233_v17  ;;  %v2289_v34 = vor.u32 %v2485_v30, %v2288_v28  ;;  %v2216_v37 = vld [vmem:[%s3541_s1 + $0xc0] sm:$0xf]  ;;  %v2153_v44 = vor.u32 %v2451_v36, %v2152_v35 }
  0x14   : > { %1132 = vmatpush.bf16.msra.mxu2 %v2297_v21  ;;  %v2353_v38 = vor.u32 %v2501_v32, %v2352_v31  ;;  %v2467_v39 = vld [vmem:[%s3541_s1 + $0xc4] sm:$0xf0]  ;;  %v2280_v40 = vld [vmem:[%s3541_s1 + $0x140] sm:$0xf]  ;;  %v2144_v47 = vld [vmem:[%s3541_s1 + $0x30] sm:$0xf] }
  0x15   : > { %1221 = vmatpush.bf16.msra.mxu3 %v2361_v25  ;;  %v2483_v41 = vld [vmem:[%s3541_s1 + $0x144] sm:$0xf0]  ;;  %v2344_v42 = vld [vmem:[%s3541_s1 + $0x1c0] sm:$0xf]  ;;  %v2217_v45 = vor.u32 %v2467_v39, %v2216_v37  ;;  %v2449_v48 = vld [vmem:[%s3541_s1 + $0x34] sm:$0xf0] }
  0x16   : > { %v2499_v43 = vld [vmem:[%s3541_s1 + $0x1c4] sm:$0xf0]  ;;  %955 = vmatpush.bf16.msra.mxu0 %v2161_v29  ;;  %v2281_v46 = vor.u32 %v2483_v41, %v2280_v40  ;;  %v2208_v49 = vld [vmem:[%s3541_s1 + $0xb0] sm:$0xf]  ;;  %v2465_v51 = vld [vmem:[%s3541_s1 + $0xb4] sm:$0xf0]  ;;  %v2145_v56 = vor.u32 %v2449_v48, %v2144_v47 }
  0x17   : > { %1044 = vmatpush.bf16.msra.mxu1 %v2225_v33  ;;  %v2345_v50 = vor.u32 %v2499_v43, %v2344_v42  ;;  %v2272_v52 = vld [vmem:[%s3541_s1 + $0x130] sm:$0xf]  ;;  %v2481_v53 = vld [vmem:[%s3541_s1 + $0x134] sm:$0xf0]  ;;  %v2209_v57 = vor.u32 %v2465_v51, %v2208_v49  ;;  %v2136_v59 = vld [vmem:[%s3541_s1 + $0x20] sm:$0xf] }
  0x18   : > { %1133 = vmatpush.bf16.msra.mxu2 %v2289_v34  ;;  %v2336_v54 = vld [vmem:[%s3541_s1 + $0x1b0] sm:$0xf]  ;;  %v2497_v55 = vld [vmem:[%s3541_s1 + $0x1b4] sm:$0xf0]  ;;  %v2273_v58 = vor.u32 %v2481_v53, %v2272_v52  ;;  %v2447_v60 = vld [vmem:[%s3541_s1 + $0x24] sm:$0xf0] }
  0x19   : > { %1222 = vmatpush.bf16.msra.mxu3 %v2353_v38  ;;  %v2200_v61 = vld [vmem:[%s3541_s1 + $0xa0] sm:$0xf]  ;;  %v2337_v62 = vor.u32 %v2497_v55, %v2336_v54  ;;  %v2463_v63 = vld [vmem:[%s3541_s1 + $0xa4] sm:$0xf0]  ;;  %v2137_v4 = vor.u32 %v2447_v60, %v2136_v59  ;;  %v2128_v5 = vld [vmem:[%s3541_s1 + $0x10] sm:$0xf] }
  0x1a   : > { %956 = vmatpush.bf16.msra.mxu0 %v2153_v44  ;;  %v2264_v0 = vld [vmem:[%s3541_s1 + $0x120] sm:$0xf]  ;;  %v2479_v1 = vld [vmem:[%s3541_s1 + $0x124] sm:$0xf0]  ;;  %v2201_v6 = vor.u32 %v2463_v63, %v2200_v61  ;;  %v2445_v8 = vld [vmem:[%s3541_s1 + $0x14] sm:$0xf0] }
  0x1b   : > { %1045 = vmatpush.bf16.msra.mxu1 %v2217_v45  ;;  %v2328_v2 = vld [vmem:[%s3541_s1 + $0x1a0] sm:$0xf]  ;;  %v2495_v3 = vld [vmem:[%s3541_s1 + $0x1a4] sm:$0xf0]  ;;  %v2265_v7 = vor.u32 %v2479_v1, %v2264_v0  ;;  %v2192_v9 = vld [vmem:[%s3541_s1 + $0x90] sm:$0xf]  ;;  %v2129_v16 = vor.u32 %v2445_v8, %v2128_v5 }
  0x1c   : > { %1134 = vmatpush.bf16.msra.mxu2 %v2281_v46  ;;  %v2461_v10 = vld [vmem:[%s3541_s1 + $0x94] sm:$0xf0]  ;;  %v2329_v11 = vor.u32 %v2495_v3, %v2328_v2  ;;  %v2256_v12 = vld [vmem:[%s3541_s1 + $0x110] sm:$0xf]  ;;  %s1856_s22 = sshll.u32 %s1851_s13, 5 }
  0x1d   : > { %1223 = vmatpush.bf16.msra.mxu3 %v2345_v50  ;;  %v2477_v13 = vld [vmem:[%s3541_s1 + $0x114] sm:$0xf0]  ;;  %v2320_v14 = vld [vmem:[%s3541_s1 + $0x190] sm:$0xf]  ;;  %p166_p3 = scmp.lt.s32.totalorder %s1856_s22, 63  ;;  %v2193_v20 = vor.u32 %v2461_v10, %v2192_v9 }
  0x1e   : > { %957 = vmatpush.bf16.msra.mxu0 %v2145_v56  ;;  %v2493_v15 = vld [vmem:[%s3541_s1 + $0x194] sm:$0xf0]  ;;  %v2120_v17 = vld [vmem:[%s3541_s1] sm:$0xf]  ;;  %v2443_v18 = vld [vmem:[%s3541_s1 + $0x4] sm:$0xf0]  ;;  %v2257_v21 = vor.u32 %v2477_v13, %v2256_v12 }
  0x1f   : > { %1046 = vmatpush.bf16.msra.mxu1 %v2209_v57  ;;  %v2184_v19 = vld [vmem:[%s3541_s1 + $0x80] sm:$0xf]  ;;  %v2459_v22 = vld [vmem:[%s3541_s1 + $0x84] sm:$0xf0]  ;;  %s3633_s22 = smov (!%p166_p3, %s1856_s22), 63  ;;  %v2321_v24 = vor.u32 %v2493_v15, %v2320_v14  ;;  %v2121_v30 = vor.u32 %v2443_v18, %v2120_v17 }
  0x20   : > { %1135 = vmatpush.bf16.msra.mxu2 %v2273_v58  ;;  %v2248_v23 = vld [vmem:[%s3541_s1 + $0x100] sm:$0xf]  ;;  %v2475_v25 = vld [vmem:[%s3541_s1 + $0x104] sm:$0xf0]  ;;  %s2376_s17 = sshll.u32 %s3633_s22, 4  ;;  %v2185_v35 = vor.u32 %v2459_v22, %v2184_v19 }
  0x21   : > { %1224 = vmatpush.bf16.msra.mxu3 %v2337_v62  ;;  %v2312_v26 = vld [vmem:[%s3541_s1 + $0x180] sm:$0xf]  ;;  %v2491_v27 = vld [vmem:[%s3541_s1 + $0x184] sm:$0xf0]  ;;  %v2488_v28 = vld [vmem:[%s3541_s1 + $0x174] sm:$0xf]  ;;  %s2756_s25 = scalar_lea.vmem %s3540_s0, %s2376_s17  ;;  %v2249_v36 = vor.u32 %v2475_v25, %v2248_v23 }
  0x22   : > { %958 = vmatpush.bf16.msra.mxu0 %v2137_v4  ;;  %v2306_v29 = vld [vmem:[%s3541_s1 + $0x178] sm:$0xf0]  ;;  %v2456_v31 = vld [vmem:[%s3541_s1 + $0x74] sm:$0xf]  ;;  %v1864_v37 = vld [vmem:[%s2756_s25] sm:$0xf]  ;;  %v2313_v41 = vor.u32 %v2491_v27, %v2312_v26 }
  0x23   : > { %1047 = vmatpush.bf16.msra.mxu1 %v2201_v6  ;;  %v2178_v32 = vld [vmem:[%s3541_s1 + $0x78] sm:$0xf0]  ;;  %v2504_v33 = vld [vmem:[%s3541_s1 + $0x1f4] sm:$0xf]  ;;  %v2380_v38 = vld [vmem:[%s2756_s25 + $0xc] sm:$0xf0]  ;;  %v2309_v45 = vor.u32 %v2488_v28, %v2306_v29 }
  0x24   : > { %1136 = vmatpush.bf16.msra.mxu2 %v2265_v7  ;;  %v2370_v34 = vld [vmem:[%s3541_s1 + $0x1f8] sm:$0xf0]  ;;  %v2378_v39 = vld [vmem:[%s2756_s25 + $0x4] sm:$0xf]  ;;  %v2472_v40 = vld [vmem:[%s3541_s1 + $0xf4] sm:$0xf]  ;;  %v2779_v46 = vor.u32 %v2380_v38, %v1864_v37  ;;  %v2181_v54 = vor.u32 %v2456_v31, %v2178_v32 }
  0x25   : > { %1225 = vmatpush.bf16.msra.mxu3 %v2329_v11  ;;  %v1866_v42 = vld [vmem:[%s2756_s25 + $0x10] sm:$0xf0]  ;;  %v1872_v43 = vld [vmem:[%s2756_s25 + $0x8] sm:$0xf]  ;;  %v2381_v44 = vld [vmem:[%s2756_s25 + $0x14] sm:$0xf0]  ;;  %v2373_v49 = vor.u32 %v2504_v33, %v2370_v34 }
  0x26   : > { %959 = vmatpush.bf16.msra.mxu0 %v2129_v16  ;;  %v2379_v47 = vld [vmem:[%s2756_s25 + $0xc] sm:$0xf]  ;;  %v1874_v48 = vld [vmem:[%s2756_s25 + $0x18] sm:$0xf0]  ;;  %v2786_v51 = vor.u32 %v2378_v39, %v1866_v42  ;;  %v2788_v52 = vor.u32 %v2381_v44, %v1872_v43  ;;  %v2486_v56 = vld [vmem:[%s3541_s1 + $0x164] sm:$0xf] }
  0x27   : > { %1048 = vmatpush.bf16.msra.mxu1 %v2193_v20  ;;  %v2242_v50 = vld [vmem:[%s3541_s1 + $0xf8] sm:$0xf0]  ;;  %v2790_v53 = vor.u32 %v2379_v47, %v1874_v48  ;;  %v2298_v57 = vld [vmem:[%s3541_s1 + $0x168] sm:$0xf0]  ;;  %v2454_v58 = vld [vmem:[%s3541_s1 + $0x64] sm:$0xf] }
  0x28   : > { %1137 = vmatpush.bf16.msra.mxu2 %v2257_v21  ;;  %v2245_v55 = vor.u32 %v2472_v40, %v2242_v50  ;;  %v2301_v59 = vor.u32 %v2486_v56, %v2298_v57  ;;  %v2170_v60 = vld [vmem:[%s3541_s1 + $0x68] sm:$0xf0]  ;;  %v2502_v61 = vld [vmem:[%s3541_s1 + $0x1e4] sm:$0xf]  ;;  %v1880_v4 = vld [vmem:[%s2756_s25 + $0x20] sm:$0xf] }
  0x29   : > { %1226 = vmatpush.bf16.msra.mxu3 %v2321_v24  ;;  %v2362_v62 = vld [vmem:[%s3541_s1 + $0x1e8] sm:$0xf0]  ;;  %v2173_v63 = vor.u32 %v2454_v58, %v2170_v60  ;;  %v2470_v1 = vld [vmem:[%s3541_s1 + $0xe4] sm:$0xf]  ;;  %v2384_v5 = vld [vmem:[%s2756_s25 + $0x2c] sm:$0xf0] }
  0x2a   : > { %960 = vmatpush.bf16.msra.mxu0 %v2121_v30  ;;  %v2365_v0 = vor.u32 %v2502_v61, %v2362_v62  ;;  %v2234_v2 = vld [vmem:[%s3541_s1 + $0xe8] sm:$0xf0]  ;;  %v2382_v6 = vld [vmem:[%s2756_s25 + $0x24] sm:$0xf]  ;;  %v1882_v7 = vld [vmem:[%s2756_s25 + $0x30] sm:$0xf0]  ;;  %v2828_v12 = vor.u32 %v2384_v5, %v1880_v4 }
  0x2b   : > { %1049 = vmatpush.bf16.msra.mxu1 %v2185_v35  ;;  %v2237_v3 = vor.u32 %v2470_v1, %v2234_v2  ;;  %v1888_v8 = vld [vmem:[%s2756_s25 + $0x28] sm:$0xf]  ;;  %v2385_v9 = vld [vmem:[%s2756_s25 + $0x34] sm:$0xf0]  ;;  %v2383_v10 = vld [vmem:[%s2756_s25 + $0x2c] sm:$0xf]  ;;  %v2830_v13 = vor.u32 %v2382_v6, %v1882_v7 }
  0x2c   : > { %1138 = vmatpush.bf16.msra.mxu2 %v2249_v36  ;;  %v1890_v11 = vld [vmem:[%s2756_s25 + $0x38] sm:$0xf0]  ;;  %v2832_v14 = vor.u32 %v2385_v9, %v1888_v8  ;;  %v1896_v16 = vld [vmem:[%s2756_s25 + $0x40] sm:$0xf]  ;;  %v2388_v17 = vld [vmem:[%s2756_s25 + $0x4c] sm:$0xf0] }
  0x2d   : > { %1227 = vmatpush.bf16.msra.mxu3 %v2313_v41  ;;  %961 = vmatmul.bf16.vlgmr.msra.gmra.mxu0 %v2779_v46  ;;  %v2834_v15 = vor.u32 %v2383_v10, %v1890_v11  ;;  %v2386_v18 = vld [vmem:[%s2756_s25 + $0x44] sm:$0xf]  ;;  %v1898_v19 = vld [vmem:[%s2756_s25 + $0x50] sm:$0xf0]  ;;  %v1904_v20 = vld [vmem:[%s2756_s25 + $0x48] sm:$0xf]  ;;  %v2848_v24 = vor.u32 %v2388_v17, %v1896_v16 }
  0x2e   : > { %1050 = vmatmul.bf16.vlgmr.msra.gmra.mxu1 %v2786_v51  ;;  %1309 = vmatpush.bf16.msrb.mxu0 %v2181_v54  ;;  %v2389_v21 = vld [vmem:[%s2756_s25 + $0x54] sm:$0xf0]  ;;  %v2387_v22 = vld [vmem:[%s2756_s25 + $0x4c] sm:$0xf]  ;;  %v1906_v23 = vld [vmem:[%s2756_s25 + $0x58] sm:$0xf0]  ;;  %v2850_v25 = vor.u32 %v2386_v18, %v1898_v19 }
  0x2f   : > { %1139 = vmatmul.bf16.vlgmr.msra.gmra.mxu2 %v2788_v52  ;;  %1398 = vmatpush.bf16.msrb.mxu1 %v2245_v55  ;;  %v2852_v26 = vor.u32 %v2389_v21, %v1904_v20  ;;  %v2854_v27 = vor.u32 %v2387_v22, %v1906_v23  ;;  %v2484_v28 = vld [vmem:[%s3541_s1 + $0x154] sm:$0xf]  ;;  %v2290_v29 = vld [vmem:[%s3541_s1 + $0x158] sm:$0xf0]  ;;  %v1912_v40 = vld [vmem:[%s2756_s25 + $0x60] sm:$0xf] }
  0x30   : > { %1487 = vmatpush.bf16.msrb.mxu2 %v2309_v45  ;;  %1228 = vmatmul.bf16.vlgmr.msra.gmra.mxu3 %v2790_v53  ;;  %v2452_v30 = vld [vmem:[%s3541_s1 + $0x54] sm:$0xf]  ;;  %v2293_v31 = vor.u32 %v2484_v28, %v2290_v29  ;;  %v2162_v32 = vld [vmem:[%s3541_s1 + $0x58] sm:$0xf0]  ;;  %v2392_v41 = vld [vmem:[%s2756_s25 + $0x6c] sm:$0xf0] }
  0x31   : > { %1576 = vmatpush.bf16.msrb.mxu3 %v2373_v49  ;;  %v2500_v33 = vld [vmem:[%s3541_s1 + $0x1d4] sm:$0xf]  ;;  %v2354_v34 = vld [vmem:[%s3541_s1 + $0x1d8] sm:$0xf0]  ;;  %v2165_v35 = vor.u32 %v2452_v30, %v2162_v32  ;;  %v2390_v42 = vld [vmem:[%s2756_s25 + $0x64] sm:$0xf]  ;;  %v2892_v49 = vor.u32 %v2392_v41, %v1912_v40 }
  0x32   : > { %1310 = vmatpush.bf16.msrb.mxu0 %v2173_v63  ;;  %v2357_v36 = vor.u32 %v2500_v33, %v2354_v34  ;;  %v2468_v37 = vld [vmem:[%s3541_s1 + $0xd4] sm:$0xf]  ;;  %v2226_v38 = vld [vmem:[%s3541_s1 + $0xd8] sm:$0xf0]  ;;  %v1920_v44 = vld [vmem:[%s2756_s25 + $0x68] sm:$0xf] }
  0x33   : > { %1399 = vmatpush.bf16.msrb.mxu1 %v2237_v3  ;;  %v2229_v39 = vor.u32 %v2468_v37, %v2226_v38  ;;  %v1914_v43 = vld [vmem:[%s2756_s25 + $0x70] sm:$0xf0]  ;;  %v2393_v45 = vld [vmem:[%s2756_s25 + $0x74] sm:$0xf0]  ;;  %v2391_v47 = vld [vmem:[%s2756_s25 + $0x6c] sm:$0xf] }
  0x34   : > { %1488 = vmatpush.bf16.msrb.mxu2 %v2301_v59  ;;  %v1922_v48 = vld [vmem:[%s2756_s25 + $0x78] sm:$0xf0]  ;;  %v2894_v50 = vor.u32 %v2390_v42, %v1914_v43  ;;  %v2896_v54 = vor.u32 %v2393_v45, %v1920_v44  ;;  %v1928_v56 = vld [vmem:[%s2756_s25 + $0x80] sm:$0xf]  ;;  %v2396_v57 = vld [vmem:[%s2756_s25 + $0x8c] sm:$0xf0] }
  0x35   : > { %1577 = vmatpush.bf16.msrb.mxu3 %v2365_v0  ;;  %v2898_v55 = vor.u32 %v2391_v47, %v1922_v48  ;;  %v2394_v58 = vld [vmem:[%s2756_s25 + $0x84] sm:$0xf]  ;;  %v1930_v59 = vld [vmem:[%s2756_s25 + $0x90] sm:$0xf0]  ;;  %v1936_v60 = vld [vmem:[%s2756_s25 + $0x88] sm:$0xf]  ;;  %v2912_v0 = vor.u32 %v2396_v57, %v1928_v56 }
  0x36   : > { %1311 = vmatpush.bf16.msrb.mxu0 %v2165_v35  ;;  %v2397_v61 = vld [vmem:[%s2756_s25 + $0x94] sm:$0xf0]  ;;  %v2395_v62 = vld [vmem:[%s2756_s25 + $0x8c] sm:$0xf]  ;;  %v1938_v63 = vld [vmem:[%s2756_s25 + $0x98] sm:$0xf0]  ;;  %v2914_v1 = vor.u32 %v2394_v58, %v1930_v59 }
  0x37   : > { %1400 = vmatpush.bf16.msrb.mxu1 %v2229_v39  ;;  %v2916_v2 = vor.u32 %v2397_v61, %v1936_v60  ;;  %v2918_v3 = vor.u32 %v2395_v62, %v1938_v63  ;;  %v2482_v4 = vld [vmem:[%s3541_s1 + $0x144] sm:$0xf]  ;;  %v2282_v5 = vld [vmem:[%s3541_s1 + $0x148] sm:$0xf0]  ;;  %v1944_v20 = vld [vmem:[%s2756_s25 + $0xa0] sm:$0xf] }
  0x38   : > { %1489 = vmatpush.bf16.msrb.mxu2 %v2293_v31  ;;  %v2450_v6 = vld [vmem:[%s3541_s1 + $0x44] sm:$0xf]  ;;  %v2285_v7 = vor.u32 %v2482_v4, %v2282_v5  ;;  %v2154_v8 = vld [vmem:[%s3541_s1 + $0x48] sm:$0xf0]  ;;  %v2400_v21 = vld [vmem:[%s2756_s25 + $0xac] sm:$0xf0] }
  0x39   : > { %1578 = vmatpush.bf16.msrb.mxu3 %v2357_v36  ;;  %v2498_v9 = vld [vmem:[%s3541_s1 + $0x1c4] sm:$0xf]  ;;  %v2346_v10 = vld [vmem:[%s3541_s1 + $0x1c8] sm:$0xf0]  ;;  %v2157_v11 = vor.u32 %v2450_v6, %v2154_v8  ;;  %v1946_v23 = vld [vmem:[%s2756_s25 + $0xb0] sm:$0xf0]  ;;  %v2956_v32 = vor.u32 %v2400_v21, %v1944_v20 }
  0x3a   : > { %v2349_v16 = vor.u32 %v2498_v9, %v2346_v10  ;;  %v2466_v17 = vld [vmem:[%s3541_s1 + $0xc4] sm:$0xf]  ;;  %v2218_v18 = vld [vmem:[%s3541_s1 + $0xc8] sm:$0xf0]  ;;  %v1952_v28 = vld [vmem:[%s2756_s25 + $0xa8] sm:$0xf] }
  0x3b   : > { %v2221_v19 = vor.u32 %v2466_v17, %v2218_v18  ;;  %1312 = vmatpush.bf16.msrb.mxu0 %v2157_v11  ;;  %v2398_v22 = vld [vmem:[%s2756_s25 + $0xa4] sm:$0xf]  ;;  %v2401_v29 = vld [vmem:[%s2756_s25 + $0xb4] sm:$0xf0]  ;;  %v2399_v30 = vld [vmem:[%s2756_s25 + $0xac] sm:$0xf] }
  0x3c   : > { %1490 = vmatpush.bf16.msrb.mxu2 %v2285_v7  ;;  %v1954_v31 = vld [vmem:[%s2756_s25 + $0xb8] sm:$0xf0]  ;;  %v2958_v33 = vor.u32 %v2398_v22, %v1946_v23  ;;  %v2960_v34 = vor.u32 %v2401_v29, %v1952_v28  ;;  %v1960_v36 = vld [vmem:[%s2756_s25 + $0xc0] sm:$0xf]  ;;  %v2404_v37 = vld [vmem:[%s2756_s25 + $0xcc] sm:$0xf0] }
  0x3d   : > { %966 = vmatmul.bf16.gmra.mxu0 %v2828_v12  ;;  %1579 = vmatpush.bf16.msrb.mxu3 %v2349_v16  ;;  %v2962_v35 = vor.u32 %v2399_v30, %v1954_v31  ;;  %v2402_v38 = vld [vmem:[%s2756_s25 + $0xc4] sm:$0xf]  ;;  %v1962_v39 = vld [vmem:[%s2756_s25 + $0xd0] sm:$0xf0]  ;;  %v1968_v40 = vld [vmem:[%s2756_s25 + $0xc8] sm:$0xf]  ;;  %v2976_v44 = vor.u32 %v2404_v37, %v1960_v36 }
  0x3e   : > { %1055 = vmatmul.bf16.gmra.mxu1 %v2830_v13  ;;  %v2405_v41 = vld [vmem:[%s2756_s25 + $0xd4] sm:$0xf0]  ;;  %v2403_v42 = vld [vmem:[%s2756_s25 + $0xcc] sm:$0xf]  ;;  %v1970_v43 = vld [vmem:[%s2756_s25 + $0xd8] sm:$0xf0]  ;;  %v2978_v45 = vor.u32 %v2402_v38, %v1962_v39 }
  0x3f   : > { %1144 = vmatmul.bf16.gmra.mxu2 %v2832_v14  ;;  %1401 = vmatpush.bf16.msrb.mxu1 %v2221_v19  ;;  %v2980_v47 = vor.u32 %v2405_v41, %v1968_v40  ;;  %v2982_v48 = vor.u32 %v2403_v42, %v1970_v43  ;;  %v2480_v56 = vld [vmem:[%s3541_s1 + $0x134] sm:$0xf]  ;;  %v2274_v57 = vld [vmem:[%s3541_s1 + $0x138] sm:$0xf0]  ;;  %v1976_v5 = vld [vmem:[%s2756_s25 + $0xe0] sm:$0xf] }
  0x40   : > { %1233 = vmatmul.bf16.gmra.mxu3 %v2834_v15  ;;  %v2448_v58 = vld [vmem:[%s3541_s1 + $0x34] sm:$0xf]  ;;  %v2277_v59 = vor.u32 %v2480_v56, %v2274_v57  ;;  %v2146_v60 = vld [vmem:[%s3541_s1 + $0x38] sm:$0xf0]  ;;  %v2408_v6 = vld [vmem:[%s2756_s25 + $0xec] sm:$0xf0] }
  0x41   : > { %v2496_v61 = vld [vmem:[%s3541_s1 + $0x1b4] sm:$0xf]  ;;  %v2338_v62 = vld [vmem:[%s3541_s1 + $0x1b8] sm:$0xf0]  ;;  %v2149_v63 = vor.u32 %v2448_v58, %v2146_v60  ;;  %v2406_v7 = vld [vmem:[%s2756_s25 + $0xe4] sm:$0xf]  ;;  %v3020_v20 = vor.u32 %v2408_v6, %v1976_v5 }
  0x42   : > { %v2341_v4 = vor.u32 %v2496_v61, %v2338_v62  ;;  %1491 = vmatpush.bf16.msrb.mxu2 %v2277_v59  ;;  %v2464_v8 = vld [vmem:[%s3541_s1 + $0xb4] sm:$0xf]  ;;  %v2210_v9 = vld [vmem:[%s3541_s1 + $0xb8] sm:$0xf0]  ;;  %v1984_v11 = vld [vmem:[%s2756_s25 + $0xe8] sm:$0xf] }
  0x43   : > { %1313 = vmatpush.bf16.msrb.mxu0 %v2149_v63  ;;  %v1978_v10 = vld [vmem:[%s2756_s25 + $0xf0] sm:$0xf0]  ;;  %v2409_v16 = vld [vmem:[%s2756_s25 + $0xf4] sm:$0xf0]  ;;  %v2213_v17 = vor.u32 %v2464_v8, %v2210_v9  ;;  %v2407_v18 = vld [vmem:[%s2756_s25 + $0xec] sm:$0xf] }
  0x44   : > { %1580 = vmatpush.bf16.msrb.mxu3 %v2341_v4  ;;  %v1986_v19 = vld [vmem:[%s2756_s25 + $0xf8] sm:$0xf0]  ;;  %v3022_v21 = vor.u32 %v2406_v7, %v1978_v10  ;;  %v3024_v22 = vor.u32 %v2409_v16, %v1984_v11  ;;  %v3035_v28 = vld [vmem:[%s3542_s2] sm:$0x3]  ;;  %v2412_v31 = vld [vmem:[%s2756_s25 + $0x10c] sm:$0xf0] }
  0x45   : > { %1402 = vmatpush.bf16.msrb.mxu1 %v2213_v17  ;;  %v3026_v23 = vor.u32 %v2407_v18, %v1986_v19  ;;  %v3038_v29 = vperm.slane %v3035_v28, 0  ;;  %v1992_v30 = vld [vmem:[%s2756_s25 + $0x100] sm:$0xf]  ;;  %v2410_v36 = vld [vmem:[%s2756_s25 + $0x104] sm:$0xf] }
  0x46   : > { %v1994_v37 = vld [vmem:[%s2756_s25 + $0x110] sm:$0xf0]  ;;  %v2000_v38 = vld [vmem:[%s2756_s25 + $0x108] sm:$0xf]  ;;  %v2413_v39 = vld [vmem:[%s2756_s25 + $0x114] sm:$0xf0]  ;;  %v3048_v42 = vor.u32 %v2412_v31, %v1992_v30 }
  0x47   : > { %v2411_v40 = vld [vmem:[%s2756_s25 + $0x10c] sm:$0xf]  ;;  %v2002_v41 = vld [vmem:[%s2756_s25 + $0x118] sm:$0xf0]  ;;  %v3050_v56 = vor.u32 %v2410_v36, %v1994_v37  ;;  %v3052_v57 = vor.u32 %v2413_v39, %v2000_v38  ;;  %v2478_v62 = vld [vmem:[%s3541_s1 + $0x124] sm:$0xf] }
  0x48   : > { %v3055_v60 = vor.u32 %v2411_v40, %v2002_v41  ;;  %v2266_v63 = vld [vmem:[%s3541_s1 + $0x128] sm:$0xf0]  ;;  %v2446_v4 = vld [vmem:[%s3541_s1 + $0x24] sm:$0xf]  ;;  %v2008_v37 = vld [vmem:[%s2756_s25 + $0x120] sm:$0xf] }
  0x49   : > { %v2269_v5 = vor.u32 %v2478_v62, %v2266_v63  ;;  %v2138_v6 = vld [vmem:[%s3541_s1 + $0x28] sm:$0xf0]  ;;  %v2494_v7 = vld [vmem:[%s3541_s1 + $0x1a4] sm:$0xf]  ;;  %v2416_v38 = vld [vmem:[%s2756_s25 + $0x12c] sm:$0xf0] }
  0x4a   : > { %v2330_v8 = vld [vmem:[%s3541_s1 + $0x1a8] sm:$0xf0]  ;;  %v2141_v10 = vor.u32 %v2446_v4, %v2138_v6  ;;  %v2414_v39 = vld [vmem:[%s2756_s25 + $0x124] sm:$0xf]  ;;  %v2018_v63 = vld [vmem:[%s2756_s25 + $0x138] sm:$0xf0] }
  0x4b   : > { %v2333_v11 = vor.u32 %v2494_v7, %v2330_v8  ;;  %1492 = vmatpush.bf16.msrb.mxu2 %v2269_v5  ;;  %v2462_v40 = vld [vmem:[%s3541_s1 + $0xa4] sm:$0xf]  ;;  %v2202_v41 = vld [vmem:[%s3541_s1 + $0xa8] sm:$0xf0]  ;;  %v3096_v5 = vor.u32 %v2416_v38, %v2008_v37 }
  0x4c   : > { %1314 = vmatpush.bf16.msrb.mxu0 %v2141_v10  ;;  %v2415_v62 = vld [vmem:[%s2756_s25 + $0x12c] sm:$0xf] }
  0x4d   : > { %971 = vmatmul.bf16.gmra.mxu0 %v2848_v24  ;;  %1581 = vmatpush.bf16.msrb.mxu3 %v2333_v11 }
  0x4e   : > { %1060 = vmatmul.bf16.gmra.mxu1 %v2850_v25 }
  0x4f   : > { %1149 = vmatmul.bf16.gmra.mxu2 %v2852_v26 }
  0x50   : > { %1238 = vmatmul.bf16.gmra.mxu3 %v2854_v27 }
  0x5d   : > { %976 = vmatmul.bf16.gmra.mxu0 %v2892_v49 }
  0x5e   : > { %1065 = vmatmul.bf16.gmra.mxu1 %v2894_v50 }
  0x5f   : > { %1154 = vmatmul.bf16.gmra.mxu2 %v2896_v54 }
  0x60   : > { %1243 = vmatmul.bf16.gmra.mxu3 %v2898_v55 }
  0x6d   : > { %981 = vmatmul.bf16.gmra.mxu0 %v2912_v0 }
  0x6e   : > { %1070 = vmatmul.bf16.gmra.mxu1 %v2914_v1 }
  0x6f   : > { %1159 = vmatmul.bf16.gmra.mxu2 %v2916_v2 }
  0x70   : > { %1248 = vmatmul.bf16.gmra.mxu3 %v2918_v3 }
  0x7d   : > { %986 = vmatmul.bf16.gmra.mxu0 %v2956_v32 }
  0x7e   : > { %1075 = vmatmul.bf16.gmra.mxu1 %v2958_v33 }
  0x7f   : > { %1164 = vmatmul.bf16.gmra.mxu2 %v2960_v34 }
  0x80   : > { %1253 = vmatmul.bf16.gmra.mxu3 %v2962_v35 }
  0x8d   : > { %991 = vmatmul.bf16.gmra.mxu0 %v2976_v44 }
  0x8e   : > { %1080 = vmatmul.bf16.gmra.mxu1 %v2978_v45 }
  0x8f   : > { %1169 = vmatmul.bf16.gmra.mxu2 %v2980_v47 }
  0x90   : > { %1258 = vmatmul.bf16.gmra.mxu3 %v2982_v48 }
  0x9d   : > { %996 = vmatmul.bf16.gmra.mxu0 %v3020_v20 }
  0x9e   : > { %1085 = vmatmul.bf16.gmra.mxu1 %v3022_v21 }
  0x9f   : > { %1174 = vmatmul.bf16.gmra.mxu2 %v3024_v22 }
  0xa0   : > { %1263 = vmatmul.bf16.gmra.mxu3 %v3026_v23 }
  0xaa   : > { %v962_v43 = vpop.f32.mrf.mxu0 }
  0xab   : > { %v963_v58 = vadd.f32 %v962_v43, %v3038_v29  ;;  %v1051_v59 = vpop.f32.mrf.mxu1  ;;  %v2010_v43 = vld [vmem:[%s2756_s25 + $0x130] sm:$0xf0] }
  0xad   : > { %v1052_v61 = vadd.f32 %v1051_v59, %v963_v58  ;;  %1001 = vmatmul.bf16.gmra.mxu0 %v3048_v42  ;;  %v2016_v58 = vld [vmem:[%s2756_s25 + $0x128] sm:$0xf]  ;;  %v2417_v59 = vld [vmem:[%s2756_s25 + $0x134] sm:$0xf0] }
  0xae   : > { %1090 = vmatmul.bf16.gmra.mxu1 %v3050_v56  ;;  %v3100_v10 = vor.u32 %v2417_v59, %v2016_v58  ;;  %v2024_v58 = vld [vmem:[%s2756_s25 + $0x140] sm:$0xf]  ;;  %v2420_v59 = vld [vmem:[%s2756_s25 + $0x14c] sm:$0xf0] }
  0xaf   : > { %1179 = vmatmul.bf16.gmra.mxu2 %v3052_v57 }
  0xb0   : > { %1268 = vmatmul.bf16.gmra.mxu3 %v3055_v60  ;;  %3566 = vst [vmem:[#allocation2_spill] sm:$0xff] %v3100_v10 }
  0xb2   : > { %v1140_v9 = vpop.f32.mrf.mxu2  ;;  %v964_v18 = vpop.f32.mrf.mxu0 }
  0xb3   : > { %v1141_v16 = vadd.f32 %v1140_v9, %v1052_v61  ;;  %v1229_v17 = vpop.f32.mrf.mxu3  ;;  %v965_v19 = vadd.f32 %v964_v18, %v3038_v29  ;;  %v1053_v30 = vpop.f32.mrf.mxu1  ;;  %v2205_v61 = vor.u32 %v2462_v40, %v2202_v41  ;;  %v3098_v9 = vor.u32 %v2414_v39, %v2010_v43 }
  0xb5   : > { %v3080_v31 = vadd.f32 %v1229_v17, %v1141_v16  ;;  %v1054_v36 = vadd.f32 %v1053_v30, %v965_v19  ;;  %1403 = vmatpush.bf16.msrb.mxu1 %v2205_v61  ;;  %v3103_v17 = vor.u32 %v2415_v62, %v2018_v63  ;;  %v2418_v61 = vld [vmem:[%s2756_s25 + $0x144] sm:$0xf]  ;;  %v2026_v62 = vld [vmem:[%s2756_s25 + $0x150] sm:$0xf0]  ;;  %v2032_v63 = vld [vmem:[%s2756_s25 + $0x148] sm:$0xf] }
  0xb7   : > { %3567 = vst [vmem:[#allocation3_spill] sm:$0xff] %v3103_v17 }
  0xba   : > { %v1142_v4 = vpop.f32.mrf.mxu2  ;;  %v967_v8 = vpop.f32.mrf.mxu0 }
  0xbb   : > { %v1143_v6 = vadd.f32 %v1142_v4, %v1054_v36  ;;  %v1231_v7 = vpop.f32.mrf.mxu3  ;;  %v968_v11 = vadd.f32 %v967_v8, %v3038_v29  ;;  %v1056_v16 = vpop.f32.mrf.mxu1  ;;  %v2421_v4 = vld [vmem:[%s2756_s25 + $0x154] sm:$0xf0] }
  0xbd   : > { %v3105_v18 = vadd.f32 %v1231_v7, %v1143_v6  ;;  %v1057_v19 = vadd.f32 %v1056_v16, %v968_v11  ;;  %1006 = vmatmul.bf16.gmra.mxu0 %v3096_v5  ;;  %v2419_v6 = vld [vmem:[%s2756_s25 + $0x14c] sm:$0xf]  ;;  %v2034_v7 = vld [vmem:[%s2756_s25 + $0x158] sm:$0xf0]  ;;  %v3122_v11 = vor.u32 %v2420_v59, %v2024_v58  ;;  %v2444_v59 = vld [vmem:[%s3541_s1 + $0x14] sm:$0xf] }
  0xbe   : > { %1095 = vmatmul.bf16.gmra.mxu1 %v3098_v9  ;;  %v2258_v58 = vld [vmem:[%s3541_s1 + $0x118] sm:$0xf0] }
  0xbf   : > { %1184 = vmatmul.bf16.gmra.mxu2 %v3100_v10  ;;  %3569 = vst [vmem:[#allocation5_spill] sm:$0xff] %v3122_v11 }
  0xc0   : > { %1273 = vmatmul.bf16.gmra.mxu3 %v3103_v17  ;;  %v3124_v17 = vor.u32 %v2418_v61, %v2026_v62  ;;  %v2130_v62 = vld [vmem:[%s3541_s1 + $0x18] sm:$0xf0] }
  0xc2   : > { %v1145_v30 = vpop.f32.mrf.mxu2  ;;  %v969_v38 = vpop.f32.mrf.mxu0  ;;  %3570 = vst [vmem:[#allocation6_spill] sm:$0xff] %v3124_v17 }
  0xc3   : > { %v1146_v36 = vadd.f32 %v1145_v30, %v1057_v19  ;;  %v1234_v37 = vpop.f32.mrf.mxu3  ;;  %v970_v39 = vadd.f32 %v969_v38, %v3038_v29  ;;  %v1058_v40 = vpop.f32.mrf.mxu1  ;;  %v3126_v38 = vor.u32 %v2421_v4, %v2032_v63  ;;  %v2492_v63 = vld [vmem:[%s3541_s1 + $0x194] sm:$0xf]  ;;  %v2322_v4 = vld [vmem:[%s3541_s1 + $0x198] sm:$0xf0] }
  0xc5   : > { %v3112_v41 = vadd.f32 %v1234_v37, %v1146_v36  ;;  %v1059_v43 = vadd.f32 %v1058_v40, %v970_v39  ;;  %3571 = vst [vmem:[#allocation7_spill] sm:$0xff] %v3126_v38  ;;  %v3129_v39 = vor.u32 %v2419_v6, %v2034_v7  ;;  %v2133_v7 = vor.u32 %v2444_v59, %v2130_v62  ;;  %v2424_v59 = vld [vmem:[%s2756_s25 + $0x16c] sm:$0xf0]  ;;  %v2422_v62 = vld [vmem:[%s2756_s25 + $0x164] sm:$0xf] }
  0xc7   : > { %3568 = vst [vmem:[#allocation4_spill] sm:$0xff] %v3112_v41  ;;  %1315 = vmatpush.bf16.msrb.mxu0 %v2133_v7  ;;  %v2423_v7 = vld [vmem:[%s2756_s25 + $0x16c] sm:$0xf] }
  0xc8   : > { %3572 = vst [vmem:[#allocation8_spill] sm:$0xff] %v3129_v39 }
  0xca   : > { %v1147_v8 = vpop.f32.mrf.mxu2  ;;  %v972_v30 = vpop.f32.mrf.mxu0 }
  0xcb   : > { %v1148_v16 = vadd.f32 %v1147_v8, %v1059_v43  ;;  %v1236_v19 = vpop.f32.mrf.mxu3  ;;  %v973_v36 = vadd.f32 %v972_v30, %v3038_v29  ;;  %v1061_v37 = vpop.f32.mrf.mxu1  ;;  %v2476_v43 = vld [vmem:[%s3541_s1 + $0x114] sm:$0xf]  ;;  %v2325_v8 = vor.u32 %v2492_v63, %v2322_v4  ;;  %v2048_v4 = vld [vmem:[%s2756_s25 + $0x168] sm:$0xf] }
  0xcc   : > { %v2261_v61 = vor.u32 %v2476_v43, %v2258_v58  ;;  %v2042_v63 = vld [vmem:[%s2756_s25 + $0x170] sm:$0xf0] }
  0xcd   : > { %v3131_v40 = vadd.f32 %v1236_v19, %v1148_v16  ;;  %v1062_v41 = vadd.f32 %v1061_v37, %v973_v36  ;;  %1011 = vmatmul.bf16.gmra.mxu0 %v3122_v11  ;;  %1582 = vmatpush.bf16.msrb.mxu3 %v2325_v8  ;;  %v2050_v8 = vld [vmem:[%s2756_s25 + $0x178] sm:$0xf0] }
  0xce   : > { %1100 = vmatmul.bf16.gmra.mxu1 %v3124_v17  ;;  %1493 = vmatpush.bf16.msrb.mxu2 %v2261_v61  ;;  %v2194_v61 = vld [vmem:[%s3541_s1 + $0x98] sm:$0xf0]  ;;  %v3179_v10 = vor.u32 %v2423_v7, %v2050_v8  ;;  %v2058_v7 = vld [vmem:[%s2756_s25 + $0x190] sm:$0xf0]  ;;  %v2064_v8 = vld [vmem:[%s2756_s25 + $0x188] sm:$0xf] }
  0xcf   : > { %3573 = vst [vmem:[#allocation9_spill] sm:$0xff] %v3131_v40  ;;  %1189 = vmatmul.bf16.gmra.mxu2 %v3126_v38  ;;  %v3174_v38 = vor.u32 %v2422_v62, %v2042_v63 }
  0xd0   : > { %1278 = vmatmul.bf16.gmra.mxu3 %v3129_v39  ;;  %v2040_v39 = vld [vmem:[%s2756_s25 + $0x160] sm:$0xf]  ;;  %3578 = vst [vmem:[#allocation14_spill] sm:$0xff] %v3179_v10 }
  0xd1   : > { %3576 = vst [vmem:[#allocation12_spill] sm:$0xff] %v3174_v38 }
  0xd2   : > { %v1150_v6 = vpop.f32.mrf.mxu2  ;;  %v974_v30 = vpop.f32.mrf.mxu0 }
  0xd3   : > { %v1151_v16 = vadd.f32 %v1150_v6, %v1062_v41  ;;  %v1239_v19 = vpop.f32.mrf.mxu3  ;;  %v975_v36 = vadd.f32 %v974_v30, %v3038_v29  ;;  %v1063_v37 = vpop.f32.mrf.mxu1  ;;  %v2460_v41 = vld [vmem:[%s3541_s1 + $0x94] sm:$0xf]  ;;  %v2425_v6 = vld [vmem:[%s2756_s25 + $0x174] sm:$0xf0] }
  0xd4   : > { %v2197_v30 = vor.u32 %v2460_v41, %v2194_v61  ;;  %v3176_v17 = vor.u32 %v2425_v6, %v2048_v4  ;;  %v2056_v4 = vld [vmem:[%s2756_s25 + $0x180] sm:$0xf]  ;;  %v2428_v6 = vld [vmem:[%s2756_s25 + $0x18c] sm:$0xf0] }
  0xd5   : > { %v3156_v43 = vadd.f32 %v1239_v19, %v1151_v16  ;;  %v1064_v58 = vadd.f32 %v1063_v37, %v975_v36  ;;  %v3172_v19 = vor.u32 %v2424_v59, %v2040_v39 }
  0xd6   : > { %1404 = vmatpush.bf16.msrb.mxu1 %v2197_v30  ;;  %3577 = vst [vmem:[#allocation13_spill] sm:$0xff] %v3176_v17  ;;  %v2426_v30 = vld [vmem:[%s2756_s25 + $0x184] sm:$0xf] }
  0xd7   : > { %3574 = vst [vmem:[#allocation10_spill] sm:$0xff] %v3156_v43 }
  0xd8   : > { %3575 = vst [vmem:[#allocation11_spill] sm:$0xff] %v3172_v19 }
  0xda   : > { %v1152_v16 = vpop.f32.mrf.mxu2  ;;  %v977_v43 = vpop.f32.mrf.mxu0 }
  0xdb   : > { %v1153_v36 = vadd.f32 %v1152_v16, %v1064_v58  ;;  %v1241_v37 = vpop.f32.mrf.mxu3  ;;  %v978_v40 = vadd.f32 %v977_v43, %v3038_v29  ;;  %v1066_v11 = vpop.f32.mrf.mxu1  ;;  %v2429_v16 = vld [vmem:[%s2756_s25 + $0x194] sm:$0xf0] }
  0xdd   : > { %v3181_v41 = vadd.f32 %v1241_v37, %v1153_v36  ;;  %v1067_v39 = vadd.f32 %v1066_v11, %v978_v40  ;;  %1016 = vmatmul.bf16.gmra.mxu0 %v3172_v19  ;;  %v2427_v36 = vld [vmem:[%s2756_s25 + $0x18c] sm:$0xf]  ;;  %v2066_v37 = vld [vmem:[%s2756_s25 + $0x198] sm:$0xf0] }
  0xde   : > { %1105 = vmatmul.bf16.gmra.mxu1 %v3174_v38 }
  0xdf   : > { %3579 = vst [vmem:[#allocation15_spill] sm:$0xff] %v3181_v41  ;;  %1194 = vmatmul.bf16.gmra.mxu2 %v3176_v17  ;;  %v3198_v17 = vor.u32 %v2428_v6, %v2056_v4  ;;  %v3200_v41 = vor.u32 %v2426_v30, %v2058_v7  ;;  %v2122_v6 = vld [vmem:[%s3541_s1 + $0x8] sm:$0xf0]  ;;  %v2490_v30 = vld [vmem:[%s3541_s1 + $0x184] sm:$0xf] }
  0xe0   : > { %1283 = vmatmul.bf16.gmra.mxu3 %v3179_v10  ;;  %v2314_v7 = vld [vmem:[%s3541_s1 + $0x188] sm:$0xf0] }
  0xe1   : > { %3581 = vst [vmem:[#allocation17_spill] sm:$0xff] %v3198_v17 }
  0xe2   : > { %v1155_v43 = vpop.f32.mrf.mxu2  ;;  %v979_v62 = vpop.f32.mrf.mxu0  ;;  %3582 = vst [vmem:[#allocation18_spill] sm:$0xff] %v3200_v41 }
  0xe3   : > { %v1156_v58 = vadd.f32 %v1155_v43, %v1067_v39  ;;  %v1244_v59 = vpop.f32.mrf.mxu3  ;;  %v980_v61 = vadd.f32 %v979_v62, %v3038_v29  ;;  %v1068_v11 = vpop.f32.mrf.mxu1  ;;  %v3202_v62 = vor.u32 %v2429_v16, %v2064_v8 }
  0xe5   : > { %v3188_v40 = vadd.f32 %v1244_v59, %v1156_v58  ;;  %v1069_v63 = vadd.f32 %v1068_v11, %v980_v61  ;;  %3583 = vst [vmem:[#allocation19_spill] sm:$0xff] %v3202_v62  ;;  %v3205_v61 = vor.u32 %v2427_v36, %v2066_v37  ;;  %v2317_v36 = vor.u32 %v2490_v30, %v2314_v7  ;;  %v2074_v30 = vld [vmem:[%s2756_s25 + $0x1b0] sm:$0xf0]  ;;  %v2080_v7 = vld [vmem:[%s2756_s25 + $0x1a8] sm:$0xf] }
  0xe7   : > { %3580 = vst [vmem:[#allocation16_spill] sm:$0xff] %v3188_v40  ;;  %1583 = vmatpush.bf16.msrb.mxu3 %v2317_v36  ;;  %v2082_v36 = vld [vmem:[%s2756_s25 + $0x1b8] sm:$0xf0] }
  0xe8   : > { %3584 = vst [vmem:[#allocation20_spill] sm:$0xff] %v3205_v61 }
  0xea   : > { %v1157_v10 = vpop.f32.mrf.mxu2  ;;  %v982_v38 = vpop.f32.mrf.mxu0 }
  0xeb   : > { %v1158_v39 = vadd.f32 %v1157_v10, %v1069_v63  ;;  %v1246_v43 = vpop.f32.mrf.mxu3  ;;  %v983_v58 = vadd.f32 %v982_v38, %v3038_v29  ;;  %v1071_v59 = vpop.f32.mrf.mxu1  ;;  %v2474_v10 = vld [vmem:[%s3541_s1 + $0x104] sm:$0xf]  ;;  %v2250_v38 = vld [vmem:[%s3541_s1 + $0x108] sm:$0xf0] }
  0xec   : > { %v2442_v63 = vld [vmem:[%s3541_s1 + $0x4] sm:$0xf]  ;;  %v2253_v4 = vor.u32 %v2474_v10, %v2250_v38 }
  0xed   : > { %v3207_v11 = vadd.f32 %v1246_v43, %v1158_v39  ;;  %v1072_v40 = vadd.f32 %v1071_v59, %v983_v58  ;;  %1021 = vmatmul.bf16.gmra.mxu0 %v3198_v17  ;;  %v2125_v16 = vor.u32 %v2442_v63, %v2122_v6  ;;  %v2432_v63 = vld [vmem:[%s2756_s25 + $0x1ac] sm:$0xf0]  ;;  %v2430_v6 = vld [vmem:[%s2756_s25 + $0x1a4] sm:$0xf] }
  0xee   : > { %1110 = vmatmul.bf16.gmra.mxu1 %v3200_v41  ;;  %1494 = vmatpush.bf16.msrb.mxu2 %v2253_v4  ;;  %v2186_v4 = vld [vmem:[%s3541_s1 + $0x88] sm:$0xf0] }
  0xef   : > { %3585 = vst [vmem:[#allocation21_spill] sm:$0xff] %v3207_v11  ;;  %1199 = vmatmul.bf16.gmra.mxu2 %v3202_v62  ;;  %1316 = vmatpush.bf16.msrb.mxu0 %v2125_v16  ;;  %v2431_v16 = vld [vmem:[%s2756_s25 + $0x1ac] sm:$0xf]  ;;  %v3250_v62 = vor.u32 %v2430_v6, %v2074_v30 }
  0xf0   : > { %1288 = vmatmul.bf16.gmra.mxu3 %v3205_v61  ;;  %v2072_v61 = vld [vmem:[%s2756_s25 + $0x1a0] sm:$0xf]  ;;  %v3255_v19 = vor.u32 %v2431_v16, %v2082_v36  ;;  %v2090_v16 = vld [vmem:[%s2756_s25 + $0x1d0] sm:$0xf0]  ;;  %v2096_v36 = vld [vmem:[%s2756_s25 + $0x1c8] sm:$0xf] }
  0xf1   : > { %3587 = vst [vmem:[#allocation23_spill] sm:$0xff] %v3250_v62 }
  0xf2   : > { %v1160_v8 = vpop.f32.mrf.mxu2  ;;  %v984_v43 = vpop.f32.mrf.mxu0  ;;  %3589 = vst [vmem:[#allocation25_spill] sm:$0xff] %v3255_v19 }
  0xf3   : > { %v1161_v37 = vadd.f32 %v1160_v8, %v1072_v40  ;;  %v1249_v39 = vpop.f32.mrf.mxu3  ;;  %v985_v58 = vadd.f32 %v984_v43, %v3038_v29  ;;  %v1073_v59 = vpop.f32.mrf.mxu1  ;;  %v2458_v40 = vld [vmem:[%s3541_s1 + $0x84] sm:$0xf]  ;;  %v2433_v8 = vld [vmem:[%s2756_s25 + $0x1b4] sm:$0xf0] }
  0xf4   : > { %v2189_v43 = vor.u32 %v2458_v40, %v2186_v4  ;;  %v3252_v41 = vor.u32 %v2433_v8, %v2080_v7  ;;  %v2088_v7 = vld [vmem:[%s2756_s25 + $0x1c0] sm:$0xf]  ;;  %v2436_v8 = vld [vmem:[%s2756_s25 + $0x1cc] sm:$0xf0] }
  0xf5   : > { %v3232_v10 = vadd.f32 %v1249_v39, %v1161_v37  ;;  %v1074_v38 = vadd.f32 %v1073_v59, %v985_v58  ;;  %v3248_v39 = vor.u32 %v2432_v63, %v2072_v61 }
  0xf6   : > { %1405 = vmatpush.bf16.msrb.mxu1 %v2189_v43  ;;  %3588 = vst [vmem:[#allocation24_spill] sm:$0xff] %v3252_v41  ;;  %v2434_v43 = vld [vmem:[%s2756_s25 + $0x1c4] sm:$0xf] }
  0xf7   : > { %3586 = vst [vmem:[#allocation22_spill] sm:$0xff] %v3232_v10 }
  0xfa   : > { %v1162_v37 = vpop.f32.mrf.mxu2  ;;  %v987_v10 = vpop.f32.mrf.mxu0 }
  0xfb   : > { %v1163_v58 = vadd.f32 %v1162_v37, %v1074_v38  ;;  %v1251_v59 = vpop.f32.mrf.mxu3  ;;  %v988_v11 = vadd.f32 %v987_v10, %v3038_v29  ;;  %v1076_v17 = vpop.f32.mrf.mxu1  ;;  %v2437_v37 = vld [vmem:[%s2756_s25 + $0x1d4] sm:$0xf0] }
  0xfd   : > { %v3257_v40 = vadd.f32 %v1251_v59, %v1163_v58  ;;  %v1077_v61 = vadd.f32 %v1076_v17, %v988_v11  ;;  %1026 = vmatmul.bf16.gmra.mxu0 %v3248_v39  ;;  %v2435_v58 = vld [vmem:[%s2756_s25 + $0x1cc] sm:$0xf]  ;;  %v2098_v59 = vld [vmem:[%s2756_s25 + $0x1d8] sm:$0xf0] }
  0xfe   : > { %1115 = vmatmul.bf16.gmra.mxu1 %v3250_v62 }
  0xff   : > { %3590 = vst [vmem:[#allocation26_spill] sm:$0xff] %v3257_v40  ;;  %1204 = vmatmul.bf16.gmra.mxu2 %v3252_v41  ;;  %v3274_v41 = vor.u32 %v2436_v8, %v2088_v7  ;;  %v3276_v40 = vor.u32 %v2434_v43, %v2090_v16 }
 0x100   : > { %1293 = vmatmul.bf16.gmra.mxu3 %v3255_v19 }
 0x101   : > { %3592 = vst [vmem:[#allocation28_spill] sm:$0xff] %v3274_v41 }
 0x102   : > { %v1165_v10 = vpop.f32.mrf.mxu2  ;;  %v989_v6 = vpop.f32.mrf.mxu0  ;;  %3593 = vst [vmem:[#allocation29_spill] sm:$0xff] %v3276_v40 }
 0x103   : > { %v1166_v38 = vadd.f32 %v1165_v10, %v1077_v61  ;;  %v1254_v63 = vpop.f32.mrf.mxu3  ;;  %v990_v4 = vadd.f32 %v989_v6, %v3038_v29  ;;  %v1078_v17 = vpop.f32.mrf.mxu1  ;;  %v3278_v6 = vor.u32 %v2437_v37, %v2096_v36  ;;  %v2104_v37 = vld [vmem:[%s2756_s25 + $0x1e0] sm:$0xf] }
 0x105   : > { %v3264_v11 = vadd.f32 %v1254_v63, %v1166_v38  ;;  %v1079_v30 = vadd.f32 %v1078_v17, %v990_v4  ;;  %3594 = vst [vmem:[#allocation30_spill] sm:$0xff] %v3278_v6  ;;  %v3281_v4 = vor.u32 %v2435_v58, %v2098_v59  ;;  %v2440_v58 = vld [vmem:[%s2756_s25 + $0x1ec] sm:$0xf0]  ;;  %v2438_v59 = vld [vmem:[%s2756_s25 + $0x1e4] sm:$0xf] }
 0x107   : > { %3591 = vst [vmem:[#allocation27_spill] sm:$0xff] %v3264_v11 }
 0x108   : > { %3595 = vst [vmem:[#allocation31_spill] sm:$0xff] %v3281_v4 }
 0x10a   : > { %v1167_v19 = vpop.f32.mrf.mxu2  ;;  %v992_v62 = vpop.f32.mrf.mxu0 }
 0x10b   : > { %v1168_v61 = vadd.f32 %v1167_v19, %v1079_v30  ;;  %v1256_v10 = vpop.f32.mrf.mxu3  ;;  %v993_v38 = vadd.f32 %v992_v62, %v3038_v29  ;;  %v1081_v63 = vpop.f32.mrf.mxu1 }
 0x10d   : > { %v3283_v17 = vadd.f32 %v1256_v10, %v1168_v61  ;;  %v1082_v11 = vadd.f32 %v1081_v63, %v993_v38  ;;  %1031 = vmatmul.bf16.gmra.mxu0 %v3274_v41  ;;  %v2106_v61 = vld [vmem:[%s2756_s25 + $0x1f0] sm:$0xf0]  ;;  %v2112_v10 = vld [vmem:[%s2756_s25 + $0x1e8] sm:$0xf]  ;;  %v2441_v38 = vld [vmem:[%s2756_s25 + $0x1f4] sm:$0xf0] }
 0x10e   : > { %1120 = vmatmul.bf16.gmra.mxu1 %v3276_v40  ;;  %v2439_v63 = vld [vmem:[%s2756_s25 + $0x1ec] sm:$0xf]  ;;  %v3300_v40 = vor.u32 %v2440_v58, %v2104_v37  ;;  %v3302_v41 = vor.u32 %v2438_v59, %v2106_v61 }
 0x10f   : > { %3596 = vst [vmem:[#allocation32_spill] sm:$0xff] %v3283_v17  ;;  %1209 = vmatmul.bf16.gmra.mxu2 %v3278_v6  ;;  %v2114_v6 = vld [vmem:[%s2756_s25 + $0x1f8] sm:$0xf0]  ;;  %s2377_s25 = sshll.u32 %s3633_s22, 3 }
 0x110   : > { %1298 = vmatmul.bf16.gmra.mxu3 %v3281_v4  ;;  %s3414_s6 = scalar_lea.vmem %s3543_s3, %s2377_s25 }
 0x112   : > { %v1170_v19 = vpop.f32.mrf.mxu2  ;;  %v994_v7 = vpop.f32.mrf.mxu0 }
 0x113   : > { %v1171_v62 = vadd.f32 %v1170_v19, %v1082_v11  ;;  %v1259_v30 = vpop.f32.mrf.mxu3  ;;  %v995_v8 = vadd.f32 %v994_v7, %v3038_v29  ;;  %v1083_v43 = vpop.f32.mrf.mxu1  ;;  %v3304_v7 = vor.u32 %v2441_v38, %v2112_v10 }
 0x115   : > { %v3290_v16 = vadd.f32 %v1259_v30, %v1171_v62  ;;  %v1084_v36 = vadd.f32 %v1083_v43, %v995_v8  ;;  %v3307_v8 = vor.u32 %v2439_v63, %v2114_v6 }
 0x117   : > { %3597 = vst [vmem:[#allocation33_spill] sm:$0xff] %v3290_v16 }
 0x118   : > { %3598 = vst [vmem:[#allocation34_spill] sm:$0xff] %v3307_v8 }
 0x11a   : > { %v1172_v4 = vpop.f32.mrf.mxu2  ;;  %v997_v17 = vpop.f32.mrf.mxu0 }
 0x11b   : > { %v1173_v11 = vadd.f32 %v1172_v4, %v1084_v36  ;;  %v1261_v19 = vpop.f32.mrf.mxu3  ;;  %v998_v62 = vadd.f32 %v997_v17, %v3038_v29  ;;  %v1086_v30 = vpop.f32.mrf.mxu1 }
 0x11d   : > { %v3309_v43 = vadd.f32 %v1261_v19, %v1173_v11  ;;  %v1087_v16 = vadd.f32 %v1086_v30, %v998_v62  ;;  %1036 = vmatmul.bf16.gmra.mxu0 %v3300_v40 }
 0x11e   : > { %1125 = vmatmul.bf16.gmra.mxu1 %v3302_v41 }
 0x11f   : > { %1214 = vmatmul.bf16.gmra.mxu2 %v3304_v7 }
 0x120   : > { %1303 = vmatmul.bf16.gmra.mxu3 %v3307_v8 }
 0x122   : > { %v1175_v4 = vpop.f32.mrf.mxu2  ;;  %v999_v58 = vpop.f32.mrf.mxu0 }
 0x123   : > { %v1176_v36 = vadd.f32 %v1175_v4, %v1087_v16  ;;  %v1264_v37 = vpop.f32.mrf.mxu3  ;;  %v1000_v17 = vadd.f32 %v999_v58, %v3038_v29  ;;  %v1088_v59 = vpop.f32.mrf.mxu1 }
 0x125   : > { %v3316_v6 = vadd.f32 %v1264_v37, %v1176_v36  ;;  %v1089_v61 = vadd.f32 %v1088_v59, %v1000_v17 }
 0x12a   : > { %v1177_v10 = vpop.f32.mrf.mxu2  ;;  %v1002_v11 = vpop.f32.mrf.mxu0 }
 0x12b   : > { %v1178_v38 = vadd.f32 %v1177_v10, %v1089_v61  ;;  %v1266_v63 = vpop.f32.mrf.mxu3  ;;  %v1003_v19 = vadd.f32 %v1002_v11, %v3038_v29  ;;  %v1091_v62 = vpop.f32.mrf.mxu1 }
 0x12d   : > { %v3319_v30 = vadd.f32 %v1266_v63, %v1178_v38  ;;  %v1092_v8 = vadd.f32 %v1091_v62, %v1003_v19  ;;  %1317 = vmatmul.bf16.vlgmr.msrb.gmra.mxu0 %v2779_v46 }
 0x12e   : > { %1406 = vmatmul.bf16.vlgmr.msrb.gmra.mxu1 %v2786_v51 }
 0x12f   : > { %1495 = vmatmul.bf16.vlgmr.msrb.gmra.mxu2 %v2788_v52 }
 0x130   : > { %1584 = vmatmul.bf16.vlgmr.msrb.gmra.mxu3 %v2790_v53 }
 0x132   : > { %v1180_v16 = vpop.f32.mrf.mxu2  ;;  %v1004_v37 = vpop.f32.mrf.mxu0 }
 0x133   : > { %v1181_v4 = vadd.f32 %v1180_v16, %v1092_v8  ;;  %v1269_v36 = vpop.f32.mrf.mxu3  ;;  %v1005_v58 = vadd.f32 %v1004_v37, %v3038_v29  ;;  %v1093_v17 = vpop.f32.mrf.mxu1 }
 0x135   : > { %v3326_v59 = vadd.f32 %v1269_v36, %v1181_v4  ;;  %v1094_v61 = vadd.f32 %v1093_v17, %v1005_v58 }
 0x13a   : > { %v1182_v10 = vpop.f32.mrf.mxu2  ;;  %v1007_v46 = vpop.f32.mrf.mxu0 }
 0x13b   : > { %v1183_v38 = vadd.f32 %v1182_v10, %v1094_v61  ;;  %v1271_v63 = vpop.f32.mrf.mxu3  ;;  %v1008_v51 = vadd.f32 %v1007_v46, %v3038_v29  ;;  %v1096_v11 = vpop.f32.mrf.mxu1 }
 0x13d   : > { %v3329_v52 = vadd.f32 %v1271_v63, %v1183_v38  ;;  %v1097_v53 = vadd.f32 %v1096_v11, %v1008_v51  ;;  %1322 = vmatmul.bf16.gmra.mxu0 %v2828_v12 }
 0x13e   : > { %1411 = vmatmul.bf16.gmra.mxu1 %v2830_v13 }
 0x13f   : > { %1500 = vmatmul.bf16.gmra.mxu2 %v2832_v14 }
 0x140   : > { %1589 = vmatmul.bf16.gmra.mxu3 %v2834_v15 }
 0x142   : > { %v1185_v8 = vpop.f32.mrf.mxu2  ;;  %v1009_v16 = vpop.f32.mrf.mxu0 }
 0x143   : > { %v1186_v19 = vadd.f32 %v1185_v8, %v1097_v53  ;;  %v1274_v62 = vpop.f32.mrf.mxu3  ;;  %v1010_v4 = vadd.f32 %v1009_v16, %v3038_v29  ;;  %v1098_v36 = vpop.f32.mrf.mxu1 }
 0x145   : > { %v3336_v37 = vadd.f32 %v1274_v62, %v1186_v19  ;;  %v1099_v58 = vadd.f32 %v1098_v36, %v1010_v4 }
 0x14a   : > { %v1187_v17 = vpop.f32.mrf.mxu2  ;;  %v1012_v12 = vpop.f32.mrf.mxu0 }
 0x14b   : > { %v1188_v61 = vadd.f32 %v1187_v17, %v1099_v58  ;;  %v1276_v10 = vpop.f32.mrf.mxu3  ;;  %v1013_v13 = vadd.f32 %v1012_v12, %v3038_v29  ;;  %v1101_v38 = vpop.f32.mrf.mxu1 }
 0x14d   : > { %v3339_v14 = vadd.f32 %v1276_v10, %v1188_v61  ;;  %v1102_v15 = vadd.f32 %v1101_v38, %v1013_v13  ;;  %1327 = vmatmul.bf16.gmra.mxu0 %v2848_v24 }
 0x14e   : > { %1416 = vmatmul.bf16.gmra.mxu1 %v2850_v25 }
 0x14f   : > { %1505 = vmatmul.bf16.gmra.mxu2 %v2852_v26 }
 0x150   : > { %1594 = vmatmul.bf16.gmra.mxu3 %v2854_v27 }
 0x152   : > { %v1190_v63 = vpop.f32.mrf.mxu2  ;;  %v1014_v11 = vpop.f32.mrf.mxu0 }
 0x153   : > { %v1191_v46 = vadd.f32 %v1190_v63, %v1102_v15  ;;  %v1279_v51 = vpop.f32.mrf.mxu3  ;;  %v1015_v53 = vadd.f32 %v1014_v11, %v3038_v29  ;;  %v1103_v8 = vpop.f32.mrf.mxu1 }
 0x155   : > { %v3346_v19 = vadd.f32 %v1279_v51, %v1191_v46  ;;  %v1104_v62 = vadd.f32 %v1103_v8, %v1015_v53 }
 0x15a   : > { %v1192_v16 = vpop.f32.mrf.mxu2  ;;  %v1017_v24 = vpop.f32.mrf.mxu0 }
 0x15b   : > { %v1193_v4 = vadd.f32 %v1192_v16, %v1104_v62  ;;  %v1281_v36 = vpop.f32.mrf.mxu3  ;;  %v1018_v25 = vadd.f32 %v1017_v24, %v3038_v29  ;;  %v1106_v58 = vpop.f32.mrf.mxu1 }
 0x15d   : > { %v3349_v26 = vadd.f32 %v1281_v36, %v1193_v4  ;;  %v1107_v27 = vadd.f32 %v1106_v58, %v1018_v25  ;;  %1332 = vmatmul.bf16.gmra.mxu0 %v2892_v49 }
 0x15e   : > { %1421 = vmatmul.bf16.gmra.mxu1 %v2894_v50 }
 0x15f   : > { %1510 = vmatmul.bf16.gmra.mxu2 %v2896_v54 }
 0x160   : > { %1599 = vmatmul.bf16.gmra.mxu3 %v2898_v55 }
 0x162   : > { %v1195_v17 = vpop.f32.mrf.mxu2  ;;  %v1019_v12 = vpop.f32.mrf.mxu0 }
 0x163   : > { %v1196_v61 = vadd.f32 %v1195_v17, %v1107_v27  ;;  %v1284_v10 = vpop.f32.mrf.mxu3  ;;  %v1020_v13 = vadd.f32 %v1019_v12, %v3038_v29  ;;  %v1108_v38 = vpop.f32.mrf.mxu1 }
 0x165   : > { %v3356_v15 = vadd.f32 %v1284_v10, %v1196_v61  ;;  %v1109_v63 = vadd.f32 %v1108_v38, %v1020_v13 }
 0x16a   : > { %v1197_v46 = vpop.f32.mrf.mxu2  ;;  %v1022_v49 = vpop.f32.mrf.mxu0 }
 0x16b   : > { %v1198_v51 = vadd.f32 %v1197_v46, %v1109_v63  ;;  %v1286_v11 = vpop.f32.mrf.mxu3  ;;  %v1023_v50 = vadd.f32 %v1022_v49, %v3038_v29  ;;  %v1111_v53 = vpop.f32.mrf.mxu1 }
 0x16d   : > { %v3359_v54 = vadd.f32 %v1286_v11, %v1198_v51  ;;  %v1112_v55 = vadd.f32 %v1111_v53, %v1023_v50  ;;  %1337 = vmatmul.bf16.gmra.mxu0 %v2912_v0 }
 0x16e   : > { %1426 = vmatmul.bf16.gmra.mxu1 %v2914_v1 }
 0x16f   : > { %1515 = vmatmul.bf16.gmra.mxu2 %v2916_v2 }
 0x170   : > { %1604 = vmatmul.bf16.gmra.mxu3 %v2918_v3 }
 0x172   : > { %v1200_v8 = vpop.f32.mrf.mxu2  ;;  %v1024_v4 = vpop.f32.mrf.mxu0 }
 0x173   : > { %v1201_v62 = vadd.f32 %v1200_v8, %v1112_v55  ;;  %v1289_v16 = vpop.f32.mrf.mxu3  ;;  %v1025_v36 = vadd.f32 %v1024_v4, %v3038_v29  ;;  %v1113_v24 = vpop.f32.mrf.mxu1 }
 0x175   : > { %v3366_v25 = vadd.f32 %v1289_v16, %v1201_v62  ;;  %v1114_v58 = vadd.f32 %v1113_v24, %v1025_v36 }
 0x17a   : > { %v1202_v27 = vpop.f32.mrf.mxu2  ;;  %v1027_v0 = vpop.f32.mrf.mxu0 }
 0x17b   : > { %v1203_v17 = vadd.f32 %v1202_v27, %v1114_v58  ;;  %v1291_v61 = vpop.f32.mrf.mxu3  ;;  %v1028_v1 = vadd.f32 %v1027_v0, %v3038_v29  ;;  %v1116_v10 = vpop.f32.mrf.mxu1 }
 0x17d   : > { %v3369_v2 = vadd.f32 %v1291_v61, %v1203_v17  ;;  %v1117_v3 = vadd.f32 %v1116_v10, %v1028_v1  ;;  %1342 = vmatmul.bf16.gmra.mxu0 %v2956_v32 }
 0x17e   : > { %1431 = vmatmul.bf16.gmra.mxu1 %v2958_v33 }
 0x17f   : > { %1520 = vmatmul.bf16.gmra.mxu2 %v2960_v34 }
 0x180   : > { %1609 = vmatmul.bf16.gmra.mxu3 %v2962_v35 }
 0x182   : > { %v1205_v12 = vpop.f32.mrf.mxu2  ;;  %v1029_v63 = vpop.f32.mrf.mxu0 }
 0x183   : > { %v1206_v13 = vadd.f32 %v1205_v12, %v1117_v3  ;;  %v1294_v38 = vpop.f32.mrf.mxu3  ;;  %v1030_v46 = vadd.f32 %v1029_v63, %v3038_v29  ;;  %v1118_v51 = vpop.f32.mrf.mxu1 }
 0x185   : > { %v3376_v11 = vadd.f32 %v1294_v38, %v1206_v13  ;;  %v1119_v49 = vadd.f32 %v1118_v51, %v1030_v46 }
 0x18a   : > { %v1207_v50 = vpop.f32.mrf.mxu2  ;;  %v1032_v32 = vpop.f32.mrf.mxu0 }
 0x18b   : > { %v1208_v53 = vadd.f32 %v1207_v50, %v1119_v49  ;;  %v1296_v55 = vpop.f32.mrf.mxu3  ;;  %v1033_v33 = vadd.f32 %v1032_v32, %v3038_v29  ;;  %v1121_v8 = vpop.f32.mrf.mxu1  ;;  %v3399_v50 = vperm.slane %v3035_v28, 1 }
 0x18d   : > { %v3379_v34 = vadd.f32 %v1296_v55, %v1208_v53  ;;  %v1122_v35 = vadd.f32 %v1121_v8, %v1033_v33  ;;  %1347 = vmatmul.bf16.gmra.mxu0 %v2976_v44 }
 0x18e   : > { %1436 = vmatmul.bf16.gmra.mxu1 %v2978_v45 }
 0x18f   : > { %1525 = vmatmul.bf16.gmra.mxu2 %v2980_v47 }
 0x190   : > { %1614 = vmatmul.bf16.gmra.mxu3 %v2982_v48 }
 0x192   : > { %v1210_v62 = vpop.f32.mrf.mxu2  ;;  %v1034_v36 = vpop.f32.mrf.mxu0 }
 0x193   : > { %v1211_v16 = vadd.f32 %v1210_v62, %v1122_v35  ;;  %v1299_v4 = vpop.f32.mrf.mxu3  ;;  %v1035_v24 = vadd.f32 %v1034_v36, %v3038_v29  ;;  %v1123_v58 = vpop.f32.mrf.mxu1  ;;  %v1665_v36 = vmax.f32 %v3080_v31, 0.0  ;;  %v1667_v31 = vmax.f32 %v3105_v18, 0.0  ;;  %v3601_v18 = vld [vmem:[#allocation4_spill] sm:$0xff] }
 0x195   : > { %v3386_v27 = vadd.f32 %v1299_v4, %v1211_v16  ;;  %v1124_v17 = vadd.f32 %v1123_v58, %v1035_v24 }
 0x19a   : > { %v1212_v61 = vpop.f32.mrf.mxu2  ;;  %v1037_v44 = vpop.f32.mrf.mxu0 }
 0x19b   : > { %v1213_v0 = vadd.f32 %v1212_v61, %v1124_v17  ;;  %v1301_v1 = vpop.f32.mrf.mxu3  ;;  %v1038_v45 = vadd.f32 %v1037_v44, %v3038_v29  ;;  %v1126_v10 = vpop.f32.mrf.mxu1 }
 0x19d   : > { %v3389_v47 = vadd.f32 %v1301_v1, %v1213_v0  ;;  %v1127_v48 = vadd.f32 %v1126_v10, %v1038_v45  ;;  %1352 = vmatmul.bf16.gmra.mxu0 %v3020_v20  ;;  %v3599_v10 = vld [vmem:[#allocation2_spill] sm:$0xff] }
 0x19e   : > { %1441 = vmatmul.bf16.gmra.mxu1 %v3022_v21 }
 0x19f   : > { %1530 = vmatmul.bf16.gmra.mxu2 %v3024_v22 }
 0x1a0   : > { %1619 = vmatmul.bf16.gmra.mxu3 %v3026_v23 }
 0x1a2   : > { %v1215_v3 = vpop.f32.mrf.mxu2  ;;  %v1039_v38 = vpop.f32.mrf.mxu0 }
 0x1a3   : > { %v1216_v12 = vadd.f32 %v1215_v3, %v1127_v48  ;;  %v1304_v13 = vpop.f32.mrf.mxu3  ;;  %v1040_v63 = vadd.f32 %v1039_v38, %v3038_v29  ;;  %v1128_v46 = vpop.f32.mrf.mxu1  ;;  %v3600_v48 = vld [vmem:[#allocation3_spill] sm:$0xff] }
 0x1a5   : > { %v3396_v51 = vadd.f32 %v1304_v13, %v1216_v12  ;;  %v1129_v49 = vadd.f32 %v1128_v46, %v1040_v63 }
 0x1aa   : > { %v1217_v20 = vpop.f32.mrf.mxu2  ;;  %v1318_v22 = vpop.f32.mrf.mxu0 }
 0x1ab   : > { %v1218_v53 = vadd.f32 %v1217_v20, %v1129_v49  ;;  %v1306_v21 = vpop.f32.mrf.mxu3  ;;  %v1319_v23 = vadd.f32 %v1318_v22, %v3399_v50  ;;  %v1407_v55 = vpop.f32.mrf.mxu1  ;;  %v1669_v20 = vmax.f32 %v3601_v18, 0.0  ;;  %v3608_v18 = vld [vmem:[#allocation11_spill] sm:$0xff] }
 0x1ad   : > { %v3402_v32 = vadd.f32 %v1306_v21, %v1218_v53  ;;  %1357 = vmatmul.bf16.gmra.mxu0 %v3048_v42  ;;  %v1408_v29 = vadd.f32 %v1407_v55, %v1319_v23 }
 0x1ae   : > { %1446 = vmatmul.bf16.gmra.mxu1 %v3050_v56 }
 0x1af   : > { %1535 = vmatmul.bf16.gmra.mxu2 %v3052_v57 }
 0x1b0   : > { %1624 = vmatmul.bf16.gmra.mxu3 %v3055_v60 }
 0x1b2   : > { %v1496_v28 = vpop.f32.mrf.mxu2  ;;  %v1320_v35 = vpop.f32.mrf.mxu0 }
 0x1b3   : > { %v1497_v33 = vadd.f32 %v1496_v28, %v1408_v29  ;;  %v1585_v8 = vpop.f32.mrf.mxu3  ;;  %v1409_v62 = vpop.f32.mrf.mxu1  ;;  %v1321_v4 = vadd.f32 %v1320_v35, %v3399_v50  ;;  %v3602_v35 = vld [vmem:[#allocation5_spill] sm:$0xff] }
 0x1b5   : > { %v1586_v16 = vadd.f32 %v1585_v8, %v1497_v33  ;;  %v1410_v56 = vadd.f32 %v1409_v62, %v1321_v4  ;;  %v3603_v62 = vld [vmem:[#allocation9_spill] sm:$0xff] }
 0x1b7   : > { %v1666_v24 = vmax.f32 %v1586_v16, 0.0  ;;  %v1671_v16 = vmax.f32 %v3603_v62, 0.0 }
 0x1b9   : > { %v1729_v42 = vpack.c.bf16 %v1666_v24, %v1665_v36  ;;  %v3604_v24 = vld [vmem:[#allocation6_spill] sm:$0xff] }
 0x1ba   : > { %v1498_v57 = vpop.f32.mrf.mxu2  ;;  %v1323_v17 = vpop.f32.mrf.mxu0 }
 0x1bb   : > { %1761 = vst [vmem:[%s3414_s6] sm:$0xff] %v1729_v42  ;;  %v1499_v60 = vadd.f32 %v1498_v57, %v1410_v56  ;;  %v1587_v58 = vpop.f32.mrf.mxu3  ;;  %v1324_v61 = vadd.f32 %v1323_v17, %v3399_v50  ;;  %v1412_v0 = vpop.f32.mrf.mxu1  ;;  %v3605_v42 = vld [vmem:[#allocation7_spill] sm:$0xff]  ;;  %v3606_v56 = vld [vmem:[#allocation8_spill] sm:$0xff] }
 0x1bd   : > { %v1588_v1 = vadd.f32 %v1587_v58, %v1499_v60  ;;  %1362 = vmatmul.bf16.gmra.mxu0 %v3096_v5  ;;  %v1413_v45 = vadd.f32 %v1412_v0, %v1324_v61 }
 0x1be   : > { %1451 = vmatmul.bf16.gmra.mxu1 %v3098_v9 }
 0x1bf   : > { %v1668_v44 = vmax.f32 %v1588_v1, 0.0  ;;  %1540 = vmatmul.bf16.gmra.mxu2 %v3599_v10 }
 0x1c0   : > { %1629 = vmatmul.bf16.gmra.mxu3 %v3600_v48 }
 0x1c1   : > { %v1730_v3 = vpack.c.bf16 %v1668_v44, %v1667_v31  ;;  %v3607_v44 = vld [vmem:[#allocation10_spill] sm:$0xff] }
 0x1c2   : > { %v1501_v12 = vpop.f32.mrf.mxu2  ;;  %v1325_v63 = vpop.f32.mrf.mxu0 }
 0x1c3   : > { %1762 = vst [vmem:[%s3414_s6 + $0x8] sm:$0xff] %v1730_v3  ;;  %v1502_v13 = vadd.f32 %v1501_v12, %v1413_v45  ;;  %v1590_v38 = vpop.f32.mrf.mxu3  ;;  %v1414_v46 = vpop.f32.mrf.mxu1  ;;  %v1326_v5 = vadd.f32 %v1325_v63, %v3399_v50  ;;  %v1673_v45 = vmax.f32 %v3607_v44, 0.0  ;;  %v3614_v44 = vld [vmem:[#allocation17_spill] sm:$0xff] }
 0x1c5   : > { %v1591_v49 = vadd.f32 %v1590_v38, %v1502_v13  ;;  %v1415_v9 = vadd.f32 %v1414_v46, %v1326_v5 }
 0x1c7   : > { %v1670_v53 = vmax.f32 %v1591_v49, 0.0 }
 0x1c9   : > { %v1731_v21 = vpack.c.bf16 %v1670_v53, %v1669_v20  ;;  %v3609_v20 = vld [vmem:[#allocation15_spill] sm:$0xff] }
 0x1ca   : > { %v1503_v22 = vpop.f32.mrf.mxu2  ;;  %v1328_v29 = vpop.f32.mrf.mxu0  ;;  %v1675_v53 = vmax.f32 %v3609_v20, 0.0 }
 0x1cb   : > { %1763 = vst [vmem:[%s3414_s6 + $0x10] sm:$0xff] %v1731_v21  ;;  %v1504_v23 = vadd.f32 %v1503_v22, %v1415_v9  ;;  %v1592_v55 = vpop.f32.mrf.mxu3  ;;  %v1329_v28 = vadd.f32 %v1328_v29, %v3399_v50  ;;  %v1417_v33 = vpop.f32.mrf.mxu1  ;;  %v3610_v22 = vld [vmem:[#allocation12_spill] sm:$0xff] }
 0x1cd   : > { %v1593_v8 = vadd.f32 %v1592_v55, %v1504_v23  ;;  %1367 = vmatmul.bf16.gmra.mxu0 %v3602_v35  ;;  %v1418_v36 = vadd.f32 %v1417_v33, %v1329_v28  ;;  %v3611_v23 = vld [vmem:[#allocation13_spill] sm:$0xff]  ;;  %v3612_v55 = vld [vmem:[#allocation14_spill] sm:$0xff] }
 0x1ce   : > { %1456 = vmatmul.bf16.gmra.mxu1 %v3604_v24 }
 0x1cf   : > { %v1672_v4 = vmax.f32 %v1593_v8, 0.0  ;;  %1545 = vmatmul.bf16.gmra.mxu2 %v3605_v42 }
 0x1d0   : > { %1634 = vmatmul.bf16.gmra.mxu3 %v3606_v56 }
 0x1d1   : > { %v1732_v57 = vpack.c.bf16 %v1672_v4, %v1671_v16 }
 0x1d2   : > { %v1506_v60 = vpop.f32.mrf.mxu2  ;;  %v1330_v61 = vpop.f32.mrf.mxu0 }
 0x1d3   : > { %1764 = vst [vmem:[%s3414_s6 + $0x18] sm:$0xff] %v1732_v57  ;;  %v1507_v58 = vadd.f32 %v1506_v60, %v1418_v36  ;;  %v1595_v17 = vpop.f32.mrf.mxu3  ;;  %v1419_v0 = vpop.f32.mrf.mxu1  ;;  %v1331_v31 = vadd.f32 %v1330_v61, %v3399_v50  ;;  %v3613_v36 = vld [vmem:[#allocation16_spill] sm:$0xff] }
 0x1d4   : > { %v1677_v24 = vmax.f32 %v3613_v36, 0.0  ;;  %v3620_v36 = vld [vmem:[#allocation26_spill] sm:$0xff] }
 0x1d5   : > { %v1596_v1 = vadd.f32 %v1595_v17, %v1507_v58  ;;  %v1420_v3 = vadd.f32 %v1419_v0, %v1331_v31 }
 0x1d7   : > { %v1674_v10 = vmax.f32 %v1596_v1, 0.0 }
 0x1d9   : > { %v1733_v48 = vpack.c.bf16 %v1674_v10, %v1673_v45  ;;  %v3615_v45 = vld [vmem:[#allocation21_spill] sm:$0xff] }
 0x1da   : > { %v1508_v12 = vpop.f32.mrf.mxu2  ;;  %v1333_v63 = vpop.f32.mrf.mxu0  ;;  %v1679_v10 = vmax.f32 %v3615_v45, 0.0 }
 0x1db   : > { %1765 = vst [vmem:[%s3414_s6 + $0x20] sm:$0xff] %v1733_v48  ;;  %v1509_v13 = vadd.f32 %v1508_v12, %v1420_v3  ;;  %v1597_v38 = vpop.f32.mrf.mxu3  ;;  %v1334_v46 = vadd.f32 %v1333_v63, %v3399_v50  ;;  %v1422_v49 = vpop.f32.mrf.mxu1  ;;  %v3616_v12 = vld [vmem:[#allocation18_spill] sm:$0xff] }
 0x1dd   : > { %v1598_v5 = vadd.f32 %v1597_v38, %v1509_v13  ;;  %1372 = vmatmul.bf16.gmra.mxu0 %v3608_v18  ;;  %v1423_v9 = vadd.f32 %v1422_v49, %v1334_v46  ;;  %v3617_v13 = vld [vmem:[#allocation19_spill] sm:$0xff]  ;;  %v3618_v38 = vld [vmem:[#allocation20_spill] sm:$0xff] }
 0x1de   : > { %1461 = vmatmul.bf16.gmra.mxu1 %v3610_v22 }
 0x1df   : > { %v1676_v21 = vmax.f32 %v1598_v5, 0.0  ;;  %1550 = vmatmul.bf16.gmra.mxu2 %v3611_v23 }
 0x1e0   : > { %1639 = vmatmul.bf16.gmra.mxu3 %v3612_v55 }
 0x1e1   : > { %v1734_v29 = vpack.c.bf16 %v1676_v21, %v1675_v53 }
 0x1e2   : > { %v1511_v28 = vpop.f32.mrf.mxu2  ;;  %v1335_v35 = vpop.f32.mrf.mxu0 }
 0x1e3   : > { %1766 = vst [vmem:[%s3414_s6 + $0x28] sm:$0xff] %v1734_v29  ;;  %v1512_v33 = vadd.f32 %v1511_v28, %v1423_v9  ;;  %v1600_v8 = vpop.f32.mrf.mxu3  ;;  %v1424_v62 = vpop.f32.mrf.mxu1  ;;  %v1336_v4 = vadd.f32 %v1335_v35, %v3399_v50  ;;  %v3619_v9 = vld [vmem:[#allocation22_spill] sm:$0xff] }
 0x1e4   : > { %v1681_v22 = vmax.f32 %v3619_v9, 0.0 }
 0x1e5   : > { %v1601_v16 = vadd.f32 %v1600_v8, %v1512_v33  ;;  %v1425_v57 = vadd.f32 %v1424_v62, %v1336_v4 }
 0x1e7   : > { %v1678_v42 = vmax.f32 %v1601_v16, 0.0 }
 0x1e9   : > { %v1735_v56 = vpack.c.bf16 %v1678_v42, %v1677_v24  ;;  %v1683_v24 = vmax.f32 %v3620_v36, 0.0 }
 0x1ea   : > { %v1513_v60 = vpop.f32.mrf.mxu2  ;;  %v1338_v61 = vpop.f32.mrf.mxu0 }
 0x1eb   : > { %1767 = vst [vmem:[%s3414_s6 + $0x30] sm:$0xff] %v1735_v56  ;;  %v1514_v58 = vadd.f32 %v1513_v60, %v1425_v57  ;;  %v1602_v17 = vpop.f32.mrf.mxu3  ;;  %v1339_v0 = vadd.f32 %v1338_v61, %v3399_v50  ;;  %v1427_v1 = vpop.f32.mrf.mxu1  ;;  %v3621_v57 = vld [vmem:[#allocation23_spill] sm:$0xff]  ;;  %v3622_v60 = vld [vmem:[#allocation24_spill] sm:$0xff] }
 0x1ed   : > { %v1603_v31 = vadd.f32 %v1602_v17, %v1514_v58  ;;  %1377 = vmatmul.bf16.gmra.mxu0 %v3614_v44  ;;  %v1428_v3 = vadd.f32 %v1427_v1, %v1339_v0  ;;  %v3623_v58 = vld [vmem:[#allocation25_spill] sm:$0xff] }
 0x1ee   : > { %1466 = vmatmul.bf16.gmra.mxu1 %v3616_v12 }
 0x1ef   : > { %v1680_v48 = vmax.f32 %v1603_v31, 0.0  ;;  %1555 = vmatmul.bf16.gmra.mxu2 %v3617_v13 }
 0x1f0   : > { %1644 = vmatmul.bf16.gmra.mxu3 %v3618_v38 }
 0x1f1   : > { %v1736_v63 = vpack.c.bf16 %v1680_v48, %v1679_v10  ;;  %v3624_v10 = vld [vmem:[#allocation27_spill] sm:$0xff] }
 0x1f2   : > { %v1516_v46 = vpop.f32.mrf.mxu2  ;;  %v1340_v18 = vpop.f32.mrf.mxu0  ;;  %v1685_v48 = vmax.f32 %v3624_v10, 0.0 }
 0x1f3   : > { %1768 = vst [vmem:[%s3414_s6 + $0x38] sm:$0xff] %v1736_v63  ;;  %v1517_v49 = vadd.f32 %v1516_v46, %v1428_v3  ;;  %v1605_v5 = vpop.f32.mrf.mxu3  ;;  %v1429_v20 = vpop.f32.mrf.mxu1  ;;  %v1341_v21 = vadd.f32 %v1340_v18, %v3399_v50 }
 0x1f5   : > { %v1606_v53 = vadd.f32 %v1605_v5, %v1517_v49  ;;  %v1430_v29 = vadd.f32 %v1429_v20, %v1341_v21  ;;  %v3626_v21 = vld [vmem:[#allocation32_spill] sm:$0xff] }
 0x1f6   : > { %v1687_v9 = vmax.f32 %v3626_v21, 0.0 }
 0x1f7   : > { %v1682_v23 = vmax.f32 %v1606_v53, 0.0  ;;  %v3625_v53 = vld [vmem:[#allocation28_spill] sm:$0xff] }
 0x1f9   : > { %v1737_v55 = vpack.c.bf16 %v1682_v23, %v1681_v22 }
 0x1fa   : > { %v1518_v28 = vpop.f32.mrf.mxu2  ;;  %v1343_v35 = vpop.f32.mrf.mxu0 }
 0x1fb   : > { %1769 = vst [vmem:[%s3414_s6 + $0x40] sm:$0xff] %v1737_v55  ;;  %v1519_v33 = vadd.f32 %v1518_v28, %v1430_v29  ;;  %v1607_v8 = vpop.f32.mrf.mxu3  ;;  %v1344_v62 = vadd.f32 %v1343_v35, %v3399_v50  ;;  %v1432_v16 = vpop.f32.mrf.mxu1  ;;  %v3627_v55 = vld [vmem:[#allocation29_spill] sm:$0xff]  ;;  %v3628_v29 = vld [vmem:[#allocation30_spill] sm:$0xff]  ;;  %v3629_v28 = vld [vmem:[#allocation31_spill] sm:$0xff] }
 0x1fd   : > { %v1608_v4 = vadd.f32 %v1607_v8, %v1519_v33  ;;  %1382 = vmatmul.bf16.gmra.mxu0 %v3248_v39  ;;  %v1433_v56 = vadd.f32 %v1432_v16, %v1344_v62 }
 0x1fe   : > { %1471 = vmatmul.bf16.gmra.mxu1 %v3621_v57 }
 0x1ff   : > { %v1684_v42 = vmax.f32 %v1608_v4, 0.0  ;;  %1560 = vmatmul.bf16.gmra.mxu2 %v3622_v60 }
 0x200   : > { %1649 = vmatmul.bf16.gmra.mxu3 %v3623_v58 }
 0x201   : > { %v1738_v17 = vpack.c.bf16 %v1684_v42, %v1683_v24  ;;  %v3630_v42 = vld [vmem:[#allocation33_spill] sm:$0xff] }
 0x202   : > { %v1521_v61 = vpop.f32.mrf.mxu2  ;;  %v1345_v31 = vpop.f32.mrf.mxu0 }
 0x203   : > { %1770 = vst [vmem:[%s3414_s6 + $0x48] sm:$0xff] %v1738_v17  ;;  %v1522_v0 = vadd.f32 %v1521_v61, %v1433_v56  ;;  %v1610_v1 = vpop.f32.mrf.mxu3  ;;  %v1434_v44 = vpop.f32.mrf.mxu1  ;;  %v1346_v39 = vadd.f32 %v1345_v31, %v3399_v50  ;;  %v1689_v56 = vmax.f32 %v3630_v42, 0.0  ;;  %v1697_v42 = vmax.f32 %v3326_v59, 0.0 }
 0x205   : > { %v1611_v45 = vadd.f32 %v1610_v1, %v1522_v0  ;;  %v1435_v13 = vadd.f32 %v1434_v44, %v1346_v39  ;;  %v1691_v39 = vmax.f32 %v3309_v43, 0.0  ;;  %v1693_v43 = vmax.f32 %v3316_v6, 0.0 }
 0x207   : > { %v1686_v3 = vmax.f32 %v1611_v45, 0.0 }
 0x209   : > { %v1739_v12 = vpack.c.bf16 %v1686_v3, %v1685_v48  ;;  %v3631_v3 = vld [vmem:[#allocation34_spill] sm:$0xff] }
 0x20a   : > { %v1523_v38 = vpop.f32.mrf.mxu2  ;;  %v1348_v49 = vpop.f32.mrf.mxu0 }
 0x20b   : > { %1771 = vst [vmem:[%s3414_s6 + $0x50] sm:$0xff] %v1739_v12  ;;  %v1524_v63 = vadd.f32 %v1523_v38, %v1435_v13  ;;  %v1612_v46 = vpop.f32.mrf.mxu3  ;;  %v1349_v5 = vadd.f32 %v1348_v49, %v3399_v50  ;;  %v1437_v18 = vpop.f32.mrf.mxu1 }
 0x20d   : > { %v1613_v20 = vadd.f32 %v1612_v46, %v1524_v63  ;;  %1387 = vmatmul.bf16.gmra.mxu0 %v3625_v53  ;;  %v1438_v23 = vadd.f32 %v1437_v18, %v1349_v5 }
 0x20e   : > { %1476 = vmatmul.bf16.gmra.mxu1 %v3627_v55 }
 0x20f   : > { %v1688_v22 = vmax.f32 %v1613_v20, 0.0  ;;  %1565 = vmatmul.bf16.gmra.mxu2 %v3628_v29  ;;  %v1695_v29 = vmax.f32 %v3319_v30, 0.0 }
 0x210   : > { %1654 = vmatmul.bf16.gmra.mxu3 %v3629_v28 }
 0x211   : > { %v1740_v33 = vpack.c.bf16 %v1688_v22, %v1687_v9 }
 0x212   : > { %v1526_v8 = vpop.f32.mrf.mxu2  ;;  %v1350_v16 = vpop.f32.mrf.mxu0 }
 0x213   : > { %1772 = vst [vmem:[%s3414_s6 + $0x58] sm:$0xff] %v1740_v33  ;;  %v1527_v35 = vadd.f32 %v1526_v8, %v1438_v23  ;;  %v1615_v62 = vpop.f32.mrf.mxu3  ;;  %v1439_v4 = vpop.f32.mrf.mxu1  ;;  %v1351_v24 = vadd.f32 %v1350_v16, %v3399_v50 }
 0x215   : > { %v1616_v36 = vadd.f32 %v1615_v62, %v1527_v35  ;;  %v1440_v58 = vadd.f32 %v1439_v4, %v1351_v24 }
 0x217   : > { %v1690_v57 = vmax.f32 %v1616_v36, 0.0 }
 0x219   : > { %v1741_v60 = vpack.c.bf16 %v1690_v57, %v1689_v56 }
 0x21a   : > { %v1528_v17 = vpop.f32.mrf.mxu2  ;;  %v1353_v1 = vpop.f32.mrf.mxu0 }
 0x21b   : > { %1773 = vst [vmem:[%s3414_s6 + $0x60] sm:$0xff] %v1741_v60  ;;  %v1529_v61 = vadd.f32 %v1528_v17, %v1440_v58  ;;  %v1617_v0 = vpop.f32.mrf.mxu3  ;;  %v1354_v31 = vadd.f32 %v1353_v1, %v3399_v50  ;;  %v1442_v44 = vpop.f32.mrf.mxu1 }
 0x21d   : > { %v1618_v45 = vadd.f32 %v1617_v0, %v1529_v61  ;;  %1392 = vmatmul.bf16.gmra.mxu0 %v3300_v40  ;;  %v1443_v48 = vadd.f32 %v1442_v44, %v1354_v31  ;;  %v1699_v44 = vmax.f32 %v3329_v52, 0.0 }
 0x21e   : > { %1481 = vmatmul.bf16.gmra.mxu1 %v3302_v41 }
 0x21f   : > { %v1692_v10 = vmax.f32 %v1618_v45, 0.0  ;;  %1570 = vmatmul.bf16.gmra.mxu2 %v3304_v7 }
 0x220   : > { %1659 = vmatmul.bf16.gmra.mxu3 %v3631_v3 }
 0x221   : > { %v1742_v12 = vpack.c.bf16 %v1692_v10, %v1691_v39 }
 0x222   : > { %v1531_v13 = vpop.f32.mrf.mxu2  ;;  %v1355_v46 = vpop.f32.mrf.mxu0 }
 0x223   : > { %1774 = vst [vmem:[%s3414_s6 + $0x68] sm:$0xff] %v1742_v12  ;;  %v1532_v38 = vadd.f32 %v1531_v13, %v1443_v48  ;;  %v1620_v63 = vpop.f32.mrf.mxu3  ;;  %v1444_v49 = vpop.f32.mrf.mxu1  ;;  %v1356_v40 = vadd.f32 %v1355_v46, %v3399_v50  ;;  %v1701_v46 = vmax.f32 %v3336_v37, 0.0 }
 0x225   : > { %v1621_v5 = vadd.f32 %v1620_v63, %v1532_v38  ;;  %v1445_v20 = vadd.f32 %v1444_v49, %v1356_v40 }
 0x227   : > { %v1694_v18 = vmax.f32 %v1621_v5, 0.0 }
 0x229   : > { %v1743_v41 = vpack.c.bf16 %v1694_v18, %v1693_v43 }
 0x22a   : > { %v1533_v7 = vpop.f32.mrf.mxu2  ;;  %v1358_v9 = vpop.f32.mrf.mxu0 }
 0x22b   : > { %1775 = vst [vmem:[%s3414_s6 + $0x70] sm:$0xff] %v1743_v41  ;;  %v1534_v53 = vadd.f32 %v1533_v7, %v1445_v20  ;;  %v1622_v21 = vpop.f32.mrf.mxu3  ;;  %v1359_v22 = vadd.f32 %v1358_v9, %v3399_v50  ;;  %v1447_v23 = vpop.f32.mrf.mxu1 }
 0x22d   : > { %v1623_v55 = vadd.f32 %v1622_v21, %v1534_v53  ;;  %v1448_v33 = vadd.f32 %v1447_v23, %v1359_v22  ;;  %v1703_v21 = vmax.f32 %v3339_v14, 0.0 }
 0x22f   : > { %v1696_v28 = vmax.f32 %v1623_v55, 0.0 }
 0x231   : > { %v1744_v8 = vpack.c.bf16 %v1696_v28, %v1695_v29 }
 0x232   : > { %v1536_v6 = vpop.f32.mrf.mxu2  ;;  %v1360_v16 = vpop.f32.mrf.mxu0 }
 0x233   : > { %1776 = vst [vmem:[%s3414_s6 + $0x78] sm:$0xff] %v1744_v8  ;;  %v1537_v35 = vadd.f32 %v1536_v6, %v1448_v33  ;;  %v1625_v62 = vpop.f32.mrf.mxu3  ;;  %v1449_v4 = vpop.f32.mrf.mxu1  ;;  %v1361_v24 = vadd.f32 %v1360_v16, %v3399_v50 }
 0x235   : > { %v1626_v36 = vadd.f32 %v1625_v62, %v1537_v35  ;;  %v1450_v60 = vadd.f32 %v1449_v4, %v1361_v24  ;;  %v1705_v35 = vmax.f32 %v3346_v19, 0.0 }
 0x237   : > { %v1698_v56 = vmax.f32 %v1626_v36, 0.0 }
 0x239   : > { %v1745_v57 = vpack.c.bf16 %v1698_v56, %v1697_v42 }
 0x23a   : > { %v1538_v30 = vpop.f32.mrf.mxu2  ;;  %v1363_v61 = vpop.f32.mrf.mxu0 }
 0x23b   : > { %1777 = vst [vmem:[%s3414_s6 + $0x80] sm:$0xff] %v1745_v57  ;;  %v1539_v58 = vadd.f32 %v1538_v30, %v1450_v60  ;;  %v1627_v17 = vpop.f32.mrf.mxu3  ;;  %v1364_v0 = vadd.f32 %v1363_v61, %v3399_v50  ;;  %v1452_v1 = vpop.f32.mrf.mxu1  ;;  %v1707_v30 = vmax.f32 %v3349_v26, 0.0 }
 0x23d   : > { %v1628_v31 = vadd.f32 %v1627_v17, %v1539_v58  ;;  %v1453_v39 = vadd.f32 %v1452_v1, %v1364_v0 }
 0x23f   : > { %v1700_v45 = vmax.f32 %v1628_v31, 0.0 }
 0x241   : > { %v1746_v10 = vpack.c.bf16 %v1700_v45, %v1699_v44 }
 0x242   : > { %v1541_v59 = vpop.f32.mrf.mxu2  ;;  %v1365_v12 = vpop.f32.mrf.mxu0 }
 0x243   : > { %1778 = vst [vmem:[%s3414_s6 + $0x88] sm:$0xff] %v1746_v10  ;;  %v1542_v48 = vadd.f32 %v1541_v59, %v1453_v39  ;;  %v1630_v3 = vpop.f32.mrf.mxu3  ;;  %v1454_v13 = vpop.f32.mrf.mxu1  ;;  %v1366_v63 = vadd.f32 %v1365_v12, %v3399_v50  ;;  %v1709_v10 = vmax.f32 %v3356_v15, 0.0 }
 0x245   : > { %v1631_v38 = vadd.f32 %v1630_v3, %v1542_v48  ;;  %v1455_v40 = vadd.f32 %v1454_v13, %v1366_v63 }
 0x247   : > { %v1702_v49 = vmax.f32 %v1631_v38, 0.0 }
 0x249   : > { %v1747_v5 = vpack.c.bf16 %v1702_v49, %v1701_v46 }
 0x24a   : > { %v1543_v52 = vpop.f32.mrf.mxu2  ;;  %v1368_v41 = vpop.f32.mrf.mxu0 }
 0x24b   : > { %1779 = vst [vmem:[%s3414_s6 + $0x90] sm:$0xff] %v1747_v5  ;;  %v1544_v43 = vadd.f32 %v1543_v52, %v1455_v40  ;;  %v1632_v18 = vpop.f32.mrf.mxu3  ;;  %v1369_v20 = vadd.f32 %v1368_v41, %v3399_v50  ;;  %v1457_v7 = vpop.f32.mrf.mxu1  ;;  %v1711_v5 = vmax.f32 %v3359_v54, 0.0 }
 0x24d   : > { %v1633_v53 = vadd.f32 %v1632_v18, %v1544_v43  ;;  %v1458_v22 = vadd.f32 %v1457_v7, %v1369_v20 }
 0x24f   : > { %v1704_v9 = vmax.f32 %v1633_v53, 0.0 }
 0x251   : > { %v1748_v23 = vpack.c.bf16 %v1704_v9, %v1703_v21  ;;  %v1713_v9 = vmax.f32 %v3366_v25, 0.0 }
 0x252   : > { %v1546_v37 = vpop.f32.mrf.mxu2  ;;  %v1370_v28 = vpop.f32.mrf.mxu0 }
 0x253   : > { %1780 = vst [vmem:[%s3414_s6 + $0x98] sm:$0xff] %v1748_v23  ;;  %v1547_v55 = vadd.f32 %v1546_v37, %v1458_v22  ;;  %v1635_v29 = vpop.f32.mrf.mxu3  ;;  %v1459_v33 = vpop.f32.mrf.mxu1  ;;  %v1371_v6 = vadd.f32 %v1370_v28, %v3399_v50 }
 0x255   : > { %v1636_v8 = vadd.f32 %v1635_v29, %v1547_v55  ;;  %v1460_v4 = vadd.f32 %v1459_v33, %v1371_v6 }
 0x257   : > { %v1706_v62 = vmax.f32 %v1636_v8, 0.0 }
 0x259   : > { %v1749_v16 = vpack.c.bf16 %v1706_v62, %v1705_v35  ;;  %v1715_v35 = vmax.f32 %v3369_v2, 0.0 }
 0x25a   : > { %v1548_v14 = vpop.f32.mrf.mxu2  ;;  %v1373_v42 = vpop.f32.mrf.mxu0 }
 0x25b   : > { %1781 = vst [vmem:[%s3414_s6 + $0xa0] sm:$0xff] %v1749_v16  ;;  %v1549_v36 = vadd.f32 %v1548_v14, %v1460_v4  ;;  %v1637_v24 = vpop.f32.mrf.mxu3  ;;  %v1374_v56 = vadd.f32 %v1373_v42, %v3399_v50  ;;  %v1462_v57 = vpop.f32.mrf.mxu1 }
 0x25d   : > { %v1638_v60 = vadd.f32 %v1637_v24, %v1549_v36  ;;  %v1463_v17 = vadd.f32 %v1462_v57, %v1374_v56 }
 0x25f   : > { %v1708_v58 = vmax.f32 %v1638_v60, 0.0  ;;  %v1717_v60 = vmax.f32 %v3376_v11, 0.0 }
 0x261   : > { %v1750_v61 = vpack.c.bf16 %v1708_v58, %v1707_v30 }
 0x262   : > { %v1551_v19 = vpop.f32.mrf.mxu2  ;;  %v1375_v31 = vpop.f32.mrf.mxu0 }
 0x263   : > { %1782 = vst [vmem:[%s3414_s6 + $0xa8] sm:$0xff] %v1750_v61  ;;  %v1552_v0 = vadd.f32 %v1551_v19, %v1463_v17  ;;  %v1640_v1 = vpop.f32.mrf.mxu3  ;;  %v1464_v44 = vpop.f32.mrf.mxu1  ;;  %v1376_v39 = vadd.f32 %v1375_v31, %v3399_v50 }
 0x265   : > { %v1641_v45 = vadd.f32 %v1640_v1, %v1552_v0  ;;  %v1465_v3 = vadd.f32 %v1464_v44, %v1376_v39 }
 0x267   : > { %v1710_v59 = vmax.f32 %v1641_v45, 0.0  ;;  %v1719_v45 = vmax.f32 %v3379_v34, 0.0 }
 0x269   : > { %v1751_v48 = vpack.c.bf16 %v1710_v59, %v1709_v10 }
 0x26a   : > { %v1553_v26 = vpop.f32.mrf.mxu2  ;;  %v1378_v38 = vpop.f32.mrf.mxu0 }
 0x26b   : > { %1783 = vst [vmem:[%s3414_s6 + $0xb0] sm:$0xff] %v1751_v48  ;;  %v1554_v12 = vadd.f32 %v1553_v26, %v1465_v3  ;;  %v1642_v13 = vpop.f32.mrf.mxu3  ;;  %v1379_v63 = vadd.f32 %v1378_v38, %v3399_v50  ;;  %v1467_v46 = vpop.f32.mrf.mxu1 }
 0x26d   : > { %v1643_v49 = vadd.f32 %v1642_v13, %v1554_v12  ;;  %v1468_v52 = vadd.f32 %v1467_v46, %v1379_v63  ;;  %v1721_v63 = vmax.f32 %v3386_v27, 0.0 }
 0x26f   : > { %v1712_v40 = vmax.f32 %v1643_v49, 0.0 }
 0x271   : > { %v1752_v43 = vpack.c.bf16 %v1712_v40, %v1711_v5 }
 0x272   : > { %v1556_v15 = vpop.f32.mrf.mxu2  ;;  %v1380_v20 = vpop.f32.mrf.mxu0 }
 0x273   : > { %1784 = vst [vmem:[%s3414_s6 + $0xb8] sm:$0xff] %v1752_v43  ;;  %v1557_v18 = vadd.f32 %v1556_v15, %v1468_v52  ;;  %v1645_v41 = vpop.f32.mrf.mxu3  ;;  %v1469_v7 = vpop.f32.mrf.mxu1  ;;  %v1381_v21 = vadd.f32 %v1380_v20, %v3399_v50  ;;  %v1723_v20 = vmax.f32 %v3389_v47, 0.0 }
 0x275   : > { %v1646_v53 = vadd.f32 %v1645_v41, %v1557_v18  ;;  %v1470_v37 = vadd.f32 %v1469_v7, %v1381_v21 }
 0x277   : > { %v1714_v22 = vmax.f32 %v1646_v53, 0.0 }
 0x279   : > { %v1753_v23 = vpack.c.bf16 %v1714_v22, %v1713_v9 }
 0x27a   : > { %v1558_v54 = vpop.f32.mrf.mxu2  ;;  %v1383_v28 = vpop.f32.mrf.mxu0 }
 0x27b   : > { %1785 = vst [vmem:[%s3414_s6 + $0xc0] sm:$0xff] %v1753_v23  ;;  %v1559_v55 = vadd.f32 %v1558_v54, %v1470_v37  ;;  %v1647_v29 = vpop.f32.mrf.mxu3  ;;  %v1384_v33 = vadd.f32 %v1383_v28, %v3399_v50  ;;  %v1472_v8 = vpop.f32.mrf.mxu1 }
 0x27d   : > { %v1648_v6 = vadd.f32 %v1647_v29, %v1559_v55  ;;  %v1473_v16 = vadd.f32 %v1472_v8, %v1384_v33  ;;  %v1725_v55 = vmax.f32 %v3396_v51, 0.0 }
 0x27f   : > { %v1716_v62 = vmax.f32 %v1648_v6, 0.0 }
 0x281   : > { %v1754_v4 = vpack.c.bf16 %v1716_v62, %v1715_v35 }
 0x282   : > { %v1561_v25 = vpop.f32.mrf.mxu2  ;;  %v1385_v24 = vpop.f32.mrf.mxu0 }
 0x283   : > { %1786 = vst [vmem:[%s3414_s6 + $0xc8] sm:$0xff] %v1754_v4  ;;  %v1562_v14 = vadd.f32 %v1561_v25, %v1473_v16  ;;  %v1650_v36 = vpop.f32.mrf.mxu3  ;;  %v1474_v42 = vpop.f32.mrf.mxu1  ;;  %v1386_v57 = vadd.f32 %v1385_v24, %v3399_v50  ;;  %v1727_v16 = vmax.f32 %v3402_v32, 0.0 }
 0x285   : > { %v1651_v56 = vadd.f32 %v1650_v36, %v1562_v14  ;;  %v1475_v17 = vadd.f32 %v1474_v42, %v1386_v57 }
 0x287   : > { %v1718_v30 = vmax.f32 %v1651_v56, 0.0 }
 0x289   : > { %v1755_v58 = vpack.c.bf16 %v1718_v30, %v1717_v60 }
 0x28a   : > { %v1563_v2 = vpop.f32.mrf.mxu2  ;;  %v1388_v0 = vpop.f32.mrf.mxu0 }
 0x28b   : > { %1787 = vst [vmem:[%s3414_s6 + $0xd0] sm:$0xff] %v1755_v58  ;;  %v1564_v61 = vadd.f32 %v1563_v2, %v1475_v17  ;;  %v1652_v19 = vpop.f32.mrf.mxu3  ;;  %v1389_v1 = vadd.f32 %v1388_v0, %v3399_v50  ;;  %v1477_v31 = vpop.f32.mrf.mxu1 }
 0x28d   : > { %v1653_v44 = vadd.f32 %v1652_v19, %v1564_v61  ;;  %v1478_v10 = vadd.f32 %v1477_v31, %v1389_v1 }
 0x28f   : > { %v1720_v39 = vmax.f32 %v1653_v44, 0.0 }
 0x291   : > { %v1756_v59 = vpack.c.bf16 %v1720_v39, %v1719_v45 }
 0x292   : > { %v1566_v11 = vpop.f32.mrf.mxu2  ;;  %v1390_v26 = vpop.f32.mrf.mxu0 }
 0x293   : > { %1788 = vst [vmem:[%s3414_s6 + $0xd8] sm:$0xff] %v1756_v59  ;;  %v1567_v48 = vadd.f32 %v1566_v11, %v1478_v10  ;;  %v1655_v3 = vpop.f32.mrf.mxu3  ;;  %v1479_v12 = vpop.f32.mrf.mxu1  ;;  %v1391_v38 = vadd.f32 %v1390_v26, %v3399_v50 }
 0x295   : > { %v1656_v13 = vadd.f32 %v1655_v3, %v1567_v48  ;;  %v1480_v5 = vadd.f32 %v1479_v12, %v1391_v38 }
 0x297   : > { %v1722_v46 = vmax.f32 %v1656_v13, 0.0 }
 0x299   : > { %v1757_v49 = vpack.c.bf16 %v1722_v46, %v1721_v63 }
 0x29a   : > { %v1568_v34 = vpop.f32.mrf.mxu2  ;;  %v1393_v43 = vpop.f32.mrf.mxu0 }
 0x29b   : > { %1789 = vst [vmem:[%s3414_s6 + $0xe0] sm:$0xff] %v1757_v49  ;;  %v1569_v40 = vadd.f32 %v1568_v34, %v1480_v5  ;;  %v1657_v52 = vpop.f32.mrf.mxu3  ;;  %v1394_v15 = vadd.f32 %v1393_v43, %v3399_v50  ;;  %v1482_v41 = vpop.f32.mrf.mxu1 }
 0x29d   : > { %v1658_v18 = vadd.f32 %v1657_v52, %v1569_v40  ;;  %v1483_v53 = vadd.f32 %v1482_v41, %v1394_v15 }
 0x29f   : > { %v1724_v7 = vmax.f32 %v1658_v18, 0.0 }
 0x2a1   : > { %v1758_v21 = vpack.c.bf16 %v1724_v7, %v1723_v20 }
 0x2a2   : > { %v1571_v27 = vpop.f32.mrf.mxu2  ;;  %v1395_v23 = vpop.f32.mrf.mxu0 }
 0x2a3   : > { %1790 = vst [vmem:[%s3414_s6 + $0xe8] sm:$0xff] %v1758_v21  ;;  %v1572_v9 = vadd.f32 %v1571_v27, %v1483_v53  ;;  %v1660_v22 = vpop.f32.mrf.mxu3  ;;  %v1396_v54 = vadd.f32 %v1395_v23, %v3399_v50  ;;  %v1484_v28 = vpop.f32.mrf.mxu1 }
 0x2a5   : > { %v1661_v37 = vadd.f32 %v1660_v22, %v1572_v9  ;;  %v1485_v8 = vadd.f32 %v1484_v28, %v1396_v54 }
 0x2a7   : > { %v1726_v29 = vmax.f32 %v1661_v37, 0.0 }
 0x2a9   : > { %v1759_v33 = vpack.c.bf16 %v1726_v29, %v1725_v55 }
 0x2aa   : > { %v1573_v47 = vpop.f32.mrf.mxu2 }
 0x2ab   : > { %1791 = vst [vmem:[%s3414_s6 + $0xf0] sm:$0xff] %v1759_v33  ;;  %v1574_v6 = vadd.f32 %v1573_v47, %v1485_v8  ;;  %v1662_v35 = vpop.f32.mrf.mxu3 }
 0x2ad   : > { %v1663_v62 = vadd.f32 %v1662_v35, %v1574_v6 }
 0x2af   : > { %v1728_v4 = vmax.f32 %v1663_v62, 0.0 }
 0x2b1   : > { %v1760_v25 = vpack.c.bf16 %v1728_v4, %v1727_v16 }
 0x2b3   : > { %1792 = vst [vmem:[%s3414_s6 + $0xf8] sm:$0xff] %v1760_v25 }
 0x2b4 PF: > { %s13_s12 = sadd.s32 1, %s2520_s12  }
 0x2b5   : > { %p10_p4 = scmp.ge.s32.totalorder %s13_s12, 4  }
 0x2b7   :  { %12 = sbr.rel (!%p10_p4) target bundleno = 1 (0x1), region = 62 }

// kernel: simple_nn_forward.10
= control target key start
LH: loop header
LB: loop body
LE: loop exit
PB: predicated region body
PF: predicated region fallthrough
CT: control target
= control target key end

     0   :  { %s4615_s1 = inlined_call_operand.vmem [shape: bf16[1024,256], index: 1, kind: input, shape index: {}]   ;;  %s4616_s0 = inlined_call_operand.vmem [shape: bf16[128,1024], index: 0, kind: input, shape index: {}]   ;;  %s4617_s2 = inlined_call_operand.vmem [shape: f32[1,256], index: 2, kind: input, shape index: {}]   ;;  %s4618_s3 = inlined_call_operand.vmem [shape: bf16[128,256], index: 3, kind: output, shape index: {}]  }
   0x1   :  { %v2306_v0 = vld [vmem:[%s4615_s1 + $0x70] sm:$0xf]  ;;  %v2839_v1 = vld [vmem:[%s4615_s1 + $0x74] sm:$0xf0]  ;;  %v2298_v11 = vld [vmem:[%s4615_s1 + $0x60] sm:$0xf] }
   0x2   :  { %v2370_v2 = vld [vmem:[%s4615_s1 + $0xf0] sm:$0xf]  ;;  %v2307_v3 = vor.u32 %v2839_v1, %v2306_v0  ;;  %v2855_v4 = vld [vmem:[%s4615_s1 + $0xf4] sm:$0xf0]  ;;  %v2837_v13 = vld [vmem:[%s4615_s1 + $0x64] sm:$0xf0] }
   0x3   :  { %v2434_v5 = vld [vmem:[%s4615_s1 + $0x170] sm:$0xf]  ;;  %v2871_v6 = vld [vmem:[%s4615_s1 + $0x174] sm:$0xf0]  ;;  %v2371_v7 = vor.u32 %v2855_v4, %v2370_v2  ;;  %v2362_v14 = vld [vmem:[%s4615_s1 + $0xe0] sm:$0xf]  ;;  %v2299_v16 = vor.u32 %v2837_v13, %v2298_v11 }
   0x4   :  { %v2435_v8 = vor.u32 %v2871_v6, %v2434_v5  ;;  %v2498_v9 = vld [vmem:[%s4615_s1 + $0x1f0] sm:$0xf]  ;;  %v2887_v10 = vld [vmem:[%s4615_s1 + $0x1f4] sm:$0xf0]  ;;  %1172 = vmatpush.bf16.msra.mxu0 %v2307_v3  ;;  %v2853_v15 = vld [vmem:[%s4615_s1 + $0xe4] sm:$0xf0] }
   0x5   :  { %v2499_v12 = vor.u32 %v2887_v10, %v2498_v9  ;;  %1221 = vmatpush.bf16.msra.mxu1 %v2371_v7  ;;  %v2363_v17 = vor.u32 %v2853_v15, %v2362_v14  ;;  %v2426_v18 = vld [vmem:[%s4615_s1 + $0x160] sm:$0xf]  ;;  %v2869_v19 = vld [vmem:[%s4615_s1 + $0x164] sm:$0xf0]  ;;  %v2290_v23 = vld [vmem:[%s4615_s1 + $0x50] sm:$0xf] }
   0x6   :  { %1270 = vmatpush.bf16.msra.mxu2 %v2435_v8  ;;  %v2490_v20 = vld [vmem:[%s4615_s1 + $0x1e0] sm:$0xf]  ;;  %v2427_v21 = vor.u32 %v2869_v19, %v2426_v18  ;;  %v2885_v22 = vld [vmem:[%s4615_s1 + $0x1e4] sm:$0xf0]  ;;  %v2835_v24 = vld [vmem:[%s4615_s1 + $0x54] sm:$0xf0] }
   0x7   :  { %1319 = vmatpush.bf16.msra.mxu3 %v2499_v12  ;;  %v2491_v25 = vor.u32 %v2885_v22, %v2490_v20  ;;  %v2354_v26 = vld [vmem:[%s4615_s1 + $0xd0] sm:$0xf]  ;;  %v2851_v27 = vld [vmem:[%s4615_s1 + $0xd4] sm:$0xf0]  ;;  %v2291_v29 = vor.u32 %v2835_v24, %v2290_v23  ;;  %v2282_v35 = vld [vmem:[%s4615_s1 + $0x40] sm:$0xf] }
   0x8   :  { %v2418_v28 = vld [vmem:[%s4615_s1 + $0x150] sm:$0xf]  ;;  %1173 = vmatpush.bf16.msra.mxu0 %v2299_v16  ;;  %v2867_v30 = vld [vmem:[%s4615_s1 + $0x154] sm:$0xf0]  ;;  %v2355_v33 = vor.u32 %v2851_v27, %v2354_v26  ;;  %v2833_v36 = vld [vmem:[%s4615_s1 + $0x44] sm:$0xf0] }
   0x9   :  { %v2482_v31 = vld [vmem:[%s4615_s1 + $0x1d0] sm:$0xf]  ;;  %v2883_v32 = vld [vmem:[%s4615_s1 + $0x1d4] sm:$0xf0]  ;;  %1222 = vmatpush.bf16.msra.mxu1 %v2363_v17  ;;  %v2419_v34 = vor.u32 %v2867_v30, %v2418_v28  ;;  %v2346_v37 = vld [vmem:[%s4615_s1 + $0xc0] sm:$0xf]  ;;  %v2283_v44 = vor.u32 %v2833_v36, %v2282_v35 }
   0xa   :  { %1271 = vmatpush.bf16.msra.mxu2 %v2427_v21  ;;  %v2483_v38 = vor.u32 %v2883_v32, %v2482_v31  ;;  %v2849_v39 = vld [vmem:[%s4615_s1 + $0xc4] sm:$0xf0]  ;;  %v2410_v40 = vld [vmem:[%s4615_s1 + $0x140] sm:$0xf]  ;;  %v2274_v47 = vld [vmem:[%s4615_s1 + $0x30] sm:$0xf] }
   0xb   :  { %1320 = vmatpush.bf16.msra.mxu3 %v2491_v25  ;;  %v2865_v41 = vld [vmem:[%s4615_s1 + $0x144] sm:$0xf0]  ;;  %v2474_v42 = vld [vmem:[%s4615_s1 + $0x1c0] sm:$0xf]  ;;  %v2347_v45 = vor.u32 %v2849_v39, %v2346_v37  ;;  %v2831_v48 = vld [vmem:[%s4615_s1 + $0x34] sm:$0xf0] }
   0xc   :  { %v2881_v43 = vld [vmem:[%s4615_s1 + $0x1c4] sm:$0xf0]  ;;  %1174 = vmatpush.bf16.msra.mxu0 %v2291_v29  ;;  %v2411_v46 = vor.u32 %v2865_v41, %v2410_v40  ;;  %v2338_v49 = vld [vmem:[%s4615_s1 + $0xb0] sm:$0xf]  ;;  %v2847_v51 = vld [vmem:[%s4615_s1 + $0xb4] sm:$0xf0]  ;;  %v2275_v56 = vor.u32 %v2831_v48, %v2274_v47 }
   0xd   :  { %1223 = vmatpush.bf16.msra.mxu1 %v2355_v33  ;;  %v2475_v50 = vor.u32 %v2881_v43, %v2474_v42  ;;  %v2402_v52 = vld [vmem:[%s4615_s1 + $0x130] sm:$0xf]  ;;  %v2863_v53 = vld [vmem:[%s4615_s1 + $0x134] sm:$0xf0]  ;;  %v2339_v57 = vor.u32 %v2847_v51, %v2338_v49  ;;  %v2266_v59 = vld [vmem:[%s4615_s1 + $0x20] sm:$0xf] }
   0xe   :  { %1272 = vmatpush.bf16.msra.mxu2 %v2419_v34  ;;  %v2466_v54 = vld [vmem:[%s4615_s1 + $0x1b0] sm:$0xf]  ;;  %v2879_v55 = vld [vmem:[%s4615_s1 + $0x1b4] sm:$0xf0]  ;;  %v2403_v58 = vor.u32 %v2863_v53, %v2402_v52  ;;  %v2829_v60 = vld [vmem:[%s4615_s1 + $0x24] sm:$0xf0] }
   0xf   :  { %1321 = vmatpush.bf16.msra.mxu3 %v2483_v38  ;;  %v2330_v61 = vld [vmem:[%s4615_s1 + $0xa0] sm:$0xf]  ;;  %v2467_v62 = vor.u32 %v2879_v55, %v2466_v54  ;;  %v2845_v63 = vld [vmem:[%s4615_s1 + $0xa4] sm:$0xf0]  ;;  %v2267_v4 = vor.u32 %v2829_v60, %v2266_v59  ;;  %v2258_v7 = vld [vmem:[%s4615_s1 + $0x10] sm:$0xf] }
  0x10   :  { %1175 = vmatpush.bf16.msra.mxu0 %v2283_v44  ;;  %v2394_v0 = vld [vmem:[%s4615_s1 + $0x120] sm:$0xf]  ;;  %v2861_v1 = vld [vmem:[%s4615_s1 + $0x124] sm:$0xf0]  ;;  %v2331_v5 = vor.u32 %v2845_v63, %v2330_v61  ;;  %v2827_v8 = vld [vmem:[%s4615_s1 + $0x14] sm:$0xf0] }
  0x11   :  { %1224 = vmatpush.bf16.msra.mxu1 %v2347_v45  ;;  %v2458_v2 = vld [vmem:[%s4615_s1 + $0x1a0] sm:$0xf]  ;;  %v2877_v3 = vld [vmem:[%s4615_s1 + $0x1a4] sm:$0xf0]  ;;  %v2395_v6 = vor.u32 %v2861_v1, %v2394_v0  ;;  %v2322_v9 = vld [vmem:[%s4615_s1 + $0x90] sm:$0xf]  ;;  %v2259_v17 = vor.u32 %v2827_v8, %v2258_v7 }
  0x12   :  { %1273 = vmatpush.bf16.msra.mxu2 %v2411_v46  ;;  %v2459_v10 = vor.u32 %v2877_v3, %v2458_v2  ;;  %v2843_v11 = vld [vmem:[%s4615_s1 + $0x94] sm:$0xf0]  ;;  %v2386_v12 = vld [vmem:[%s4615_s1 + $0x110] sm:$0xf]  ;;  %v2250_v16 = vld [vmem:[%s4615_s1] sm:$0xf] }
  0x13   :  { %1322 = vmatpush.bf16.msra.mxu3 %v2475_v50  ;;  %v2859_v13 = vld [vmem:[%s4615_s1 + $0x114] sm:$0xf0]  ;;  %v2450_v14 = vld [vmem:[%s4615_s1 + $0x190] sm:$0xf]  ;;  %v2825_v18 = vld [vmem:[%s4615_s1 + $0x4] sm:$0xf0]  ;;  %v2323_v21 = vor.u32 %v2843_v11, %v2322_v9 }
  0x14   :  { %1176 = vmatpush.bf16.msra.mxu0 %v2275_v56  ;;  %v2875_v15 = vld [vmem:[%s4615_s1 + $0x194] sm:$0xf0]  ;;  %v2314_v19 = vld [vmem:[%s4615_s1 + $0x80] sm:$0xf]  ;;  %v2841_v20 = vld [vmem:[%s4615_s1 + $0x84] sm:$0xf0]  ;;  %v2387_v22 = vor.u32 %v2859_v13, %v2386_v12  ;;  %v2251_v34 = vor.u32 %v2825_v18, %v2250_v16 }
  0x15   :  { %1225 = vmatpush.bf16.msra.mxu1 %v2339_v57  ;;  %v2378_v23 = vld [vmem:[%s4615_s1 + $0x100] sm:$0xf]  ;;  %v2857_v24 = vld [vmem:[%s4615_s1 + $0x104] sm:$0xf0]  ;;  %v2451_v26 = vor.u32 %v2875_v15, %v2450_v14  ;;  %v2760_v30 = vld [vmem:[%s4616_s0 + $0x4] sm:$0xf]  ;;  %v2315_v38 = vor.u32 %v2841_v20, %v2314_v19 }
  0x16   :  { %1274 = vmatpush.bf16.msra.mxu2 %v2403_v58  ;;  %v2442_v25 = vld [vmem:[%s4615_s1 + $0x180] sm:$0xf]  ;;  %v2873_v27 = vld [vmem:[%s4615_s1 + $0x184] sm:$0xf0]  ;;  %v1996_v31 = vld [vmem:[%s4616_s0 + $0x20] sm:$0xf0]  ;;  %v2379_v39 = vor.u32 %v2857_v24, %v2378_v23 }
  0x17   :  { %1323 = vmatpush.bf16.msra.mxu3 %v2467_v62  ;;  %v1994_v28 = vld [vmem:[%s4616_s0] sm:$0xf]  ;;  %v2690_v32 = vld [vmem:[%s4615_s1 + $0x370] sm:$0xf]  ;;  %v2935_v33 = vld [vmem:[%s4615_s1 + $0x374] sm:$0xf0]  ;;  %v2443_v43 = vor.u32 %v2873_v27, %v2442_v25  ;;  %v3221_v53 = vor.u32 %v2760_v30, %v1996_v31 }
  0x18   :  { %1177 = vmatpush.bf16.msra.mxu0 %v2267_v4  ;;  %v2764_v29 = vld [vmem:[%s4616_s0 + $0x1c] sm:$0xf0]  ;;  %v2002_v35 = vld [vmem:[%s4616_s0 + $0x8] sm:$0xf]  ;;  %v2754_v36 = vld [vmem:[%s4615_s1 + $0x3f0] sm:$0xf]  ;;  %v2691_v44 = vor.u32 %v2935_v33, %v2690_v32 }
  0x19   :  { %1226 = vmatpush.bf16.msra.mxu1 %v2331_v5  ;;  %v2951_v37 = vld [vmem:[%s4615_s1 + $0x3f4] sm:$0xf0]  ;;  %v2765_v40 = vld [vmem:[%s4616_s0 + $0x24] sm:$0xf0]  ;;  %v2761_v41 = vld [vmem:[%s4616_s0 + $0xc] sm:$0xf]  ;;  %v3210_v48 = vor.u32 %v2764_v29, %v1994_v28 }
  0x1a   :  { %1275 = vmatpush.bf16.msra.mxu2 %v2395_v6  ;;  %v2004_v42 = vld [vmem:[%s4616_s0 + $0x28] sm:$0xf0]  ;;  %v2562_v45 = vld [vmem:[%s4615_s1 + $0x270] sm:$0xf]  ;;  %v2903_v46 = vld [vmem:[%s4615_s1 + $0x274] sm:$0xf0]  ;;  %v2755_v49 = vor.u32 %v2951_v37, %v2754_v36  ;;  %v3223_v54 = vor.u32 %v2765_v40, %v2002_v35 }
  0x1b   :  { %1324 = vmatpush.bf16.msra.mxu3 %v2459_v10  ;;  %v2626_v47 = vld [vmem:[%s4615_s1 + $0x2f0] sm:$0xf]  ;;  %v2919_v50 = vld [vmem:[%s4615_s1 + $0x2f4] sm:$0xf0]  ;;  %v2682_v51 = vld [vmem:[%s4615_s1 + $0x360] sm:$0xf]  ;;  %v3231_v57 = vor.u32 %v2761_v41, %v2004_v42  ;;  %v2563_v58 = vor.u32 %v2903_v46, %v2562_v45 }
  0x1c   :  { %1178 = vmatpush.bf16.msra.mxu0 %v2259_v17  ;;  %v2933_v52 = vld [vmem:[%s4615_s1 + $0x364] sm:$0xf0]  ;;  %v2746_v55 = vld [vmem:[%s4615_s1 + $0x3e0] sm:$0xf]  ;;  %v2627_v59 = vor.u32 %v2919_v50, %v2626_v47  ;;  %v2674_v3 = vld [vmem:[%s4615_s1 + $0x350] sm:$0xf] }
  0x1d   :  { %1227 = vmatpush.bf16.msra.mxu1 %v2323_v21  ;;  %v2949_v56 = vld [vmem:[%s4615_s1 + $0x3e4] sm:$0xf0]  ;;  %v2683_v60 = vor.u32 %v2933_v52, %v2682_v51  ;;  %v2554_v61 = vld [vmem:[%s4615_s1 + $0x260] sm:$0xf]  ;;  %v2931_v4 = vld [vmem:[%s4615_s1 + $0x354] sm:$0xf0] }
  0x1e   :  { %1276 = vmatpush.bf16.msra.mxu2 %v2387_v22  ;;  %v2901_v62 = vld [vmem:[%s4615_s1 + $0x264] sm:$0xf0]  ;;  %v2747_v63 = vor.u32 %v2949_v56, %v2746_v55  ;;  %v2618_v0 = vld [vmem:[%s4615_s1 + $0x2e0] sm:$0xf]  ;;  %v2546_v5 = vld [vmem:[%s4615_s1 + $0x250] sm:$0xf]  ;;  %v2675_v7 = vor.u32 %v2931_v4, %v2674_v3 }
  0x1f   :  { %1325 = vmatpush.bf16.msra.mxu3 %v2451_v26  ;;  %v2917_v1 = vld [vmem:[%s4615_s1 + $0x2e4] sm:$0xf0]  ;;  %v2555_v2 = vor.u32 %v2901_v62, %v2554_v61  ;;  %v2899_v8 = vld [vmem:[%s4615_s1 + $0x254] sm:$0xf0]  ;;  %v2738_v9 = vld [vmem:[%s4615_s1 + $0x3d0] sm:$0xf] }
  0x20   :  { %1179 = vmatpush.bf16.msra.mxu0 %v2251_v34  ;;  %v2619_v6 = vor.u32 %v2917_v1, %v2618_v0  ;;  %v2947_v10 = vld [vmem:[%s4615_s1 + $0x3d4] sm:$0xf0]  ;;  %v2610_v12 = vld [vmem:[%s4615_s1 + $0x2d0] sm:$0xf]  ;;  %v2547_v14 = vor.u32 %v2899_v8, %v2546_v5  ;;  %v2026_v16 = vld [vmem:[%s4616_s0 + $0x40] sm:$0xf] }
  0x21   :  { %1228 = vmatpush.bf16.msra.mxu1 %v2315_v38  ;;  %v2739_v11 = vor.u32 %v2947_v10, %v2738_v9  ;;  %v2915_v13 = vld [vmem:[%s4615_s1 + $0x2d4] sm:$0xf0]  ;;  %v2772_v17 = vld [vmem:[%s4616_s0 + $0x5c] sm:$0xf0]  ;;  %v2768_v18 = vld [vmem:[%s4616_s0 + $0x44] sm:$0xf] }
  0x22   :  { %1277 = vmatpush.bf16.msra.mxu2 %v2379_v39  ;;  %v2611_v15 = vor.u32 %v2915_v13, %v2610_v12  ;;  %v2028_v19 = vld [vmem:[%s4616_s0 + $0x60] sm:$0xf0]  ;;  %v2034_v20 = vld [vmem:[%s4616_s0 + $0x48] sm:$0xf]  ;;  %v2769_v22 = vld [vmem:[%s4616_s0 + $0x4c] sm:$0xf]  ;;  %v3297_v24 = vor.u32 %v2772_v17, %v2026_v16 }
  0x23   :  { %1326 = vmatpush.bf16.msra.mxu3 %v2443_v43  ;;  %1180 = vmatmul.bf16.vlgmr.msra.gmra.mxu0 %v3210_v48  ;;  %v2773_v21 = vld [vmem:[%s4616_s0 + $0x64] sm:$0xf0]  ;;  %v2036_v23 = vld [vmem:[%s4616_s0 + $0x68] sm:$0xf0]  ;;  %v3299_v25 = vor.u32 %v2768_v18, %v2028_v19  ;;  %v2666_v28 = vld [vmem:[%s4615_s1 + $0x340] sm:$0xf] }
  0x24   :  { %1229 = vmatmul.bf16.vlgmr.msra.gmra.mxu1 %v3221_v53  ;;  %1368 = vmatpush.bf16.msrb.mxu0 %v2563_v58  ;;  %v3301_v26 = vor.u32 %v2773_v21, %v2034_v20  ;;  %v3303_v27 = vor.u32 %v2769_v22, %v2036_v23  ;;  %v2929_v29 = vld [vmem:[%s4615_s1 + $0x344] sm:$0xf0]  ;;  %v2538_v30 = vld [vmem:[%s4615_s1 + $0x240] sm:$0xf]  ;;  %v2776_v42 = vld [vmem:[%s4616_s0 + $0x84] sm:$0xf] }
  0x25   :  { %1278 = vmatmul.bf16.vlgmr.msra.gmra.mxu2 %v3223_v54  ;;  %1417 = vmatpush.bf16.msrb.mxu1 %v2627_v59  ;;  %v2667_v31 = vor.u32 %v2929_v29, %v2666_v28  ;;  %v2897_v32 = vld [vmem:[%s4615_s1 + $0x244] sm:$0xf0]  ;;  %v2730_v33 = vld [vmem:[%s4615_s1 + $0x3c0] sm:$0xf]  ;;  %v2060_v43 = vld [vmem:[%s4616_s0 + $0xa0] sm:$0xf0] }
  0x26   :  { %1466 = vmatpush.bf16.msrb.mxu2 %v2691_v44  ;;  %1327 = vmatmul.bf16.vlgmr.msra.gmra.mxu3 %v3231_v57  ;;  %v2945_v34 = vld [vmem:[%s4615_s1 + $0x3c4] sm:$0xf0]  ;;  %v2539_v35 = vor.u32 %v2897_v32, %v2538_v30  ;;  %v2602_v37 = vld [vmem:[%s4615_s1 + $0x2c0] sm:$0xf]  ;;  %v2777_v46 = vld [vmem:[%s4616_s0 + $0x8c] sm:$0xf]  ;;  %v3359_v50 = vor.u32 %v2776_v42, %v2060_v43 }
  0x27   :  { %1515 = vmatpush.bf16.msrb.mxu3 %v2755_v49  ;;  %v2731_v36 = vor.u32 %v2945_v34, %v2730_v33  ;;  %v2913_v38 = vld [vmem:[%s4615_s1 + $0x2c4] sm:$0xf0]  ;;  %v2058_v40 = vld [vmem:[%s4616_s0 + $0x80] sm:$0xf]  ;;  %v2068_v47 = vld [vmem:[%s4616_s0 + $0xa8] sm:$0xf0] }
  0x28   :  { %1369 = vmatpush.bf16.msrb.mxu0 %v2555_v2  ;;  %v2603_v39 = vor.u32 %v2913_v38, %v2602_v37  ;;  %v2780_v41 = vld [vmem:[%s4616_s0 + $0x9c] sm:$0xf0]  ;;  %v2066_v44 = vld [vmem:[%s4616_s0 + $0x88] sm:$0xf]  ;;  %v3363_v52 = vor.u32 %v2777_v46, %v2068_v47  ;;  %v2658_v55 = vld [vmem:[%s4615_s1 + $0x330] sm:$0xf] }
  0x29   :  { %1418 = vmatpush.bf16.msrb.mxu1 %v2619_v6  ;;  %v2781_v45 = vld [vmem:[%s4616_s0 + $0xa4] sm:$0xf0]  ;;  %v3357_v49 = vor.u32 %v2780_v41, %v2058_v40  ;;  %v2927_v56 = vld [vmem:[%s4615_s1 + $0x334] sm:$0xf0]  ;;  %v2530_v58 = vld [vmem:[%s4615_s1 + $0x230] sm:$0xf] }
  0x2a   :  { %1467 = vmatpush.bf16.msrb.mxu2 %v2683_v60  ;;  %v3361_v51 = vor.u32 %v2781_v45, %v2066_v44  ;;  %v2659_v59 = vor.u32 %v2927_v56, %v2658_v55  ;;  %v2895_v60 = vld [vmem:[%s4615_s1 + $0x234] sm:$0xf0]  ;;  %v2722_v61 = vld [vmem:[%s4615_s1 + $0x3b0] sm:$0xf]  ;;  %v2090_v4 = vld [vmem:[%s4616_s0 + $0xc0] sm:$0xf] }
  0x2b   :  { %1516 = vmatpush.bf16.msrb.mxu3 %v2747_v63  ;;  %v2943_v62 = vld [vmem:[%s4615_s1 + $0x3b4] sm:$0xf0]  ;;  %v2531_v63 = vor.u32 %v2895_v60, %v2530_v58  ;;  %v2594_v1 = vld [vmem:[%s4615_s1 + $0x2b0] sm:$0xf]  ;;  %v2788_v5 = vld [vmem:[%s4616_s0 + $0xdc] sm:$0xf0] }
  0x2c   :  { %1370 = vmatpush.bf16.msrb.mxu0 %v2547_v14  ;;  %v2723_v0 = vor.u32 %v2943_v62, %v2722_v61  ;;  %v2911_v2 = vld [vmem:[%s4615_s1 + $0x2b4] sm:$0xf0]  ;;  %v2784_v6 = vld [vmem:[%s4616_s0 + $0xc4] sm:$0xf]  ;;  %v2098_v8 = vld [vmem:[%s4616_s0 + $0xc8] sm:$0xf]  ;;  %v3417_v12 = vor.u32 %v2788_v5, %v2090_v4 }
  0x2d   :  { %1419 = vmatpush.bf16.msrb.mxu1 %v2611_v15  ;;  %v2595_v3 = vor.u32 %v2911_v2, %v2594_v1  ;;  %v2789_v9 = vld [vmem:[%s4616_s0 + $0xe4] sm:$0xf0]  ;;  %v2785_v10 = vld [vmem:[%s4616_s0 + $0xcc] sm:$0xf]  ;;  %v2650_v16 = vld [vmem:[%s4615_s1 + $0x320] sm:$0xf] }
  0x2e   :  { %1468 = vmatpush.bf16.msrb.mxu2 %v2675_v7  ;;  %v2092_v7 = vld [vmem:[%s4616_s0 + $0xe0] sm:$0xf0]  ;;  %v3421_v14 = vor.u32 %v2789_v9, %v2098_v8  ;;  %v2925_v17 = vld [vmem:[%s4615_s1 + $0x324] sm:$0xf0]  ;;  %v2522_v18 = vld [vmem:[%s4615_s1 + $0x220] sm:$0xf] }
  0x2f   :  { %1517 = vmatpush.bf16.msrb.mxu3 %v2739_v11  ;;  %v2100_v11 = vld [vmem:[%s4616_s0 + $0xe8] sm:$0xf0]  ;;  %v3419_v13 = vor.u32 %v2784_v6, %v2092_v7  ;;  %v2651_v19 = vor.u32 %v2925_v17, %v2650_v16  ;;  %v2893_v20 = vld [vmem:[%s4615_s1 + $0x224] sm:$0xf0]  ;;  %v2714_v21 = vld [vmem:[%s4615_s1 + $0x3a0] sm:$0xf] }
  0x30   :  { %1371 = vmatpush.bf16.msrb.mxu0 %v2539_v35  ;;  %v3423_v15 = vor.u32 %v2785_v10, %v2100_v11  ;;  %v2941_v22 = vld [vmem:[%s4615_s1 + $0x3a4] sm:$0xf0]  ;;  %v2523_v23 = vor.u32 %v2893_v20, %v2522_v18  ;;  %v2586_v29 = vld [vmem:[%s4615_s1 + $0x2a0] sm:$0xf]  ;;  %v2792_v34 = vld [vmem:[%s4616_s0 + $0x104] sm:$0xf] }
  0x31   :  { %1420 = vmatpush.bf16.msrb.mxu1 %v2603_v39  ;;  %v2715_v28 = vor.u32 %v2941_v22, %v2714_v21  ;;  %v2909_v30 = vld [vmem:[%s4615_s1 + $0x2a4] sm:$0xf0]  ;;  %v2122_v32 = vld [vmem:[%s4616_s0 + $0x100] sm:$0xf]  ;;  %v2124_v35 = vld [vmem:[%s4616_s0 + $0x120] sm:$0xf0] }
  0x32   :  { %1469 = vmatpush.bf16.msrb.mxu2 %v2667_v31  ;;  %v2587_v31 = vor.u32 %v2909_v30, %v2586_v29  ;;  %v2796_v33 = vld [vmem:[%s4616_s0 + $0x11c] sm:$0xf0]  ;;  %v2797_v37 = vld [vmem:[%s4616_s0 + $0x124] sm:$0xf0]  ;;  %v2793_v38 = vld [vmem:[%s4616_s0 + $0x10c] sm:$0xf]  ;;  %v3479_v41 = vor.u32 %v2792_v34, %v2124_v35 }
  0x33   :  { %1185 = vmatmul.bf16.gmra.mxu0 %v3297_v24  ;;  %1518 = vmatpush.bf16.msrb.mxu3 %v2731_v36  ;;  %v2130_v36 = vld [vmem:[%s4616_s0 + $0x108] sm:$0xf]  ;;  %v2132_v39 = vld [vmem:[%s4616_s0 + $0x128] sm:$0xf0]  ;;  %v3477_v40 = vor.u32 %v2796_v33, %v2122_v32  ;;  %v2642_v44 = vld [vmem:[%s4615_s1 + $0x310] sm:$0xf] }
  0x34   :  { %1234 = vmatmul.bf16.gmra.mxu1 %v3299_v25  ;;  %1372 = vmatpush.bf16.msrb.mxu0 %v2531_v63  ;;  %v3481_v42 = vor.u32 %v2797_v37, %v2130_v36  ;;  %v3483_v43 = vor.u32 %v2793_v38, %v2132_v39  ;;  %v2923_v45 = vld [vmem:[%s4615_s1 + $0x314] sm:$0xf0]  ;;  %v2514_v46 = vld [vmem:[%s4615_s1 + $0x210] sm:$0xf]  ;;  %v2804_v1 = vld [vmem:[%s4616_s0 + $0x15c] sm:$0xf0] }
  0x35   :  { %1283 = vmatmul.bf16.gmra.mxu2 %v3301_v26  ;;  %1421 = vmatpush.bf16.msrb.mxu1 %v2595_v3  ;;  %v2643_v47 = vor.u32 %v2923_v45, %v2642_v44  ;;  %v2891_v55 = vld [vmem:[%s4615_s1 + $0x214] sm:$0xf0]  ;;  %v2706_v56 = vld [vmem:[%s4615_s1 + $0x390] sm:$0xf]  ;;  %v2800_v2 = vld [vmem:[%s4616_s0 + $0x144] sm:$0xf] }
  0x36   :  { %1332 = vmatmul.bf16.gmra.mxu3 %v3303_v27  ;;  %1470 = vmatpush.bf16.msrb.mxu2 %v2659_v59  ;;  %v2939_v58 = vld [vmem:[%s4615_s1 + $0x394] sm:$0xf0]  ;;  %v2515_v59 = vor.u32 %v2891_v55, %v2514_v46  ;;  %v2578_v61 = vld [vmem:[%s4615_s1 + $0x290] sm:$0xf]  ;;  %v2156_v3 = vld [vmem:[%s4616_s0 + $0x160] sm:$0xf0] }
  0x37   :  { %1519 = vmatpush.bf16.msrb.mxu3 %v2723_v0  ;;  %v2707_v60 = vor.u32 %v2939_v58, %v2706_v56  ;;  %v2907_v62 = vld [vmem:[%s4615_s1 + $0x294] sm:$0xf0]  ;;  %v2154_v0 = vld [vmem:[%s4616_s0 + $0x140] sm:$0xf]  ;;  %v2162_v4 = vld [vmem:[%s4616_s0 + $0x148] sm:$0xf]  ;;  %v3539_v9 = vor.u32 %v2800_v2, %v2156_v3 }
  0x38   :  { %1373 = vmatpush.bf16.msrb.mxu0 %v2523_v23  ;;  %v2579_v63 = vor.u32 %v2907_v62, %v2578_v61  ;;  %v2805_v5 = vld [vmem:[%s4616_s0 + $0x164] sm:$0xf0]  ;;  %v2801_v6 = vld [vmem:[%s4616_s0 + $0x14c] sm:$0xf]  ;;  %v3537_v8 = vor.u32 %v2804_v1, %v2154_v0  ;;  %v2634_v16 = vld [vmem:[%s4615_s1 + $0x300] sm:$0xf] }
  0x39   :  { %1422 = vmatpush.bf16.msrb.mxu1 %v2587_v31  ;;  %v2164_v7 = vld [vmem:[%s4616_s0 + $0x168] sm:$0xf0]  ;;  %v3541_v10 = vor.u32 %v2805_v5, %v2162_v4  ;;  %v2921_v17 = vld [vmem:[%s4615_s1 + $0x304] sm:$0xf0]  ;;  %v2506_v18 = vld [vmem:[%s4615_s1 + $0x200] sm:$0xf] }
  0x3a   :  { %1471 = vmatpush.bf16.msrb.mxu2 %v2651_v19  ;;  %v3543_v11 = vor.u32 %v2801_v6, %v2164_v7  ;;  %v2635_v19 = vor.u32 %v2921_v17, %v2634_v16  ;;  %v2889_v20 = vld [vmem:[%s4615_s1 + $0x204] sm:$0xf0]  ;;  %v2698_v21 = vld [vmem:[%s4615_s1 + $0x380] sm:$0xf]  ;;  %v2808_v34 = vld [vmem:[%s4616_s0 + $0x184] sm:$0xf] }
  0x3b   :  { %1520 = vmatpush.bf16.msrb.mxu3 %v2715_v28  ;;  %v2937_v22 = vld [vmem:[%s4615_s1 + $0x384] sm:$0xf0]  ;;  %v2507_v23 = vor.u32 %v2889_v20, %v2506_v18  ;;  %v2570_v29 = vld [vmem:[%s4615_s1 + $0x280] sm:$0xf]  ;;  %v2188_v35 = vld [vmem:[%s4616_s0 + $0x1a0] sm:$0xf0] }
  0x3c   :  { %1374 = vmatpush.bf16.msrb.mxu0 %v2515_v59  ;;  %v2699_v28 = vor.u32 %v2937_v22, %v2698_v21  ;;  %v2905_v30 = vld [vmem:[%s4615_s1 + $0x284] sm:$0xf0]  ;;  %v2186_v32 = vld [vmem:[%s4616_s0 + $0x180] sm:$0xf]  ;;  %v2809_v38 = vld [vmem:[%s4616_s0 + $0x18c] sm:$0xf]  ;;  %v3599_v45 = vor.u32 %v2808_v34, %v2188_v35 }
  0x3d   :  { %1423 = vmatpush.bf16.msrb.mxu1 %v2579_v63  ;;  %v2571_v31 = vor.u32 %v2905_v30, %v2570_v29  ;;  %v2812_v33 = vld [vmem:[%s4616_s0 + $0x19c] sm:$0xf0]  ;;  %v2194_v36 = vld [vmem:[%s4616_s0 + $0x188] sm:$0xf]  ;;  %v2196_v39 = vld [vmem:[%s4616_s0 + $0x1a8] sm:$0xf0] }
  0x3e   :  { %1472 = vmatpush.bf16.msrb.mxu2 %v2643_v47  ;;  %v2813_v37 = vld [vmem:[%s4616_s0 + $0x1a4] sm:$0xf0]  ;;  %v3597_v44 = vor.u32 %v2812_v33, %v2186_v32  ;;  %v3603_v47 = vor.u32 %v2809_v38, %v2196_v39  ;;  %v2870_v55 = vld [vmem:[%s4615_s1 + $0x174] sm:$0xf]  ;;  %v2436_v56 = vld [vmem:[%s4615_s1 + $0x178] sm:$0xf0] }
  0x3f   :  { %1521 = vmatpush.bf16.msrb.mxu3 %v2707_v60  ;;  %v3601_v46 = vor.u32 %v2813_v37, %v2194_v36  ;;  %v2838_v58 = vld [vmem:[%s4615_s1 + $0x74] sm:$0xf]  ;;  %v2439_v59 = vor.u32 %v2870_v55, %v2436_v56  ;;  %v2308_v60 = vld [vmem:[%s4615_s1 + $0x78] sm:$0xf0]  ;;  %v2218_v4 = vld [vmem:[%s4616_s0 + $0x1c0] sm:$0xf] }
  0x40   :  { %1375 = vmatpush.bf16.msrb.mxu0 %v2507_v23  ;;  %v2886_v61 = vld [vmem:[%s4615_s1 + $0x1f4] sm:$0xf]  ;;  %v2500_v62 = vld [vmem:[%s4615_s1 + $0x1f8] sm:$0xf0]  ;;  %v2311_v63 = vor.u32 %v2838_v58, %v2308_v60  ;;  %v2820_v5 = vld [vmem:[%s4616_s0 + $0x1dc] sm:$0xf0] }
  0x41   :  { %1424 = vmatpush.bf16.msrb.mxu1 %v2571_v31  ;;  %v2503_v0 = vor.u32 %v2886_v61, %v2500_v62  ;;  %v2854_v1 = vld [vmem:[%s4615_s1 + $0xf4] sm:$0xf]  ;;  %v2372_v2 = vld [vmem:[%s4615_s1 + $0xf8] sm:$0xf0]  ;;  %v2816_v6 = vld [vmem:[%s4616_s0 + $0x1c4] sm:$0xf]  ;;  %v3657_v20 = vor.u32 %v2820_v5, %v2218_v4 }
  0x42   :  { %1473 = vmatpush.bf16.msrb.mxu2 %v2635_v19  ;;  %v2375_v3 = vor.u32 %v2854_v1, %v2372_v2  ;;  %v2220_v7 = vld [vmem:[%s4616_s0 + $0x1e0] sm:$0xf0]  ;;  %v2226_v16 = vld [vmem:[%s4616_s0 + $0x1c8] sm:$0xf]  ;;  %v2817_v18 = vld [vmem:[%s4616_s0 + $0x1cc] sm:$0xf] }
  0x43   :  { %1190 = vmatmul.bf16.gmra.mxu0 %v3357_v49  ;;  %1522 = vmatpush.bf16.msrb.mxu3 %v2699_v28  ;;  %v2821_v17 = vld [vmem:[%s4616_s0 + $0x1e4] sm:$0xf0]  ;;  %v2228_v19 = vld [vmem:[%s4616_s0 + $0x1e8] sm:$0xf0]  ;;  %v3659_v21 = vor.u32 %v2816_v6, %v2220_v7  ;;  %v2868_v28 = vld [vmem:[%s4615_s1 + $0x164] sm:$0xf] }
  0x44   :  { %1239 = vmatmul.bf16.gmra.mxu1 %v3359_v50  ;;  %1564 = vmatpush.bf16.msra.mxu0 %v2311_v63  ;;  %v3661_v22 = vor.u32 %v2821_v17, %v2226_v16  ;;  %v3663_v23 = vor.u32 %v2817_v18, %v2228_v19  ;;  %v2428_v29 = vld [vmem:[%s4615_s1 + $0x168] sm:$0xf0]  ;;  %v2836_v30 = vld [vmem:[%s4615_s1 + $0x64] sm:$0xf]  ;;  %v206_v37 = vld [vmem:[%s4617_s2] sm:$0x3] }
  0x45   :  { %1288 = vmatmul.bf16.gmra.mxu2 %v3361_v51  ;;  %1613 = vmatpush.bf16.msra.mxu1 %v2375_v3  ;;  %4650 = vst [vmem:[#allocation2_spill] sm:$0xff] %v3659_v21  ;;  %v2431_v31 = vor.u32 %v2868_v28, %v2428_v29  ;;  %v2300_v32 = vld [vmem:[%s4615_s1 + $0x68] sm:$0xf0]  ;;  %v2884_v33 = vld [vmem:[%s4615_s1 + $0x1e4] sm:$0xf]  ;;  %v3696_v55 = vperm.slane %v206_v37, 0 }
  0x46   :  { %1337 = vmatmul.bf16.gmra.mxu3 %v3363_v52  ;;  %1662 = vmatpush.bf16.msra.mxu2 %v2439_v59  ;;  %4651 = vst [vmem:[#allocation3_spill] sm:$0xff] %v3661_v22  ;;  %v2492_v34 = vld [vmem:[%s4615_s1 + $0x1e8] sm:$0xf0]  ;;  %v2303_v35 = vor.u32 %v2836_v30, %v2300_v32  ;;  %v2852_v38 = vld [vmem:[%s4615_s1 + $0xe4] sm:$0xf] }
  0x47   :  { %1711 = vmatpush.bf16.msra.mxu3 %v2503_v0  ;;  %4652 = vst [vmem:[#allocation4_spill] sm:$0xff] %v3663_v23  ;;  %v2495_v36 = vor.u32 %v2884_v33, %v2492_v34  ;;  %v2364_v39 = vld [vmem:[%s4615_s1 + $0xe8] sm:$0xf0]  ;;  %v2010_v58 = vld [vmem:[%s4616_s0 + $0x10] sm:$0xf] }
  0x48   :  { %1565 = vmatpush.bf16.msra.mxu0 %v2303_v35  ;;  %v2367_v56 = vor.u32 %v2852_v38, %v2364_v39  ;;  %v2766_v59 = vld [vmem:[%s4616_s0 + $0x2c] sm:$0xf0]  ;;  %v2762_v60 = vld [vmem:[%s4616_s0 + $0x14] sm:$0xf]  ;;  %v2018_v62 = vld [vmem:[%s4616_s0 + $0x18] sm:$0xf] }
  0x49   :  { %v2012_v61 = vld [vmem:[%s4616_s0 + $0x30] sm:$0xf0]  ;;  %v2767_v63 = vld [vmem:[%s4616_s0 + $0x34] sm:$0xf0]  ;;  %v2763_v0 = vld [vmem:[%s4616_s0 + $0x1c] sm:$0xf]  ;;  %v3722_v2 = vor.u32 %v2766_v59, %v2010_v58 }
  0x4a   :  { %1663 = vmatpush.bf16.msra.mxu2 %v2431_v31  ;;  %1614 = vmatpush.bf16.msra.mxu1 %v2367_v56  ;;  %v2020_v1 = vld [vmem:[%s4616_s0 + $0x38] sm:$0xf0]  ;;  %v3724_v4 = vor.u32 %v2762_v60, %v2012_v61  ;;  %v3726_v5 = vor.u32 %v2767_v63, %v2018_v62  ;;  %v2866_v18 = vld [vmem:[%s4615_s1 + $0x154] sm:$0xf]  ;;  %v2042_v63 = vld [vmem:[%s4616_s0 + $0x50] sm:$0xf] }
  0x4b   :  { %1712 = vmatpush.bf16.msra.mxu3 %v2495_v36  ;;  %4653 = vst [vmem:[#allocation5_spill] sm:$0xff] %v3722_v2  ;;  %v3729_v16 = vor.u32 %v2763_v0, %v2020_v1  ;;  %v2420_v19 = vld [vmem:[%s4615_s1 + $0x158] sm:$0xf0]  ;;  %v2834_v28 = vld [vmem:[%s4615_s1 + $0x54] sm:$0xf] }
  0x4c   :  { %4654 = vst [vmem:[#allocation6_spill] sm:$0xff] %v3724_v4  ;;  %v2423_v29 = vor.u32 %v2866_v18, %v2420_v19  ;;  %v2292_v30 = vld [vmem:[%s4615_s1 + $0x58] sm:$0xf0]  ;;  %v2882_v31 = vld [vmem:[%s4615_s1 + $0x1d4] sm:$0xf] }
  0x4d   :  { %4655 = vst [vmem:[#allocation7_spill] sm:$0xff] %v3726_v5  ;;  %v2484_v32 = vld [vmem:[%s4615_s1 + $0x1d8] sm:$0xf0]  ;;  %v2295_v34 = vor.u32 %v2834_v28, %v2292_v30  ;;  %v2850_v59 = vld [vmem:[%s4615_s1 + $0xd4] sm:$0xf] }
  0x4e   :  { %4656 = vst [vmem:[#allocation8_spill] sm:$0xff] %v3729_v16  ;;  %v2487_v35 = vor.u32 %v2882_v31, %v2484_v32  ;;  %1664 = vmatpush.bf16.msra.mxu2 %v2423_v29  ;;  %v2356_v60 = vld [vmem:[%s4615_s1 + $0xd8] sm:$0xf0]  ;;  %v2774_v0 = vld [vmem:[%s4616_s0 + $0x6c] sm:$0xf0] }
  0x4f   :  { %1566 = vmatpush.bf16.msra.mxu0 %v2295_v34  ;;  %v2359_v62 = vor.u32 %v2850_v59, %v2356_v60  ;;  %v2770_v1 = vld [vmem:[%s4616_s0 + $0x54] sm:$0xf]  ;;  %v2052_v18 = vld [vmem:[%s4616_s0 + $0x78] sm:$0xf0]  ;;  %v3786_v28 = vor.u32 %v2774_v0, %v2042_v63  ;;  %v2832_v59 = vld [vmem:[%s4615_s1 + $0x44] sm:$0xf] }
  0x50   :  { %1713 = vmatpush.bf16.msra.mxu3 %v2487_v35  ;;  %v2476_v63 = vld [vmem:[%s4615_s1 + $0x1c8] sm:$0xf0] }
  0x51   :  { %1615 = vmatpush.bf16.msra.mxu1 %v2359_v62  ;;  %4657 = vst [vmem:[#allocation9_spill] sm:$0xff] %v3786_v28  ;;  %v2880_v62 = vld [vmem:[%s4615_s1 + $0x1c4] sm:$0xf] }
  0x53   :  { %1195 = vmatmul.bf16.gmra.mxu0 %v3417_v12 }
  0x54   :  { %1244 = vmatmul.bf16.gmra.mxu1 %v3419_v13 }
  0x55   :  { %1293 = vmatmul.bf16.gmra.mxu2 %v3421_v14 }
  0x56   :  { %1342 = vmatmul.bf16.gmra.mxu3 %v3423_v15 }
  0x63   :  { %1200 = vmatmul.bf16.gmra.mxu0 %v3477_v40 }
  0x64   :  { %1249 = vmatmul.bf16.gmra.mxu1 %v3479_v41 }
  0x65   :  { %1298 = vmatmul.bf16.gmra.mxu2 %v3481_v42 }
  0x66   :  { %1347 = vmatmul.bf16.gmra.mxu3 %v3483_v43 }
  0x73   :  { %1205 = vmatmul.bf16.gmra.mxu0 %v3537_v8 }
  0x74   :  { %1254 = vmatmul.bf16.gmra.mxu1 %v3539_v9 }
  0x75   :  { %1303 = vmatmul.bf16.gmra.mxu2 %v3541_v10 }
  0x76   :  { %1352 = vmatmul.bf16.gmra.mxu3 %v3543_v11 }
  0x83   :  { %1210 = vmatmul.bf16.gmra.mxu0 %v3597_v44 }
  0x84   :  { %1259 = vmatmul.bf16.gmra.mxu1 %v3599_v45 }
  0x85   :  { %1308 = vmatmul.bf16.gmra.mxu2 %v3601_v46 }
  0x86   :  { %1357 = vmatmul.bf16.gmra.mxu3 %v3603_v47 }
  0x93   :  { %1215 = vmatmul.bf16.gmra.mxu0 %v3657_v20 }
  0x94   :  { %1264 = vmatmul.bf16.gmra.mxu1 %v3659_v21 }
  0x95   :  { %1313 = vmatmul.bf16.gmra.mxu2 %v3661_v22 }
  0x96   :  { %1362 = vmatmul.bf16.gmra.mxu3 %v3663_v23 }
  0xa0   :  { %v1181_v3 = vpop.f32.mrf.mxu0 }
  0xa1   :  { %v1182_v6 = vadd.f32 %v1181_v3, %v3696_v55  ;;  %v1230_v7 = vpop.f32.mrf.mxu1  ;;  %v2044_v3 = vld [vmem:[%s4616_s0 + $0x70] sm:$0xf0] }
  0xa2   :  { %v3788_v32 = vor.u32 %v2770_v1, %v2044_v3  ;;  %v2479_v3 = vor.u32 %v2880_v62, %v2476_v63  ;;  %v2779_v62 = vld [vmem:[%s4616_s0 + $0x9c] sm:$0xf] }
  0xa3   :  { %v1231_v17 = vadd.f32 %v1230_v7, %v1182_v6  ;;  %1376 = vmatmul.bf16.vlgmr.msrb.gmra.mxu0 %v3722_v2  ;;  %v2050_v6 = vld [vmem:[%s4616_s0 + $0x58] sm:$0xf]  ;;  %v2084_v63 = vld [vmem:[%s4616_s0 + $0xb8] sm:$0xf0] }
  0xa4   :  { %1425 = vmatmul.bf16.vlgmr.msrb.gmra.mxu1 %v3724_v4  ;;  %v2775_v7 = vld [vmem:[%s4616_s0 + $0x74] sm:$0xf0]  ;;  %4658 = vst [vmem:[#allocation10_spill] sm:$0xff] %v3788_v32  ;;  %1714 = vmatpush.bf16.msra.mxu3 %v2479_v3 }
  0xa5   :  { %1474 = vmatmul.bf16.vlgmr.msrb.gmra.mxu2 %v3726_v5 }
  0xa6   :  { %1523 = vmatmul.bf16.vlgmr.msrb.gmra.mxu3 %v3729_v16 }
  0xa8   :  { %v1279_v33 = vpop.f32.mrf.mxu2  ;;  %v1183_v38 = vpop.f32.mrf.mxu0 }
  0xa9   :  { %v1280_v36 = vadd.f32 %v1279_v33, %v1231_v17  ;;  %v1328_v37 = vpop.f32.mrf.mxu3  ;;  %v1184_v39 = vadd.f32 %v1183_v38, %v3696_v55  ;;  %v1232_v56 = vpop.f32.mrf.mxu1  ;;  %v2771_v17 = vld [vmem:[%s4616_s0 + $0x5c] sm:$0xf]  ;;  %v3790_v33 = vor.u32 %v2775_v7, %v2050_v6 }
  0xab   :  { %v3754_v58 = vadd.f32 %v1328_v37, %v1280_v36  ;;  %v1233_v61 = vadd.f32 %v1232_v56, %v1184_v39  ;;  %4659 = vst [vmem:[#allocation11_spill] sm:$0xff] %v3790_v33  ;;  %v3793_v36 = vor.u32 %v2771_v17, %v2052_v18  ;;  %v2864_v39 = vld [vmem:[%s4615_s1 + $0x144] sm:$0xf]  ;;  %v2412_v56 = vld [vmem:[%s4615_s1 + $0x148] sm:$0xf0] }
  0xac   :  { %v2415_v60 = vor.u32 %v2864_v39, %v2412_v56  ;;  %v2782_v39 = vld [vmem:[%s4616_s0 + $0xac] sm:$0xf0]  ;;  %v2778_v56 = vld [vmem:[%s4616_s0 + $0x94] sm:$0xf] }
  0xad   :  { %4660 = vst [vmem:[#allocation12_spill] sm:$0xff] %v3793_v36 }
  0xae   :  { %1665 = vmatpush.bf16.msra.mxu2 %v2415_v60  ;;  %v2082_v60 = vld [vmem:[%s4616_s0 + $0x98] sm:$0xf] }
  0xb0   :  { %v1281_v19 = vpop.f32.mrf.mxu2  ;;  %v1186_v31 = vpop.f32.mrf.mxu0 }
  0xb1   :  { %v1282_v29 = vadd.f32 %v1281_v19, %v1233_v61  ;;  %v1330_v30 = vpop.f32.mrf.mxu3  ;;  %v1187_v34 = vadd.f32 %v1186_v31, %v3696_v55  ;;  %v1235_v35 = vpop.f32.mrf.mxu1  ;;  %v2284_v61 = vld [vmem:[%s4615_s1 + $0x48] sm:$0xf0] }
  0xb2   :  { %v2287_v1 = vor.u32 %v2832_v59, %v2284_v61  ;;  %v2348_v31 = vld [vmem:[%s4615_s1 + $0xc8] sm:$0xf0]  ;;  %v2076_v59 = vld [vmem:[%s4616_s0 + $0xb0] sm:$0xf0]  ;;  %v2783_v61 = vld [vmem:[%s4616_s0 + $0xb4] sm:$0xf0] }
  0xb3   :  { %v3795_v37 = vadd.f32 %v1330_v30, %v1282_v29  ;;  %v1236_v38 = vadd.f32 %v1235_v35, %v1187_v34  ;;  %1381 = vmatmul.bf16.gmra.mxu0 %v3786_v28  ;;  %v2848_v30 = vld [vmem:[%s4615_s1 + $0xc4] sm:$0xf] }
  0xb4   :  { %1430 = vmatmul.bf16.gmra.mxu1 %v3788_v32  ;;  %1567 = vmatpush.bf16.msra.mxu0 %v2287_v1  ;;  %v2351_v35 = vor.u32 %v2848_v30, %v2348_v31  ;;  %v3859_v31 = vor.u32 %v2779_v62, %v2084_v63 }
  0xb5   :  { %1479 = vmatmul.bf16.gmra.mxu2 %v3790_v33 }
  0xb6   :  { %1528 = vmatmul.bf16.gmra.mxu3 %v3793_v36  ;;  %1616 = vmatpush.bf16.msra.mxu1 %v2351_v35  ;;  %4664 = vst [vmem:[#allocation16_spill] sm:$0xff] %v3859_v31 }
  0xb8   :  { %v1284_v0 = vpop.f32.mrf.mxu2  ;;  %v1188_v17 = vpop.f32.mrf.mxu0 }
  0xb9   :  { %v1285_v6 = vadd.f32 %v1284_v0, %v1236_v38  ;;  %v1333_v7 = vpop.f32.mrf.mxu3  ;;  %v1189_v18 = vadd.f32 %v1188_v17, %v3696_v55  ;;  %v1237_v19 = vpop.f32.mrf.mxu1  ;;  %v2074_v38 = vld [vmem:[%s4616_s0 + $0x90] sm:$0xf]  ;;  %v3854_v17 = vor.u32 %v2778_v56, %v2076_v59  ;;  %v2276_v59 = vld [vmem:[%s4615_s1 + $0x38] sm:$0xf0] }
  0xba   :  { %v3852_v1 = vor.u32 %v2782_v39, %v2074_v38  ;;  %v2404_v38 = vld [vmem:[%s4615_s1 + $0x138] sm:$0xf0]  ;;  %v2830_v39 = vld [vmem:[%s4615_s1 + $0x34] sm:$0xf] }
  0xbb   :  { %v3820_v29 = vadd.f32 %v1333_v7, %v1285_v6  ;;  %v1238_v34 = vadd.f32 %v1237_v19, %v1189_v18  ;;  %4662 = vst [vmem:[#allocation14_spill] sm:$0xff] %v3854_v17  ;;  %v3856_v18 = vor.u32 %v2783_v61, %v2082_v60  ;;  %v2878_v60 = vld [vmem:[%s4615_s1 + $0x1b4] sm:$0xf]  ;;  %v2468_v61 = vld [vmem:[%s4615_s1 + $0x1b8] sm:$0xf0]  ;;  %v2279_v63 = vor.u32 %v2830_v39, %v2276_v59 }
  0xbc   :  { %4661 = vst [vmem:[#allocation13_spill] sm:$0xff] %v3852_v1  ;;  %v2340_v39 = vld [vmem:[%s4615_s1 + $0xb8] sm:$0xf0] }
  0xbd   :  { %4663 = vst [vmem:[#allocation15_spill] sm:$0xff] %v3856_v18  ;;  %1568 = vmatpush.bf16.msra.mxu0 %v2279_v63  ;;  %v2114_v63 = vld [vmem:[%s4616_s0 + $0xd8] sm:$0xf] }
  0xc0   :  { %v1286_v0 = vpop.f32.mrf.mxu2  ;;  %v1191_v7 = vpop.f32.mrf.mxu0 }
  0xc1   :  { %v1287_v3 = vadd.f32 %v1286_v0, %v1238_v34  ;;  %v1335_v6 = vpop.f32.mrf.mxu3  ;;  %v1192_v19 = vadd.f32 %v1191_v7, %v3696_v55  ;;  %v1240_v30 = vpop.f32.mrf.mxu1  ;;  %v2862_v34 = vld [vmem:[%s4615_s1 + $0x134] sm:$0xf]  ;;  %v2471_v0 = vor.u32 %v2878_v60, %v2468_v61  ;;  %v2790_v60 = vld [vmem:[%s4616_s0 + $0xec] sm:$0xf0] }
  0xc2   :  { %v2407_v56 = vor.u32 %v2862_v34, %v2404_v38  ;;  %v2846_v38 = vld [vmem:[%s4615_s1 + $0xb4] sm:$0xf] }
  0xc3   :  { %v3861_v35 = vadd.f32 %v1335_v6, %v1287_v3  ;;  %v1241_v36 = vadd.f32 %v1240_v30, %v1192_v19  ;;  %1386 = vmatmul.bf16.gmra.mxu0 %v3852_v1  ;;  %1715 = vmatpush.bf16.msra.mxu3 %v2471_v0  ;;  %v2786_v61 = vld [vmem:[%s4616_s0 + $0xd4] sm:$0xf]  ;;  %v2791_v0 = vld [vmem:[%s4616_s0 + $0xf4] sm:$0xf0] }
  0xc4   :  { %1435 = vmatmul.bf16.gmra.mxu1 %v3854_v17  ;;  %1666 = vmatpush.bf16.msra.mxu2 %v2407_v56  ;;  %v2106_v56 = vld [vmem:[%s4616_s0 + $0xd0] sm:$0xf] }
  0xc5   :  { %1484 = vmatmul.bf16.gmra.mxu2 %v3856_v18  ;;  %v3922_v18 = vor.u32 %v2791_v0, %v2114_v63  ;;  %v2460_v63 = vld [vmem:[%s4615_s1 + $0x1a8] sm:$0xf0] }
  0xc6   :  { %1533 = vmatmul.bf16.gmra.mxu3 %v3859_v31 }
  0xc7   :  { %4667 = vst [vmem:[#allocation19_spill] sm:$0xff] %v3922_v18 }
  0xc8   :  { %v1289_v62 = vpop.f32.mrf.mxu2  ;;  %v1193_v7 = vpop.f32.mrf.mxu0 }
  0xc9   :  { %v1290_v3 = vadd.f32 %v1289_v62, %v1241_v36  ;;  %v1338_v6 = vpop.f32.mrf.mxu3  ;;  %v1194_v19 = vadd.f32 %v1193_v7, %v3696_v55  ;;  %v1242_v30 = vpop.f32.mrf.mxu1  ;;  %v2343_v36 = vor.u32 %v2846_v38, %v2340_v39  ;;  %v2108_v62 = vld [vmem:[%s4616_s0 + $0xf0] sm:$0xf0] }
  0xca   :  { %v3920_v31 = vor.u32 %v2786_v61, %v2108_v62  ;;  %v2268_v61 = vld [vmem:[%s4615_s1 + $0x28] sm:$0xf0]  ;;  %v2876_v62 = vld [vmem:[%s4615_s1 + $0x1a4] sm:$0xf] }
  0xcb   :  { %v3886_v34 = vadd.f32 %v1338_v6, %v1290_v3  ;;  %v1243_v59 = vadd.f32 %v1242_v30, %v1194_v19  ;;  %1617 = vmatpush.bf16.msra.mxu1 %v2343_v36  ;;  %v2787_v3 = vld [vmem:[%s4616_s0 + $0xdc] sm:$0xf]  ;;  %v3918_v19 = vor.u32 %v2790_v60, %v2106_v56  ;;  %v2396_v56 = vld [vmem:[%s4615_s1 + $0x128] sm:$0xf0] }
  0xcc   :  { %v2116_v6 = vld [vmem:[%s4616_s0 + $0xf8] sm:$0xf0]  ;;  %4666 = vst [vmem:[#allocation18_spill] sm:$0xff] %v3920_v31 }
  0xcd   :  { %4665 = vst [vmem:[#allocation17_spill] sm:$0xff] %v3918_v19  ;;  %v3925_v1 = vor.u32 %v2787_v3, %v2116_v6  ;;  %v2463_v6 = vor.u32 %v2876_v62, %v2460_v63  ;;  %v2798_v62 = vld [vmem:[%s4616_s0 + $0x12c] sm:$0xf0]  ;;  %v2794_v63 = vld [vmem:[%s4616_s0 + $0x114] sm:$0xf] }
  0xcf   :  { %4668 = vst [vmem:[#allocation20_spill] sm:$0xff] %v3925_v1  ;;  %1716 = vmatpush.bf16.msra.mxu3 %v2463_v6  ;;  %v2799_v6 = vld [vmem:[%s4616_s0 + $0x134] sm:$0xf0] }
  0xd0   :  { %v1291_v7 = vpop.f32.mrf.mxu2  ;;  %v1196_v39 = vpop.f32.mrf.mxu0 }
  0xd1   :  { %v1292_v30 = vadd.f32 %v1291_v7, %v1243_v59  ;;  %v1340_v38 = vpop.f32.mrf.mxu3  ;;  %v1197_v36 = vadd.f32 %v1196_v39, %v3696_v55  ;;  %v1245_v17 = vpop.f32.mrf.mxu1  ;;  %v2860_v59 = vld [vmem:[%s4615_s1 + $0x124] sm:$0xf] }
  0xd2   :  { %v2399_v60 = vor.u32 %v2860_v59, %v2396_v56  ;;  %v2844_v56 = vld [vmem:[%s4615_s1 + $0xa4] sm:$0xf] }
  0xd3   :  { %v3927_v33 = vadd.f32 %v1340_v38, %v1292_v30  ;;  %v1246_v32 = vadd.f32 %v1245_v17, %v1197_v36  ;;  %1391 = vmatmul.bf16.gmra.mxu0 %v3918_v19  ;;  %v2828_v17 = vld [vmem:[%s4615_s1 + $0x24] sm:$0xf] }
  0xd4   :  { %1440 = vmatmul.bf16.gmra.mxu1 %v3920_v31  ;;  %v2271_v3 = vor.u32 %v2828_v17, %v2268_v61  ;;  %1667 = vmatpush.bf16.msra.mxu2 %v2399_v60  ;;  %v2332_v17 = vld [vmem:[%s4615_s1 + $0xa8] sm:$0xf0]  ;;  %v2138_v60 = vld [vmem:[%s4616_s0 + $0x110] sm:$0xf] }
  0xd5   :  { %1489 = vmatmul.bf16.gmra.mxu2 %v3922_v18 }
  0xd6   :  { %1538 = vmatmul.bf16.gmra.mxu3 %v3925_v1  ;;  %1569 = vmatpush.bf16.msra.mxu0 %v2271_v3  ;;  %v2146_v3 = vld [vmem:[%s4616_s0 + $0x118] sm:$0xf] }
  0xd7   :  { %v3988_v18 = vor.u32 %v2799_v6, %v2146_v3  ;;  %v2452_v3 = vld [vmem:[%s4615_s1 + $0x198] sm:$0xf0] }
  0xd8   :  { %v1294_v0 = vpop.f32.mrf.mxu2  ;;  %v1198_v38 = vpop.f32.mrf.mxu0 }
  0xd9   :  { %v1295_v7 = vadd.f32 %v1294_v0, %v1246_v32  ;;  %v1343_v30 = vpop.f32.mrf.mxu3  ;;  %v1199_v39 = vadd.f32 %v1198_v38, %v3696_v55  ;;  %v1247_v36 = vpop.f32.mrf.mxu1  ;;  %v2335_v32 = vor.u32 %v2844_v56, %v2332_v17  ;;  %v2140_v0 = vld [vmem:[%s4616_s0 + $0x130] sm:$0xf0]  ;;  %4671 = vst [vmem:[#allocation23_spill] sm:$0xff] %v3988_v18 }
  0xda   :  { %v3986_v1 = vor.u32 %v2794_v63, %v2140_v0  ;;  %v2260_v63 = vld [vmem:[%s4615_s1 + $0x18] sm:$0xf0]  ;;  %v2874_v0 = vld [vmem:[%s4615_s1 + $0x194] sm:$0xf] }
  0xdb   :  { %v3952_v59 = vadd.f32 %v1343_v30, %v1295_v7  ;;  %v1248_v61 = vadd.f32 %v1247_v36, %v1199_v39  ;;  %1618 = vmatpush.bf16.msra.mxu1 %v2335_v32  ;;  %v2795_v7 = vld [vmem:[%s4616_s0 + $0x11c] sm:$0xf]  ;;  %v3984_v39 = vor.u32 %v2798_v62, %v2138_v60 }
  0xdc   :  { %v2148_v30 = vld [vmem:[%s4616_s0 + $0x138] sm:$0xf0]  ;;  %4670 = vst [vmem:[#allocation22_spill] sm:$0xff] %v3986_v1 }
  0xdd   :  { %4669 = vst [vmem:[#allocation21_spill] sm:$0xff] %v3984_v39  ;;  %v3991_v19 = vor.u32 %v2795_v7, %v2148_v30  ;;  %v2388_v60 = vld [vmem:[%s4615_s1 + $0x118] sm:$0xf0]  ;;  %v2455_v30 = vor.u32 %v2874_v0, %v2452_v3  ;;  %v2806_v0 = vld [vmem:[%s4616_s0 + $0x16c] sm:$0xf0] }
  0xde   :  { %v2802_v3 = vld [vmem:[%s4616_s0 + $0x154] sm:$0xf] }
  0xdf   :  { %4672 = vst [vmem:[#allocation24_spill] sm:$0xff] %v3991_v19  ;;  %1717 = vmatpush.bf16.msra.mxu3 %v2455_v30  ;;  %v2807_v30 = vld [vmem:[%s4616_s0 + $0x174] sm:$0xf0] }
  0xe0   :  { %v1296_v38 = vpop.f32.mrf.mxu2  ;;  %v1201_v17 = vpop.f32.mrf.mxu0 }
  0xe1   :  { %v1297_v36 = vadd.f32 %v1296_v38, %v1248_v61  ;;  %v1345_v56 = vpop.f32.mrf.mxu3  ;;  %v1202_v32 = vadd.f32 %v1201_v17, %v3696_v55  ;;  %v1250_v31 = vpop.f32.mrf.mxu1  ;;  %v2858_v61 = vld [vmem:[%s4615_s1 + $0x114] sm:$0xf] }
  0xe2   :  { %v2391_v62 = vor.u32 %v2858_v61, %v2388_v60  ;;  %v2842_v60 = vld [vmem:[%s4615_s1 + $0x94] sm:$0xf] }
  0xe3   :  { %v3993_v28 = vadd.f32 %v1345_v56, %v1297_v36  ;;  %v1251_v16 = vadd.f32 %v1250_v31, %v1202_v32  ;;  %1396 = vmatmul.bf16.gmra.mxu0 %v3984_v39  ;;  %v2826_v31 = vld [vmem:[%s4615_s1 + $0x14] sm:$0xf] }
  0xe4   :  { %1445 = vmatmul.bf16.gmra.mxu1 %v3986_v1  ;;  %v2263_v7 = vor.u32 %v2826_v31, %v2260_v63  ;;  %1668 = vmatpush.bf16.msra.mxu2 %v2391_v62  ;;  %v2324_v31 = vld [vmem:[%s4615_s1 + $0x98] sm:$0xf0]  ;;  %v2170_v62 = vld [vmem:[%s4616_s0 + $0x150] sm:$0xf] }
  0xe5   :  { %1494 = vmatmul.bf16.gmra.mxu2 %v3988_v18 }
  0xe6   :  { %1543 = vmatmul.bf16.gmra.mxu3 %v3991_v19  ;;  %1570 = vmatpush.bf16.msra.mxu0 %v2263_v7  ;;  %v2178_v7 = vld [vmem:[%s4616_s0 + $0x158] sm:$0xf] }
  0xe7   :  { %v4054_v18 = vor.u32 %v2807_v30, %v2178_v7  ;;  %v2444_v7 = vld [vmem:[%s4615_s1 + $0x188] sm:$0xf0] }
  0xe8   :  { %v1299_v6 = vpop.f32.mrf.mxu2  ;;  %v1203_v56 = vpop.f32.mrf.mxu0 }
  0xe9   :  { %v1300_v38 = vadd.f32 %v1299_v6, %v1251_v16  ;;  %v1348_v36 = vpop.f32.mrf.mxu3  ;;  %v1204_v17 = vadd.f32 %v1203_v56, %v3696_v55  ;;  %v1252_v32 = vpop.f32.mrf.mxu1  ;;  %v2327_v16 = vor.u32 %v2842_v60, %v2324_v31  ;;  %v2172_v6 = vld [vmem:[%s4616_s0 + $0x170] sm:$0xf0]  ;;  %4675 = vst [vmem:[#allocation27_spill] sm:$0xff] %v4054_v18 }
  0xea   :  { %v4052_v19 = vor.u32 %v2802_v3, %v2172_v6  ;;  %v2252_v3 = vld [vmem:[%s4615_s1 + $0x8] sm:$0xf0]  ;;  %v2872_v6 = vld [vmem:[%s4615_s1 + $0x184] sm:$0xf] }
  0xeb   :  { %v4018_v61 = vadd.f32 %v1348_v36, %v1300_v38  ;;  %v1253_v63 = vadd.f32 %v1252_v32, %v1204_v17  ;;  %1619 = vmatpush.bf16.msra.mxu1 %v2327_v16  ;;  %v2803_v38 = vld [vmem:[%s4616_s0 + $0x15c] sm:$0xf]  ;;  %v4050_v17 = vor.u32 %v2806_v0, %v2170_v62  ;;  %v2380_v62 = vld [vmem:[%s4615_s1 + $0x108] sm:$0xf0] }
  0xec   :  { %v2180_v36 = vld [vmem:[%s4616_s0 + $0x178] sm:$0xf0]  ;;  %4674 = vst [vmem:[#allocation26_spill] sm:$0xff] %v4052_v19 }
  0xed   :  { %4673 = vst [vmem:[#allocation25_spill] sm:$0xff] %v4050_v17  ;;  %v4057_v39 = vor.u32 %v2803_v38, %v2180_v36  ;;  %v2447_v36 = vor.u32 %v2872_v6, %v2444_v7  ;;  %v2814_v6 = vld [vmem:[%s4616_s0 + $0x1ac] sm:$0xf0]  ;;  %v2810_v7 = vld [vmem:[%s4616_s0 + $0x194] sm:$0xf] }
  0xef   :  { %4676 = vst [vmem:[#allocation28_spill] sm:$0xff] %v4057_v39  ;;  %1718 = vmatpush.bf16.msra.mxu3 %v2447_v36  ;;  %v2815_v36 = vld [vmem:[%s4616_s0 + $0x1b4] sm:$0xf0] }
  0xf0   :  { %v1301_v56 = vpop.f32.mrf.mxu2  ;;  %v1206_v31 = vpop.f32.mrf.mxu0 }
  0xf1   :  { %v1302_v32 = vadd.f32 %v1301_v56, %v1253_v63  ;;  %v1350_v60 = vpop.f32.mrf.mxu3  ;;  %v1207_v16 = vadd.f32 %v1206_v31, %v3696_v55  ;;  %v1255_v1 = vpop.f32.mrf.mxu1  ;;  %v2856_v63 = vld [vmem:[%s4615_s1 + $0x104] sm:$0xf] }
  0xf2   :  { %v2383_v0 = vor.u32 %v2856_v63, %v2380_v62  ;;  %v2840_v62 = vld [vmem:[%s4615_s1 + $0x84] sm:$0xf] }
  0xf3   :  { %v4059_v5 = vadd.f32 %v1350_v60, %v1302_v32  ;;  %v1256_v4 = vadd.f32 %v1255_v1, %v1207_v16  ;;  %1401 = vmatmul.bf16.gmra.mxu0 %v4050_v17  ;;  %v2824_v1 = vld [vmem:[%s4615_s1 + $0x4] sm:$0xf] }
  0xf4   :  { %1450 = vmatmul.bf16.gmra.mxu1 %v4052_v19  ;;  %v2255_v38 = vor.u32 %v2824_v1, %v2252_v3  ;;  %1669 = vmatpush.bf16.msra.mxu2 %v2383_v0  ;;  %v2316_v1 = vld [vmem:[%s4615_s1 + $0x88] sm:$0xf0]  ;;  %v2202_v0 = vld [vmem:[%s4616_s0 + $0x190] sm:$0xf] }
  0xf5   :  { %1499 = vmatmul.bf16.gmra.mxu2 %v4054_v18 }
  0xf6   :  { %1548 = vmatmul.bf16.gmra.mxu3 %v4057_v39  ;;  %1571 = vmatpush.bf16.msra.mxu0 %v2255_v38  ;;  %v2210_v38 = vld [vmem:[%s4616_s0 + $0x198] sm:$0xf] }
  0xf7   :  { %v4120_v18 = vor.u32 %v2815_v36, %v2210_v38  ;;  %v2756_v38 = vld [vmem:[%s4615_s1 + $0x3f8] sm:$0xf0] }
  0xf8   :  { %v1304_v30 = vpop.f32.mrf.mxu2  ;;  %v1208_v60 = vpop.f32.mrf.mxu0 }
  0xf9   :  { %v1305_v56 = vadd.f32 %v1304_v30, %v1256_v4  ;;  %v1353_v32 = vpop.f32.mrf.mxu3  ;;  %v1209_v31 = vadd.f32 %v1208_v60, %v3696_v55  ;;  %v1257_v16 = vpop.f32.mrf.mxu1  ;;  %v2319_v4 = vor.u32 %v2840_v62, %v2316_v1  ;;  %v2204_v30 = vld [vmem:[%s4616_s0 + $0x1b0] sm:$0xf0]  ;;  %4679 = vst [vmem:[#allocation31_spill] sm:$0xff] %v4120_v18 }
  0xfa   :  { %v4118_v39 = vor.u32 %v2810_v7, %v2204_v30  ;;  %v2564_v7 = vld [vmem:[%s4615_s1 + $0x278] sm:$0xf0]  ;;  %v2950_v30 = vld [vmem:[%s4615_s1 + $0x3f4] sm:$0xf] }
  0xfb   :  { %v4084_v63 = vadd.f32 %v1353_v32, %v1305_v56  ;;  %v1258_v3 = vadd.f32 %v1257_v16, %v1209_v31  ;;  %1620 = vmatpush.bf16.msra.mxu1 %v2319_v4  ;;  %v2811_v56 = vld [vmem:[%s4616_s0 + $0x19c] sm:$0xf]  ;;  %v4116_v31 = vor.u32 %v2814_v6, %v2202_v0 }
  0xfc   :  { %v2212_v32 = vld [vmem:[%s4616_s0 + $0x1b8] sm:$0xf0]  ;;  %4678 = vst [vmem:[#allocation30_spill] sm:$0xff] %v4118_v39 }
  0xfd   :  { %4677 = vst [vmem:[#allocation29_spill] sm:$0xff] %v4116_v31  ;;  %v4123_v17 = vor.u32 %v2811_v56, %v2212_v32  ;;  %v2692_v0 = vld [vmem:[%s4615_s1 + $0x378] sm:$0xf0]  ;;  %v2759_v32 = vor.u32 %v2950_v30, %v2756_v38  ;;  %v2822_v30 = vld [vmem:[%s4616_s0 + $0x1ec] sm:$0xf0] }
  0xfe   :  { %v2818_v38 = vld [vmem:[%s4616_s0 + $0x1d4] sm:$0xf] }
  0xff   :  { %4680 = vst [vmem:[#allocation32_spill] sm:$0xff] %v4123_v17  ;;  %1907 = vmatpush.bf16.msrb.mxu3 %v2759_v32  ;;  %v2823_v32 = vld [vmem:[%s4616_s0 + $0x1f4] sm:$0xf0] }
 0x100   :  { %v1306_v60 = vpop.f32.mrf.mxu2  ;;  %v1211_v1 = vpop.f32.mrf.mxu0 }
 0x101   :  { %v1307_v16 = vadd.f32 %v1306_v60, %v1258_v3  ;;  %v1355_v62 = vpop.f32.mrf.mxu3  ;;  %v1212_v4 = vadd.f32 %v1211_v1, %v3696_v55  ;;  %v1260_v19 = vpop.f32.mrf.mxu1  ;;  %v2934_v3 = vld [vmem:[%s4615_s1 + $0x374] sm:$0xf] }
 0x102   :  { %v2695_v6 = vor.u32 %v2934_v3, %v2692_v0  ;;  %v2918_v0 = vld [vmem:[%s4615_s1 + $0x2f4] sm:$0xf] }
 0x103   :  { %v4125_v2 = vadd.f32 %v1355_v62, %v1307_v16  ;;  %v1261_v23 = vadd.f32 %v1260_v19, %v1212_v4  ;;  %1406 = vmatmul.bf16.gmra.mxu0 %v4116_v31  ;;  %v2902_v19 = vld [vmem:[%s4615_s1 + $0x274] sm:$0xf] }
 0x104   :  { %1455 = vmatmul.bf16.gmra.mxu1 %v4118_v39  ;;  %v2567_v56 = vor.u32 %v2902_v19, %v2564_v7  ;;  %1858 = vmatpush.bf16.msrb.mxu2 %v2695_v6  ;;  %v2628_v19 = vld [vmem:[%s4615_s1 + $0x2f8] sm:$0xf0]  ;;  %v2234_v6 = vld [vmem:[%s4616_s0 + $0x1d0] sm:$0xf] }
 0x105   :  { %1504 = vmatmul.bf16.gmra.mxu2 %v4120_v18 }
 0x106   :  { %1553 = vmatmul.bf16.gmra.mxu3 %v4123_v17  ;;  %1760 = vmatpush.bf16.msrb.mxu0 %v2567_v56  ;;  %v2242_v56 = vld [vmem:[%s4616_s0 + $0x1d8] sm:$0xf] }
 0x107   :  { %v4186_v18 = vor.u32 %v2823_v32, %v2242_v56  ;;  %v2748_v56 = vld [vmem:[%s4615_s1 + $0x3e8] sm:$0xf0] }
 0x108   :  { %v1309_v36 = vpop.f32.mrf.mxu2  ;;  %v1213_v62 = vpop.f32.mrf.mxu0 }
 0x109   :  { %v1310_v60 = vadd.f32 %v1309_v36, %v1261_v23  ;;  %v1358_v16 = vpop.f32.mrf.mxu3  ;;  %v1214_v1 = vadd.f32 %v1213_v62, %v3696_v55  ;;  %v1262_v4 = vpop.f32.mrf.mxu1  ;;  %v2631_v23 = vor.u32 %v2918_v0, %v2628_v19  ;;  %v2236_v36 = vld [vmem:[%s4616_s0 + $0x1f0] sm:$0xf0] }
 0x10a   :  { %v4184_v17 = vor.u32 %v2818_v38, %v2236_v36  ;;  %v2556_v38 = vld [vmem:[%s4615_s1 + $0x268] sm:$0xf0]  ;;  %v2948_v36 = vld [vmem:[%s4615_s1 + $0x3e4] sm:$0xf] }
 0x10b   :  { %v4150_v3 = vadd.f32 %v1358_v16, %v1310_v60  ;;  %v1263_v7 = vadd.f32 %v1262_v4, %v1214_v1  ;;  %1809 = vmatpush.bf16.msrb.mxu1 %v2631_v23  ;;  %v2819_v60 = vld [vmem:[%s4616_s0 + $0x1dc] sm:$0xf]  ;;  %v4182_v1 = vor.u32 %v2822_v30, %v2234_v6  ;;  %v2684_v6 = vld [vmem:[%s4615_s1 + $0x368] sm:$0xf0] }
 0x10c   :  { %v2244_v16 = vld [vmem:[%s4616_s0 + $0x1f8] sm:$0xf0] }
 0x10d   :  { %v4189_v31 = vor.u32 %v2819_v60, %v2244_v16  ;;  %v2751_v16 = vor.u32 %v2948_v36, %v2748_v56 }
 0x10f   :  { %1908 = vmatpush.bf16.msrb.mxu3 %v2751_v16 }
 0x110   :  { %v1311_v62 = vpop.f32.mrf.mxu2  ;;  %v1216_v19 = vpop.f32.mrf.mxu0 }
 0x111   :  { %v1312_v4 = vadd.f32 %v1311_v62, %v1263_v7  ;;  %v1360_v0 = vpop.f32.mrf.mxu3  ;;  %v1217_v23 = vadd.f32 %v1216_v19, %v3696_v55  ;;  %v1265_v39 = vpop.f32.mrf.mxu1  ;;  %v2932_v7 = vld [vmem:[%s4615_s1 + $0x364] sm:$0xf] }
 0x112   :  { %v2687_v30 = vor.u32 %v2932_v7, %v2684_v6  ;;  %v2916_v6 = vld [vmem:[%s4615_s1 + $0x2e4] sm:$0xf] }
 0x113   :  { %v4191_v22 = vadd.f32 %v1360_v0, %v1312_v4  ;;  %v1266_v21 = vadd.f32 %v1265_v39, %v1217_v23  ;;  %1411 = vmatmul.bf16.gmra.mxu0 %v4182_v1  ;;  %v2900_v39 = vld [vmem:[%s4615_s1 + $0x264] sm:$0xf] }
 0x114   :  { %1460 = vmatmul.bf16.gmra.mxu1 %v4184_v17  ;;  %v2559_v60 = vor.u32 %v2900_v39, %v2556_v38  ;;  %1859 = vmatpush.bf16.msrb.mxu2 %v2687_v30  ;;  %v2620_v39 = vld [vmem:[%s4615_s1 + $0x2e8] sm:$0xf0] }
 0x115   :  { %1509 = vmatmul.bf16.gmra.mxu2 %v4186_v18 }
 0x116   :  { %1558 = vmatmul.bf16.gmra.mxu3 %v4189_v31  ;;  %1761 = vmatpush.bf16.msrb.mxu0 %v2559_v60 }
 0x118   :  { %v1314_v32 = vpop.f32.mrf.mxu2  ;;  %v1218_v0 = vpop.f32.mrf.mxu0 }
 0x119   :  { %v1315_v62 = vadd.f32 %v1314_v32, %v1266_v21  ;;  %v1363_v4 = vpop.f32.mrf.mxu3  ;;  %v1219_v19 = vadd.f32 %v1218_v0, %v3696_v55  ;;  %v1267_v23 = vpop.f32.mrf.mxu1  ;;  %v2623_v21 = vor.u32 %v2916_v6, %v2620_v39  ;;  %v2898_v0 = vld [vmem:[%s4615_s1 + $0x254] sm:$0xf] }
 0x11b   :  { %v4216_v7 = vadd.f32 %v1363_v4, %v1315_v62  ;;  %v1268_v38 = vadd.f32 %v1267_v23, %v1219_v19  ;;  %1810 = vmatpush.bf16.msrb.mxu1 %v2623_v21  ;;  %v2930_v4 = vld [vmem:[%s4615_s1 + $0x354] sm:$0xf] }
 0x120   :  { %v1316_v36 = vpop.f32.mrf.mxu2  ;;  %v1377_v55 = vpop.f32.mrf.mxu0 }
 0x121   :  { %v1317_v30 = vadd.f32 %v1316_v36, %v1268_v38  ;;  %v1365_v56 = vpop.f32.mrf.mxu3  ;;  %v1378_v32 = vadd.f32 %v1377_v55, %v3754_v58  ;;  %v1426_v60 = vpop.f32.mrf.mxu1  ;;  %v2676_v58 = vld [vmem:[%s4615_s1 + $0x358] sm:$0xf0]  ;;  %v2914_v55 = vld [vmem:[%s4615_s1 + $0x2d4] sm:$0xf] }
 0x122   :  { %v2679_v19 = vor.u32 %v2930_v4, %v2676_v58 }
 0x123   :  { %v4225_v16 = vadd.f32 %v1365_v56, %v1317_v30  ;;  %v1427_v62 = vadd.f32 %v1426_v60, %v1378_v32  ;;  %1572 = vmatmul.bf16.vlgmr.msra.gmra.mxu0 %v3210_v48  ;;  %v2548_v48 = vld [vmem:[%s4615_s1 + $0x258] sm:$0xf0] }
 0x124   :  { %1621 = vmatmul.bf16.vlgmr.msra.gmra.mxu1 %v3221_v53  ;;  %v2946_v53 = vld [vmem:[%s4615_s1 + $0x3d4] sm:$0xf]  ;;  %v2551_v23 = vor.u32 %v2898_v0, %v2548_v48  ;;  %1860 = vmatpush.bf16.msrb.mxu2 %v2679_v19  ;;  %v2612_v32 = vld [vmem:[%s4615_s1 + $0x2d8] sm:$0xf0] }
 0x125   :  { %1670 = vmatmul.bf16.vlgmr.msra.gmra.mxu2 %v3223_v54  ;;  %v2740_v54 = vld [vmem:[%s4615_s1 + $0x3d8] sm:$0xf0] }
 0x126   :  { %1719 = vmatmul.bf16.vlgmr.msra.gmra.mxu3 %v3231_v57  ;;  %v2743_v6 = vor.u32 %v2946_v53, %v2740_v54  ;;  %1762 = vmatpush.bf16.msrb.mxu0 %v2551_v23  ;;  %v2896_v23 = vld [vmem:[%s4615_s1 + $0x244] sm:$0xf] }
 0x128   :  { %v1475_v57 = vpop.f32.mrf.mxu2  ;;  %v1379_v21 = vpop.f32.mrf.mxu0  ;;  %1909 = vmatpush.bf16.msrb.mxu3 %v2743_v6 }
 0x129   :  { %v1476_v39 = vadd.f32 %v1475_v57, %v1427_v62  ;;  %v1524_v38 = vpop.f32.mrf.mxu3  ;;  %v1380_v36 = vadd.f32 %v1379_v21, %v3795_v37  ;;  %v1428_v30 = vpop.f32.mrf.mxu1  ;;  %v2615_v62 = vor.u32 %v2914_v55, %v2612_v32  ;;  %v2928_v57 = vld [vmem:[%s4615_s1 + $0x344] sm:$0xf] }
 0x12b   :  { %v4250_v56 = vadd.f32 %v1524_v38, %v1476_v39  ;;  %v1429_v60 = vadd.f32 %v1428_v30, %v1380_v36  ;;  %1811 = vmatpush.bf16.msrb.mxu1 %v2615_v62  ;;  %v2912_v62 = vld [vmem:[%s4615_s1 + $0x2c4] sm:$0xf] }
 0x130   :  { %v1477_v4 = vpop.f32.mrf.mxu2  ;;  %v1382_v37 = vpop.f32.mrf.mxu0 }
 0x131   :  { %v1478_v58 = vadd.f32 %v1477_v4, %v1429_v60  ;;  %v1526_v0 = vpop.f32.mrf.mxu3  ;;  %v1383_v19 = vadd.f32 %v1382_v37, %v3820_v29  ;;  %v1431_v48 = vpop.f32.mrf.mxu1  ;;  %v2668_v29 = vld [vmem:[%s4615_s1 + $0x348] sm:$0xf0] }
 0x132   :  { %v2671_v6 = vor.u32 %v2928_v57, %v2668_v29  ;;  %v2604_v4 = vld [vmem:[%s4615_s1 + $0x2c8] sm:$0xf0] }
 0x133   :  { %v4259_v53 = vadd.f32 %v1526_v0, %v1478_v58  ;;  %v1432_v54 = vadd.f32 %v1431_v48, %v1383_v19  ;;  %1577 = vmatmul.bf16.gmra.mxu0 %v3297_v24  ;;  %v2540_v24 = vld [vmem:[%s4615_s1 + $0x248] sm:$0xf0]  ;;  %v2607_v0 = vor.u32 %v2912_v62, %v2604_v4  ;;  %v2596_v62 = vld [vmem:[%s4615_s1 + $0x2b8] sm:$0xf0] }
 0x134   :  { %1626 = vmatmul.bf16.gmra.mxu1 %v3299_v25  ;;  %v2944_v25 = vld [vmem:[%s4615_s1 + $0x3c4] sm:$0xf]  ;;  %v2543_v39 = vor.u32 %v2896_v23, %v2540_v24  ;;  %1861 = vmatpush.bf16.msrb.mxu2 %v2671_v6  ;;  %v2926_v6 = vld [vmem:[%s4615_s1 + $0x334] sm:$0xf] }
 0x135   :  { %1675 = vmatmul.bf16.gmra.mxu2 %v3301_v26  ;;  %v2732_v26 = vld [vmem:[%s4615_s1 + $0x3c8] sm:$0xf0]  ;;  %1812 = vmatpush.bf16.msrb.mxu1 %v2607_v0  ;;  %v2894_v24 = vld [vmem:[%s4615_s1 + $0x234] sm:$0xf] }
 0x136   :  { %1724 = vmatmul.bf16.gmra.mxu3 %v3303_v27  ;;  %v2735_v38 = vor.u32 %v2944_v25, %v2732_v26  ;;  %1763 = vmatpush.bf16.msrb.mxu0 %v2543_v39 }
 0x138   :  { %v1480_v27 = vpop.f32.mrf.mxu2  ;;  %v1384_v30 = vpop.f32.mrf.mxu0  ;;  %1910 = vmatpush.bf16.msrb.mxu3 %v2735_v38 }
 0x139   :  { %v1481_v21 = vadd.f32 %v1480_v27, %v1432_v54  ;;  %v1529_v36 = vpop.f32.mrf.mxu3  ;;  %v1385_v55 = vadd.f32 %v1384_v30, %v3861_v35  ;;  %v1433_v32 = vpop.f32.mrf.mxu1 }
 0x13b   :  { %v4284_v60 = vadd.f32 %v1529_v36, %v1481_v21  ;;  %v1434_v58 = vadd.f32 %v1433_v32, %v1385_v55  ;;  %v2910_v32 = vld [vmem:[%s4615_s1 + $0x2b4] sm:$0xf] }
 0x140   :  { %v1482_v37 = vpop.f32.mrf.mxu2  ;;  %v1387_v35 = vpop.f32.mrf.mxu0 }
 0x141   :  { %v1483_v19 = vadd.f32 %v1482_v37, %v1434_v58  ;;  %v1531_v48 = vpop.f32.mrf.mxu3  ;;  %v1388_v54 = vadd.f32 %v1387_v35, %v3886_v34  ;;  %v1436_v57 = vpop.f32.mrf.mxu1  ;;  %v2660_v34 = vld [vmem:[%s4615_s1 + $0x338] sm:$0xf0]  ;;  %v2599_v58 = vor.u32 %v2910_v32, %v2596_v62 }
 0x142   :  { %v2663_v25 = vor.u32 %v2926_v6, %v2660_v34  ;;  %v2892_v6 = vld [vmem:[%s4615_s1 + $0x224] sm:$0xf] }
 0x143   :  { %v4293_v29 = vadd.f32 %v1531_v48, %v1483_v19  ;;  %v1437_v23 = vadd.f32 %v1436_v57, %v1388_v54  ;;  %1582 = vmatmul.bf16.gmra.mxu0 %v3357_v49  ;;  %v2532_v49 = vld [vmem:[%s4615_s1 + $0x238] sm:$0xf0]  ;;  %1813 = vmatpush.bf16.msrb.mxu1 %v2599_v58 }
 0x144   :  { %1631 = vmatmul.bf16.gmra.mxu1 %v3359_v50  ;;  %v2942_v50 = vld [vmem:[%s4615_s1 + $0x3b4] sm:$0xf]  ;;  %v2535_v26 = vor.u32 %v2894_v24, %v2532_v49  ;;  %1862 = vmatpush.bf16.msrb.mxu2 %v2663_v25 }
 0x145   :  { %1680 = vmatmul.bf16.gmra.mxu2 %v3361_v51  ;;  %v2724_v51 = vld [vmem:[%s4615_s1 + $0x3b8] sm:$0xf0] }
 0x146   :  { %1729 = vmatmul.bf16.gmra.mxu3 %v3363_v52  ;;  %v2727_v27 = vor.u32 %v2942_v50, %v2724_v51  ;;  %1764 = vmatpush.bf16.msrb.mxu0 %v2535_v26 }
 0x148   :  { %v1485_v52 = vpop.f32.mrf.mxu2  ;;  %v1389_v21 = vpop.f32.mrf.mxu0  ;;  %1911 = vmatpush.bf16.msrb.mxu3 %v2727_v27 }
 0x149   :  { %v1486_v39 = vadd.f32 %v1485_v52, %v1437_v23  ;;  %v1534_v38 = vpop.f32.mrf.mxu3  ;;  %v1390_v36 = vadd.f32 %v1389_v21, %v3927_v33  ;;  %v1438_v30 = vpop.f32.mrf.mxu1  ;;  %v2924_v23 = vld [vmem:[%s4615_s1 + $0x324] sm:$0xf] }
 0x14b   :  { %v4318_v55 = vadd.f32 %v1534_v38, %v1486_v39  ;;  %v1439_v4 = vadd.f32 %v1438_v30, %v1390_v36  ;;  %v2908_v39 = vld [vmem:[%s4615_s1 + $0x2a4] sm:$0xf]  ;;  %v2588_v38 = vld [vmem:[%s4615_s1 + $0x2a8] sm:$0xf0] }
 0x14c   :  { %v2591_v36 = vor.u32 %v2908_v39, %v2588_v38 }
 0x14e   :  { %1814 = vmatpush.bf16.msrb.mxu1 %v2591_v36  ;;  %v2888_v36 = vld [vmem:[%s4615_s1 + $0x204] sm:$0xf] }
 0x150   :  { %v1487_v0 = vpop.f32.mrf.mxu2  ;;  %v1392_v33 = vpop.f32.mrf.mxu0 }
 0x151   :  { %v1488_v37 = vadd.f32 %v1487_v0, %v1439_v4  ;;  %v1536_v19 = vpop.f32.mrf.mxu3  ;;  %v1393_v48 = vadd.f32 %v1392_v33, %v3952_v59  ;;  %v1441_v35 = vpop.f32.mrf.mxu1  ;;  %v2652_v59 = vld [vmem:[%s4615_s1 + $0x328] sm:$0xf0]  ;;  %v2890_v33 = vld [vmem:[%s4615_s1 + $0x214] sm:$0xf] }
 0x152   :  { %v2655_v34 = vor.u32 %v2924_v23, %v2652_v59 }
 0x153   :  { %v4327_v54 = vadd.f32 %v1536_v19, %v1488_v37  ;;  %v1442_v57 = vadd.f32 %v1441_v35, %v1393_v48  ;;  %1587 = vmatmul.bf16.gmra.mxu0 %v3417_v12  ;;  %v2524_v12 = vld [vmem:[%s4615_s1 + $0x228] sm:$0xf0]  ;;  %v2922_v19 = vld [vmem:[%s4615_s1 + $0x314] sm:$0xf] }
 0x154   :  { %1636 = vmatmul.bf16.gmra.mxu1 %v3419_v13  ;;  %v2940_v13 = vld [vmem:[%s4615_s1 + $0x3a4] sm:$0xf]  ;;  %v2527_v24 = vor.u32 %v2892_v6, %v2524_v12  ;;  %1863 = vmatpush.bf16.msrb.mxu2 %v2655_v34 }
 0x155   :  { %1685 = vmatmul.bf16.gmra.mxu2 %v3421_v14  ;;  %v2716_v14 = vld [vmem:[%s4615_s1 + $0x3a8] sm:$0xf0] }
 0x156   :  { %1734 = vmatmul.bf16.gmra.mxu3 %v3423_v15  ;;  %v2719_v25 = vor.u32 %v2940_v13, %v2716_v14  ;;  %1765 = vmatpush.bf16.msrb.mxu0 %v2527_v24  ;;  %v2906_v14 = vld [vmem:[%s4615_s1 + $0x294] sm:$0xf] }
 0x158   :  { %v1490_v15 = vpop.f32.mrf.mxu2  ;;  %v1394_v51 = vpop.f32.mrf.mxu0  ;;  %1912 = vmatpush.bf16.msrb.mxu3 %v2719_v25 }
 0x159   :  { %v1491_v49 = vadd.f32 %v1490_v15, %v1442_v57  ;;  %v1539_v50 = vpop.f32.mrf.mxu3  ;;  %v1395_v52 = vadd.f32 %v1394_v51, %v3993_v28  ;;  %v1443_v26 = vpop.f32.mrf.mxu1  ;;  %v2580_v15 = vld [vmem:[%s4615_s1 + $0x298] sm:$0xf0] }
 0x15a   :  { %v2583_v25 = vor.u32 %v2906_v14, %v2580_v15 }
 0x15b   :  { %v4352_v27 = vadd.f32 %v1539_v50, %v1491_v49  ;;  %v1444_v21 = vadd.f32 %v1443_v26, %v1395_v52 }
 0x15c   :  { %1815 = vmatpush.bf16.msrb.mxu1 %v2583_v25 }
 0x160   :  { %v1492_v30 = vpop.f32.mrf.mxu2  ;;  %v1397_v28 = vpop.f32.mrf.mxu0 }
 0x161   :  { %v1493_v32 = vadd.f32 %v1492_v30, %v1444_v21  ;;  %v1541_v62 = vpop.f32.mrf.mxu3  ;;  %v1398_v4 = vadd.f32 %v1397_v28, %v4018_v61  ;;  %v1446_v58 = vpop.f32.mrf.mxu1  ;;  %v2644_v61 = vld [vmem:[%s4615_s1 + $0x318] sm:$0xf0]  ;;  %v2920_v21 = vld [vmem:[%s4615_s1 + $0x304] sm:$0xf] }
 0x162   :  { %v2647_v48 = vor.u32 %v2922_v19, %v2644_v61 }
 0x163   :  { %v4361_v0 = vadd.f32 %v1541_v62, %v1493_v32  ;;  %v1447_v37 = vadd.f32 %v1446_v58, %v1398_v4  ;;  %1592 = vmatmul.bf16.gmra.mxu0 %v3477_v40  ;;  %v2516_v40 = vld [vmem:[%s4615_s1 + $0x218] sm:$0xf0] }
 0x164   :  { %1641 = vmatmul.bf16.gmra.mxu1 %v3479_v41  ;;  %v2938_v41 = vld [vmem:[%s4615_s1 + $0x394] sm:$0xf]  ;;  %v2519_v35 = vor.u32 %v2890_v33, %v2516_v40  ;;  %1864 = vmatpush.bf16.msrb.mxu2 %v2647_v48  ;;  %v2904_v33 = vld [vmem:[%s4615_s1 + $0x284] sm:$0xf]  ;;  %v2572_v48 = vld [vmem:[%s4615_s1 + $0x288] sm:$0xf0] }
 0x165   :  { %1690 = vmatmul.bf16.gmra.mxu2 %v3481_v42  ;;  %v2708_v42 = vld [vmem:[%s4615_s1 + $0x398] sm:$0xf0] }
 0x166   :  { %1739 = vmatmul.bf16.gmra.mxu3 %v3483_v43  ;;  %v2711_v57 = vor.u32 %v2938_v41, %v2708_v42  ;;  %1766 = vmatpush.bf16.msrb.mxu0 %v2519_v35  ;;  %v2575_v41 = vor.u32 %v2904_v33, %v2572_v48  ;;  %v4684_v33 = vld [vmem:[#allocation5_spill] sm:$0xff]  ;;  %v4685_v48 = vld [vmem:[#allocation6_spill] sm:$0xff] }
 0x168   :  { %v1495_v43 = vpop.f32.mrf.mxu2  ;;  %v1399_v6 = vpop.f32.mrf.mxu0  ;;  %1913 = vmatpush.bf16.msrb.mxu3 %v2711_v57  ;;  %1816 = vmatpush.bf16.msrb.mxu1 %v2575_v41  ;;  %v4687_v41 = vld [vmem:[#allocation8_spill] sm:$0xff] }
 0x169   :  { %v1496_v23 = vadd.f32 %v1495_v43, %v1447_v37  ;;  %v1544_v59 = vpop.f32.mrf.mxu3  ;;  %v1400_v34 = vadd.f32 %v1399_v6, %v4059_v5  ;;  %v1448_v12 = vpop.f32.mrf.mxu1 }
 0x16b   :  { %v4386_v13 = vadd.f32 %v1544_v59, %v1496_v23  ;;  %v1449_v24 = vadd.f32 %v1448_v12, %v1400_v34 }
 0x170   :  { %v1497_v49 = vpop.f32.mrf.mxu2  ;;  %v1402_v5 = vpop.f32.mrf.mxu0 }
 0x171   :  { %v1498_v50 = vadd.f32 %v1497_v49, %v1449_v24  ;;  %v1546_v51 = vpop.f32.mrf.mxu3  ;;  %v1403_v52 = vadd.f32 %v1402_v5, %v4084_v63  ;;  %v1451_v26 = vpop.f32.mrf.mxu1  ;;  %v2636_v63 = vld [vmem:[%s4615_s1 + $0x308] sm:$0xf0] }
 0x172   :  { %v2639_v30 = vor.u32 %v2920_v21, %v2636_v63 }
 0x173   :  { %v4395_v39 = vadd.f32 %v1546_v51, %v1498_v50  ;;  %v1452_v38 = vadd.f32 %v1451_v26, %v1403_v52  ;;  %1597 = vmatmul.bf16.gmra.mxu0 %v3537_v8  ;;  %v2508_v8 = vld [vmem:[%s4615_s1 + $0x208] sm:$0xf0]  ;;  %v4681_v26 = vld [vmem:[#allocation2_spill] sm:$0xff] }
 0x174   :  { %1646 = vmatmul.bf16.gmra.mxu1 %v3539_v9  ;;  %v2936_v9 = vld [vmem:[%s4615_s1 + $0x384] sm:$0xf]  ;;  %v2511_v32 = vor.u32 %v2888_v36, %v2508_v8  ;;  %1865 = vmatpush.bf16.msrb.mxu2 %v2639_v30 }
 0x175   :  { %1695 = vmatmul.bf16.gmra.mxu2 %v3541_v10  ;;  %v2700_v10 = vld [vmem:[%s4615_s1 + $0x388] sm:$0xf0] }
 0x176   :  { %1744 = vmatmul.bf16.gmra.mxu3 %v3543_v11  ;;  %v2703_v62 = vor.u32 %v2936_v9, %v2700_v10  ;;  %1767 = vmatpush.bf16.msrb.mxu0 %v2511_v32 }
 0x178   :  { %v1500_v11 = vpop.f32.mrf.mxu2  ;;  %v1404_v58 = vpop.f32.mrf.mxu0  ;;  %1914 = vmatpush.bf16.msrb.mxu3 %v2703_v62 }
 0x179   :  { %v1501_v28 = vadd.f32 %v1500_v11, %v1452_v38  ;;  %v1549_v4 = vpop.f32.mrf.mxu3  ;;  %v1405_v37 = vadd.f32 %v1404_v58, %v4125_v2  ;;  %v1453_v19 = vpop.f32.mrf.mxu1  ;;  %v4682_v38 = vld [vmem:[#allocation3_spill] sm:$0xff] }
 0x17b   :  { %v4420_v61 = vadd.f32 %v1549_v4, %v1501_v28  ;;  %v1454_v40 = vadd.f32 %v1453_v19, %v1405_v37 }
 0x180   :  { %v1502_v42 = vpop.f32.mrf.mxu2  ;;  %v1407_v2 = vpop.f32.mrf.mxu0 }
 0x181   :  { %v1503_v43 = vadd.f32 %v1502_v42, %v1454_v40  ;;  %v1551_v35 = vpop.f32.mrf.mxu3  ;;  %v1408_v57 = vadd.f32 %v1407_v2, %v4150_v3  ;;  %v1456_v23 = vpop.f32.mrf.mxu1  ;;  %v4686_v40 = vld [vmem:[#allocation7_spill] sm:$0xff] }
 0x183   :  { %v4429_v59 = vadd.f32 %v1551_v35, %v1503_v43  ;;  %v1457_v6 = vadd.f32 %v1456_v23, %v1408_v57  ;;  %1602 = vmatmul.bf16.gmra.mxu0 %v3597_v44 }
 0x184   :  { %1651 = vmatmul.bf16.gmra.mxu1 %v3599_v45 }
 0x185   :  { %1700 = vmatmul.bf16.gmra.mxu2 %v3601_v46 }
 0x186   :  { %1749 = vmatmul.bf16.gmra.mxu3 %v3603_v47 }
 0x188   :  { %v1505_v34 = vpop.f32.mrf.mxu2  ;;  %v1409_v15 = vpop.f32.mrf.mxu0 }
 0x189   :  { %v1506_v12 = vadd.f32 %v1505_v34, %v1457_v6  ;;  %v1554_v14 = vpop.f32.mrf.mxu3  ;;  %v1410_v24 = vadd.f32 %v1409_v15, %v4191_v22  ;;  %v1458_v25 = vpop.f32.mrf.mxu1  ;;  %v4683_v22 = vld [vmem:[#allocation4_spill] sm:$0xff] }
 0x18b   :  { %v4436_v3 = vadd.f32 %v1554_v14, %v1506_v12  ;;  %v1459_v49 = vadd.f32 %v1458_v25, %v1410_v24 }
 0x190   :  { %v1507_v50 = vpop.f32.mrf.mxu2  ;;  %v1412_v44 = vpop.f32.mrf.mxu0 }
 0x191   :  { %v1508_v51 = vadd.f32 %v1507_v50, %v1459_v49  ;;  %v1556_v5 = vpop.f32.mrf.mxu3  ;;  %v1413_v45 = vadd.f32 %v1412_v44, %v4216_v7  ;;  %v1461_v52 = vpop.f32.mrf.mxu1  ;;  %v4689_v44 = vld [vmem:[#allocation10_spill] sm:$0xff] }
 0x193   :  { %v4439_v46 = vadd.f32 %v1556_v5, %v1508_v51  ;;  %v1462_v47 = vadd.f32 %v1461_v52, %v1413_v45  ;;  %1607 = vmatmul.bf16.gmra.mxu0 %v3657_v20  ;;  %v2952_v20 = vld [vmem:[%s4617_s2] sm:$0x3]  ;;  %v4688_v5 = vld [vmem:[#allocation9_spill] sm:$0xff]  ;;  %v4690_v45 = vld [vmem:[#allocation11_spill] sm:$0xff] }
 0x194   :  { %1656 = vmatmul.bf16.gmra.mxu1 %v4681_v26  ;;  %v4451_v11 = vperm.slane %v2952_v20, 1  ;;  %v4691_v52 = vld [vmem:[#allocation12_spill] sm:$0xff] }
 0x195   :  { %1705 = vmatmul.bf16.gmra.mxu2 %v4682_v38 }
 0x196   :  { %1754 = vmatmul.bf16.gmra.mxu3 %v4683_v22 }
 0x198   :  { %v1510_v21 = vpop.f32.mrf.mxu2  ;;  %v1414_v30 = vpop.f32.mrf.mxu0 }
 0x199   :  { %v1511_v63 = vadd.f32 %v1510_v21, %v1462_v47  ;;  %v1559_v36 = vpop.f32.mrf.mxu3  ;;  %v1415_v8 = vadd.f32 %v1414_v30, %v4225_v16  ;;  %v1463_v9 = vpop.f32.mrf.mxu1 }
 0x19b   :  { %v4446_v7 = vadd.f32 %v1559_v36, %v1511_v63  ;;  %v1464_v10 = vadd.f32 %v1463_v9, %v1415_v8 }
 0x1a0   :  { %v1512_v32 = vpop.f32.mrf.mxu2  ;;  %v1573_v4 = vpop.f32.mrf.mxu0 }
 0x1a1   :  { %v1513_v62 = vadd.f32 %v1512_v32, %v1464_v10  ;;  %v1561_v28 = vpop.f32.mrf.mxu3  ;;  %v1574_v58 = vadd.f32 %v1573_v4, %v4451_v11  ;;  %v1622_v37 = vpop.f32.mrf.mxu1 }
 0x1a3   :  { %v4454_v19 = vadd.f32 %v1561_v28, %v1513_v62  ;;  %v1623_v16 = vadd.f32 %v1622_v37, %v1574_v58  ;;  %1768 = vmatmul.bf16.vlgmr.msrb.gmra.mxu0 %v4684_v33  ;;  %v4692_v58 = vld [vmem:[#allocation13_spill] sm:$0xff]  ;;  %v4693_v37 = vld [vmem:[#allocation14_spill] sm:$0xff]  ;;  %v4695_v33 = vld [vmem:[#allocation16_spill] sm:$0xff] }
 0x1a4   :  { %1817 = vmatmul.bf16.vlgmr.msrb.gmra.mxu1 %v4685_v48 }
 0x1a5   :  { %1866 = vmatmul.bf16.vlgmr.msrb.gmra.mxu2 %v4686_v40 }
 0x1a6   :  { %1915 = vmatmul.bf16.vlgmr.msrb.gmra.mxu3 %v4687_v41 }
 0x1a8   :  { %v1671_v42 = vpop.f32.mrf.mxu2  ;;  %v1575_v2 = vpop.f32.mrf.mxu0 }
 0x1a9   :  { %v1672_v43 = vadd.f32 %v1671_v42, %v1623_v16  ;;  %v1720_v35 = vpop.f32.mrf.mxu3  ;;  %v1576_v57 = vadd.f32 %v1575_v2, %v4451_v11  ;;  %v1624_v23 = vpop.f32.mrf.mxu1  ;;  %v4694_v16 = vld [vmem:[#allocation15_spill] sm:$0xff] }
 0x1ab   :  { %v4461_v6 = vadd.f32 %v1720_v35, %v1672_v43  ;;  %v1625_v34 = vadd.f32 %v1624_v23, %v1576_v57 }
 0x1b0   :  { %v1673_v12 = vpop.f32.mrf.mxu2  ;;  %v1578_v24 = vpop.f32.mrf.mxu0 }
 0x1b1   :  { %v1674_v14 = vadd.f32 %v1673_v12, %v1625_v34  ;;  %v1722_v15 = vpop.f32.mrf.mxu3  ;;  %v1579_v25 = vadd.f32 %v1578_v24, %v4451_v11  ;;  %v1627_v49 = vpop.f32.mrf.mxu1 }
 0x1b3   :  { %v4464_v50 = vadd.f32 %v1722_v15, %v1674_v14  ;;  %v1628_v51 = vadd.f32 %v1627_v49, %v1579_v25  ;;  %1773 = vmatmul.bf16.gmra.mxu0 %v4688_v5  ;;  %v4697_v5 = vld [vmem:[#allocation18_spill] sm:$0xff] }
 0x1b4   :  { %1822 = vmatmul.bf16.gmra.mxu1 %v4689_v44  ;;  %v4698_v44 = vld [vmem:[#allocation19_spill] sm:$0xff] }
 0x1b5   :  { %1871 = vmatmul.bf16.gmra.mxu2 %v4690_v45  ;;  %v4699_v45 = vld [vmem:[#allocation20_spill] sm:$0xff] }
 0x1b6   :  { %1920 = vmatmul.bf16.gmra.mxu3 %v4691_v52 }
 0x1b8   :  { %v1676_v47 = vpop.f32.mrf.mxu2  ;;  %v1580_v22 = vpop.f32.mrf.mxu0 }
 0x1b9   :  { %v1677_v26 = vadd.f32 %v1676_v47, %v1628_v51  ;;  %v1725_v38 = vpop.f32.mrf.mxu3  ;;  %v1581_v21 = vadd.f32 %v1580_v22, %v4451_v11  ;;  %v1629_v63 = vpop.f32.mrf.mxu1  ;;  %v4696_v51 = vld [vmem:[#allocation17_spill] sm:$0xff] }
 0x1bb   :  { %v4471_v36 = vadd.f32 %v1725_v38, %v1677_v26  ;;  %v1630_v30 = vadd.f32 %v1629_v63, %v1581_v21 }
 0x1c0   :  { %v1678_v8 = vpop.f32.mrf.mxu2  ;;  %v1583_v20 = vpop.f32.mrf.mxu0 }
 0x1c1   :  { %v1679_v9 = vadd.f32 %v1678_v8, %v1630_v30  ;;  %v1727_v10 = vpop.f32.mrf.mxu3  ;;  %v1584_v32 = vadd.f32 %v1583_v20, %v4451_v11  ;;  %v1632_v62 = vpop.f32.mrf.mxu1 }
 0x1c3   :  { %v4474_v28 = vadd.f32 %v1727_v10, %v1679_v9  ;;  %v1633_v4 = vadd.f32 %v1632_v62, %v1584_v32  ;;  %1778 = vmatmul.bf16.gmra.mxu0 %v4692_v58 }
 0x1c4   :  { %1827 = vmatmul.bf16.gmra.mxu1 %v4693_v37  ;;  %v4700_v37 = vld [vmem:[#allocation21_spill] sm:$0xff] }
 0x1c5   :  { %1876 = vmatmul.bf16.gmra.mxu2 %v4694_v16  ;;  %v4701_v16 = vld [vmem:[#allocation22_spill] sm:$0xff] }
 0x1c6   :  { %1925 = vmatmul.bf16.gmra.mxu3 %v4695_v33  ;;  %v4702_v33 = vld [vmem:[#allocation23_spill] sm:$0xff] }
 0x1c8   :  { %v1681_v48 = vpop.f32.mrf.mxu2  ;;  %v1585_v42 = vpop.f32.mrf.mxu0 }
 0x1c9   :  { %v1682_v40 = vadd.f32 %v1681_v48, %v1633_v4  ;;  %v1730_v41 = vpop.f32.mrf.mxu3  ;;  %v1586_v43 = vadd.f32 %v1585_v42, %v4451_v11  ;;  %v1634_v35 = vpop.f32.mrf.mxu1  ;;  %v4703_v48 = vld [vmem:[#allocation24_spill] sm:$0xff] }
 0x1cb   :  { %v4481_v2 = vadd.f32 %v1730_v41, %v1682_v40  ;;  %v1635_v57 = vadd.f32 %v1634_v35, %v1586_v43 }
 0x1d0   :  { %v1683_v23 = vpop.f32.mrf.mxu2  ;;  %v1588_v14 = vpop.f32.mrf.mxu0 }
 0x1d1   :  { %v1684_v34 = vadd.f32 %v1683_v23, %v1635_v57  ;;  %v1732_v12 = vpop.f32.mrf.mxu3  ;;  %v1589_v15 = vadd.f32 %v1588_v14, %v4451_v11  ;;  %v1637_v24 = vpop.f32.mrf.mxu1 }
 0x1d3   :  { %v4484_v25 = vadd.f32 %v1732_v12, %v1684_v34  ;;  %v1638_v49 = vadd.f32 %v1637_v24, %v1589_v15  ;;  %1783 = vmatmul.bf16.gmra.mxu0 %v4696_v51 }
 0x1d4   :  { %1832 = vmatmul.bf16.gmra.mxu1 %v4697_v5 }
 0x1d5   :  { %1881 = vmatmul.bf16.gmra.mxu2 %v4698_v44 }
 0x1d6   :  { %1930 = vmatmul.bf16.gmra.mxu3 %v4699_v45  ;;  %v4704_v45 = vld [vmem:[#allocation25_spill] sm:$0xff] }
 0x1d8   :  { %v1686_v52 = vpop.f32.mrf.mxu2  ;;  %v1590_v38 = vpop.f32.mrf.mxu0 }
 0x1d9   :  { %v1687_v47 = vadd.f32 %v1686_v52, %v1638_v49  ;;  %v1735_v26 = vpop.f32.mrf.mxu3  ;;  %v1591_v22 = vadd.f32 %v1590_v38, %v4451_v11  ;;  %v1639_v21 = vpop.f32.mrf.mxu1  ;;  %v4705_v52 = vld [vmem:[#allocation26_spill] sm:$0xff] }
 0x1db   :  { %v4491_v63 = vadd.f32 %v1735_v26, %v1687_v47  ;;  %v1640_v30 = vadd.f32 %v1639_v21, %v1591_v22  ;;  %v4706_v47 = vld [vmem:[#allocation27_spill] sm:$0xff]  ;;  %v4707_v26 = vld [vmem:[#allocation28_spill] sm:$0xff] }
 0x1e0   :  { %v1688_v8 = vpop.f32.mrf.mxu2  ;;  %v1593_v20 = vpop.f32.mrf.mxu0 }
 0x1e1   :  { %v1689_v9 = vadd.f32 %v1688_v8, %v1640_v30  ;;  %v1737_v10 = vpop.f32.mrf.mxu3  ;;  %v1594_v32 = vadd.f32 %v1593_v20, %v4451_v11  ;;  %v1642_v62 = vpop.f32.mrf.mxu1 }
 0x1e3   :  { %v4494_v4 = vadd.f32 %v1737_v10, %v1689_v9  ;;  %v1643_v58 = vadd.f32 %v1642_v62, %v1594_v32  ;;  %1788 = vmatmul.bf16.gmra.mxu0 %v4700_v37 }
 0x1e4   :  { %1837 = vmatmul.bf16.gmra.mxu1 %v4701_v16 }
 0x1e5   :  { %1886 = vmatmul.bf16.gmra.mxu2 %v4702_v33 }
 0x1e6   :  { %1935 = vmatmul.bf16.gmra.mxu3 %v4703_v48 }
 0x1e8   :  { %v1691_v40 = vpop.f32.mrf.mxu2  ;;  %v1595_v43 = vpop.f32.mrf.mxu0 }
 0x1e9   :  { %v1692_v41 = vadd.f32 %v1691_v40, %v1643_v58  ;;  %v1740_v42 = vpop.f32.mrf.mxu3  ;;  %v1596_v35 = vadd.f32 %v1595_v43, %v4451_v11  ;;  %v1644_v57 = vpop.f32.mrf.mxu1  ;;  %v4710_v43 = vld [vmem:[#allocation31_spill] sm:$0xff] }
 0x1eb   :  { %v4501_v23 = vadd.f32 %v1740_v42, %v1692_v41  ;;  %v1645_v34 = vadd.f32 %v1644_v57, %v1596_v35  ;;  %v4708_v41 = vld [vmem:[#allocation29_spill] sm:$0xff]  ;;  %v4709_v42 = vld [vmem:[#allocation30_spill] sm:$0xff]  ;;  %v4711_v35 = vld [vmem:[#allocation32_spill] sm:$0xff] }
 0x1f0   :  { %v1693_v12 = vpop.f32.mrf.mxu2  ;;  %v1598_v24 = vpop.f32.mrf.mxu0 }
 0x1f1   :  { %v1694_v14 = vadd.f32 %v1693_v12, %v1645_v34  ;;  %v1742_v15 = vpop.f32.mrf.mxu3  ;;  %v1599_v49 = vadd.f32 %v1598_v24, %v4451_v11  ;;  %v1647_v51 = vpop.f32.mrf.mxu1 }
 0x1f3   :  { %v4504_v5 = vadd.f32 %v1742_v15, %v1694_v14  ;;  %v1648_v44 = vadd.f32 %v1647_v51, %v1599_v49  ;;  %1793 = vmatmul.bf16.gmra.mxu0 %v4704_v45 }
 0x1f4   :  { %1842 = vmatmul.bf16.gmra.mxu1 %v4705_v52 }
 0x1f5   :  { %1891 = vmatmul.bf16.gmra.mxu2 %v4706_v47 }
 0x1f6   :  { %1940 = vmatmul.bf16.gmra.mxu3 %v4707_v26 }
 0x1f8   :  { %v1696_v38 = vpop.f32.mrf.mxu2  ;;  %v1600_v30 = vpop.f32.mrf.mxu0 }
 0x1f9   :  { %v1697_v22 = vadd.f32 %v1696_v38, %v1648_v44  ;;  %v1745_v21 = vpop.f32.mrf.mxu3  ;;  %v1601_v8 = vadd.f32 %v1600_v30, %v4451_v11  ;;  %v1649_v9 = vpop.f32.mrf.mxu1 }
 0x1fb   :  { %v4511_v10 = vadd.f32 %v1745_v21, %v1697_v22  ;;  %v1650_v20 = vadd.f32 %v1649_v9, %v1601_v8 }
 0x200   :  { %v1698_v32 = vpop.f32.mrf.mxu2  ;;  %v1603_v37 = vpop.f32.mrf.mxu0 }
 0x201   :  { %v1699_v62 = vadd.f32 %v1698_v32, %v1650_v20  ;;  %v1747_v58 = vpop.f32.mrf.mxu3  ;;  %v1604_v16 = vadd.f32 %v1603_v37, %v4451_v11  ;;  %v1652_v33 = vpop.f32.mrf.mxu1 }
 0x203   :  { %v4514_v48 = vadd.f32 %v1747_v58, %v1699_v62  ;;  %v1653_v40 = vadd.f32 %v1652_v33, %v1604_v16  ;;  %1798 = vmatmul.bf16.gmra.mxu0 %v4708_v41 }
 0x204   :  { %1847 = vmatmul.bf16.gmra.mxu1 %v4709_v42 }
 0x205   :  { %1896 = vmatmul.bf16.gmra.mxu2 %v4710_v43 }
 0x206   :  { %1945 = vmatmul.bf16.gmra.mxu3 %v4711_v35 }
 0x208   :  { %v1701_v57 = vpop.f32.mrf.mxu2  ;;  %v1605_v14 = vpop.f32.mrf.mxu0 }
 0x209   :  { %v1702_v34 = vadd.f32 %v1701_v57, %v1653_v40  ;;  %v1750_v12 = vpop.f32.mrf.mxu3  ;;  %v1606_v15 = vadd.f32 %v1605_v14, %v4451_v11  ;;  %v1654_v24 = vpop.f32.mrf.mxu1 }
 0x20b   :  { %v4521_v49 = vadd.f32 %v1750_v12, %v1702_v34  ;;  %v1655_v51 = vadd.f32 %v1654_v24, %v1606_v15 }
 0x210   :  { %v1703_v44 = vpop.f32.mrf.mxu2  ;;  %v1608_v47 = vpop.f32.mrf.mxu0 }
 0x211   :  { %v1704_v45 = vadd.f32 %v1703_v44, %v1655_v51  ;;  %v1752_v52 = vpop.f32.mrf.mxu3  ;;  %v1609_v26 = vadd.f32 %v1608_v47, %v4451_v11  ;;  %v1657_v38 = vpop.f32.mrf.mxu1 }
 0x213   :  { %v4524_v22 = vadd.f32 %v1752_v52, %v1704_v45  ;;  %v1658_v21 = vadd.f32 %v1657_v38, %v1609_v26  ;;  %1803 = vmatmul.bf16.gmra.mxu0 %v4182_v1 }
 0x214   :  { %1852 = vmatmul.bf16.gmra.mxu1 %v4184_v17 }
 0x215   :  { %1901 = vmatmul.bf16.gmra.mxu2 %v4186_v18 }
 0x216   :  { %1950 = vmatmul.bf16.gmra.mxu3 %v4189_v31 }
 0x218   :  { %v1706_v30 = vpop.f32.mrf.mxu2  ;;  %v1610_v20 = vpop.f32.mrf.mxu0 }
 0x219   :  { %v1707_v8 = vadd.f32 %v1706_v30, %v1658_v21  ;;  %v1755_v9 = vpop.f32.mrf.mxu3  ;;  %v1611_v32 = vadd.f32 %v1610_v20, %v4451_v11  ;;  %v1659_v62 = vpop.f32.mrf.mxu1 }
 0x21b   :  { %v4531_v58 = vadd.f32 %v1755_v9, %v1707_v8  ;;  %v1660_v37 = vadd.f32 %v1659_v62, %v1611_v32 }
 0x220   :  { %v1708_v16 = vpop.f32.mrf.mxu2  ;;  %v1769_v1 = vpop.f32.mrf.mxu0 }
 0x221   :  { %v1709_v33 = vadd.f32 %v1708_v16, %v1660_v37  ;;  %v1757_v40 = vpop.f32.mrf.mxu3  ;;  %v1818_v41 = vpop.f32.mrf.mxu1  ;;  %v1770_v18 = vadd.f32 %v1769_v1, %v4461_v6 }
 0x223   :  { %v4533_v17 = vadd.f32 %v1757_v40, %v1709_v33  ;;  %v1819_v31 = vadd.f32 %v1818_v41, %v1770_v18 }
 0x228   :  { %v1867_v42 = vpop.f32.mrf.mxu2  ;;  %v1771_v57 = vpop.f32.mrf.mxu0 }
 0x229   :  { %v1868_v43 = vadd.f32 %v1867_v42, %v1819_v31  ;;  %v1916_v35 = vpop.f32.mrf.mxu3  ;;  %v1820_v34 = vpop.f32.mrf.mxu1  ;;  %v1772_v12 = vadd.f32 %v1771_v57, %v4464_v50 }
 0x22b   :  { %v1917_v11 = vadd.f32 %v1916_v35, %v1868_v43  ;;  %v1821_v15 = vadd.f32 %v1820_v34, %v1772_v12 }
 0x22d   :  { %v1956_v14 = vpack.c.bf16 %v1917_v11, %v4250_v56 }
 0x22f   :  { %1972 = vst [vmem:[%s4618_s3] sm:$0xff] %v1956_v14 }
 0x230   :  { %v1869_v24 = vpop.f32.mrf.mxu2  ;;  %v1774_v6 = vpop.f32.mrf.mxu0 }
 0x231   :  { %v1870_v51 = vadd.f32 %v1869_v24, %v1821_v15  ;;  %v1918_v44 = vpop.f32.mrf.mxu3  ;;  %v1823_v45 = vpop.f32.mrf.mxu1  ;;  %v1775_v47 = vadd.f32 %v1774_v6, %v4471_v36 }
 0x233   :  { %v1919_v52 = vadd.f32 %v1918_v44, %v1870_v51  ;;  %v1824_v56 = vadd.f32 %v1823_v45, %v1775_v47 }
 0x235   :  { %v1957_v26 = vpack.c.bf16 %v1919_v52, %v4259_v53 }
 0x237   :  { %1973 = vst [vmem:[%s4618_s3 + $0x8] sm:$0xff] %v1957_v26 }
 0x238   :  { %v1872_v50 = vpop.f32.mrf.mxu2  ;;  %v1776_v30 = vpop.f32.mrf.mxu0 }
 0x239   :  { %v1873_v38 = vadd.f32 %v1872_v50, %v1824_v56  ;;  %v1921_v21 = vpop.f32.mrf.mxu3  ;;  %v1825_v8 = vpop.f32.mrf.mxu1  ;;  %v1777_v20 = vadd.f32 %v1776_v30, %v4474_v28 }
 0x23b   :  { %v1922_v9 = vadd.f32 %v1921_v21, %v1873_v38  ;;  %v1826_v53 = vadd.f32 %v1825_v8, %v1777_v20 }
 0x23d   :  { %v1958_v32 = vpack.c.bf16 %v1922_v9, %v4284_v60 }
 0x23f   :  { %1974 = vst [vmem:[%s4618_s3 + $0x10] sm:$0xff] %v1958_v32 }
 0x240   :  { %v1874_v36 = vpop.f32.mrf.mxu2  ;;  %v1779_v16 = vpop.f32.mrf.mxu0 }
 0x241   :  { %v1875_v62 = vadd.f32 %v1874_v36, %v1826_v53  ;;  %v1923_v37 = vpop.f32.mrf.mxu3  ;;  %v1828_v33 = vpop.f32.mrf.mxu1  ;;  %v1780_v1 = vadd.f32 %v1779_v16, %v4481_v2 }
 0x243   :  { %v1924_v40 = vadd.f32 %v1923_v37, %v1875_v62  ;;  %v1829_v60 = vadd.f32 %v1828_v33, %v1780_v1 }
 0x245   :  { %v1959_v41 = vpack.c.bf16 %v1924_v40, %v4293_v29 }
 0x247   :  { %1975 = vst [vmem:[%s4618_s3 + $0x18] sm:$0xff] %v1959_v41 }
 0x248   :  { %v1877_v28 = vpop.f32.mrf.mxu2  ;;  %v1781_v42 = vpop.f32.mrf.mxu0 }
 0x249   :  { %v1878_v18 = vadd.f32 %v1877_v28, %v1829_v60  ;;  %v1926_v31 = vpop.f32.mrf.mxu3  ;;  %v1830_v43 = vpop.f32.mrf.mxu1  ;;  %v1782_v57 = vadd.f32 %v1781_v42, %v4484_v25 }
 0x24b   :  { %v1927_v35 = vadd.f32 %v1926_v31, %v1878_v18  ;;  %v1831_v29 = vadd.f32 %v1830_v43, %v1782_v57 }
 0x24d   :  { %v1960_v34 = vpack.c.bf16 %v1927_v35, %v4318_v55 }
 0x24f   :  { %1976 = vst [vmem:[%s4618_s3 + $0x20] sm:$0xff] %v1960_v34 }
 0x250   :  { %v1879_v2 = vpop.f32.mrf.mxu2  ;;  %v1784_v14 = vpop.f32.mrf.mxu0 }
 0x251   :  { %v1880_v11 = vadd.f32 %v1879_v2, %v1831_v29  ;;  %v1928_v12 = vpop.f32.mrf.mxu3  ;;  %v1833_v15 = vpop.f32.mrf.mxu1  ;;  %v1785_v51 = vadd.f32 %v1784_v14, %v4491_v63 }
 0x253   :  { %v1929_v24 = vadd.f32 %v1928_v12, %v1880_v11  ;;  %v1834_v55 = vadd.f32 %v1833_v15, %v1785_v51 }
 0x255   :  { %v1961_v44 = vpack.c.bf16 %v1929_v24, %v4327_v54 }
 0x257   :  { %1977 = vst [vmem:[%s4618_s3 + $0x28] sm:$0xff] %v1961_v44 }
 0x258   :  { %v1882_v25 = vpop.f32.mrf.mxu2  ;;  %v1786_v52 = vpop.f32.mrf.mxu0 }
 0x259   :  { %v1883_v6 = vadd.f32 %v1882_v25, %v1834_v55  ;;  %v1931_v45 = vpop.f32.mrf.mxu3  ;;  %v1835_v47 = vpop.f32.mrf.mxu1  ;;  %v1787_v56 = vadd.f32 %v1786_v52, %v4494_v4 }
 0x25b   :  { %v1932_v26 = vadd.f32 %v1931_v45, %v1883_v6  ;;  %v1836_v54 = vadd.f32 %v1835_v47, %v1787_v56 }
 0x25d   :  { %v1962_v50 = vpack.c.bf16 %v1932_v26, %v4352_v27 }
 0x25f   :  { %1978 = vst [vmem:[%s4618_s3 + $0x30] sm:$0xff] %v1962_v50 }
 0x260   :  { %v1884_v63 = vpop.f32.mrf.mxu2  ;;  %v1789_v30 = vpop.f32.mrf.mxu0 }
 0x261   :  { %v1885_v38 = vadd.f32 %v1884_v63, %v1836_v54  ;;  %v1933_v21 = vpop.f32.mrf.mxu3  ;;  %v1838_v8 = vpop.f32.mrf.mxu1  ;;  %v1790_v20 = vadd.f32 %v1789_v30, %v4501_v23 }
 0x263   :  { %v1934_v9 = vadd.f32 %v1933_v21, %v1885_v38  ;;  %v1839_v27 = vadd.f32 %v1838_v8, %v1790_v20 }
 0x265   :  { %v1963_v32 = vpack.c.bf16 %v1934_v9, %v4361_v0 }
 0x267   :  { %1979 = vst [vmem:[%s4618_s3 + $0x38] sm:$0xff] %v1963_v32 }
 0x268   :  { %v1887_v4 = vpop.f32.mrf.mxu2  ;;  %v1791_v62 = vpop.f32.mrf.mxu0 }
 0x269   :  { %v1888_v53 = vadd.f32 %v1887_v4, %v1839_v27  ;;  %v1936_v36 = vpop.f32.mrf.mxu3  ;;  %v1840_v37 = vpop.f32.mrf.mxu1  ;;  %v1792_v33 = vadd.f32 %v1791_v62, %v4504_v5 }
 0x26b   :  { %v1937_v16 = vadd.f32 %v1936_v36, %v1888_v53  ;;  %v1841_v0 = vadd.f32 %v1840_v37, %v1792_v33 }
 0x26d   :  { %v1964_v40 = vpack.c.bf16 %v1937_v16, %v4386_v13 }
 0x26f   :  { %1980 = vst [vmem:[%s4618_s3 + $0x40] sm:$0xff] %v1964_v40 }
 0x270   :  { %v1889_v23 = vpop.f32.mrf.mxu2  ;;  %v1794_v60 = vpop.f32.mrf.mxu0 }
 0x271   :  { %v1890_v1 = vadd.f32 %v1889_v23, %v1841_v0  ;;  %v1938_v41 = vpop.f32.mrf.mxu3  ;;  %v1843_v28 = vpop.f32.mrf.mxu1  ;;  %v1795_v31 = vadd.f32 %v1794_v60, %v4511_v10 }
 0x273   :  { %v1939_v18 = vadd.f32 %v1938_v41, %v1890_v1  ;;  %v1844_v13 = vadd.f32 %v1843_v28, %v1795_v31 }
 0x275   :  { %v1965_v42 = vpack.c.bf16 %v1939_v18, %v4395_v39 }
 0x277   :  { %1981 = vst [vmem:[%s4618_s3 + $0x48] sm:$0xff] %v1965_v42 }
 0x278   :  { %v1892_v5 = vpop.f32.mrf.mxu2  ;;  %v1796_v57 = vpop.f32.mrf.mxu0 }
 0x279   :  { %v1893_v43 = vadd.f32 %v1892_v5, %v1844_v13  ;;  %v1941_v35 = vpop.f32.mrf.mxu3  ;;  %v1845_v34 = vpop.f32.mrf.mxu1  ;;  %v1797_v2 = vadd.f32 %v1796_v57, %v4514_v48 }
 0x27b   :  { %v1942_v29 = vadd.f32 %v1941_v35, %v1893_v43  ;;  %v1846_v39 = vadd.f32 %v1845_v34, %v1797_v2 }
 0x27d   :  { %v1966_v11 = vpack.c.bf16 %v1942_v29, %v4420_v61 }
 0x27f   :  { %1982 = vst [vmem:[%s4618_s3 + $0x50] sm:$0xff] %v1966_v11 }
 0x280   :  { %v1894_v10 = vpop.f32.mrf.mxu2  ;;  %v1799_v15 = vpop.f32.mrf.mxu0 }
 0x281   :  { %v1895_v12 = vadd.f32 %v1894_v10, %v1846_v39  ;;  %v1943_v14 = vpop.f32.mrf.mxu3  ;;  %v1848_v24 = vpop.f32.mrf.mxu1  ;;  %v1800_v44 = vadd.f32 %v1799_v15, %v4521_v49 }
 0x283   :  { %v1944_v51 = vadd.f32 %v1943_v14, %v1895_v12  ;;  %v1849_v61 = vadd.f32 %v1848_v24, %v1800_v44 }
 0x285   :  { %v1967_v55 = vpack.c.bf16 %v1944_v51, %v4429_v59 }
 0x287   :  { %1983 = vst [vmem:[%s4618_s3 + $0x58] sm:$0xff] %v1967_v55 }
 0x288   :  { %v1897_v48 = vpop.f32.mrf.mxu2  ;;  %v1801_v45 = vpop.f32.mrf.mxu0 }
 0x289   :  { %v1898_v25 = vadd.f32 %v1897_v48, %v1849_v61  ;;  %v1946_v6 = vpop.f32.mrf.mxu3  ;;  %v1850_v52 = vpop.f32.mrf.mxu1  ;;  %v1802_v26 = vadd.f32 %v1801_v45, %v4524_v22 }
 0x28b   :  { %v1947_v47 = vadd.f32 %v1946_v6, %v1898_v25  ;;  %v1851_v59 = vadd.f32 %v1850_v52, %v1802_v26 }
 0x28d   :  { %v1968_v56 = vpack.c.bf16 %v1947_v47, %v4436_v3 }
 0x28f   :  { %1984 = vst [vmem:[%s4618_s3 + $0x60] sm:$0xff] %v1968_v56 }
 0x290   :  { %v1899_v49 = vpop.f32.mrf.mxu2  ;;  %v1804_v63 = vpop.f32.mrf.mxu0 }
 0x291   :  { %v1900_v50 = vadd.f32 %v1899_v49, %v1851_v59  ;;  %v1948_v54 = vpop.f32.mrf.mxu3  ;;  %v1805_v21 = vadd.f32 %v1804_v63, %v4531_v58  ;;  %v1853_v30 = vpop.f32.mrf.mxu1 }
 0x293   :  { %v1949_v38 = vadd.f32 %v1948_v54, %v1900_v50  ;;  %v1854_v3 = vadd.f32 %v1853_v30, %v1805_v21 }
 0x295   :  { %v1969_v8 = vpack.c.bf16 %v1949_v38, %v4439_v46 }
 0x297   :  { %1985 = vst [vmem:[%s4618_s3 + $0x68] sm:$0xff] %v1969_v8 }
 0x298   :  { %v1902_v22 = vpop.f32.mrf.mxu2  ;;  %v1806_v32 = vpop.f32.mrf.mxu0 }
 0x299   :  { %v1903_v9 = vadd.f32 %v1902_v22, %v1854_v3  ;;  %v1951_v20 = vpop.f32.mrf.mxu3  ;;  %v1807_v4 = vadd.f32 %v1806_v32, %v4533_v17  ;;  %v1855_v36 = vpop.f32.mrf.mxu1 }
 0x29b   :  { %v1952_v27 = vadd.f32 %v1951_v20, %v1903_v9  ;;  %v1856_v46 = vadd.f32 %v1855_v36, %v1807_v4 }
 0x29d   :  { %v1970_v53 = vpack.c.bf16 %v1952_v27, %v4446_v7 }
 0x29f   :  { %1986 = vst [vmem:[%s4618_s3 + $0x70] sm:$0xff] %v1970_v53 }
 0x2a0   :  { %v1904_v58 = vpop.f32.mrf.mxu2 }
 0x2a1   :  { %v1905_v62 = vadd.f32 %v1904_v58, %v1856_v46  ;;  %v1953_v37 = vpop.f32.mrf.mxu3 }
 0x2a3   :  { %v1954_v16 = vadd.f32 %v1953_v37, %v1905_v62 }
 0x2a5   :  { %v1971_v33 = vpack.c.bf16 %v1954_v16, %v4454_v19 }
 0x2a7   :  { %1987 = vst [vmem:[%s4618_s3 + $0x78] sm:$0xff] %v1971_v33 }

// kernel: simple_nn_forward.11
= control target key start
LH: loop header
LB: loop body
LE: loop exit
PB: predicated region body
PF: predicated region fallthrough
CT: control target
= control target key end

     0   :  { %s2228_s12 = smov 0   ;;  %s2397_s0 = inlined_call_operand.vmem [shape: bf16[8,16384], index: 0, kind: input, shape index: {}]   ;;  %s2398_s1 = inlined_call_operand.vmem [shape: bf16[16384,21], index: 1, kind: input, shape index: {}]   ;;  %s2399_s2 = inlined_call_operand.vmem [shape: f32[1,21], index: 2, kind: input, shape index: {}]   ;;  %s2400_s3 = inlined_call_operand.vmem [shape: f32[8,21], index: 3, kind: output, shape index: {}]  }
   0x1 LB: > { %s2234_s13 = sadd.s32 4294967295, %s2205_s12   ;;  %p1540_p0 = scmp.ge.s32.totalorder %s2205_s12, 1  ;;  %s2205_s12 = sphi %s2228_s12, %s13_s12  }
   0x2   : > { %p144_p1 = scmp.lt.s32.totalorder %s2205_s12, 9 }
   0x4   : > { %p145_p2 = pnand %p1540_p0, %p144_p1 }
   0x5   : > { %s1541_s14 = sshll.u32 (!%p145_p2), %s2234_s13, 4  ;;  %s1543_s15 = sshll.u32 (!%p145_p2), %s2234_s13, 8 }
   0x6   : > { %148 = sbr.rel (%p145_p2) target bundleno = 300 (0x12c), region = 32  ;;  %p169_p3 = scmp.lt.s32.totalorder (!%p145_p2), %s1541_s14, 127 }
   0x7   : > { %p175_p4 = scmp.lt.s32.totalorder (!%p145_p2), %s1543_s15, 2047  ;;  %p1545_p5 = scmp.ne.s32.totalorder (!%p145_p2), %s2234_s13, 0 }
   0xb   : > { %s2402_s14 = smov (!%p169_p3, %s1541_s14), 127  ;;  %s2404_s15 = smov (!%p175_p4, %s1543_s15), 2047 }
   0xc   : > { %s1542_s16 = sshll.u32 %s2402_s14, 2  ;;  %s1544_s20 = sshll.u32 %s2404_s15, 2 }
   0xd   : > { %s2243_s19 = scalar_lea.vmem %s2397_s0, %s1542_s16  ;;  %s2248_s23 = scalar_lea.vmem %s2398_s1, %s1544_s20 }
   0xe   : > { %183 = sbr.rel (%p1545_p5) target bundleno = 21 (0x15), region = 36 }
  0x13   : > { %vm184_vm0 = vcmask 171008   ;;  %v2207_v0 = vmov 0.0  }
  0x14   : > { %185 = vst.msk [vmem:[#allocation2] sm:$0xff] %vm184_vm0, %v2207_v0 }
  0x15 PF: > { %v2068_v1 = vld [vmem:[%s2248_s23 + $0x38] sm:$0xff]  ;;  %v2067_v5 = vld [vmem:[%s2248_s23 + $0x30] sm:$0xff]  ;;  %v2066_v9 = vld [vmem:[%s2248_s23 + $0x28] sm:$0xff]  ;;  %vm1484_vm1 = vcmask 171008   ;;  %p2058_p6 = scmp.ne.s32.totalorder %s2234_s13, 7 }
  0x16   : > { %v2076_v2 = vld [vmem:[%s2248_s23 + $0x78] sm:$0xff]  ;;  %1275 = vmatpush.bf16.msra.mxu0 %v2068_v1  ;;  %v2075_v6 = vld [vmem:[%s2248_s23 + $0x70] sm:$0xff]  ;;  %v2074_v10 = vld [vmem:[%s2248_s23 + $0x68] sm:$0xff] }
  0x17   : > { %v2084_v3 = vld [vmem:[%s2248_s23 + $0xb8] sm:$0xff]  ;;  %1288 = vmatpush.bf16.msra.mxu1 %v2076_v2  ;;  %v2083_v7 = vld [vmem:[%s2248_s23 + $0xb0] sm:$0xff]  ;;  %v2082_v11 = vld [vmem:[%s2248_s23 + $0xa8] sm:$0xff] }
  0x18   : > { %v2092_v4 = vld [vmem:[%s2248_s23 + $0xf8] sm:$0xff]  ;;  %1301 = vmatpush.bf16.msra.mxu2 %v2084_v3  ;;  %v2091_v8 = vld [vmem:[%s2248_s23 + $0xf0] sm:$0xff]  ;;  %v2090_v12 = vld [vmem:[%s2248_s23 + $0xe8] sm:$0xff] }
  0x19   : > { %1314 = vmatpush.bf16.msra.mxu3 %v2092_v4  ;;  %v2065_v13 = vld [vmem:[%s2248_s23 + $0x20] sm:$0xff]  ;;  %v2064_v17 = vld [vmem:[%s2248_s23 + $0x18] sm:$0xff]  ;;  %v2063_v21 = vld [vmem:[%s2248_s23 + $0x10] sm:$0xff] }
  0x1a   : > { %1276 = vmatpush.bf16.msra.mxu0 %v2067_v5  ;;  %v2073_v14 = vld [vmem:[%s2248_s23 + $0x60] sm:$0xff]  ;;  %v2072_v18 = vld [vmem:[%s2248_s23 + $0x58] sm:$0xff]  ;;  %v2071_v22 = vld [vmem:[%s2248_s23 + $0x50] sm:$0xff] }
  0x1b   : > { %1289 = vmatpush.bf16.msra.mxu1 %v2075_v6  ;;  %v2081_v15 = vld [vmem:[%s2248_s23 + $0xa0] sm:$0xff]  ;;  %v2080_v19 = vld [vmem:[%s2248_s23 + $0x98] sm:$0xff]  ;;  %v2079_v23 = vld [vmem:[%s2248_s23 + $0x90] sm:$0xff] }
  0x1c   : > { %1302 = vmatpush.bf16.msra.mxu2 %v2083_v7  ;;  %v2089_v16 = vld [vmem:[%s2248_s23 + $0xe0] sm:$0xff]  ;;  %v2088_v20 = vld [vmem:[%s2248_s23 + $0xd8] sm:$0xff]  ;;  %v2087_v24 = vld [vmem:[%s2248_s23 + $0xd0] sm:$0xff] }
  0x1d   : > { %1315 = vmatpush.bf16.msra.mxu3 %v2091_v8  ;;  %v2062_v25 = vld [vmem:[%s2248_s23 + $0x8] sm:$0xff]  ;;  %v187_v30 = vld [vmem:[%s2243_s19] sm:$0xff]  ;;  %v2100_v39 = vld [vmem:[%s2248_s23 + $0x138] sm:$0xff] }
  0x1e   : > { %1277 = vmatpush.bf16.msra.mxu0 %v2066_v9  ;;  %v2070_v26 = vld [vmem:[%s2248_s23 + $0x48] sm:$0xff]  ;;  %v2061_v31 = vld [vmem:[%s2248_s23] sm:$0xff]  ;;  %v459_v34 = vunpack.c.l.b16 %v187_v30  ;;  %v460_v38 = vunpack.c.h.b16 %v187_v30  ;;  %v2108_v40 = vld [vmem:[%s2248_s23 + $0x178] sm:$0xff] }
  0x1f   : > { %1290 = vmatpush.bf16.msra.mxu1 %v2074_v10  ;;  %v2078_v27 = vld [vmem:[%s2248_s23 + $0x88] sm:$0xff]  ;;  %v2069_v32 = vld [vmem:[%s2248_s23 + $0x40] sm:$0xff]  ;;  %v2116_v41 = vld [vmem:[%s2248_s23 + $0x1b8] sm:$0xff] }
  0x20   : > { %1303 = vmatpush.bf16.msra.mxu2 %v2082_v11  ;;  %v2086_v28 = vld [vmem:[%s2248_s23 + $0xc8] sm:$0xff]  ;;  %v2077_v35 = vld [vmem:[%s2248_s23 + $0x80] sm:$0xff]  ;;  %v2124_v42 = vld [vmem:[%s2248_s23 + $0x1f8] sm:$0xff]  ;;  %v475_v44 = vpack.c.b16 %v459_v34, %v459_v34  ;;  %v476_v46 = vpack.c.b16 %v460_v38, %v460_v38 }
  0x21   : > { %1316 = vmatpush.bf16.msra.mxu3 %v2090_v12  ;;  %v188_v29 = vld [vmem:[%s2243_s19 + $0x8] sm:$0xff]  ;;  %v2085_v36 = vld [vmem:[%s2248_s23 + $0xc0] sm:$0xff]  ;;  %v2099_v47 = vld [vmem:[%s2248_s23 + $0x130] sm:$0xff] }
  0x22   : > { %1278 = vmatpush.bf16.msra.mxu0 %v2065_v13  ;;  %v461_v33 = vunpack.c.l.b16 %v188_v29  ;;  %v462_v37 = vunpack.c.h.b16 %v188_v29  ;;  %v2107_v48 = vld [vmem:[%s2248_s23 + $0x170] sm:$0xff]  ;;  %v2098_v51 = vld [vmem:[%s2248_s23 + $0x128] sm:$0xff]  ;;  %v2097_v55 = vld [vmem:[%s2248_s23 + $0x120] sm:$0xff] }
  0x23   : > { %1291 = vmatpush.bf16.msra.mxu1 %v2073_v14  ;;  %v2115_v49 = vld [vmem:[%s2248_s23 + $0x1b0] sm:$0xff]  ;;  %v2106_v52 = vld [vmem:[%s2248_s23 + $0x168] sm:$0xff]  ;;  %v2105_v56 = vld [vmem:[%s2248_s23 + $0x160] sm:$0xff] }
  0x24   : > { %1304 = vmatpush.bf16.msra.mxu2 %v2081_v15  ;;  %v477_v43 = vpack.c.b16 %v461_v33, %v461_v33  ;;  %v478_v45 = vpack.c.b16 %v462_v37, %v462_v37  ;;  %v2123_v50 = vld [vmem:[%s2248_s23 + $0x1f0] sm:$0xff]  ;;  %v2114_v53 = vld [vmem:[%s2248_s23 + $0x1a8] sm:$0xff]  ;;  %v2113_v57 = vld [vmem:[%s2248_s23 + $0x1a0] sm:$0xff] }
  0x25   : > { %1317 = vmatpush.bf16.msra.mxu3 %v2089_v16  ;;  %v2122_v54 = vld [vmem:[%s2248_s23 + $0x1e8] sm:$0xff]  ;;  %v2121_v58 = vld [vmem:[%s2248_s23 + $0x1e0] sm:$0xff]  ;;  %v2096_v59 = vld [vmem:[%s2248_s23 + $0x118] sm:$0xff] }
  0x26   : > { %1279 = vmatpush.bf16.msra.mxu0 %v2064_v17  ;;  %v2104_v60 = vld [vmem:[%s2248_s23 + $0x158] sm:$0xff]  ;;  %v2095_v63 = vld [vmem:[%s2248_s23 + $0x110] sm:$0xff]  ;;  %v2094_v3 = vld [vmem:[%s2248_s23 + $0x108] sm:$0xff] }
  0x27   : > { %1292 = vmatpush.bf16.msra.mxu1 %v2072_v18  ;;  %v2112_v61 = vld [vmem:[%s2248_s23 + $0x198] sm:$0xff]  ;;  %v2103_v0 = vld [vmem:[%s2248_s23 + $0x150] sm:$0xff]  ;;  %v2102_v4 = vld [vmem:[%s2248_s23 + $0x148] sm:$0xff] }
  0x28   : > { %1305 = vmatpush.bf16.msra.mxu2 %v2080_v19  ;;  %v2120_v62 = vld [vmem:[%s2248_s23 + $0x1d8] sm:$0xff]  ;;  %v2111_v1 = vld [vmem:[%s2248_s23 + $0x190] sm:$0xff]  ;;  %v2110_v5 = vld [vmem:[%s2248_s23 + $0x188] sm:$0xff] }
  0x29   : > { %1318 = vmatpush.bf16.msra.mxu3 %v2088_v20  ;;  %v2119_v2 = vld [vmem:[%s2248_s23 + $0x1d0] sm:$0xff]  ;;  %v2118_v6 = vld [vmem:[%s2248_s23 + $0x1c8] sm:$0xff]  ;;  %v190_v7 = vld [vmem:[%s2243_s19 + $0x18] sm:$0xff] }
  0x2a   : > { %1280 = vmatpush.bf16.msra.mxu0 %v2063_v21  ;;  %v189_v8 = vld [vmem:[%s2243_s19 + $0x10] sm:$0xff]  ;;  %v2093_v9 = vld [vmem:[%s2248_s23 + $0x100] sm:$0xff]  ;;  %v465_v11 = vunpack.c.l.b16 %v190_v7  ;;  %v466_v15 = vunpack.c.h.b16 %v190_v7  ;;  %v2132_v17 = vld [vmem:[%s2248_s23 + $0x238] sm:$0xff] }
  0x2b   : > { %1293 = vmatpush.bf16.msra.mxu1 %v2071_v22  ;;  %v2101_v10 = vld [vmem:[%s2248_s23 + $0x140] sm:$0xff]  ;;  %v463_v12 = vunpack.c.l.b16 %v189_v8  ;;  %v464_v16 = vunpack.c.h.b16 %v189_v8  ;;  %v2140_v18 = vld [vmem:[%s2248_s23 + $0x278] sm:$0xff]  ;;  %v2130_v29 = vld [vmem:[%s2248_s23 + $0x228] sm:$0xff] }
  0x2c   : > { %1306 = vmatpush.bf16.msra.mxu2 %v2079_v23  ;;  %v2109_v13 = vld [vmem:[%s2248_s23 + $0x180] sm:$0xff]  ;;  %v2148_v19 = vld [vmem:[%s2248_s23 + $0x2b8] sm:$0xff]  ;;  %v481_v21 = vpack.c.b16 %v465_v11, %v465_v11  ;;  %v482_v23 = vpack.c.b16 %v466_v15, %v466_v15  ;;  %v2138_v30 = vld [vmem:[%s2248_s23 + $0x268] sm:$0xff] }
  0x2d   : > { %1319 = vmatpush.bf16.msra.mxu3 %v2087_v24  ;;  %v2117_v14 = vld [vmem:[%s2248_s23 + $0x1c0] sm:$0xff]  ;;  %v2156_v20 = vld [vmem:[%s2248_s23 + $0x2f8] sm:$0xff]  ;;  %v479_v22 = vpack.c.b16 %v463_v12, %v463_v12  ;;  %v480_v24 = vpack.c.b16 %v464_v16, %v464_v16  ;;  %v2162_v7 = vld [vmem:[%s2248_s23 + $0x328] sm:$0xff] }
  0x2e   : > { %1281 = vmatpush.bf16.msra.mxu0 %v2062_v25  ;;  %v2131_v25 = vld [vmem:[%s2248_s23 + $0x230] sm:$0xff]  ;;  %v2129_v33 = vld [vmem:[%s2248_s23 + $0x220] sm:$0xff]  ;;  %v2128_v37 = vld [vmem:[%s2248_s23 + $0x218] sm:$0xff] }
  0x2f   : > { %1294 = vmatpush.bf16.msra.mxu1 %v2070_v26  ;;  %v2139_v26 = vld [vmem:[%s2248_s23 + $0x270] sm:$0xff]  ;;  %v2137_v34 = vld [vmem:[%s2248_s23 + $0x260] sm:$0xff]  ;;  %v2136_v38 = vld [vmem:[%s2248_s23 + $0x258] sm:$0xff] }
  0x30   : > { %1307 = vmatpush.bf16.msra.mxu2 %v2078_v27  ;;  %v2147_v27 = vld [vmem:[%s2248_s23 + $0x2b0] sm:$0xff]  ;;  %v2170_v8 = vld [vmem:[%s2248_s23 + $0x368] sm:$0xff]  ;;  %v2161_v11 = vld [vmem:[%s2248_s23 + $0x320] sm:$0xff] }
  0x31   : > { %1320 = vmatpush.bf16.msra.mxu3 %v2086_v28  ;;  %v2155_v28 = vld [vmem:[%s2248_s23 + $0x2f0] sm:$0xff]  ;;  %v2169_v12 = vld [vmem:[%s2248_s23 + $0x360] sm:$0xff]  ;;  %v2160_v15 = vld [vmem:[%s2248_s23 + $0x318] sm:$0xff] }
  0x32   : > { %1282 = vmatpush.bf16.msra.mxu0 %v2061_v31  ;;  %v2146_v31 = vld [vmem:[%s2248_s23 + $0x2a8] sm:$0xff]  ;;  %v2168_v16 = vld [vmem:[%s2248_s23 + $0x358] sm:$0xff] }
  0x33   : > { %1295 = vmatpush.bf16.msra.mxu1 %v2069_v32  ;;  %v2154_v32 = vld [vmem:[%s2248_s23 + $0x2e8] sm:$0xff] }
  0x34   : > { %1308 = vmatpush.bf16.msra.mxu2 %v2077_v35  ;;  %v2145_v35 = vld [vmem:[%s2248_s23 + $0x2a0] sm:$0xff] }
  0x35   : > { %1321 = vmatpush.bf16.msra.mxu3 %v2085_v36  ;;  %1283 = vmatmul.bf16.vlgmr.msra.gmra.mxu0 %v475_v44  ;;  %v2153_v36 = vld [vmem:[%s2248_s23 + $0x2e0] sm:$0xff]  ;;  %v2151_v44 = vld [vmem:[%s2248_s23 + $0x2d0] sm:$0xff] }
  0x36   : > { %1327 = vmatpush.bf16.msrb.mxu0 %v2100_v39  ;;  %1296 = vmatmul.bf16.vlgmr.msra.gmra.mxu1 %v476_v46  ;;  %v2144_v39 = vld [vmem:[%s2248_s23 + $0x298] sm:$0xff]  ;;  %v2134_v46 = vld [vmem:[%s2248_s23 + $0x248] sm:$0xff] }
  0x37   : > { %1340 = vmatpush.bf16.msrb.mxu1 %v2108_v40  ;;  %1309 = vmatmul.bf16.vlgmr.msra.gmra.mxu2 %v477_v43  ;;  %v2152_v40 = vld [vmem:[%s2248_s23 + $0x2d8] sm:$0xff]  ;;  %v2143_v43 = vld [vmem:[%s2248_s23 + $0x290] sm:$0xff] }
  0x38   : > { %1353 = vmatpush.bf16.msrb.mxu2 %v2116_v41  ;;  %1322 = vmatmul.bf16.vlgmr.msra.gmra.mxu3 %v478_v45  ;;  %v2127_v41 = vld [vmem:[%s2248_s23 + $0x210] sm:$0xff]  ;;  %v2126_v45 = vld [vmem:[%s2248_s23 + $0x208] sm:$0xff] }
  0x39   : > { %1366 = vmatpush.bf16.msrb.mxu3 %v2124_v42  ;;  %v2135_v42 = vld [vmem:[%s2248_s23 + $0x250] sm:$0xff] }
  0x3a   : > { %1328 = vmatpush.bf16.msrb.mxu0 %v2099_v47  ;;  %v2142_v47 = vld [vmem:[%s2248_s23 + $0x288] sm:$0xff] }
  0x3b   : > { %1341 = vmatpush.bf16.msrb.mxu1 %v2107_v48  ;;  %v2150_v48 = vld [vmem:[%s2248_s23 + $0x2c8] sm:$0xff] }
  0x3c   : > { %1354 = vmatpush.bf16.msrb.mxu2 %v2115_v49  ;;  %v191_v49 = vld [vmem:[%s2243_s19 + $0x20] sm:$0xff] }
  0x3d   : > { %1367 = vmatpush.bf16.msrb.mxu3 %v2123_v50  ;;  %v192_v50 = vld [vmem:[%s2243_s19 + $0x28] sm:$0xff] }
  0x3e   : > { %1329 = vmatpush.bf16.msrb.mxu0 %v2098_v51  ;;  %v2125_v51 = vld [vmem:[%s2248_s23 + $0x200] sm:$0xff] }
  0x3f   : > { %1342 = vmatpush.bf16.msrb.mxu1 %v2106_v52  ;;  %v2133_v52 = vld [vmem:[%s2248_s23 + $0x240] sm:$0xff] }
  0x40   : > { %1355 = vmatpush.bf16.msrb.mxu2 %v2114_v53  ;;  %v467_v53 = vunpack.c.l.b16 %v191_v49 }
  0x41   : > { %1368 = vmatpush.bf16.msrb.mxu3 %v2122_v54  ;;  %v469_v54 = vunpack.c.l.b16 %v192_v50 }
  0x42   : > { %1330 = vmatpush.bf16.msrb.mxu0 %v2097_v55  ;;  %v2141_v55 = vld [vmem:[%s2248_s23 + $0x280] sm:$0xff] }
  0x43   : > { %1343 = vmatpush.bf16.msrb.mxu1 %v2105_v56  ;;  %v2149_v56 = vld [vmem:[%s2248_s23 + $0x2c0] sm:$0xff] }
  0x44   : > { %1356 = vmatpush.bf16.msrb.mxu2 %v2113_v57  ;;  %v468_v57 = vunpack.c.h.b16 %v191_v49 }
  0x45   : > { %1369 = vmatpush.bf16.msrb.mxu3 %v2121_v58  ;;  %v470_v58 = vunpack.c.h.b16 %v192_v50 }
  0x46   : > { %1331 = vmatpush.bf16.msrb.mxu0 %v2096_v59  ;;  %v2164_v59 = vld [vmem:[%s2248_s23 + $0x338] sm:$0xff] }
  0x47   : > { %1344 = vmatpush.bf16.msrb.mxu1 %v2104_v60  ;;  %v2172_v60 = vld [vmem:[%s2248_s23 + $0x378] sm:$0xff] }
  0x48   : > { %1357 = vmatpush.bf16.msrb.mxu2 %v2112_v61  ;;  %v2180_v61 = vld [vmem:[%s2248_s23 + $0x3b8] sm:$0xff] }
  0x49   : > { %1370 = vmatpush.bf16.msrb.mxu3 %v2120_v62  ;;  %v2188_v62 = vld [vmem:[%s2248_s23 + $0x3f8] sm:$0xff] }
  0x4a   : > { %1332 = vmatpush.bf16.msrb.mxu0 %v2095_v63  ;;  %v483_v63 = vpack.c.b16 %v467_v53, %v467_v53 }
  0x4b   : > { %1345 = vmatpush.bf16.msrb.mxu1 %v2103_v0  ;;  %v485_v0 = vpack.c.b16 %v469_v54, %v469_v54 }
  0x4c   : > { %1358 = vmatpush.bf16.msrb.mxu2 %v2111_v1  ;;  %v484_v1 = vpack.c.b16 %v468_v57, %v468_v57 }
  0x4d   : > { %1371 = vmatpush.bf16.msrb.mxu3 %v2119_v2  ;;  %v486_v2 = vpack.c.b16 %v470_v58, %v470_v58 }
  0x4e   : > { %1333 = vmatpush.bf16.msrb.mxu0 %v2094_v3  ;;  %v2163_v3 = vld [vmem:[%s2248_s23 + $0x330] sm:$0xff] }
  0x4f   : > { %1346 = vmatpush.bf16.msrb.mxu1 %v2102_v4  ;;  %v2171_v4 = vld [vmem:[%s2248_s23 + $0x370] sm:$0xff] }
  0x50   : > { %1359 = vmatpush.bf16.msrb.mxu2 %v2110_v5  ;;  %v2179_v5 = vld [vmem:[%s2248_s23 + $0x3b0] sm:$0xff] }
  0x51   : > { %1372 = vmatpush.bf16.msrb.mxu3 %v2118_v6  ;;  %v2187_v6 = vld [vmem:[%s2248_s23 + $0x3f0] sm:$0xff] }
  0x52   : > { %1334 = vmatpush.bf16.msrb.mxu0 %v2093_v9  ;;  %v2178_v9 = vld [vmem:[%s2248_s23 + $0x3a8] sm:$0xff] }
  0x53   : > { %1347 = vmatpush.bf16.msrb.mxu1 %v2101_v10  ;;  %v2186_v10 = vld [vmem:[%s2248_s23 + $0x3e8] sm:$0xff] }
  0x54   : > { %1360 = vmatpush.bf16.msrb.mxu2 %v2109_v13  ;;  %v2177_v13 = vld [vmem:[%s2248_s23 + $0x3a0] sm:$0xff] }
  0x55   : > { %1373 = vmatpush.bf16.msrb.mxu3 %v2117_v14  ;;  %1335 = vmatmul.bf16.vlgmr.msrb.gmra.mxu0 %v479_v22  ;;  %v2185_v14 = vld [vmem:[%s2248_s23 + $0x3e0] sm:$0xff]  ;;  %v2183_v22 = vld [vmem:[%s2248_s23 + $0x3d0] sm:$0xff] }
  0x56   : > { %1379 = vmatpush.bf16.msra.mxu0 %v2132_v17  ;;  %1348 = vmatmul.bf16.vlgmr.msrb.gmra.mxu1 %v480_v24  ;;  %v2176_v17 = vld [vmem:[%s2248_s23 + $0x398] sm:$0xff]  ;;  %v2166_v24 = vld [vmem:[%s2248_s23 + $0x348] sm:$0xff] }
  0x57   : > { %1392 = vmatpush.bf16.msra.mxu1 %v2140_v18  ;;  %1361 = vmatmul.bf16.vlgmr.msrb.gmra.mxu2 %v481_v21  ;;  %v2184_v18 = vld [vmem:[%s2248_s23 + $0x3d8] sm:$0xff]  ;;  %v2175_v21 = vld [vmem:[%s2248_s23 + $0x390] sm:$0xff] }
  0x58   : > { %1405 = vmatpush.bf16.msra.mxu2 %v2148_v19  ;;  %1374 = vmatmul.bf16.vlgmr.msrb.gmra.mxu3 %v482_v23  ;;  %v2159_v19 = vld [vmem:[%s2248_s23 + $0x310] sm:$0xff]  ;;  %v2158_v23 = vld [vmem:[%s2248_s23 + $0x308] sm:$0xff] }
  0x59   : > { %1418 = vmatpush.bf16.msra.mxu3 %v2156_v20  ;;  %v2167_v20 = vld [vmem:[%s2248_s23 + $0x350] sm:$0xff] }
  0x5a   : > { %1380 = vmatpush.bf16.msra.mxu0 %v2131_v25  ;;  %v193_v25 = vld [vmem:[%s2243_s19 + $0x30] sm:$0xff] }
  0x5b   : > { %1393 = vmatpush.bf16.msra.mxu1 %v2139_v26  ;;  %v2174_v26 = vld [vmem:[%s2248_s23 + $0x388] sm:$0xff] }
  0x5c   : > { %1406 = vmatpush.bf16.msra.mxu2 %v2147_v27  ;;  %v2182_v27 = vld [vmem:[%s2248_s23 + $0x3c8] sm:$0xff] }
  0x5d   : > { %1419 = vmatpush.bf16.msra.mxu3 %v2155_v28  ;;  %v194_v28 = vld [vmem:[%s2243_s19 + $0x38] sm:$0xff] }
  0x5e   : > { %1381 = vmatpush.bf16.msra.mxu0 %v2130_v29  ;;  %v471_v29 = vunpack.c.l.b16 %v193_v25 }
  0x5f   : > { %1394 = vmatpush.bf16.msra.mxu1 %v2138_v30  ;;  %v472_v30 = vunpack.c.h.b16 %v193_v25 }
  0x60   : > { %1407 = vmatpush.bf16.msra.mxu2 %v2146_v31  ;;  %v2157_v31 = vld [vmem:[%s2248_s23 + $0x300] sm:$0xff] }
  0x61   : > { %1420 = vmatpush.bf16.msra.mxu3 %v2154_v32  ;;  %v2165_v32 = vld [vmem:[%s2248_s23 + $0x340] sm:$0xff] }
  0x62   : > { %1382 = vmatpush.bf16.msra.mxu0 %v2129_v33  ;;  %v473_v33 = vunpack.c.l.b16 %v194_v28 }
  0x63   : > { %1395 = vmatpush.bf16.msra.mxu1 %v2137_v34  ;;  %v474_v34 = vunpack.c.h.b16 %v194_v28 }
  0x64   : > { %1408 = vmatpush.bf16.msra.mxu2 %v2145_v35  ;;  %v2173_v35 = vld [vmem:[%s2248_s23 + $0x380] sm:$0xff] }
  0x65   : > { %1421 = vmatpush.bf16.msra.mxu3 %v2153_v36  ;;  %v2181_v36 = vld [vmem:[%s2248_s23 + $0x3c0] sm:$0xff] }
  0x66   : > { %1383 = vmatpush.bf16.msra.mxu0 %v2128_v37  ;;  %v487_v37 = vpack.c.b16 %v471_v29, %v471_v29 }
  0x67   : > { %1396 = vmatpush.bf16.msra.mxu1 %v2136_v38  ;;  %v488_v38 = vpack.c.b16 %v472_v30, %v472_v30 }
  0x68   : > { %1409 = vmatpush.bf16.msra.mxu2 %v2144_v39  ;;  %v489_v39 = vpack.c.b16 %v473_v33, %v473_v33 }
  0x69   : > { %1422 = vmatpush.bf16.msra.mxu3 %v2152_v40  ;;  %v490_v40 = vpack.c.b16 %v474_v34, %v474_v34 }
  0x6a   : > { %1384 = vmatpush.bf16.msra.mxu0 %v2127_v41 }
  0x6b   : > { %1397 = vmatpush.bf16.msra.mxu1 %v2135_v42 }
  0x6c   : > { %1410 = vmatpush.bf16.msra.mxu2 %v2143_v43 }
  0x6d   : > { %1423 = vmatpush.bf16.msra.mxu3 %v2151_v44 }
  0x6e   : > { %1385 = vmatpush.bf16.msra.mxu0 %v2126_v45 }
  0x6f   : > { %1398 = vmatpush.bf16.msra.mxu1 %v2134_v46 }
  0x70   : > { %1411 = vmatpush.bf16.msra.mxu2 %v2142_v47 }
  0x71   : > { %1424 = vmatpush.bf16.msra.mxu3 %v2150_v48 }
  0x72   : > { %1386 = vmatpush.bf16.msra.mxu0 %v2125_v51 }
  0x73   : > { %1399 = vmatpush.bf16.msra.mxu1 %v2133_v52 }
  0x74   : > { %1412 = vmatpush.bf16.msra.mxu2 %v2141_v55 }
  0x75   : > { %1425 = vmatpush.bf16.msra.mxu3 %v2149_v56  ;;  %1387 = vmatmul.bf16.vlgmr.msra.gmra.mxu0 %v483_v63 }
  0x76   : > { %1431 = vmatpush.bf16.msrb.mxu0 %v2164_v59  ;;  %1400 = vmatmul.bf16.vlgmr.msra.gmra.mxu1 %v484_v1 }
  0x77   : > { %1444 = vmatpush.bf16.msrb.mxu1 %v2172_v60  ;;  %1413 = vmatmul.bf16.vlgmr.msra.gmra.mxu2 %v485_v0 }
  0x78   : > { %1457 = vmatpush.bf16.msrb.mxu2 %v2180_v61  ;;  %1426 = vmatmul.bf16.vlgmr.msra.gmra.mxu3 %v486_v2 }
  0x79   : > { %1470 = vmatpush.bf16.msrb.mxu3 %v2188_v62 }
  0x7a   : > { %1432 = vmatpush.bf16.msrb.mxu0 %v2163_v3 }
  0x7b   : > { %1445 = vmatpush.bf16.msrb.mxu1 %v2171_v4 }
  0x7c   : > { %1458 = vmatpush.bf16.msrb.mxu2 %v2179_v5 }
  0x7d   : > { %1471 = vmatpush.bf16.msrb.mxu3 %v2187_v6 }
  0x7e   : > { %1433 = vmatpush.bf16.msrb.mxu0 %v2162_v7 }
  0x7f   : > { %1446 = vmatpush.bf16.msrb.mxu1 %v2170_v8 }
  0x80   : > { %1459 = vmatpush.bf16.msrb.mxu2 %v2178_v9 }
  0x81   : > { %1472 = vmatpush.bf16.msrb.mxu3 %v2186_v10 }
  0x82   : > { %1434 = vmatpush.bf16.msrb.mxu0 %v2161_v11 }
  0x83   : > { %1447 = vmatpush.bf16.msrb.mxu1 %v2169_v12 }
  0x84   : > { %1460 = vmatpush.bf16.msrb.mxu2 %v2177_v13 }
  0x85   : > { %1473 = vmatpush.bf16.msrb.mxu3 %v2185_v14 }
  0x86   : > { %1435 = vmatpush.bf16.msrb.mxu0 %v2160_v15 }
  0x87   : > { %1448 = vmatpush.bf16.msrb.mxu1 %v2168_v16 }
  0x88   : > { %1461 = vmatpush.bf16.msrb.mxu2 %v2176_v17 }
  0x89   : > { %1474 = vmatpush.bf16.msrb.mxu3 %v2184_v18 }
  0x8a   : > { %1436 = vmatpush.bf16.msrb.mxu0 %v2159_v19 }
  0x8b   : > { %1449 = vmatpush.bf16.msrb.mxu1 %v2167_v20 }
  0x8c   : > { %1462 = vmatpush.bf16.msrb.mxu2 %v2175_v21  ;;  %v186_v21 = vld [vmem:[#allocation2] sm:$0xff] }
  0x8d   : > { %1475 = vmatpush.bf16.msrb.mxu3 %v2183_v22 }
  0x8e   : > { %1437 = vmatpush.bf16.msrb.mxu0 %v2158_v23 }
  0x8f   : > { %1450 = vmatpush.bf16.msrb.mxu1 %v2166_v24 }
  0x90   : > { %1463 = vmatpush.bf16.msrb.mxu2 %v2174_v26 }
  0x91   : > { %1476 = vmatpush.bf16.msrb.mxu3 %v2182_v27 }
  0x92   : > { %1438 = vmatpush.bf16.msrb.mxu0 %v2157_v31 }
  0x93   : > { %1451 = vmatpush.bf16.msrb.mxu1 %v2165_v32 }
  0x94   : > { %1464 = vmatpush.bf16.msrb.mxu2 %v2173_v35 }
  0x95   : > { %1477 = vmatpush.bf16.msrb.mxu3 %v2181_v36  ;;  %1439 = vmatmul.bf16.vlgmr.msrb.gmra.mxu0 %v487_v37 }
  0x96   : > { %1452 = vmatmul.bf16.vlgmr.msrb.gmra.mxu1 %v488_v38 }
  0x97   : > { %1465 = vmatmul.bf16.vlgmr.msrb.gmra.mxu2 %v489_v39 }
  0x98   : > { %1478 = vmatmul.bf16.vlgmr.msrb.gmra.mxu3 %v490_v40 }
  0xb2   : > { %v1284_v41 = vpop.f32.mrf.mxu0 }
  0xb3   : > { %v1297_v42 = vpop.f32.mrf.mxu1 }
  0xb4   : > { %v1298_v43 = vadd.f32 %v1297_v42, %v1284_v41 }
  0xba   : > { %v1310_v44 = vpop.f32.mrf.mxu2  ;;  %v1286_v47 = vpop.f32.mrf.mxu0 }
  0xbb   : > { %v1311_v45 = vadd.f32 %v1310_v44, %v1298_v43  ;;  %v1323_v46 = vpop.f32.mrf.mxu3  ;;  %v1299_v49 = vpop.f32.mrf.mxu1 }
  0xbd   : > { %v1324_v48 = vadd.f32 %v1323_v46, %v1311_v45 }
  0xc2   : > { %v1312_v50 = vpop.f32.mrf.mxu2 }
  0xc3   : > { %v1325_v51 = vpop.f32.mrf.mxu3 }
  0xd2   : > { %v1336_v52 = vpop.f32.mrf.mxu0 }
  0xd3   : > { %v1349_v53 = vpop.f32.mrf.mxu1  ;;  %v1337_v62 = vadd.f32 %v1336_v52, %v1324_v48 }
  0xd5   : > { %v1350_v2 = vadd.f32 %v1349_v53, %v1337_v62 }
  0xda   : > { %v1362_v54 = vpop.f32.mrf.mxu2  ;;  %v1338_v56 = vpop.f32.mrf.mxu0 }
  0xdb   : > { %v1375_v55 = vpop.f32.mrf.mxu3  ;;  %v1351_v57 = vpop.f32.mrf.mxu1  ;;  %v1363_v4 = vadd.f32 %v1362_v54, %v1350_v2 }
  0xdd   : > { %v1376_v7 = vadd.f32 %v1375_v55, %v1363_v4 }
  0xe2   : > { %v1364_v58 = vpop.f32.mrf.mxu2 }
  0xe3   : > { %v1377_v59 = vpop.f32.mrf.mxu3 }
  0xf2   : > { %v1388_v60 = vpop.f32.mrf.mxu0 }
  0xf3   : > { %v1401_v61 = vpop.f32.mrf.mxu1  ;;  %v1389_v8 = vadd.f32 %v1388_v60, %v1376_v7 }
  0xf5   : > { %v1402_v9 = vadd.f32 %v1401_v61, %v1389_v8 }
  0xfa   : > { %v1414_v63 = vpop.f32.mrf.mxu2  ;;  %v1390_v1 = vpop.f32.mrf.mxu0 }
  0xfb   : > { %v1427_v0 = vpop.f32.mrf.mxu3  ;;  %v1403_v3 = vpop.f32.mrf.mxu1  ;;  %v1415_v10 = vadd.f32 %v1414_v63, %v1402_v9 }
  0xfd   : > { %v1428_v11 = vadd.f32 %v1427_v0, %v1415_v10 }
 0x102   : > { %v1416_v5 = vpop.f32.mrf.mxu2 }
 0x103   : > { %v1429_v6 = vpop.f32.mrf.mxu3 }
 0x112   : > { %v1440_v12 = vpop.f32.mrf.mxu0 }
 0x113   : > { %v1453_v13 = vpop.f32.mrf.mxu1  ;;  %v1441_v14 = vadd.f32 %v1440_v12, %v1428_v11 }
 0x115   : > { %v1454_v15 = vadd.f32 %v1453_v13, %v1441_v14 }
 0x11a   : > { %v1466_v16 = vpop.f32.mrf.mxu2  ;;  %v1442_v19 = vpop.f32.mrf.mxu0 }
 0x11b   : > { %v1479_v17 = vpop.f32.mrf.mxu3  ;;  %v1467_v18 = vadd.f32 %v1466_v16, %v1454_v15  ;;  %v1455_v20 = vpop.f32.mrf.mxu1 }
 0x11d   : > { %v1480_v22 = vadd.f32 %v1479_v17, %v1467_v18 }
 0x11f   : > { %v1483_v23 = vadd.f32 %v1480_v22, %v186_v21  ;;  %1489 = sbr.rel (%p2058_p6) target bundleno = 300 (0x12c), region = 40 }
 0x121   : > { %1485 = vst.msk [vmem:[#allocation2] sm:$0xff] %vm1484_vm1, %v1483_v23 }
 0x122   : > { %v1468_v24 = vpop.f32.mrf.mxu2 }
 0x123   : > { %v1481_v25 = vpop.f32.mrf.mxu3 }
 0x124   : > { %v2198_v27 = vld [vmem:[%s2399_s2] ss:$0 sm:$0xff] }
 0x128   : > { %v1490_v26 = vld [vmem:[#allocation2] sm:$0xff] }
 0x129   : > { %v1495_v28 = vadd.f32 %v2198_v27, %v1490_v26 }
 0x12b   : > { %1496 = vst.msk [vmem:[%s2400_s3] sm:$0xff] %vm1484_vm1, %v1495_v28 }
 0x12c PF: > { %s13_s12 = sadd.s32 1, %s2205_s12  }
 0x12d   : > { %p10_p7 = scmp.ge.s32.totalorder %s13_s12, 10  }
 0x12f   :  { %12 = sbr.rel (!%p10_p7) target bundleno = 1 (0x1), region = 69 }

</bundles_post_ra>
